<compile_context>
chip_gen: v7x
topology: tpu7x:2x2x1
jax: 0.10.0
libtpu: 0.0.40
codegen_flags: <defaults>
</compile_context>

<pallas_src>
import functools

import jax
import jax.numpy as jnp
from jax.experimental import pallas as pl
from jax.experimental.pallas import tpu as pltpu

BN_EPS = 1e-5
_PAD = 128  # zero lane margin on each side of the flattened image (>= W + 1)


# ----------------------------------------------------------------------------
# Pallas kernel: fused 3x3 stride-1 conv (in-kernel im2col -> ONE MXU matmul)
#                + folded BatchNorm scale/bias + ReLU.
# x_ref     : (1, Cin, H*W)     bf16, flattened image, spatial on lanes
# w_ref     : (Cg, 9*Cin)       bf16, weights for this output-channel group
# s_ref/b_ref: (Cg, 1)          f32, folded BN scale / bias
# o_ref     : (1, Cg, H*W)      bf16 or f32
# patch_ref : (9*Cin, H*W)      bf16 scratch, persists across the group axis
# ----------------------------------------------------------------------------
def _conv3x3_bn_relu_kernel(x_ref, w_ref, s_ref, b_ref, o_ref, patch_ref, *,
                            H, W, Cin):
    L = H * W
    g = pl.program_id(1)

    # Build the im2col patch once per image (group 0) and reuse it for all groups.
    @pl.when(g == 0)
    def _build_patch():
        x = x_ref[0]                                           # (Cin, L) bf16
        zpad = jnp.zeros((Cin, _PAD), x.dtype)
        xp = jnp.concatenate([zpad, x, zpad], axis=1)          # (Cin, L + 2*_PAD)
        # lane index -> column index v within a row (L is a multiple of W)
        vidx = jax.lax.broadcasted_iota(jnp.int32, (1, L), 1) % W
        idx = 0
        for a in range(3):            # window row offset a-1
            for b in range(3):        # window col offset b-1
                off = _PAD + (a - 1) * W + (b - 1)
                tap = xp[:, off:off + L]                       # (Cin, L)
                # column halo: zero taps that would read outside the row
                if b == 0:
                    tap = jnp.where(vidx >= 1, tap, jnp.zeros_like(tap))
                elif b == 2:
                    tap = jnp.where(vidx <= W - 2, tap, jnp.zeros_like(tap))
                # row halo is handled by the zero lane margins of xp
                patch_ref[idx * Cin:(idx + 1) * Cin, :] = tap
                idx += 1

    # Single deep-contraction matmul on the MXU: (Cg, 9*Cin) @ (9*Cin, L)
    acc = jnp.dot(w_ref[...], patch_ref[...],
                  preferred_element_type=jnp.float32)          # (Cg, L) f32
    out = jnp.maximum(acc * s_ref[...] + b_ref[...], 0.0)      # folded BN + ReLU (f32)
    o_ref[0] = out.astype(o_ref.dtype)


def conv_bn_relu_call(x_flat, wmat, scale, bias, *, H, W, groups, out_dtype):
    """x_flat: (N, Cin, H*W) bf16 -> (N, groups*Cg, H*W) in `out_dtype`."""
    N, cin_p, L = x_flat.shape
    g_cout, kkc = wmat.shape
    assert cin_p % 8 == 0 and L == H * W and L % 128 == 0
    assert kkc == 9 * cin_p and g_cout % groups == 0 and W + 1 <= _PAD
    cg = g_cout // groups
    kernel = functools.partial(_conv3x3_bn_relu_kernel, H=H, W=W, Cin=cin_p)
    return pl.pallas_call(
        kernel,
        out_shape=jax.ShapeDtypeStruct((N, g_cout, L), out_dtype),
        grid=(N, groups),
        in_specs=[
            pl.BlockSpec((1, cin_p, L), lambda n, g: (n, 0, 0)),   # resident image
            pl.BlockSpec((cg, kkc), lambda n, g: (g, 0)),
            pl.BlockSpec((cg, 1), lambda n, g: (g, 0)),
            pl.BlockSpec((cg, 1), lambda n, g: (g, 0)),
        ],
        out_specs=pl.BlockSpec((1, cg, L), lambda n, g: (n, g, 0)),
        scratch_shapes=[pltpu.VMEM((9 * cin_p, L), jnp.bfloat16)],
        compiler_params=pltpu.CompilerParams(
            dimension_semantics=("parallel", "arbitrary")),
    )(x_flat, wmat, scale, bias)


# ----------------------------------------------------------------------------
# One-time parameter preparation (hoisted out of the forward path, review #8)
# ----------------------------------------------------------------------------
def get_deconv_cfg(deconv_kernel):
    if deconv_kernel == 4:
        return 4, 1, 0
    elif deconv_kernel == 3:
        return 3, 1, 1
    elif deconv_kernel == 2:
        return 2, 0, 0
    raise ValueError(f"Not supported num_kernels ({deconv_kernel}).")


def _round_up(x, m):
    return (x + m - 1) // m * m


def _bf16_exact(x):
    # Values exactly representable in bf16 so MXU input truncation is lossless.
    return x.astype(jnp.bfloat16).astype(jnp.float32)


def fold_bn(gamma, beta, mean, var, conv_bias=None, eps=BN_EPS):
    scale = gamma / jnp.sqrt(var + eps)
    bias = beta - mean * scale
    if conv_bias is not None:
        bias = bias + conv_bias * scale
    return scale.astype(jnp.float32), bias.astype(jnp.float32)


# Polyphase tables for ConvTranspose2d(k=4, s=2, p=1): output phase r uses
# transposed-kernel row kh at combined 3x3 window row a (offset a-1).
_KH_TAB = {0: {0: 3, 1: 1}, 1: {1: 2, 2: 0}}


def _prep_deconv(raw, cin, cout):
    """ConvTranspose2d(4,2,1) -> single 3x3 conv with 4*cout phase channels."""
    cin_pad = _round_up(cin, 8)
    w_t = raw["w"]                                          # (Cin, Cout, 4, 4)
    wc = jnp.zeros((2, 2, cout, 3, 3, cin_pad), jnp.float32)
    for r in (0, 1):
        for s in (0, 1):
            for a, kh in _KH_TAB[r].items():
                for b, kw in _KH_TAB[s].items():
                    blk = jnp.transpose(w_t[:, :, kh, kw], (1, 0))   # (Cout, Cin)
                    wc = wc.at[r, s, :, a, b, :cin].set(blk)
    wmat = wc.reshape(4 * cout, 9 * cin_pad).astype(jnp.bfloat16)
    scale, bias = fold_bn(raw["gamma"], raw["beta"], raw["mean"], raw["var"])
    return dict(wmat=wmat,
                scale=jnp.tile(scale, 4).reshape(4 * cout, 1),
                bias=jnp.tile(bias, 4).reshape(4 * cout, 1),
                cin_pad=cin_pad, cout=cout)


def _prep_conv(raw, cin, cout):
    cin_pad = _round_up(cin, 8)
    w = raw["w"]                                            # (Cout, Cin, 3, 3)
    wc = jnp.zeros((cout, 3, 3, cin_pad), jnp.float32)
    wc = wc.at[:, :, :, :cin].set(jnp.transpose(w, (0, 2, 3, 1)))
    wmat = wc.reshape(cout, 9 * cin_pad).astype(jnp.bfloat16)
    scale, bias = fold_bn(raw["gamma"], raw["beta"], raw["mean"], raw["var"],
                          conv_bias=raw["b"])
    return dict(wmat=wmat, scale=scale.reshape(cout, 1), bias=bias.reshape(cout, 1),
                cin_pad=cin_pad, cout=cout)


def init_params(key, in_channels, out_channels, num_filters, deconv_kernels):
    params = {"deconvs": [], "conv": None}
    in_planes = in_channels
    for planes, dk in zip(num_filters, deconv_kernels):
        key, k1, k2, k3, k4, k5 = jax.random.split(key, 6)
        kern, pad, opad = get_deconv_cfg(dk)
        assert (kern, pad, opad) == (4, 1, 0), "polyphase prep implemented for k=4"
        # TODO(synk): polyphase weight prep for deconv_kernel in {2, 3}.
        raw = dict(
            w=_bf16_exact(jax.random.normal(k1, (in_planes, planes, kern, kern)) * 0.05),
            gamma=jax.random.uniform(k2, (planes,), jnp.float32, 0.5, 1.5),
            beta=jax.random.normal(k3, (planes,), jnp.float32) * 0.1,
            mean=jax.random.normal(k4, (planes,), jnp.float32) * 0.1,
            var=jax.random.uniform(k5, (planes,), jnp.float32, 0.5, 1.5))
        raw.update(_prep_deconv(raw, in_planes, planes))
        params["deconvs"].append(raw)
        in_planes = planes
    key, k1, k2, k3, k4, k5, k6 = jax.random.split(key, 7)
    raw = dict(
        w=_bf16_exact(jax.random.normal(k1, (out_channels, in_planes, 3, 3)) * 0.05),
        b=jax.random.normal(k2, (out_channels,), jnp.float32) * 0.1,
        gamma=jax.random.uniform(k3, (out_channels,), jnp.float32, 0.5, 1.5),
        beta=jax.random.normal(k4, (out_channels,), jnp.float32) * 0.1,
        mean=jax.random.normal(k5, (out_channels,), jnp.float32) * 0.1,
        var=jax.random.uniform(k6, (out_channels,), jnp.float32, 0.5, 1.5))
    raw.update(_prep_conv(raw, in_planes, out_channels))
    params["conv"] = raw
    return params


# ----------------------------------------------------------------------------
# Forward pass (NCHW in / NCHW out; activations stay bf16 NC(HW) between stages)
# ----------------------------------------------------------------------------
def pallas_decoder_forward(x_nchw, params):
    N, C, H, W = x_nchw.shape
    x = x_nchw.astype(jnp.bfloat16).reshape(N, C, H * W)
    for lp in params["deconvs"]:
        cin_p, cout = lp["cin_pad"], lp["cout"]
        if x.shape[1] < cin_p:  # one-time zero channel pad (network input only)
            x = jnp.pad(x, ((0, 0), (0, cin_p - x.shape[1]), (0, 0)))
        z = conv_bn_relu_call(x, lp["wmat"], lp["scale"], lp["bias"],
                              H=H, W=W, groups=4, out_dtype=jnp.bfloat16)
        # z rows are ((r*2+s)*cout + co); interleave the 4 phases -> (2H, 2W)
        z = z.reshape(N, 2, 2, cout, H, W)
        y = jnp.transpose(z, (0, 3, 4, 1, 5, 2)).reshape(N, cout, 2 * H, 2 * W)
        H, W = 2 * H, 2 * W
        x = y.reshape(N, cout, H * W)
    cp = params["conv"]
    cin_p = cp["cin_pad"]
    if x.shape[1] < cin_p:
        x = jnp.pad(x, ((0, 0), (0, cin_p - x.shape[1]), (0, 0)))
    out = conv_bn_relu_call(x, cp["wmat"], cp["scale"], cp["bias"],
                            H=H, W=W, groups=1, out_dtype=jnp.float32)
    return out.reshape(N, cp["cout"], H, W)


# ----------------------------------------------------------------------------
# Pure-JAX reference (NCHW, PyTorch eval-mode semantics, same bf16 activation policy)
# ----------------------------------------------------------------------------
def reference_decoder_forward(x, params):
    dn = ("NCHW", "OIHW", "NCHW")
    hp = jax.lax.Precision.HIGHEST

    def bn_relu(o, gamma, beta, mean, var):
        o = ((o - mean[None, :, None, None])
             / jnp.sqrt(var[None, :, None, None] + BN_EPS)
             * gamma[None, :, None, None] + beta[None, :, None, None])
        return jnp.maximum(o, 0.0)

    out = x.astype(jnp.float32)
    for lp in params["deconvs"]:
        w_conv = jnp.flip(jnp.transpose(lp["w"], (1, 0, 2, 3)), axis=(2, 3))
        out = jax.lax.conv_general_dilated(
            out, w_conv.astype(jnp.float32), window_strides=(1, 1),
            padding=[(2, 2), (2, 2)], lhs_dilation=(2, 2),
            dimension_numbers=dn, precision=hp)
        out = bn_relu(out, lp["gamma"], lp["beta"], lp["mean"], lp["var"])
        out = out.astype(jnp.bfloat16).astype(jnp.float32)  # same inference precision
    cp = params["conv"]
    out = jax.lax.conv_general_dilated(
        out, cp["w"].astype(jnp.float32), window_strides=(1, 1),
        padding=[(1, 1), (1, 1)], dimension_numbers=dn, precision=hp)
    out = out + cp["b"][None, :, None, None]
    out = bn_relu(out, cp["gamma"], cp["beta"], cp["mean"], cp["var"])
    return out


if __name__ == "__main__":
    # Small config: 2 deconv stages (kernel 4, stride 2) + final 3x3 conv
    in_channels, out_channels = 4, 4
    num_filters = [8, 8]
    deconv_kernels = [4, 4]

    key = jax.random.PRNGKey(0)
    key, xkey = jax.random.split(key)
    x = _bf16_exact(jax.random.normal(xkey, (2, in_channels, 16, 16), jnp.float32))

    params = init_params(key, in_channels, out_channels, num_filters, deconv_kernels)

    fwd = jax.jit(lambda t: pallas_decoder_forward(t, params))
    out = jax.block_until_ready(fwd(x))

    ref = reference_decoder_forward(x, params)
    assert out.shape == ref.shape == (2, out_channels, 64, 64), (out.shape, ref.shape)
    assert bool(jnp.all(jnp.isfinite(out)))
    max_err = float(jnp.max(jnp.abs(out - ref)))
    assert bool(jnp.allclose(out, ref, atol=2e-2, rtol=2e-2)), max_err

    print("KERNEL_OK")
</pallas_src>

<mosaic_0001>
module attributes {stable_mosaic.version = 11 : i64} {
  func.func @_conv3x3_bn_relu_kernel(%arg0: i32, %arg1: i32, %arg2: memref<1x8x256xbf16, #tpu.memory_space<vmem>>, %arg3: memref<8x72xbf16, #tpu.memory_space<vmem>>, %arg4: memref<8x1xf32, #tpu.memory_space<vmem>>, %arg5: memref<8x1xf32, #tpu.memory_space<vmem>>, %arg6: memref<1x8x256xbf16, #tpu.memory_space<vmem>>, %arg7: memref<72x256xbf16, #tpu.memory_space<vmem>>) attributes {dimension_semantics = [#tpu.dimension_semantics<parallel>, #tpu.dimension_semantics<arbitrary>], iteration_bounds = array<i64: 2, 4>, scalar_prefetch = 0 : i64, scratch_operands = 1 : i64, tpu.core_type = #tpu.core_type<tc>, window_params = [{transform_indices = @transform_0, window_bounds = array<i64: 1, 8, 256>}, {transform_indices = @transform_1, window_bounds = array<i64: 8, 72>}, {transform_indices = @transform_2, window_bounds = array<i64: 8, 1>}, {transform_indices = @transform_3, window_bounds = array<i64: 8, 1>}, {transform_indices = @transform_4, window_bounds = array<i64: 1, 8, 256>}]} {
    %c0_i32 = arith.constant 0 : i32
    %0 = arith.cmpi eq, %arg1, %c0_i32 : i32
    %1 = arith.extui %0 : i1 to i32
    %c0_i32_0 = arith.constant 0 : i32
    %2 = arith.cmpi ne, %1, %c0_i32_0 : i32
    scf.if %2 {
      %c0_12 = arith.constant 0 : index
      %c0_13 = arith.constant 0 : index
      %c0_14 = arith.constant 0 : index
      %18 = vector.load %arg2[%c0_12, %c0_13, %c0_14] : memref<1x8x256xbf16, #tpu.memory_space<vmem>>, vector<1x8x256xbf16>
      %19 = vector.shape_cast %18 : vector<1x8x256xbf16> to vector<8x256xbf16>
      %cst_15 = arith.constant 0.000000e+00 : bf16
      %20 = vector.broadcast %cst_15 : bf16 to vector<8x128xbf16>
      %21 = tpu.concatenate %20, %19, %20 in 1 : vector<8x128xbf16>, vector<8x256xbf16>, vector<8x128xbf16> -> vector<8x512xbf16>
      %22 = tpu.iota {dimensions = array<i32: 1>} : vector<1x256xi32>
      %c16_i32 = arith.constant 16 : i32
      %c0_i32_16 = arith.constant 0 : i32
      %23 = arith.cmpi eq, %c16_i32, %c0_i32_16 : i32
      %c1_i32 = arith.constant 1 : i32
      %24 = arith.select %23, %c1_i32, %c16_i32 : i32
      %25 = vector.broadcast %24 : i32 to vector<1x256xi32>
      %26 = arith.remsi %22, %25 : vector<1x256xi32>
      %c0_i32_17 = arith.constant 0 : i32
      %27 = vector.broadcast %c0_i32_17 : i32 to vector<1x256xi32>
      %28 = arith.cmpi ne, %26, %27 : vector<1x256xi32>
      %c0_i32_18 = arith.constant 0 : i32
      %29 = vector.broadcast %c0_i32_18 : i32 to vector<1x256xi32>
      %30 = arith.cmpi slt, %26, %29 : vector<1x256xi32>
      %c0_i32_19 = arith.constant 0 : i32
      %31 = arith.cmpi slt, %24, %c0_i32_19 : i32
      %32 = vector.broadcast %31 : i1 to vector<1x256xi1>
      %33 = vector.broadcast %32 : vector<1x256xi1> to vector<1x256xi1>
      %34 = arith.xori %30, %33 : vector<1x256xi1>
      %35 = arith.andi %34, %28 : vector<1x256xi1>
      %36 = vector.broadcast %24 : i32 to vector<1x256xi32>
      %37 = arith.addi %26, %36 : vector<1x256xi32>
      %38 = arith.select %35, %37, %26 : vector<1x256xi1>, vector<1x256xi32>
      %39 = vector.extract_strided_slice %21 {offsets = [0, 111], sizes = [8, 256], strides = [1, 1]} : vector<8x512xbf16> to vector<8x256xbf16>
      %c1_i32_20 = arith.constant 1 : i32
      %40 = vector.broadcast %c1_i32_20 : i32 to vector<1x256xi32>
      %41 = arith.cmpi sge, %38, %40 : vector<1x256xi32>
      %cst_21 = arith.constant 0.000000e+00 : bf16
      %42 = vector.broadcast %cst_21 : bf16 to vector<8x256xbf16>
      %43 = vector.shape_cast %41 : vector<1x256xi1> to vector<1x256xi1>
      %44 = vector.broadcast %43 : vector<1x256xi1> to vector<8x256xi1>
      %45 = arith.select %44, %39, %42 : vector<8x256xi1>, vector<8x256xbf16>
      %c0_22 = arith.constant 0 : index
      %c0_23 = arith.constant 0 : index
      %46 = vector.load %arg7[%c0_22, %c0_23] : memref<72x256xbf16, #tpu.memory_space<vmem>>, vector<8x256xbf16>
      tpu.vector_store %arg7[%c0_22, %c0_23], %45 {strides = array<i32>} : memref<72x256xbf16, #tpu.memory_space<vmem>>, vector<8x256xbf16>,
      %47 = vector.extract_strided_slice %21 {offsets = [0, 112], sizes = [8, 256], strides = [1, 1]} : vector<8x512xbf16> to vector<8x256xbf16>
      %c8 = arith.constant 8 : index
      %c0_24 = arith.constant 0 : index
      %48 = vector.load %arg7[%c8, %c0_24] : memref<72x256xbf16, #tpu.memory_space<vmem>>, vector<8x256xbf16>
      tpu.vector_store %arg7[%c8, %c0_24], %47 {strides = array<i32>} : memref<72x256xbf16, #tpu.memory_space<vmem>>, vector<8x256xbf16>,
      %49 = vector.extract_strided_slice %21 {offsets = [0, 113], sizes = [8, 256], strides = [1, 1]} : vector<8x512xbf16> to vector<8x256xbf16>
      %c14_i32 = arith.constant 14 : i32
      %50 = vector.broadcast %c14_i32 : i32 to vector<1x256xi32>
      %51 = arith.cmpi sle, %38, %50 : vector<1x256xi32>
      %cst_25 = arith.constant 0.000000e+00 : bf16
      %52 = vector.broadcast %cst_25 : bf16 to vector<8x256xbf16>
      %53 = vector.shape_cast %51 : vector<1x256xi1> to vector<1x256xi1>
      %54 = vector.broadcast %53 : vector<1x256xi1> to vector<8x256xi1>
      %55 = arith.select %54, %49, %52 : vector<8x256xi1>, vector<8x256xbf16>
      %c16 = arith.constant 16 : index
      %c0_26 = arith.constant 0 : index
      %56 = vector.load %arg7[%c16, %c0_26] : memref<72x256xbf16, #tpu.memory_space<vmem>>, vector<8x256xbf16>
      tpu.vector_store %arg7[%c16, %c0_26], %55 {strides = array<i32>} : memref<72x256xbf16, #tpu.memory_space<vmem>>, vector<8x256xbf16>,
      %57 = vector.extract_strided_slice %21 {offsets = [0, 127], sizes = [8, 256], strides = [1, 1]} : vector<8x512xbf16> to vector<8x256xbf16>
      %c1_i32_27 = arith.constant 1 : i32
      %58 = vector.broadcast %c1_i32_27 : i32 to vector<1x256xi32>
      %59 = arith.cmpi sge, %38, %58 : vector<1x256xi32>
      %cst_28 = arith.constant 0.000000e+00 : bf16
      %60 = vector.broadcast %cst_28 : bf16 to vector<8x256xbf16>
      %61 = vector.shape_cast %59 : vector<1x256xi1> to vector<1x256xi1>
      %62 = vector.broadcast %61 : vector<1x256xi1> to vector<8x256xi1>
      %63 = arith.select %62, %57, %60 : vector<8x256xi1>, vector<8x256xbf16>
      %c24 = arith.constant 24 : index
      %c0_29 = arith.constant 0 : index
      %64 = vector.load %arg7[%c24, %c0_29] : memref<72x256xbf16, #tpu.memory_space<vmem>>, vector<8x256xbf16>
      tpu.vector_store %arg7[%c24, %c0_29], %63 {strides = array<i32>} : memref<72x256xbf16, #tpu.memory_space<vmem>>, vector<8x256xbf16>,
      %65 = vector.extract_strided_slice %21 {offsets = [0, 128], sizes = [8, 256], strides = [1, 1]} : vector<8x512xbf16> to vector<8x256xbf16>
      %c32 = arith.constant 32 : index
      %c0_30 = arith.constant 0 : index
      %66 = vector.load %arg7[%c32, %c0_30] : memref<72x256xbf16, #tpu.memory_space<vmem>>, vector<8x256xbf16>
      tpu.vector_store %arg7[%c32, %c0_30], %65 {strides = array<i32>} : memref<72x256xbf16, #tpu.memory_space<vmem>>, vector<8x256xbf16>,
      %67 = vector.extract_strided_slice %21 {offsets = [0, 129], sizes = [8, 256], strides = [1, 1]} : vector<8x512xbf16> to vector<8x256xbf16>
      %c14_i32_31 = arith.constant 14 : i32
      %68 = vector.broadcast %c14_i32_31 : i32 to vector<1x256xi32>
      %69 = arith.cmpi sle, %38, %68 : vector<1x256xi32>
      %cst_32 = arith.constant 0.000000e+00 : bf16
      %70 = vector.broadcast %cst_32 : bf16 to vector<8x256xbf16>
      %71 = vector.shape_cast %69 : vector<1x256xi1> to vector<1x256xi1>
      %72 = vector.broadcast %71 : vector<1x256xi1> to vector<8x256xi1>
      %73 = arith.select %72, %67, %70 : vector<8x256xi1>, vector<8x256xbf16>
      %c40 = arith.constant 40 : index
      %c0_33 = arith.constant 0 : index
      %74 = vector.load %arg7[%c40, %c0_33] : memref<72x256xbf16, #tpu.memory_space<vmem>>, vector<8x256xbf16>
      tpu.vector_store %arg7[%c40, %c0_33], %73 {strides = array<i32>} : memref<72x256xbf16, #tpu.memory_space<vmem>>, vector<8x256xbf16>,
      %75 = vector.extract_strided_slice %21 {offsets = [0, 143], sizes = [8, 256], strides = [1, 1]} : vector<8x512xbf16> to vector<8x256xbf16>
      %c1_i32_34 = arith.constant 1 : i32
      %76 = vector.broadcast %c1_i32_34 : i32 to vector<1x256xi32>
      %77 = arith.cmpi sge, %38, %76 : vector<1x256xi32>
      %cst_35 = arith.constant 0.000000e+00 : bf16
      %78 = vector.broadcast %cst_35 : bf16 to vector<8x256xbf16>
      %79 = vector.shape_cast %77 : vector<1x256xi1> to vector<1x256xi1>
      %80 = vector.broadcast %79 : vector<1x256xi1> to vector<8x256xi1>
      %81 = arith.select %80, %75, %78 : vector<8x256xi1>, vector<8x256xbf16>
      %c48 = arith.constant 48 : index
      %c0_36 = arith.constant 0 : index
      %82 = vector.load %arg7[%c48, %c0_36] : memref<72x256xbf16, #tpu.memory_space<vmem>>, vector<8x256xbf16>
      tpu.vector_store %arg7[%c48, %c0_36], %81 {strides = array<i32>} : memref<72x256xbf16, #tpu.memory_space<vmem>>, vector<8x256xbf16>,
      %83 = vector.extract_strided_slice %21 {offsets = [0, 144], sizes = [8, 256], strides = [1, 1]} : vector<8x512xbf16> to vector<8x256xbf16>
      %c56 = arith.constant 56 : index
      %c0_37 = arith.constant 0 : index
      %84 = vector.load %arg7[%c56, %c0_37] : memref<72x256xbf16, #tpu.memory_space<vmem>>, vector<8x256xbf16>
      tpu.vector_store %arg7[%c56, %c0_37], %83 {strides = array<i32>} : memref<72x256xbf16, #tpu.memory_space<vmem>>, vector<8x256xbf16>,
      %85 = vector.extract_strided_slice %21 {offsets = [0, 145], sizes = [8, 256], strides = [1, 1]} : vector<8x512xbf16> to vector<8x256xbf16>
      %c14_i32_38 = arith.constant 14 : i32
      %86 = vector.broadcast %c14_i32_38 : i32 to vector<1x256xi32>
      %87 = arith.cmpi sle, %38, %86 : vector<1x256xi32>
      %cst_39 = arith.constant 0.000000e+00 : bf16
      %88 = vector.broadcast %cst_39 : bf16 to vector<8x256xbf16>
      %89 = vector.shape_cast %87 : vector<1x256xi1> to vector<1x256xi1>
      %90 = vector.broadcast %89 : vector<1x256xi1> to vector<8x256xi1>
      %91 = arith.select %90, %85, %88 : vector<8x256xi1>, vector<8x256xbf16>
      %c64 = arith.constant 64 : index
      %c0_40 = arith.constant 0 : index
      %92 = vector.load %arg7[%c64, %c0_40] : memref<72x256xbf16, #tpu.memory_space<vmem>>, vector<8x256xbf16>
      tpu.vector_store %arg7[%c64, %c0_40], %91 {strides = array<i32>} : memref<72x256xbf16, #tpu.memory_space<vmem>>, vector<8x256xbf16>,
    } else {
    }
    %c0 = arith.constant 0 : index
    %c0_1 = arith.constant 0 : index
    %3 = vector.load %arg3[%c0, %c0_1] : memref<8x72xbf16, #tpu.memory_space<vmem>>, vector<8x72xbf16>
    %c0_2 = arith.constant 0 : index
    %c0_3 = arith.constant 0 : index
    %4 = vector.load %arg7[%c0_2, %c0_3] : memref<72x256xbf16, #tpu.memory_space<vmem>>, vector<72x256xbf16>
    %cst = arith.constant dense<0.000000e+00> : vector<8x256xf32>
    %5 = tpu.matmul %3, %4, %cst {dimension_numbers = #tpu.dot_dimension_numbers<[1], [0], [0], [1], [0, 0, 1, 1], [], []>} : vector<8x72xbf16>, vector<72x256xbf16>, vector<8x256xf32> -> vector<8x256xf32>
    %c0_4 = arith.constant 0 : index
    %c0_5 = arith.constant 0 : index
    %6 = vector.load %arg4[%c0_4, %c0_5] : memref<8x1xf32, #tpu.memory_space<vmem>>, vector<8x1xf32>
    %7 = vector.broadcast %6 : vector<8x1xf32> to vector<8x256xf32>
    %8 = arith.mulf %5, %7 : vector<8x256xf32>
    %c0_6 = arith.constant 0 : index
    %c0_7 = arith.constant 0 : index
    %9 = vector.load %arg5[%c0_6, %c0_7] : memref<8x1xf32, #tpu.memory_space<vmem>>, vector<8x1xf32>
    %10 = vector.broadcast %9 : vector<8x1xf32> to vector<8x256xf32>
    %11 = arith.addf %8, %10 : vector<8x256xf32>
    %cst_8 = arith.constant 0.000000e+00 : f32
    %12 = vector.broadcast %cst_8 : f32 to vector<8x256xf32>
    %13 = arith.maximumf %11, %12 : vector<8x256xf32>
    %14 = arith.truncf %13 : vector<8x256xf32> to vector<8x256xbf16>
    %c0_9 = arith.constant 0 : index
    %c0_10 = arith.constant 0 : index
    %c0_11 = arith.constant 0 : index
    %15 = vector.load %arg6[%c0_9, %c0_10, %c0_11] : memref<1x8x256xbf16, #tpu.memory_space<vmem>>, vector<1x8x256xbf16>
    %16 = vector.shape_cast %15 : vector<1x8x256xbf16> to vector<8x256xbf16>
    %17 = vector.shape_cast %14 : vector<8x256xbf16> to vector<1x8x256xbf16>
    tpu.vector_store %arg6[%c0_9, %c0_10, %c0_11], %17 {strides = array<i32>} : memref<1x8x256xbf16, #tpu.memory_space<vmem>>, vector<1x8x256xbf16>,
    return
  }
  func.func @transform_0(%arg0: i32, %arg1: i32) -> (i32, i32, i32) {
    %c0_i32 = arith.constant 0 : i32
    %c0_i32_0 = arith.constant 0 : i32
    %c0_i32_1 = arith.constant 0 : i32
    return %arg0, %c0_i32, %c0_i32_0 : i32, i32, i32
  }
  func.func @transform_1(%arg0: i32, %arg1: i32) -> (i32, i32) {
    %c0_i32 = arith.constant 0 : i32
    %c0_i32_0 = arith.constant 0 : i32
    return %arg1, %c0_i32 : i32, i32
  }
  func.func @transform_2(%arg0: i32, %arg1: i32) -> (i32, i32) {
    %c0_i32 = arith.constant 0 : i32
    %c0_i32_0 = arith.constant 0 : i32
    return %arg1, %c0_i32 : i32, i32
  }
  func.func @transform_3(%arg0: i32, %arg1: i32) -> (i32, i32) {
    %c0_i32 = arith.constant 0 : i32
    %c0_i32_0 = arith.constant 0 : i32
    return %arg1, %c0_i32 : i32, i32
  }
  func.func @transform_4(%arg0: i32, %arg1: i32) -> (i32, i32, i32) {
    %c0_i32 = arith.constant 0 : i32
    %c0_i32_0 = arith.constant 0 : i32
    return %arg0, %arg1, %c0_i32 : i32, i32, i32
  }
}

module attributes {stable_mosaic.version = 11 : i64} {
  func.func @_conv3x3_bn_relu_kernel(%arg0: i32, %arg1: i32, %arg2: memref<1x8x1024xbf16, #tpu.memory_space<vmem>>, %arg3: memref<8x72xbf16, #tpu.memory_space<vmem>>, %arg4: memref<8x1xf32, #tpu.memory_space<vmem>>, %arg5: memref<8x1xf32, #tpu.memory_space<vmem>>, %arg6: memref<1x8x1024xbf16, #tpu.memory_space<vmem>>, %arg7: memref<72x1024xbf16, #tpu.memory_space<vmem>>) attributes {dimension_semantics = [#tpu.dimension_semantics<parallel>, #tpu.dimension_semantics<arbitrary>], iteration_bounds = array<i64: 2, 4>, scalar_prefetch = 0 : i64, scratch_operands = 1 : i64, tpu.core_type = #tpu.core_type<tc>, window_params = [{transform_indices = @transform_0, window_bounds = array<i64: 1, 8, 1024>}, {transform_indices = @transform_1, window_bounds = array<i64: 8, 72>}, {transform_indices = @transform_2, window_bounds = array<i64: 8, 1>}, {transform_indices = @transform_3, window_bounds = array<i64: 8, 1>}, {transform_indices = @transform_4, window_bounds = array<i64: 1, 8, 1024>}]} {
    %c0_i32 = arith.constant 0 : i32
    %0 = arith.cmpi eq, %arg1, %c0_i32 : i32
    %1 = arith.extui %0 : i1 to i32
    %c0_i32_0 = arith.constant 0 : i32
    %2 = arith.cmpi ne, %1, %c0_i32_0 : i32
    scf.if %2 {
      %c0_12 = arith.constant 0 : index
      %c0_13 = arith.constant 0 : index
      %c0_14 = arith.constant 0 : index
      %18 = vector.load %arg2[%c0_12, %c0_13, %c0_14] : memref<1x8x1024xbf16, #tpu.memory_space<vmem>>, vector<1x8x1024xbf16>
      %19 = vector.shape_cast %18 : vector<1x8x1024xbf16> to vector<8x1024xbf16>
      %cst_15 = arith.constant 0.000000e+00 : bf16
      %20 = vector.broadcast %cst_15 : bf16 to vector<8x128xbf16>
      %21 = tpu.concatenate %20, %19, %20 in 1 : vector<8x128xbf16>, vector<8x1024xbf16>, vector<8x128xbf16> -> vector<8x1280xbf16>
      %22 = tpu.iota {dimensions = array<i32: 1>} : vector<1x1024xi32>
      %c32_i32 = arith.constant 32 : i32
      %c0_i32_16 = arith.constant 0 : i32
      %23 = arith.cmpi eq, %c32_i32, %c0_i32_16 : i32
      %c1_i32 = arith.constant 1 : i32
      %24 = arith.select %23, %c1_i32, %c32_i32 : i32
      %25 = vector.broadcast %24 : i32 to vector<1x1024xi32>
      %26 = arith.remsi %22, %25 : vector<1x1024xi32>
      %c0_i32_17 = arith.constant 0 : i32
      %27 = vector.broadcast %c0_i32_17 : i32 to vector<1x1024xi32>
      %28 = arith.cmpi ne, %26, %27 : vector<1x1024xi32>
      %c0_i32_18 = arith.constant 0 : i32
      %29 = vector.broadcast %c0_i32_18 : i32 to vector<1x1024xi32>
      %30 = arith.cmpi slt, %26, %29 : vector<1x1024xi32>
      %c0_i32_19 = arith.constant 0 : i32
      %31 = arith.cmpi slt, %24, %c0_i32_19 : i32
      %32 = vector.broadcast %31 : i1 to vector<1x1024xi1>
      %33 = vector.broadcast %32 : vector<1x1024xi1> to vector<1x1024xi1>
      %34 = arith.xori %30, %33 : vector<1x1024xi1>
      %35 = arith.andi %34, %28 : vector<1x1024xi1>
      %36 = vector.broadcast %24 : i32 to vector<1x1024xi32>
      %37 = arith.addi %26, %36 : vector<1x1024xi32>
      %38 = arith.select %35, %37, %26 : vector<1x1024xi1>, vector<1x1024xi32>
      %39 = vector.extract_strided_slice %21 {offsets = [0, 95], sizes = [8, 1024], strides = [1, 1]} : vector<8x1280xbf16> to vector<8x1024xbf16>
      %c1_i32_20 = arith.constant 1 : i32
      %40 = vector.broadcast %c1_i32_20 : i32 to vector<1x1024xi32>
      %41 = arith.cmpi sge, %38, %40 : vector<1x1024xi32>
      %cst_21 = arith.constant 0.000000e+00 : bf16
      %42 = vector.broadcast %cst_21 : bf16 to vector<8x1024xbf16>
      %43 = vector.shape_cast %41 : vector<1x1024xi1> to vector<1x1024xi1>
      %44 = vector.broadcast %43 : vector<1x1024xi1> to vector<8x1024xi1>
      %45 = arith.select %44, %39, %42 : vector<8x1024xi1>, vector<8x1024xbf16>
      %c0_22 = arith.constant 0 : index
      %c0_23 = arith.constant 0 : index
      %46 = vector.load %arg7[%c0_22, %c0_23] : memref<72x1024xbf16, #tpu.memory_space<vmem>>, vector<8x1024xbf16>
      tpu.vector_store %arg7[%c0_22, %c0_23], %45 {strides = array<i32>} : memref<72x1024xbf16, #tpu.memory_space<vmem>>, vector<8x1024xbf16>,
      %47 = vector.extract_strided_slice %21 {offsets = [0, 96], sizes = [8, 1024], strides = [1, 1]} : vector<8x1280xbf16> to vector<8x1024xbf16>
      %c8 = arith.constant 8 : index
      %c0_24 = arith.constant 0 : index
      %48 = vector.load %arg7[%c8, %c0_24] : memref<72x1024xbf16, #tpu.memory_space<vmem>>, vector<8x1024xbf16>
      tpu.vector_store %arg7[%c8, %c0_24], %47 {strides = array<i32>} : memref<72x1024xbf16, #tpu.memory_space<vmem>>, vector<8x1024xbf16>,
      %49 = vector.extract_strided_slice %21 {offsets = [0, 97], sizes = [8, 1024], strides = [1, 1]} : vector<8x1280xbf16> to vector<8x1024xbf16>
      %c30_i32 = arith.constant 30 : i32
      %50 = vector.broadcast %c30_i32 : i32 to vector<1x1024xi32>
      %51 = arith.cmpi sle, %38, %50 : vector<1x1024xi32>
      %cst_25 = arith.constant 0.000000e+00 : bf16
      %52 = vector.broadcast %cst_25 : bf16 to vector<8x1024xbf16>
      %53 = vector.shape_cast %51 : vector<1x1024xi1> to vector<1x1024xi1>
      %54 = vector.broadcast %53 : vector<1x1024xi1> to vector<8x1024xi1>
      %55 = arith.select %54, %49, %52 : vector<8x1024xi1>, vector<8x1024xbf16>
      %c16 = arith.constant 16 : index
      %c0_26 = arith.constant 0 : index
      %56 = vector.load %arg7[%c16, %c0_26] : memref<72x1024xbf16, #tpu.memory_space<vmem>>, vector<8x1024xbf16>
      tpu.vector_store %arg7[%c16, %c0_26], %55 {strides = array<i32>} : memref<72x1024xbf16, #tpu.memory_space<vmem>>, vector<8x1024xbf16>,
      %57 = vector.extract_strided_slice %21 {offsets = [0, 127], sizes = [8, 1024], strides = [1, 1]} : vector<8x1280xbf16> to vector<8x1024xbf16>
      %c1_i32_27 = arith.constant 1 : i32
      %58 = vector.broadcast %c1_i32_27 : i32 to vector<1x1024xi32>
      %59 = arith.cmpi sge, %38, %58 : vector<1x1024xi32>
      %cst_28 = arith.constant 0.000000e+00 : bf16
      %60 = vector.broadcast %cst_28 : bf16 to vector<8x1024xbf16>
      %61 = vector.shape_cast %59 : vector<1x1024xi1> to vector<1x1024xi1>
      %62 = vector.broadcast %61 : vector<1x1024xi1> to vector<8x1024xi1>
      %63 = arith.select %62, %57, %60 : vector<8x1024xi1>, vector<8x1024xbf16>
      %c24 = arith.constant 24 : index
      %c0_29 = arith.constant 0 : index
      %64 = vector.load %arg7[%c24, %c0_29] : memref<72x1024xbf16, #tpu.memory_space<vmem>>, vector<8x1024xbf16>
      tpu.vector_store %arg7[%c24, %c0_29], %63 {strides = array<i32>} : memref<72x1024xbf16, #tpu.memory_space<vmem>>, vector<8x1024xbf16>,
      %65 = vector.extract_strided_slice %21 {offsets = [0, 128], sizes = [8, 1024], strides = [1, 1]} : vector<8x1280xbf16> to vector<8x1024xbf16>
      %c32 = arith.constant 32 : index
      %c0_30 = arith.constant 0 : index
      %66 = vector.load %arg7[%c32, %c0_30] : memref<72x1024xbf16, #tpu.memory_space<vmem>>, vector<8x1024xbf16>
      tpu.vector_store %arg7[%c32, %c0_30], %65 {strides = array<i32>} : memref<72x1024xbf16, #tpu.memory_space<vmem>>, vector<8x1024xbf16>,
      %67 = vector.extract_strided_slice %21 {offsets = [0, 129], sizes = [8, 1024], strides = [1, 1]} : vector<8x1280xbf16> to vector<8x1024xbf16>
      %c30_i32_31 = arith.constant 30 : i32
      %68 = vector.broadcast %c30_i32_31 : i32 to vector<1x1024xi32>
      %69 = arith.cmpi sle, %38, %68 : vector<1x1024xi32>
      %cst_32 = arith.constant 0.000000e+00 : bf16
      %70 = vector.broadcast %cst_32 : bf16 to vector<8x1024xbf16>
      %71 = vector.shape_cast %69 : vector<1x1024xi1> to vector<1x1024xi1>
      %72 = vector.broadcast %71 : vector<1x1024xi1> to vector<8x1024xi1>
      %73 = arith.select %72, %67, %70 : vector<8x1024xi1>, vector<8x1024xbf16>
      %c40 = arith.constant 40 : index
      %c0_33 = arith.constant 0 : index
      %74 = vector.load %arg7[%c40, %c0_33] : memref<72x1024xbf16, #tpu.memory_space<vmem>>, vector<8x1024xbf16>
      tpu.vector_store %arg7[%c40, %c0_33], %73 {strides = array<i32>} : memref<72x1024xbf16, #tpu.memory_space<vmem>>, vector<8x1024xbf16>,
      %75 = vector.extract_strided_slice %21 {offsets = [0, 159], sizes = [8, 1024], strides = [1, 1]} : vector<8x1280xbf16> to vector<8x1024xbf16>
      %c1_i32_34 = arith.constant 1 : i32
      %76 = vector.broadcast %c1_i32_34 : i32 to vector<1x1024xi32>
      %77 = arith.cmpi sge, %38, %76 : vector<1x1024xi32>
      %cst_35 = arith.constant 0.000000e+00 : bf16
      %78 = vector.broadcast %cst_35 : bf16 to vector<8x1024xbf16>
      %79 = vector.shape_cast %77 : vector<1x1024xi1> to vector<1x1024xi1>
      %80 = vector.broadcast %79 : vector<1x1024xi1> to vector<8x1024xi1>
      %81 = arith.select %80, %75, %78 : vector<8x1024xi1>, vector<8x1024xbf16>
      %c48 = arith.constant 48 : index
      %c0_36 = arith.constant 0 : index
      %82 = vector.load %arg7[%c48, %c0_36] : memref<72x1024xbf16, #tpu.memory_space<vmem>>, vector<8x1024xbf16>
      tpu.vector_store %arg7[%c48, %c0_36], %81 {strides = array<i32>} : memref<72x1024xbf16, #tpu.memory_space<vmem>>, vector<8x1024xbf16>,
      %83 = vector.extract_strided_slice %21 {offsets = [0, 160], sizes = [8, 1024], strides = [1, 1]} : vector<8x1280xbf16> to vector<8x1024xbf16>
      %c56 = arith.constant 56 : index
      %c0_37 = arith.constant 0 : index
      %84 = vector.load %arg7[%c56, %c0_37] : memref<72x1024xbf16, #tpu.memory_space<vmem>>, vector<8x1024xbf16>
      tpu.vector_store %arg7[%c56, %c0_37], %83 {strides = array<i32>} : memref<72x1024xbf16, #tpu.memory_space<vmem>>, vector<8x1024xbf16>,
      %85 = vector.extract_strided_slice %21 {offsets = [0, 161], sizes = [8, 1024], strides = [1, 1]} : vector<8x1280xbf16> to vector<8x1024xbf16>
      %c30_i32_38 = arith.constant 30 : i32
      %86 = vector.broadcast %c30_i32_38 : i32 to vector<1x1024xi32>
      %87 = arith.cmpi sle, %38, %86 : vector<1x1024xi32>
      %cst_39 = arith.constant 0.000000e+00 : bf16
      %88 = vector.broadcast %cst_39 : bf16 to vector<8x1024xbf16>
      %89 = vector.shape_cast %87 : vector<1x1024xi1> to vector<1x1024xi1>
      %90 = vector.broadcast %89 : vector<1x1024xi1> to vector<8x1024xi1>
      %91 = arith.select %90, %85, %88 : vector<8x1024xi1>, vector<8x1024xbf16>
      %c64 = arith.constant 64 : index
      %c0_40 = arith.constant 0 : index
      %92 = vector.load %arg7[%c64, %c0_40] : memref<72x1024xbf16, #tpu.memory_space<vmem>>, vector<8x1024xbf16>
      tpu.vector_store %arg7[%c64, %c0_40], %91 {strides = array<i32>} : memref<72x1024xbf16, #tpu.memory_space<vmem>>, vector<8x1024xbf16>,
    } else {
    }
    %c0 = arith.constant 0 : index
    %c0_1 = arith.constant 0 : index
    %3 = vector.load %arg3[%c0, %c0_1] : memref<8x72xbf16, #tpu.memory_space<vmem>>, vector<8x72xbf16>
    %c0_2 = arith.constant 0 : index
    %c0_3 = arith.constant 0 : index
    %4 = vector.load %arg7[%c0_2, %c0_3] : memref<72x1024xbf16, #tpu.memory_space<vmem>>, vector<72x1024xbf16>
    %cst = arith.constant dense<0.000000e+00> : vector<8x1024xf32>
    %5 = tpu.matmul %3, %4, %cst {dimension_numbers = #tpu.dot_dimension_numbers<[1], [0], [0], [1], [0, 0, 1, 1], [], []>} : vector<8x72xbf16>, vector<72x1024xbf16>, vector<8x1024xf32> -> vector<8x1024xf32>
    %c0_4 = arith.constant 0 : index
    %c0_5 = arith.constant 0 : index
    %6 = vector.load %arg4[%c0_4, %c0_5] : memref<8x1xf32, #tpu.memory_space<vmem>>, vector<8x1xf32>
    %7 = vector.broadcast %6 : vector<8x1xf32> to vector<8x1024xf32>
    %8 = arith.mulf %5, %7 : vector<8x1024xf32>
    %c0_6 = arith.constant 0 : index
    %c0_7 = arith.constant 0 : index
    %9 = vector.load %arg5[%c0_6, %c0_7] : memref<8x1xf32, #tpu.memory_space<vmem>>, vector<8x1xf32>
    %10 = vector.broadcast %9 : vector<8x1xf32> to vector<8x1024xf32>
    %11 = arith.addf %8, %10 : vector<8x1024xf32>
    %cst_8 = arith.constant 0.000000e+00 : f32
    %12 = vector.broadcast %cst_8 : f32 to vector<8x1024xf32>
    %13 = arith.maximumf %11, %12 : vector<8x1024xf32>
    %14 = arith.truncf %13 : vector<8x1024xf32> to vector<8x1024xbf16>
    %c0_9 = arith.constant 0 : index
    %c0_10 = arith.constant 0 : index
    %c0_11 = arith.constant 0 : index
    %15 = vector.load %arg6[%c0_9, %c0_10, %c0_11] : memref<1x8x1024xbf16, #tpu.memory_space<vmem>>, vector<1x8x1024xbf16>
    %16 = vector.shape_cast %15 : vector<1x8x1024xbf16> to vector<8x1024xbf16>
    %17 = vector.shape_cast %14 : vector<8x1024xbf16> to vector<1x8x1024xbf16>
    tpu.vector_store %arg6[%c0_9, %c0_10, %c0_11], %17 {strides = array<i32>} : memref<1x8x1024xbf16, #tpu.memory_space<vmem>>, vector<1x8x1024xbf16>,
    return
  }
  func.func @transform_0(%arg0: i32, %arg1: i32) -> (i32, i32, i32) {
    %c0_i32 = arith.constant 0 : i32
    %c0_i32_0 = arith.constant 0 : i32
    %c0_i32_1 = arith.constant 0 : i32
    return %arg0, %c0_i32, %c0_i32_0 : i32, i32, i32
  }
  func.func @transform_1(%arg0: i32, %arg1: i32) -> (i32, i32) {
    %c0_i32 = arith.constant 0 : i32
    %c0_i32_0 = arith.constant 0 : i32
    return %arg1, %c0_i32 : i32, i32
  }
  func.func @transform_2(%arg0: i32, %arg1: i32) -> (i32, i32) {
    %c0_i32 = arith.constant 0 : i32
    %c0_i32_0 = arith.constant 0 : i32
    return %arg1, %c0_i32 : i32, i32
  }
  func.func @transform_3(%arg0: i32, %arg1: i32) -> (i32, i32) {
    %c0_i32 = arith.constant 0 : i32
    %c0_i32_0 = arith.constant 0 : i32
    return %arg1, %c0_i32 : i32, i32
  }
  func.func @transform_4(%arg0: i32, %arg1: i32) -> (i32, i32, i32) {
    %c0_i32 = arith.constant 0 : i32
    %c0_i32_0 = arith.constant 0 : i32
    return %arg0, %arg1, %c0_i32 : i32, i32, i32
  }
}

module attributes {stable_mosaic.version = 11 : i64} {
  func.func @_conv3x3_bn_relu_kernel(%arg0: i32, %arg1: i32, %arg2: memref<1x8x4096xbf16, #tpu.memory_space<vmem>>, %arg3: memref<4x72xbf16, #tpu.memory_space<vmem>>, %arg4: memref<4x1xf32, #tpu.memory_space<vmem>>, %arg5: memref<4x1xf32, #tpu.memory_space<vmem>>, %arg6: memref<1x4x4096xf32, #tpu.memory_space<vmem>>, %arg7: memref<72x4096xbf16, #tpu.memory_space<vmem>>) attributes {dimension_semantics = [#tpu.dimension_semantics<parallel>, #tpu.dimension_semantics<arbitrary>], iteration_bounds = array<i64: 2, 1>, scalar_prefetch = 0 : i64, scratch_operands = 1 : i64, tpu.core_type = #tpu.core_type<tc>, window_params = [{transform_indices = @transform_0, window_bounds = array<i64: 1, 8, 4096>}, {transform_indices = @transform_1, window_bounds = array<i64: 4, 72>}, {transform_indices = @transform_2, window_bounds = array<i64: 4, 1>}, {transform_indices = @transform_3, window_bounds = array<i64: 4, 1>}, {transform_indices = @transform_4, window_bounds = array<i64: 1, 4, 4096>}]} {
    %c0_i32 = arith.constant 0 : i32
    %0 = arith.cmpi eq, %arg1, %c0_i32 : i32
    %1 = arith.extui %0 : i1 to i32
    %c0_i32_0 = arith.constant 0 : i32
    %2 = arith.cmpi ne, %1, %c0_i32_0 : i32
    scf.if %2 {
      %c0_12 = arith.constant 0 : index
      %c0_13 = arith.constant 0 : index
      %c0_14 = arith.constant 0 : index
      %17 = vector.load %arg2[%c0_12, %c0_13, %c0_14] : memref<1x8x4096xbf16, #tpu.memory_space<vmem>>, vector<1x8x4096xbf16>
      %18 = vector.shape_cast %17 : vector<1x8x4096xbf16> to vector<8x4096xbf16>
      %cst_15 = arith.constant 0.000000e+00 : bf16
      %19 = vector.broadcast %cst_15 : bf16 to vector<8x128xbf16>
      %20 = tpu.concatenate %19, %18, %19 in 1 : vector<8x128xbf16>, vector<8x4096xbf16>, vector<8x128xbf16> -> vector<8x4352xbf16>
      %21 = tpu.iota {dimensions = array<i32: 1>} : vector<1x4096xi32>
      %c64_i32 = arith.constant 64 : i32
      %c0_i32_16 = arith.constant 0 : i32
      %22 = arith.cmpi eq, %c64_i32, %c0_i32_16 : i32
      %c1_i32 = arith.constant 1 : i32
      %23 = arith.select %22, %c1_i32, %c64_i32 : i32
      %24 = vector.broadcast %23 : i32 to vector<1x4096xi32>
      %25 = arith.remsi %21, %24 : vector<1x4096xi32>
      %c0_i32_17 = arith.constant 0 : i32
      %26 = vector.broadcast %c0_i32_17 : i32 to vector<1x4096xi32>
      %27 = arith.cmpi ne, %25, %26 : vector<1x4096xi32>
      %c0_i32_18 = arith.constant 0 : i32
      %28 = vector.broadcast %c0_i32_18 : i32 to vector<1x4096xi32>
      %29 = arith.cmpi slt, %25, %28 : vector<1x4096xi32>
      %c0_i32_19 = arith.constant 0 : i32
      %30 = arith.cmpi slt, %23, %c0_i32_19 : i32
      %31 = vector.broadcast %30 : i1 to vector<1x4096xi1>
      %32 = vector.broadcast %31 : vector<1x4096xi1> to vector<1x4096xi1>
      %33 = arith.xori %29, %32 : vector<1x4096xi1>
      %34 = arith.andi %33, %27 : vector<1x4096xi1>
      %35 = vector.broadcast %23 : i32 to vector<1x4096xi32>
      %36 = arith.addi %25, %35 : vector<1x4096xi32>
      %37 = arith.select %34, %36, %25 : vector<1x4096xi1>, vector<1x4096xi32>
      %38 = vector.extract_strided_slice %20 {offsets = [0, 63], sizes = [8, 4096], strides = [1, 1]} : vector<8x4352xbf16> to vector<8x4096xbf16>
      %c1_i32_20 = arith.constant 1 : i32
      %39 = vector.broadcast %c1_i32_20 : i32 to vector<1x4096xi32>
      %40 = arith.cmpi sge, %37, %39 : vector<1x4096xi32>
      %cst_21 = arith.constant 0.000000e+00 : bf16
      %41 = vector.broadcast %cst_21 : bf16 to vector<8x4096xbf16>
      %42 = vector.shape_cast %40 : vector<1x4096xi1> to vector<1x4096xi1>
      %43 = vector.broadcast %42 : vector<1x4096xi1> to vector<8x4096xi1>
      %44 = arith.select %43, %38, %41 : vector<8x4096xi1>, vector<8x4096xbf16>
      %c0_22 = arith.constant 0 : index
      %c0_23 = arith.constant 0 : index
      %45 = vector.load %arg7[%c0_22, %c0_23] : memref<72x4096xbf16, #tpu.memory_space<vmem>>, vector<8x4096xbf16>
      tpu.vector_store %arg7[%c0_22, %c0_23], %44 {strides = array<i32>} : memref<72x4096xbf16, #tpu.memory_space<vmem>>, vector<8x4096xbf16>,
      %46 = vector.extract_strided_slice %20 {offsets = [0, 64], sizes = [8, 4096], strides = [1, 1]} : vector<8x4352xbf16> to vector<8x4096xbf16>
      %c8 = arith.constant 8 : index
      %c0_24 = arith.constant 0 : index
      %47 = vector.load %arg7[%c8, %c0_24] : memref<72x4096xbf16, #tpu.memory_space<vmem>>, vector<8x4096xbf16>
      tpu.vector_store %arg7[%c8, %c0_24], %46 {strides = array<i32>} : memref<72x4096xbf16, #tpu.memory_space<vmem>>, vector<8x4096xbf16>,
      %48 = vector.extract_strided_slice %20 {offsets = [0, 65], sizes = [8, 4096], strides = [1, 1]} : vector<8x4352xbf16> to vector<8x4096xbf16>
      %c62_i32 = arith.constant 62 : i32
      %49 = vector.broadcast %c62_i32 : i32 to vector<1x4096xi32>
      %50 = arith.cmpi sle, %37, %49 : vector<1x4096xi32>
      %cst_25 = arith.constant 0.000000e+00 : bf16
      %51 = vector.broadcast %cst_25 : bf16 to vector<8x4096xbf16>
      %52 = vector.shape_cast %50 : vector<1x4096xi1> to vector<1x4096xi1>
      %53 = vector.broadcast %52 : vector<1x4096xi1> to vector<8x4096xi1>
      %54 = arith.select %53, %48, %51 : vector<8x4096xi1>, vector<8x4096xbf16>
      %c16 = arith.constant 16 : index
      %c0_26 = arith.constant 0 : index
      %55 = vector.load %arg7[%c16, %c0_26] : memref<72x4096xbf16, #tpu.memory_space<vmem>>, vector<8x4096xbf16>
      tpu.vector_store %arg7[%c16, %c0_26], %54 {strides = array<i32>} : memref<72x4096xbf16, #tpu.memory_space<vmem>>, vector<8x4096xbf16>,
      %56 = vector.extract_strided_slice %20 {offsets = [0, 127], sizes = [8, 4096], strides = [1, 1]} : vector<8x4352xbf16> to vector<8x4096xbf16>
      %c1_i32_27 = arith.constant 1 : i32
      %57 = vector.broadcast %c1_i32_27 : i32 to vector<1x4096xi32>
      %58 = arith.cmpi sge, %37, %57 : vector<1x4096xi32>
      %cst_28 = arith.constant 0.000000e+00 : bf16
      %59 = vector.broadcast %cst_28 : bf16 to vector<8x4096xbf16>
      %60 = vector.shape_cast %58 : vector<1x4096xi1> to vector<1x4096xi1>
      %61 = vector.broadcast %60 : vector<1x4096xi1> to vector<8x4096xi1>
      %62 = arith.select %61, %56, %59 : vector<8x4096xi1>, vector<8x4096xbf16>
      %c24 = arith.constant 24 : index
      %c0_29 = arith.constant 0 : index
      %63 = vector.load %arg7[%c24, %c0_29] : memref<72x4096xbf16, #tpu.memory_space<vmem>>, vector<8x4096xbf16>
      tpu.vector_store %arg7[%c24, %c0_29], %62 {strides = array<i32>} : memref<72x4096xbf16, #tpu.memory_space<vmem>>, vector<8x4096xbf16>,
      %64 = vector.extract_strided_slice %20 {offsets = [0, 128], sizes = [8, 4096], strides = [1, 1]} : vector<8x4352xbf16> to vector<8x4096xbf16>
      %c32 = arith.constant 32 : index
      %c0_30 = arith.constant 0 : index
      %65 = vector.load %arg7[%c32, %c0_30] : memref<72x4096xbf16, #tpu.memory_space<vmem>>, vector<8x4096xbf16>
      tpu.vector_store %arg7[%c32, %c0_30], %64 {strides = array<i32>} : memref<72x4096xbf16, #tpu.memory_space<vmem>>, vector<8x4096xbf16>,
      %66 = vector.extract_strided_slice %20 {offsets = [0, 129], sizes = [8, 4096], strides = [1, 1]} : vector<8x4352xbf16> to vector<8x4096xbf16>
      %c62_i32_31 = arith.constant 62 : i32
      %67 = vector.broadcast %c62_i32_31 : i32 to vector<1x4096xi32>
      %68 = arith.cmpi sle, %37, %67 : vector<1x4096xi32>
      %cst_32 = arith.constant 0.000000e+00 : bf16
      %69 = vector.broadcast %cst_32 : bf16 to vector<8x4096xbf16>
      %70 = vector.shape_cast %68 : vector<1x4096xi1> to vector<1x4096xi1>
      %71 = vector.broadcast %70 : vector<1x4096xi1> to vector<8x4096xi1>
      %72 = arith.select %71, %66, %69 : vector<8x4096xi1>, vector<8x4096xbf16>
      %c40 = arith.constant 40 : index
      %c0_33 = arith.constant 0 : index
      %73 = vector.load %arg7[%c40, %c0_33] : memref<72x4096xbf16, #tpu.memory_space<vmem>>, vector<8x4096xbf16>
      tpu.vector_store %arg7[%c40, %c0_33], %72 {strides = array<i32>} : memref<72x4096xbf16, #tpu.memory_space<vmem>>, vector<8x4096xbf16>,
      %74 = vector.extract_strided_slice %20 {offsets = [0, 191], sizes = [8, 4096], strides = [1, 1]} : vector<8x4352xbf16> to vector<8x4096xbf16>
      %c1_i32_34 = arith.constant 1 : i32
      %75 = vector.broadcast %c1_i32_34 : i32 to vector<1x4096xi32>
      %76 = arith.cmpi sge, %37, %75 : vector<1x4096xi32>
      %cst_35 = arith.constant 0.000000e+00 : bf16
      %77 = vector.broadcast %cst_35 : bf16 to vector<8x4096xbf16>
      %78 = vector.shape_cast %76 : vector<1x4096xi1> to vector<1x4096xi1>
      %79 = vector.broadcast %78 : vector<1x4096xi1> to vector<8x4096xi1>
      %80 = arith.select %79, %74, %77 : vector<8x4096xi1>, vector<8x4096xbf16>
      %c48 = arith.constant 48 : index
      %c0_36 = arith.constant 0 : index
      %81 = vector.load %arg7[%c48, %c0_36] : memref<72x4096xbf16, #tpu.memory_space<vmem>>, vector<8x4096xbf16>
      tpu.vector_store %arg7[%c48, %c0_36], %80 {strides = array<i32>} : memref<72x4096xbf16, #tpu.memory_space<vmem>>, vector<8x4096xbf16>,
      %82 = vector.extract_strided_slice %20 {offsets = [0, 192], sizes = [8, 4096], strides = [1, 1]} : vector<8x4352xbf16> to vector<8x4096xbf16>
      %c56 = arith.constant 56 : index
      %c0_37 = arith.constant 0 : index
      %83 = vector.load %arg7[%c56, %c0_37] : memref<72x4096xbf16, #tpu.memory_space<vmem>>, vector<8x4096xbf16>
      tpu.vector_store %arg7[%c56, %c0_37], %82 {strides = array<i32>} : memref<72x4096xbf16, #tpu.memory_space<vmem>>, vector<8x4096xbf16>,
      %84 = vector.extract_strided_slice %20 {offsets = [0, 193], sizes = [8, 4096], strides = [1, 1]} : vector<8x4352xbf16> to vector<8x4096xbf16>
      %c62_i32_38 = arith.constant 62 : i32
      %85 = vector.broadcast %c62_i32_38 : i32 to vector<1x4096xi32>
      %86 = arith.cmpi sle, %37, %85 : vector<1x4096xi32>
      %cst_39 = arith.constant 0.000000e+00 : bf16
      %87 = vector.broadcast %cst_39 : bf16 to vector<8x4096xbf16>
      %88 = vector.shape_cast %86 : vector<1x4096xi1> to vector<1x4096xi1>
      %89 = vector.broadcast %88 : vector<1x4096xi1> to vector<8x4096xi1>
      %90 = arith.select %89, %84, %87 : vector<8x4096xi1>, vector<8x4096xbf16>
      %c64 = arith.constant 64 : index
      %c0_40 = arith.constant 0 : index
      %91 = vector.load %arg7[%c64, %c0_40] : memref<72x4096xbf16, #tpu.memory_space<vmem>>, vector<8x4096xbf16>
      tpu.vector_store %arg7[%c64, %c0_40], %90 {strides = array<i32>} : memref<72x4096xbf16, #tpu.memory_space<vmem>>, vector<8x4096xbf16>,
    } else {
    }
    %c0 = arith.constant 0 : index
    %c0_1 = arith.constant 0 : index
    %3 = vector.load %arg3[%c0, %c0_1] : memref<4x72xbf16, #tpu.memory_space<vmem>>, vector<4x72xbf16>
    %c0_2 = arith.constant 0 : index
    %c0_3 = arith.constant 0 : index
    %4 = vector.load %arg7[%c0_2, %c0_3] : memref<72x4096xbf16, #tpu.memory_space<vmem>>, vector<72x4096xbf16>
    %cst = arith.constant dense<0.000000e+00> : vector<4x4096xf32>
    %5 = tpu.matmul %3, %4, %cst {dimension_numbers = #tpu.dot_dimension_numbers<[1], [0], [0], [1], [0, 0, 1, 1], [], []>} : vector<4x72xbf16>, vector<72x4096xbf16>, vector<4x4096xf32> -> vector<4x4096xf32>
    %c0_4 = arith.constant 0 : index
    %c0_5 = arith.constant 0 : index
    %6 = vector.load %arg4[%c0_4, %c0_5] : memref<4x1xf32, #tpu.memory_space<vmem>>, vector<4x1xf32>
    %7 = vector.broadcast %6 : vector<4x1xf32> to vector<4x4096xf32>
    %8 = arith.mulf %5, %7 : vector<4x4096xf32>
    %c0_6 = arith.constant 0 : index
    %c0_7 = arith.constant 0 : index
    %9 = vector.load %arg5[%c0_6, %c0_7] : memref<4x1xf32, #tpu.memory_space<vmem>>, vector<4x1xf32>
    %10 = vector.broadcast %9 : vector<4x1xf32> to vector<4x4096xf32>
    %11 = arith.addf %8, %10 : vector<4x4096xf32>
    %cst_8 = arith.constant 0.000000e+00 : f32
    %12 = vector.broadcast %cst_8 : f32 to vector<4x4096xf32>
    %13 = arith.maximumf %11, %12 : vector<4x4096xf32>
    %c0_9 = arith.constant 0 : index
    %c0_10 = arith.constant 0 : index
    %c0_11 = arith.constant 0 : index
    %14 = vector.load %arg6[%c0_9, %c0_10, %c0_11] : memref<1x4x4096xf32, #tpu.memory_space<vmem>>, vector<1x4x4096xf32>
    %15 = vector.shape_cast %14 : vector<1x4x4096xf32> to vector<4x4096xf32>
    %16 = vector.shape_cast %13 : vector<4x4096xf32> to vector<1x4x4096xf32>
    tpu.vector_store %arg6[%c0_9, %c0_10, %c0_11], %16 {strides = array<i32>} : memref<1x4x4096xf32, #tpu.memory_space<vmem>>, vector<1x4x4096xf32>,
    return
  }
  func.func @transform_0(%arg0: i32, %arg1: i32) -> (i32, i32, i32) {
    %c0_i32 = arith.constant 0 : i32
    %c0_i32_0 = arith.constant 0 : i32
    %c0_i32_1 = arith.constant 0 : i32
    return %arg0, %c0_i32, %c0_i32_0 : i32, i32, i32
  }
  func.func @transform_1(%arg0: i32, %arg1: i32) -> (i32, i32) {
    %c0_i32 = arith.constant 0 : i32
    %c0_i32_0 = arith.constant 0 : i32
    return %arg1, %c0_i32 : i32, i32
  }
  func.func @transform_2(%arg0: i32, %arg1: i32) -> (i32, i32) {
    %c0_i32 = arith.constant 0 : i32
    %c0_i32_0 = arith.constant 0 : i32
    return %arg1, %c0_i32 : i32, i32
  }
  func.func @transform_3(%arg0: i32, %arg1: i32) -> (i32, i32) {
    %c0_i32 = arith.constant 0 : i32
    %c0_i32_0 = arith.constant 0 : i32
    return %arg1, %c0_i32 : i32, i32
  }
  func.func @transform_4(%arg0: i32, %arg1: i32) -> (i32, i32, i32) {
    %c0_i32 = arith.constant 0 : i32
    %c0_i32_0 = arith.constant 0 : i32
    return %arg0, %arg1, %c0_i32 : i32, i32, i32
  }
}

</mosaic_0001>

<bundles_post_ra>
// kernel: _lambda_.3
= control target key start
LH: loop header
LB: loop body
LE: loop exit
PB: predicated region body
PF: predicated region fallthrough
CT: control target
= control target key end

     0   :  { %s1540_s0 = inlined_call_operand.vmem [shape: bf16[2,8,256], index: 0, kind: input, shape index: {}]   ;;  %s1541_s1 = inlined_call_operand.hbm [shape: bf16[32,72], index: 1, kind: input, shape index: {}]   ;;  %s1542_s2 = inlined_call_operand.hbm [shape: f32[32,1], index: 2, kind: input, shape index: {}]   ;;  %s1543_s3 = inlined_call_operand.hbm [shape: f32[32,1], index: 3, kind: input, shape index: {}]   ;;  %s1544_s4 = inlined_call_operand.vmem [shape: bf16[2,32,256], index: 4, kind: output, shape index: {}]  }
   0x1   :  { %1551 = sst [smem:[#allocation13_spill]] %s1542_s2 }
   0x2   :  { %9 = vsyncpa [#allocation4], 0 }
   0x3   :  { %11 = vsyncpa [#allocation4 + $0x1], 0 }
   0x4   :  { %12 = vsyncpa [#allocation6], 0 }
   0x5   :  { %14 = vsyncpa [#allocation6 + $0x1], 0  ;;  %s1230_s15 = smov 0   ;;  %s1232_s16 = smov 0  }
   0x6   :  { %s1234_s17 = smov 0   ;;  %s1236_s18 = smov 0  }
   0x7   :  { %s1238_s19 = smov 0   ;;  %s1240_s20 = smov 0  }
   0x8   :  { %s1242_s21 = smov 0   ;;  %s1244_s22 = smov 0  }
   0x9 LB: > { %1552 = sst [smem:[#allocation10_spill]] %s1186_s21  ;;  %s1545_s23 = sadd.s32 4294967295, %s1190_s22   ;;  %s1190_s22 = sphi %s1244_s22, %s20_s22   ;;  %s1186_s21 = sphi %s1242_s21, %s1573_s21   ;;  %s1182_s20 = sphi %s1240_s20, %s1572_s20   ;;  %s1178_s19 = sphi %s1238_s19, %s1565_s19   ;;  %s1174_s18 = sphi %s1236_s18, %s1571_s18   ;;  %s1170_s17 = sphi %s1234_s17, %s1570_s17   ;;  %s1166_s16 = sphi %s1232_s16, %s1569_s16   ;;  %s1162_s15 = sphi %s1230_s15, %s1568_s15  }
   0xa   : > { %s29_s24 = sadd.s32 1, %s1182_s20  ;;  %s32_s25 = sadd.s32 1, %s1186_s21 }
   0xb   : > { %p30_p0 = scmp.ge.s32.totalorder %s29_s24, 4  ;;  %s65_s26 = sadd.s32 1, %s1170_s17 }
   0xc   : > { %p72_p1 = scmp.ne.s32.totalorder %s1170_s17, %s1166_s16  ;;  %p73_p2 = scmp.eq.s32.totalorder %s1190_s22, 0 }
   0xd   : > { %s1575_s24 = smov (%p30_p0, %s29_s24), 0  ;;  %s1577_s25 = smov (!%p30_p0, %s32_s25), %s1186_s21 }
   0xe   : > { %1553 = sst [smem:[#allocation11_spill]] %s1575_s24  ;;  %s62_s27 = ssub.s32 %s1182_s20, %s1575_s24 }
   0xf   : > { %p34_p3 = scmp.ge.s32.totalorder %s1577_s25, 2  ;;  %p63_p4 = scmp.eq.s32.totalorder %s62_s27, 0 }
  0x10   : > { %p74_p5 = por %p73_p2, %p72_p1  ;;  %p78_p6 = scmp.ne.s32.totalorder %s1166_s16, %s1162_s15 }
  0x11   : > { %s1579_s25 = smov (%p34_p3, %s1577_s25), 0  ;;  %p79_p7 = scmp.eq.s32.totalorder %s1545_s23, 0 }
  0x12   : > { %1554 = sst [smem:[#allocation12_spill]] %s1579_s25  ;;  %p938_p8 = scmp.lt.s32.totalorder %s1190_s22, 8 }
  0x13   : > { %s1284_s28 = scalar_select %p63_p4, %s1170_s17, %s65_s26  }
  0x14   : > { %s1290_s29 = sand.u32 1, %s1170_s17   ;;  %p1292_p9 = por %p79_p7, %p78_p6 }
  0x15   : > { %s208_s5 = sand.u32 1, %s1190_s22   ;;  %p1297_p10 = pnand %p938_p8, %p74_p5 }
  0x16   : > { %s1555_s30 = scalar_select %p1292_p9, 1, 0 }
  0x17   : > { %s1556_s6 = scalar_select %p1297_p10, 1, 0 }
  0x18   : > { %s1547_s7 = sshll.u32 %s1290_s29, 3  ;;  %s879_s8 = sshll.u32 %s1182_s20, 7 }
  0x19   : > { %s1557_s2 = sld [smem:[#allocation13_spill]]  ;;  %s212_s12 = scalar_lea.vmem [#allocation5], %s1547_s7 }
  0x1a   : > { %s219_s13 = sshll.u32 %s212_s12, 4  ;;  %s1314_s14 = scalar_lea.sflag [#allocation6], %s208_s5  ;;  %s1312_s13 = int_to_ptr.vmem [resolvable:$true] %s219_s13 }
  0x1b   : > { %p1320_p12 = pneg %p1297_p10 }
  0x1f   : > { %s1308_s11 = scalar_lea.hbm %s1557_s2, %s879_s8  ;;  %s1035_s10 = scalar_lea.hbm %s1557_s2, 512 }
  0x20   : > { %s1030_s15 = scalar_lea.hbm %s1308_s11, 128  ;;  %p1036_p1 = scmp.lt.u32.totalorder %s1308_s11, %s1557_s2 }
  0x21   : > { %p1031_p11 = scmp.ne.s32.totalorder %s1308_s11, %s1030_s15  ;;  %p1037_p2 = scmp.lt.u32.totalorder %s1035_s10, %s1030_s15 }
  0x22   : > { %p1039_p4 = scmp.lt.u32.totalorder %s1030_s15, %s1308_s11 }
  0x23   : > { %p1033_p13 = pnand %p1320_p12, %p1031_p11  ;;  %p1038_p3 = por %p1037_p2, %p1036_p1 }
  0x25   : > { %p1034_p0 = pneg %p1033_p13  ;;  %p1040_p5 = por %p1039_p4, %p1038_p3 }
  0x27   : > { %p1041_p6 = pnand %p1040_p5, %p1034_p0 }
  0x29   : > { %1044 = shalt.err (!%p1041_p6)
}
  0x2a   : > { %s1045_s5 = scalar_lea.vmem %s1312_s13, 128  ;;  %s1192_s27 = smov [#allocation5]  }
  0x2b   : > { %p1046_p7 = scmp.ne.s32.totalorder %s1312_s13, %s1045_s5  ;;  %s1050_s9 = sshll.u32 %s1192_s27, 4  ;;  %s1051_s9 = int_to_ptr.vmem [resolvable:$false] %s1050_s9 }
  0x2c   : > { %s1052_s23 = scalar_lea.vmem %s1051_s9, 256  ;;  %p1053_p13 = scmp.lt.s32.totalorder %s1312_s13, %s1051_s9 }
  0x2d   : > { %p1048_p8 = pnand %p1046_p7, %p1320_p12  ;;  %p1054_p9 = scmp.lt.s32.totalorder %s1052_s23, %s1045_s5 }
  0x2f   : > { %p1049_p11 = pneg %p1048_p8  ;;  %p1055_p1 = por %p1054_p9, %p1053_p13 }
  0x31   : > { %p1056_p2 = pnand %p1055_p1, %p1049_p11 }
  0x33   : > { %1059 = shalt.err (!%p1056_p2)
}
  0x34   : > { %934 = dma.hbm_to_vmem [thread:$0]  (!%p1297_p10), %s1308_s11, 128, %s1312_s13, %s1314_s14  }
  0x35   : > { %s1349_s12 = scalar_lea.hbm %s1543_s3, %s879_s8  ;;  %p882_p9 = scmp.ge.s32.totalorder %s1190_s22, 1 }
  0x36   : > { %p242_p0 = scmp.lt.s32.totalorder %s1190_s22, 9  ;;  %s876_s27 = sshll.u32 %s1290_s29, 2 }
  0x37   : > { %s877_s9 = sshll.u32 %s1182_s20, 6  ;;  %s194_s11 = scalar_lea.vmem [#allocation3], %s876_s27 }
  0x38   : > { %p1353_p3 = pnand %p882_p9, %p242_p0  ;;  %s1362_s2 = scalar_lea.hbm %s1541_s1, %s877_s9 }
  0x39   : > { %s201_s8 = sshll.u32 %s194_s11, 4  ;;  %s1560_s13 = sshll.u32 %s1290_s29, 3  ;;  %s1364_s8 = int_to_ptr.vmem [resolvable:$true] %s201_s8 }
  0x3a   : > { %s1559_s5 = scalar_select %p1353_p3, 1, 0 }
  0x3b   : > { %s1368_s15 = scalar_lea.vmem [#allocation7], %s1560_s13  ;;  %s191_s25 = scalar_lea.sflag [#allocation4], %s1290_s29 }
  0x3c   : > { %s237_s10 = sshll.u32 %s1368_s15, 4  ;;  %s1060_s24 = scalar_lea.hbm %s1362_s2, 64  ;;  %s238_s10 = int_to_ptr.vmem [resolvable:$true] %s237_s10 }
  0x3d   : > { %p1061_p4 = scmp.ne.s32.totalorder %s1362_s2, %s1060_s24  ;;  %s1065_s23 = scalar_lea.hbm %s1541_s1, 256 }
  0x3e   : > { %p1066_p7 = scmp.lt.u32.totalorder %s1362_s2, %s1541_s1  ;;  %p1067_p8 = scmp.lt.u32.totalorder %s1065_s23, %s1060_s24 }
  0x3f   : > { %p1063_p5 = pnand %p1061_p4, %p1320_p12  ;;  %p1069_p13 = scmp.lt.u32.totalorder %s1060_s24, %s1362_s2 }
  0x40   : > { %p1068_p11 = por %p1067_p8, %p1066_p7 }
  0x41   : > { %p1064_p6 = pneg %p1063_p5 }
  0x42   : > { %p1070_p1 = por %p1069_p13, %p1068_p11 }
  0x44   : > { %p1071_p2 = pnand %p1070_p1, %p1064_p6 }
  0x46   : > { %1074 = shalt.err (!%p1071_p2)
}
  0x47   : > { %s1075_s29 = scalar_lea.vmem %s1364_s8, 64  ;;  %s1193_s11 = smov [#allocation3]  }
  0x48   : > { %p1076_p9 = scmp.ne.s32.totalorder %s1364_s8, %s1075_s29  ;;  %s1080_s13 = sshll.u32 %s1193_s11, 4  ;;  %s1081_s13 = int_to_ptr.vmem [resolvable:$false] %s1080_s13 }
  0x49   : > { %s1082_s21 = scalar_lea.vmem %s1081_s13, 128  ;;  %p1083_p5 = scmp.lt.s32.totalorder %s1364_s8, %s1081_s13 }
  0x4a   : > { %p1078_p0 = pnand %p1076_p9, %p1320_p12  ;;  %p1084_p3 = scmp.lt.s32.totalorder %s1082_s21, %s1075_s29 }
  0x4c   : > { %p1079_p4 = pneg %p1078_p0  ;;  %p1085_p7 = por %p1084_p3, %p1083_p5 }
  0x4e   : > { %p1086_p8 = pnand %p1085_p7, %p1079_p4 }
  0x50   : > { %1089 = shalt.err (!%p1086_p8)
}
  0x51   : > { %931 = dma.hbm_to_vmem [thread:$0]  (!%p1297_p10), %s1362_s2, 64, %s1364_s8, %s191_s25  }
  0x52   : > { %s1090_s24 = scalar_lea.hbm %s1349_s12, 128  ;;  %s1095_s23 = scalar_lea.hbm %s1543_s3, 512 }
  0x53   : > { %p1091_p6 = scmp.ne.s32.totalorder %s1349_s12, %s1090_s24  ;;  %p1096_p13 = scmp.lt.u32.totalorder %s1349_s12, %s1543_s3 }
  0x54   : > { %p1097_p1 = scmp.lt.u32.totalorder %s1095_s23, %s1090_s24  ;;  %p1099_p9 = scmp.lt.u32.totalorder %s1090_s24, %s1349_s12 }
  0x55   : > { %p1093_p11 = pnand %p1091_p6, %p1320_p12 }
  0x56   : > { %p1098_p2 = por %p1097_p1, %p1096_p13 }
  0x57   : > { %p1094_p3 = pneg %p1093_p11 }
  0x58   : > { %p1100_p0 = por %p1099_p9, %p1098_p2 }
  0x5a   : > { %p1101_p4 = pnand %p1100_p0, %p1094_p3 }
  0x5c   : > { %1104 = shalt.err (!%p1101_p4)
}
  0x5d   : > { %s1105_s2 = scalar_lea.vmem %s238_s10, 128  ;;  %s1194_s25 = smov [#allocation7]  }
  0x5e   : > { %p1106_p5 = scmp.ne.s32.totalorder %s238_s10, %s1105_s2  ;;  %s1110_s8 = sshll.u32 %s1194_s25, 4  ;;  %s1111_s8 = int_to_ptr.vmem [resolvable:$false] %s1110_s8 }
  0x5f   : > { %s1112_s15 = scalar_lea.vmem %s1111_s8, 256  ;;  %p1113_p6 = scmp.lt.s32.totalorder %s238_s10, %s1111_s8 }
  0x60   : > { %p1108_p7 = pnand %p1106_p5, %p1320_p12  ;;  %p1114_p11 = scmp.lt.s32.totalorder %s1112_s15, %s1105_s2 }
  0x62   : > { %p1109_p8 = pneg %p1108_p7  ;;  %p1115_p10 = por %p1114_p11, %p1113_p6 }
  0x64   : > { %p1116_p1 = pnand %p1115_p10, %p1109_p8 }
  0x66   : > { %1119 = shalt.err (!%p1116_p1)
}
  0x67   : > { %p1561_p13 = scmp.ne.s32.totalorder %s1556_s6, 0  ;;  %p1562_p3 = scmp.ne.s32.totalorder %s1559_s5, 0 }
  0x68   : > { %s248_s26 = sand.u32 (!%p1562_p3), 1, %s1166_s16   ;;  %p1563_p12 = scmp.ne.s32.totalorder (!%p1562_p3), %s1555_s30, 0 }
  0x69   : > { %937 = dma.hbm_to_vmem [thread:$0]  (!%p1561_p13), %s1349_s12, 128, %s238_s10, %s1314_s14  }
  0x6a   : > { %246 = sbr.rel (%p1562_p3) target bundleno = 642 (0x282), region = 36  ;;  %s883_s11 = sshll.u32 (!%p1562_p3), %s248_s26, 2 }
  0x6b   : > { %s249_s13 = scalar_lea.sflag (!%p1562_p3), [#allocation4], %s248_s26  ;;  %s1416_s21 = scalar_lea.vmem (!%p1562_p3), [#allocation3], %s883_s11 }
  0x71   : > { %1153 = dma.done.wait (%p1563_p12), %s249_s13, 64  }
  0x72   : > { %1155 = vsyncadd (%p1563_p12), %s249_s13, 4294967232  ;;  %s1564_s6 = sadd.s32 4294967295, %s1190_s22   ;;  %s884_s14 = sshll.u32 %s248_s26, 3 }
  0x73   : > { %s257_s24 = sand.u32 1, %s1564_s6   ;;  %s1424_s5 = scalar_lea.vmem [#allocation5], %s884_s14 }
  0x74   : > { %s258_s12 = scalar_lea.sflag [#allocation6], %s257_s24 }
  0x75   : > { %1157 = dma.done.wait (%p1563_p12), %s258_s12, 256  }
  0x76   : > { %1159 = vsyncadd (%p1563_p12), %s258_s12, 4294967040  ;;  %p314_p10 = scmp.lt.s32.totalorder %s1178_s19, 1  ;;  %p321_p2 = scmp.lt.s32.totalorder %s1174_s18, 3 }
  0x77   : > { %s1442_s26 = scalar_lea.vmem [#allocation7], %s884_s14  ;;  %p891_p9 = scmp.ne.s32.totalorder %s1174_s18, 0 }
  0x78   : > { %s1581_s19 = smov (!%p314_p10, %s1178_s19), 1  ;;  %v343_v0 = vlaneseq (!%p891_p9)  ;;  %v1195_v9 = vmov (!%p891_p9), 0   ;;  %s1198_s11 = smov (!%p891_p9), 127   ;;  %vm448_vm6 = vcmask (!%p891_p9), 924672   ;;  %vm390_vm7 = vcmask (!%p891_p9), 908288  }
  0x79   : > { %s322_s10 = scalar_select %p321_p2, %s1174_s18, 3 }
  0x7a   : > { %s920_s7 = sshll.u32 %s1581_s19, 3  ;;  %334 = sbr.rel (%p891_p9) target bundleno = 398 (0x18e), region = 52  ;;  %v344_v2 = vand.u32 (!%p891_p9), 127, %v343_v0  ;;  %v379_v3 = vshrl.u32 (!%p891_p9), %v343_v0, 7  ;;  %v1465_v18 = vcombine.low (!%p891_p9), %v1195_v9, %v1195_v9  ;;  %vm475_vm10 = vcmask (!%p891_p9), 1039360  }
  0x7b   : > { %s318_s27 = scalar_lea.vmem %s1540_s0, %s920_s7  ;;  %s888_s29 = sshll.u32 %s322_s10, 1  ;;  %vm494_vm15 = vcmask (!%p891_p9), 7168  }
  0x7c   : > { %s325_s2 = sadd.s32 %s920_s7, %s888_s29  ;;  %v335_v1 = vld [vmem:[%s318_s27] sm:$0xff] (!%p891_p9)  ;;  %v345_v4 = vadd.s32 (!%p891_p9), 128, %v344_v2  ;;  %v350_v5 = vand.u32 (!%p891_p9), 15, %v344_v2  ;;  %v380_v7 = vsub.s32 (!%p891_p9), 0, %v379_v3  ;;  %v384_v8 = vsub.s32 (!%p891_p9), 4, %v379_v3  ;;  %s1196_s18 = smov (!%p891_p9), 113  }
  0x7d   : > { %s890_s25 = sshll.u32 %s325_s2, 2  ;;  %500 = vst [vmem:[#allocation2 + $0x20] sm:$0xff] (!%p891_p9), %v335_v1  ;;  %s1197_s19 = smov (!%p891_p9), 111   ;;  %v1458_v16 = vcombine.high (!%p891_p9), %v335_v1, %v335_v1  ;;  %v896_v17 = vcombine.low (!%p891_p9), %v1195_v9, %v335_v1  ;;  %v892_v22 = vcombine.low (!%p891_p9), %v335_v1, %v335_v1 }
  0x7e   : > { %s1440_s30 = scalar_lea.vmem %s1544_s4, %s890_s25  ;;  %v357_v6 = vand.u32 (!%p891_p9), 15, %v345_v4  ;;  %vm428_vm0 = vcmp.le.s32.totalorder (!%p891_p9), %v350_v5, 14  ;;  %vm370_vm1 = vcmp.ge.s32.totalorder (!%p891_p9), %v350_v5, 1  ;;  %s1199_s13 = smov (!%p891_p9), 1  }
  0x7f   : > { %s1200_s6 = smov (!%p891_p9), 15   ;;  %s1201_s24 = smov (!%p891_p9), 17  }
  0x80   : > { %vm429_vm2 = vcmp.le.s32.totalorder (!%p891_p9), %v357_v6, 14  ;;  %vm371_vm3 = vcmp.ge.s32.totalorder (!%p891_p9), %v357_v6, 1  ;;  %s1202_s14 = smov (!%p891_p9), 16   ;;  %s1203_s12 = smov (!%p891_p9), 112  }
  0x81   : > { %vm434_vm4 = vmpackc.low %vm429_vm2, %vm428_vm0  ;;  %vm467_vm2 = vcmask 121856  }
  0x82   : > { %v435_v10 = vsel %vm434_vm4, 65537, %v1195_v9  ;;  %vm376_vm5 = vmpackc.low %vm371_vm3, %vm370_vm1 }
  0x83   : > { %v439_v11 = vrot.slane %v435_v10, %v380_v7  ;;  %v377_v12 = vsel %vm376_vm5, 65537, %v1195_v9  ;;  %v443_v14 = vrot.slane %v435_v10, %v384_v8  ;;  %vm412_vm5 = vcmask 138240  }
  0x84   : > { %v381_v13 = vrot.slane %v377_v12, %v380_v7  ;;  %v385_v15 = vrot.slane %v377_v12, %v384_v8 }
  0x85   : > { %444 = vrot.lane.b32.xlu1 %v439_v11, %s1196_s18 }
  0x86   : > { %386 = vrot.lane.b32.xlu0 %v381_v13, %s1197_s19 }
  0x89   : > { %446 = vrot.lane.b32.xlu1 %v443_v14, %s1196_s18 }
  0x8a   : > { %388 = vrot.lane.b32.xlu0 %v385_v15, %s1197_s19 }
  0x8d   : > { %473 = vrot.lane.b32.xlu1 %v385_v15, %s1198_s11 }
  0x8e   : > { %471 = vrot.lane.b32.xlu0 %v381_v13, %s1198_s11 }
  0x91   : > { %503 = vrot.lane.b32.xlu1 %v443_v14, %s1199_s13 }
  0x92   : > { %501 = vrot.lane.b32.xlu0 %v439_v11, %s1199_s13 }
  0x95   : > { %528 = vrot.lane.b32.xlu1 %v385_v15, %s1200_s6 }
  0x96   : > { %526 = vrot.lane.b32.xlu0 %v381_v13, %s1200_s6 }
  0x99   : > { %563 = vrot.lane.b32.xlu1 %v443_v14, %s1201_s24 }
  0x9a   : > { %561 = vrot.lane.b32.xlu0 %v439_v11, %s1201_s24 }
  0x9d   : > { %419 = vrot.lane.b32.xlu1 %v1458_v16, %s1202_s14 }
  0x9e   : > { %417 = vrot.lane.b32.xlu0 %v896_v17, %s1202_s14 }
  0xa1   : > { %518 = vrot.lane.b32.xlu1 %v1465_v18, %s1198_s11 }
  0xa2   : > { %550 = vrot.lane.b32.xlu0 %v335_v1, %s1203_s12 }
  0xa5   : > { %542 = vrot.lane.b32.xlu1 %v1465_v18, %s1196_s18 }
  0xa9   : > { %552 = vrot.lane.b32.xlu1 %v1465_v18, %s1203_s12 }
  0xf7   : > { %v445_v19 = vpop.permute.xlu1 %444 }
  0xf8   : > { %v387_v20 = vpop.permute.xlu0 %386 }
  0xfb   : > { %v447_v21 = vpop.permute.xlu1 %446 }
  0xfc   : > { %v449_v23 = vsel %vm448_vm6, %v445_v19, %v447_v21  ;;  %vm451_vm8 = vcmp.ne.s16.totalorder %v447_v21, 0  ;;  %v389_v24 = vpop.permute.xlu0 %388 }
  0xfd   : > { %v391_v25 = vsel %vm390_vm7, %v387_v20, %v389_v24  ;;  %vm393_vm9 = vcmp.ne.s16.totalorder %v389_v24, 0  ;;  %vm450_vm11 = vcmp.ne.s16.totalorder %v449_v23, 0  ;;  %v453_v26 = vsel %vm451_vm8, %v1458_v16, 0 }
  0xfe   : > { %vm392_vm12 = vcmp.ne.s16.totalorder %v391_v25, 0  ;;  %v395_v27 = vsel %vm393_vm9, %v1458_v16, 0  ;;  %v452_v33 = vsel %vm450_vm11, %v892_v22, 0  ;;  %v898_v34 = vcombine.low %v453_v26, %v453_v26 }
  0xff   : > { %v394_v28 = vsel %vm392_vm12, %v892_v22, 0  ;;  %v895_v29 = vcombine.low %v395_v27, %v395_v27  ;;  %v474_v30 = vpop.permute.xlu1 %473  ;;  %v897_v39 = vcombine.low %v1195_v9, %v452_v33  ;;  %vm410_vm11 = vcmask 1043456  }
 0x100   : > { %v894_v31 = vcombine.low %v1195_v9, %v394_v28  ;;  %vm478_vm13 = vcmp.ne.s16.totalorder %v474_v30, 0  ;;  %v472_v32 = vpop.permute.xlu0 %471  ;;  %vm424_vm12 = vcmask 130048  }
 0x101   : > { %406 = vrot.lane.b32.xlu1 %v895_v29, %s1201_s24  ;;  %v476_v35 = vsel %vm475_vm10, %v472_v32, %v474_v30  ;;  %v480_v36 = vsel %vm478_vm13, %v1458_v16, 0  ;;  %vm557_vm13 = vcmask 916480  }
 0x102   : > { %404 = vrot.lane.b32.xlu0 %v894_v31, %s1201_s24  ;;  %vm477_vm14 = vcmp.ne.s16.totalorder %v476_v35, 0  ;;  %v900_v41 = vcombine.low %v480_v36, %v480_v36 }
 0x103   : > { %v479_v37 = vsel %vm477_vm14, %v892_v22, 0  ;;  %v504_v38 = vpop.permute.xlu1 %503 }
 0x104   : > { %v502_v40 = vpop.permute.xlu0 %501  ;;  %v899_v43 = vcombine.low %v1195_v9, %v479_v37 }
 0x105   : > { %462 = vrot.lane.b32.xlu1 %v898_v34, %s1200_s6  ;;  %v505_v42 = vsel %vm494_vm15, %v502_v40, %v504_v38  ;;  %vm506_vm0 = vcmp.ne.s16.totalorder %v502_v40, 0 }
 0x106   : > { %460 = vrot.lane.b32.xlu0 %v897_v39, %s1200_s6  ;;  %vm507_vm1 = vcmp.ne.s16.totalorder %v505_v42, 0  ;;  %v508_v44 = vsel %vm506_vm0, %v892_v22, 0 }
 0x107   : > { %v509_v45 = vsel %vm507_vm1, %v1458_v16, 0  ;;  %v529_v46 = vpop.permute.xlu1 %528 }
 0x108   : > { %v527_v47 = vpop.permute.xlu0 %526  ;;  %v901_v49 = vcombine.low %v508_v44, %v509_v45 }
 0x109   : > { %489 = vrot.lane.b32.xlu1 %v900_v41, %s1199_s13  ;;  %v530_v48 = vsel %vm467_vm2, %v527_v47, %v529_v46  ;;  %vm531_vm3 = vcmp.ne.s16.totalorder %v527_v47, 0 }
 0x10a   : > { %487 = vrot.lane.b32.xlu0 %v899_v43, %s1199_s13  ;;  %vm532_vm4 = vcmp.ne.s16.totalorder %v530_v48, 0  ;;  %v533_v50 = vsel %vm531_vm3, %v892_v22, 0 }
 0x10b   : > { %v534_v51 = vsel %vm532_vm4, %v1458_v16, 0  ;;  %v564_v52 = vpop.permute.xlu1 %563 }
 0x10c   : > { %v562_v53 = vpop.permute.xlu0 %561  ;;  %v903_v55 = vcombine.low %v533_v50, %v534_v51 }
 0x10d   : > { %v565_v54 = vsel %vm412_vm5, %v562_v53, %v564_v52  ;;  %vm566_vm8 = vcmp.ne.s16.totalorder %v562_v53, 0  ;;  %577 = vrot.lane.b32.xlu1 %v1465_v18, %s1197_s19 }
 0x10e   : > { %516 = vrot.lane.b32.xlu0 %v901_v49, %s1198_s11  ;;  %vm567_vm9 = vcmp.ne.s16.totalorder %v565_v54, 0  ;;  %v568_v56 = vsel %vm566_vm8, %v892_v22, 0 }
 0x10f   : > { %v569_v57 = vsel %vm567_vm9, %v1458_v16, 0  ;;  %v420_v58 = vpop.permute.xlu1 %419 }
 0x110   : > { %v422_v59 = vrot.slane %v420_v58, 4  ;;  %v418_v60 = vpop.permute.xlu0 %417  ;;  %v904_v62 = vcombine.low %v568_v56, %v569_v57 }
 0x111   : > { %v421_v61 = vrot.slane %v418_v60, 4 }
 0x112   : > { %540 = vrot.lane.b32.xlu0 %v903_v55, %s1196_s18 }
 0x113   : > { %v519_v63 = vpop.permute.xlu1 %518  ;;  %v423_v0 = vsel %vm410_vm11, %v421_v61, %v422_v59 }
 0x114   : > { %v425_v1 = vsel %vm424_vm12, %v418_v60, %v423_v0  ;;  %v551_v3 = vpop.permute.xlu0 %550  ;;  %v521_v28 = vrot.slane %v519_v63, 4 }
 0x115   : > { %427 = vst [vmem:[#allocation2 + $0x8] sm:$0xff] %v425_v1  ;;  %v554_v4 = vrot.slane %v551_v3, 4 }
 0x116   : > { %575 = vrot.lane.b32.xlu0 %v904_v62, %s1197_s19 }
 0x117   : > { %v543_v2 = vpop.permute.xlu1 %542 }
 0x118   : > { %v545_v34 = vrot.slane %v543_v2, 4 }
 0x11b   : > { %v553_v5 = vpop.permute.xlu1 %552 }
 0x11c   : > { %v555_v6 = vrot.slane %v553_v5, 4 }
 0x11e   : > { %v556_v7 = vsel %vm410_vm11, %v554_v4, %v555_v6 }
 0x11f   : > { %v558_v8 = vsel %vm557_vm13, %v551_v3, %v556_v7 }
 0x120   : > { %560 = vst [vmem:[#allocation2 + $0x38] sm:$0xff] %v558_v8 }
 0x173   : > { %v407_v9 = vpop.permute.xlu1 %406 }
 0x174   : > { %v409_v10 = vrot.slane %v407_v9, 4  ;;  %v405_v11 = vpop.permute.xlu0 %404 }
 0x175   : > { %v408_v12 = vrot.slane %v405_v11, 4 }
 0x177   : > { %v411_v13 = vsel %vm410_vm11, %v408_v12, %v409_v10  ;;  %v463_v14 = vpop.permute.xlu1 %462 }
 0x178   : > { %v413_v15 = vsel %vm412_vm5, %v405_v11, %v411_v13  ;;  %v465_v16 = vrot.slane %v463_v14, 4  ;;  %v461_v17 = vpop.permute.xlu0 %460 }
 0x179   : > { %415 = vst [vmem:[#allocation2] sm:$0xff] %v413_v15  ;;  %v464_v18 = vrot.slane %v461_v17, 4 }
 0x17b   : > { %v466_v19 = vsel %vm410_vm11, %v464_v18, %v465_v16  ;;  %v490_v20 = vpop.permute.xlu1 %489 }
 0x17c   : > { %v468_v21 = vsel %vm467_vm2, %v461_v17, %v466_v19  ;;  %v492_v22 = vrot.slane %v490_v20, 4  ;;  %v488_v23 = vpop.permute.xlu0 %487 }
 0x17d   : > { %470 = vst [vmem:[#allocation2 + $0x10] sm:$0xff] %v468_v21  ;;  %v491_v24 = vrot.slane %v488_v23, 4 }
 0x17f   : > { %v493_v25 = vsel %vm410_vm11, %v491_v24, %v492_v22  ;;  %v578_v33 = vpop.permute.xlu1 %577 }
 0x180   : > { %v495_v26 = vsel %vm494_vm15, %v488_v23, %v493_v25  ;;  %v517_v27 = vpop.permute.xlu0 %516  ;;  %v580_v37 = vrot.slane %v578_v33, 4 }
 0x181   : > { %497 = vst [vmem:[#allocation2 + $0x18] sm:$0xff] %v495_v26  ;;  %v520_v29 = vrot.slane %v517_v27, 4 }
 0x183   : > { %v522_v30 = vsel %vm410_vm11, %v520_v29, %v521_v28 }
 0x184   : > { %v523_v31 = vsel %vm475_vm10, %v517_v27, %v522_v30  ;;  %v541_v32 = vpop.permute.xlu0 %540 }
 0x185   : > { %525 = vst [vmem:[#allocation2 + $0x28] sm:$0xff] %v523_v31  ;;  %v544_v35 = vrot.slane %v541_v32, 4 }
 0x187   : > { %v546_v36 = vsel %vm410_vm11, %v544_v35, %v545_v34 }
 0x188   : > { %v547_v38 = vsel %vm448_vm6, %v541_v32, %v546_v36  ;;  %v576_v39 = vpop.permute.xlu0 %575 }
 0x189   : > { %549 = vst [vmem:[#allocation2 + $0x30] sm:$0xff] %v547_v38  ;;  %v579_v40 = vrot.slane %v576_v39, 4 }
 0x18b   : > { %v581_v41 = vsel %vm410_vm11, %v579_v40, %v580_v37 }
 0x18c   : > { %v582_v42 = vsel %vm390_vm7, %v576_v39, %v581_v41 }
 0x18d   : > { %584 = vst [vmem:[#allocation2 + $0x40] sm:$0xff] %v582_v42 }
 0x18e PF: > { %v1016_v43 = vld [vmem:[#allocation2 + $0x4] ss:$8 sps:$4 sm:$0xff]   ;;  %v1018_v44 = vld [vmem:[#allocation2] ss:$8 sps:$4 sm:$0xff]   ;;  %v1204_v45 = vmov 0   ;;  %v692_v49 = vld [vmem:[%s1424_s5] sm:$0xff] }
 0x18f   : > { %683 = vmatprep.mubr.bf16.mxu0 %v1204_v45  ;;  %1015 = vset.pattern.permute.xlu0 %v1204_v45  ;;  %v1019_v46 = vld [vmem:[#allocation2 + $0x14] ss:$8 sps:$4 sm:$0xff]   ;;  %v1021_v47 = vld [vmem:[#allocation2 + $0x10] ss:$8 sps:$4 sm:$0xff]   ;;  %v700_v52 = vld [vmem:[%s1442_s26] sm:$0xff]  ;;  %vm644_vm6 = vcmask 1043456  }
 0x190   : > { %651 = vmatprep.subr.bf16.mxu0 %v1016_v43  ;;  %695 = vperm.xlu0 %1015, %v692_v49   ;;  %v1025_v51 = vld [vmem:[#allocation2 + $0x34] ss:$8 sps:$4 sm:$0xff]   ;;  %v1027_v54 = vld [vmem:[#allocation2 + $0x30] ss:$8 sps:$4 sm:$0xff]   ;;  %v585_v58 = vld [vmem:[%s1416_s21] sm:$0xf] }
 0x191   : > { %652 = vmatpush1.bf16.msra.mxu0 %v1018_v44  ;;  %v1022_v48 = vld [vmem:[#allocation2 + $0x24] ss:$8 sps:$4 sm:$0xff]   ;;  %v1024_v50 = vld [vmem:[#allocation2 + $0x20] ss:$8 sps:$4 sm:$0xff]   ;;  %vm640_vm7 = vcmask 588800  }
 0x192   : > { %653 = vmatprep.subr.bf16.mxu0 %v1019_v46 }
 0x194   : > { %v594_v53 = vld [vmem:[#allocation2 + $0x40] sm:$0xff]  ;;  %703 = vperm.xlu0 %1015, %v700_v52  }
 0x195   : > { %654 = vmatpush1.bf16.msra.mxu0 %v1021_v47  ;;  %v914_v55 = vcombine.high %v594_v53, %v594_v53  ;;  %v913_v56 = vcombine.low %v594_v53, %v594_v53 }
 0x196   : > { %655 = vmatprep.subr.bf16.mxu0 %v1022_v48 }
 0x197   : > { %v646_v57 = vsel %vm644_vm6, %v913_v56, 0 }
 0x199   : > { %656 = vmatpush1.bf16.msra.mxu0 %v1024_v50 }
 0x19a   : > { %657 = vmatprep.subr.bf16.mxu0 %v1025_v51 }
 0x19d   : > { %658 = vmatpush1.bf16.msra.mxu0 %v1027_v54 }
 0x19e   : > { %915 = vmatprep.subr.msk.bf16.mxu0 %vm644_vm6, %v914_v55 }
 0x1a1   : > { %660 = vmatpush1.bf16.msra.mxu0 %v646_v57 }
 0x1a4   : > { %916 = vmatmul.mubr.msk.bf16.vlgmr.msra.gmra.mrb[0].mxu0 %vm640_vm7, %v585_v58 }
 0x20f   : > { %v696_v59 = vpop.permute.xlu0 %695 }
 0x213   : > { %v704_v63 = vpop.permute.xlu0 %703 }
 0x277   : > { %v685_v60 = vpop.f32.mrb[0].mxu0 }
 0x278   : > { %v698_v61 = vmul.f32 %v696_v59, %v685_v60  ;;  %v687_v62 = vpop.f32.mrb[1].mxu0 }
 0x279   : > { %v699_v0 = vmul.f32 %v696_v59, %v687_v62  ;;  %v689_v1 = vpop.f32.mrb[2].mxu0 }
 0x27a   : > { %v706_v2 = vadd.f32 %v704_v63, %v698_v61  ;;  %v690_v3 = vpop.f32.mrb[3].mxu0 }
 0x27b   : > { %v707_v4 = vadd.f32 %v704_v63, %v699_v0 }
 0x27c   : > { %v708_v5 = vmax.f32 %v706_v2, 0.0 }
 0x27d   : > { %v709_v6 = vmax.f32 %v707_v4, 0.0 }
 0x27f   : > { %v921_v7 = vpack.c.bf16 %v709_v6, %v708_v5 }
 0x281   : > { %718 = vst [vmem:[%s1440_s30] sm:$0xff] %v921_v7 }
 0x282 PF: > { %s20_s22 = sadd.s32 1, %s1190_s22   ;;  %s1565_s19 = sld [smem:[#allocation10_spill]] }
 0x283   : > { %p17_p0 = scmp.ge.s32.totalorder %s20_s22, 10   ;;  %s1566_s21 = sld [smem:[#allocation11_spill]] }
 0x284   : > { %s1567_s5 = sld [smem:[#allocation12_spill]]  ;;  %s1568_s15 = smov %s1166_s16 }
 0x285   : > { %s1569_s16 = smov %s1170_s17  ;;  %s1570_s17 = smov %s1284_s28 }
 0x286   : > { %s1571_s18 = smov %s1182_s20  ;;  %19 = sbr.rel (!%p17_p0) target bundleno = 9 (0x9), region = 107 }
 0x289   : > { %s1572_s20 = smov %s1566_s21 }
 0x28a   : > { %s1573_s21 = smov %s1567_s5 }
 0x28d   :  { %748 = vsyncpa [#allocation4], 1 }
 0x28e   :  { %750 = vsyncpa [#allocation4 + $0x1], 1 }
 0x28f   :  { %751 = vsyncpa [#allocation6], 1 }
 0x290   :  { %753 = vsyncpa [#allocation6 + $0x1], 1 }

// kernel: _lambda_.4
= control target key start
LH: loop header
LB: loop body
LE: loop exit
PB: predicated region body
PF: predicated region fallthrough
CT: control target
= control target key end

     0   :  { %s3058_s0 = inlined_call_operand.vmem [shape: bf16[2,8,1024], index: 0, kind: input, shape index: {}]   ;;  %s3059_s1 = inlined_call_operand.hbm [shape: bf16[32,72], index: 1, kind: input, shape index: {}]   ;;  %s3060_s2 = inlined_call_operand.hbm [shape: f32[32,1], index: 2, kind: input, shape index: {}]   ;;  %s3061_s3 = inlined_call_operand.hbm [shape: f32[32,1], index: 3, kind: input, shape index: {}]   ;;  %s3062_s4 = inlined_call_operand.vmem [shape: bf16[2,32,1024], index: 4, kind: output, shape index: {}]  }
   0x1   :  { %3069 = sst [smem:[#allocation13_spill]] %s3060_s2 }
   0x2   :  { %9 = vsyncpa [#allocation4], 0 }
   0x3   :  { %11 = vsyncpa [#allocation4 + $0x1], 0 }
   0x4   :  { %12 = vsyncpa [#allocation6], 0 }
   0x5   :  { %14 = vsyncpa [#allocation6 + $0x1], 0  ;;  %s2313_s15 = smov 0   ;;  %s2315_s16 = smov 0  }
   0x6   :  { %s2317_s17 = smov 0   ;;  %s2319_s18 = smov 0  }
   0x7   :  { %s2321_s19 = smov 0   ;;  %s2323_s20 = smov 0  }
   0x8   :  { %s2325_s21 = smov 0   ;;  %s2327_s22 = smov 0  }
   0x9 LB: > { %3070 = sst [smem:[#allocation10_spill]] %s2269_s21  ;;  %s3063_s23 = sadd.s32 4294967295, %s2273_s22   ;;  %s2273_s22 = sphi %s2327_s22, %s20_s22   ;;  %s2269_s21 = sphi %s2325_s21, %s3097_s21   ;;  %s2265_s20 = sphi %s2323_s20, %s3096_s20   ;;  %s2261_s19 = sphi %s2321_s19, %s3089_s19   ;;  %s2257_s18 = sphi %s2319_s18, %s3095_s18   ;;  %s2253_s17 = sphi %s2317_s17, %s3094_s17   ;;  %s2249_s16 = sphi %s2315_s16, %s3093_s16   ;;  %s2245_s15 = sphi %s2313_s15, %s3092_s15  }
   0xa   : > { %s29_s24 = sadd.s32 1, %s2265_s20  ;;  %s32_s25 = sadd.s32 1, %s2269_s21 }
   0xb   : > { %p30_p0 = scmp.ge.s32.totalorder %s29_s24, 4  ;;  %s65_s26 = sadd.s32 1, %s2253_s17 }
   0xc   : > { %p72_p1 = scmp.ne.s32.totalorder %s2253_s17, %s2249_s16  ;;  %p73_p2 = scmp.eq.s32.totalorder %s2273_s22, 0 }
   0xd   : > { %s3099_s24 = smov (%p30_p0, %s29_s24), 0  ;;  %s3101_s25 = smov (!%p30_p0, %s32_s25), %s2269_s21 }
   0xe   : > { %3071 = sst [smem:[#allocation11_spill]] %s3099_s24  ;;  %s62_s27 = ssub.s32 %s2265_s20, %s3099_s24 }
   0xf   : > { %p34_p3 = scmp.ge.s32.totalorder %s3101_s25, 2  ;;  %p63_p4 = scmp.eq.s32.totalorder %s62_s27, 0 }
  0x10   : > { %p74_p5 = por %p73_p2, %p72_p1  ;;  %p78_p6 = scmp.ne.s32.totalorder %s2249_s16, %s2245_s15 }
  0x11   : > { %s3103_s25 = smov (%p34_p3, %s3101_s25), 0  ;;  %p79_p7 = scmp.eq.s32.totalorder %s3063_s23, 0 }
  0x12   : > { %3072 = sst [smem:[#allocation12_spill]] %s3103_s25  ;;  %p2021_p8 = scmp.lt.s32.totalorder %s2273_s22, 8 }
  0x13   : > { %s2367_s28 = scalar_select %p63_p4, %s2253_s17, %s65_s26  }
  0x14   : > { %s2373_s29 = sand.u32 1, %s2253_s17   ;;  %p2375_p9 = por %p79_p7, %p78_p6 }
  0x15   : > { %s208_s5 = sand.u32 1, %s2273_s22   ;;  %p2380_p10 = pnand %p2021_p8, %p74_p5 }
  0x16   : > { %s3073_s30 = scalar_select %p2375_p9, 1, 0 }
  0x17   : > { %s3074_s6 = scalar_select %p2380_p10, 1, 0 }
  0x18   : > { %s3065_s7 = sshll.u32 %s2373_s29, 3  ;;  %s1875_s8 = sshll.u32 %s2265_s20, 7 }
  0x19   : > { %s3075_s2 = sld [smem:[#allocation13_spill]]  ;;  %s212_s12 = scalar_lea.vmem [#allocation5], %s3065_s7 }
  0x1a   : > { %s219_s13 = sshll.u32 %s212_s12, 4  ;;  %s2397_s14 = scalar_lea.sflag [#allocation6], %s208_s5  ;;  %s2395_s13 = int_to_ptr.vmem [resolvable:$true] %s219_s13 }
  0x1b   : > { %p2403_p12 = pneg %p2380_p10 }
  0x1f   : > { %s2391_s11 = scalar_lea.hbm %s3075_s2, %s1875_s8  ;;  %s2118_s10 = scalar_lea.hbm %s3075_s2, 512 }
  0x20   : > { %s2113_s15 = scalar_lea.hbm %s2391_s11, 128  ;;  %p2119_p1 = scmp.lt.u32.totalorder %s2391_s11, %s3075_s2 }
  0x21   : > { %p2114_p11 = scmp.ne.s32.totalorder %s2391_s11, %s2113_s15  ;;  %p2120_p2 = scmp.lt.u32.totalorder %s2118_s10, %s2113_s15 }
  0x22   : > { %p2122_p4 = scmp.lt.u32.totalorder %s2113_s15, %s2391_s11 }
  0x23   : > { %p2116_p13 = pnand %p2403_p12, %p2114_p11  ;;  %p2121_p3 = por %p2120_p2, %p2119_p1 }
  0x25   : > { %p2117_p0 = pneg %p2116_p13  ;;  %p2123_p5 = por %p2122_p4, %p2121_p3 }
  0x27   : > { %p2124_p6 = pnand %p2123_p5, %p2117_p0 }
  0x29   : > { %2127 = shalt.err (!%p2124_p6)
}
  0x2a   : > { %s2128_s5 = scalar_lea.vmem %s2395_s13, 128  ;;  %s2275_s27 = smov [#allocation5]  }
  0x2b   : > { %p2129_p7 = scmp.ne.s32.totalorder %s2395_s13, %s2128_s5  ;;  %s2133_s9 = sshll.u32 %s2275_s27, 4  ;;  %s2134_s9 = int_to_ptr.vmem [resolvable:$false] %s2133_s9 }
  0x2c   : > { %s2135_s23 = scalar_lea.vmem %s2134_s9, 256  ;;  %p2136_p13 = scmp.lt.s32.totalorder %s2395_s13, %s2134_s9 }
  0x2d   : > { %p2131_p8 = pnand %p2129_p7, %p2403_p12  ;;  %p2137_p9 = scmp.lt.s32.totalorder %s2135_s23, %s2128_s5 }
  0x2f   : > { %p2132_p11 = pneg %p2131_p8  ;;  %p2138_p1 = por %p2137_p9, %p2136_p13 }
  0x31   : > { %p2139_p2 = pnand %p2138_p1, %p2132_p11 }
  0x33   : > { %2142 = shalt.err (!%p2139_p2)
}
  0x34   : > { %2017 = dma.hbm_to_vmem [thread:$0]  (!%p2380_p10), %s2391_s11, 128, %s2395_s13, %s2397_s14  }
  0x35   : > { %s2432_s12 = scalar_lea.hbm %s3061_s3, %s1875_s8  ;;  %p1878_p9 = scmp.ge.s32.totalorder %s2273_s22, 1 }
  0x36   : > { %p242_p0 = scmp.lt.s32.totalorder %s2273_s22, 9  ;;  %s1872_s27 = sshll.u32 %s2373_s29, 2 }
  0x37   : > { %s1873_s9 = sshll.u32 %s2265_s20, 6  ;;  %s194_s11 = scalar_lea.vmem [#allocation3], %s1872_s27 }
  0x38   : > { %p2436_p3 = pnand %p1878_p9, %p242_p0  ;;  %s2445_s2 = scalar_lea.hbm %s3059_s1, %s1873_s9 }
  0x39   : > { %s201_s8 = sshll.u32 %s194_s11, 4  ;;  %s3078_s13 = sshll.u32 %s2373_s29, 3  ;;  %s2447_s8 = int_to_ptr.vmem [resolvable:$true] %s201_s8 }
  0x3a   : > { %s3077_s5 = scalar_select %p2436_p3, 1, 0 }
  0x3b   : > { %s2451_s15 = scalar_lea.vmem [#allocation7], %s3078_s13  ;;  %s191_s25 = scalar_lea.sflag [#allocation4], %s2373_s29 }
  0x3c   : > { %s237_s10 = sshll.u32 %s2451_s15, 4  ;;  %s2143_s24 = scalar_lea.hbm %s2445_s2, 64  ;;  %s238_s10 = int_to_ptr.vmem [resolvable:$true] %s237_s10 }
  0x3d   : > { %p2144_p4 = scmp.ne.s32.totalorder %s2445_s2, %s2143_s24  ;;  %s2148_s23 = scalar_lea.hbm %s3059_s1, 256 }
  0x3e   : > { %p2149_p7 = scmp.lt.u32.totalorder %s2445_s2, %s3059_s1  ;;  %p2150_p8 = scmp.lt.u32.totalorder %s2148_s23, %s2143_s24 }
  0x3f   : > { %p2146_p5 = pnand %p2144_p4, %p2403_p12  ;;  %p2152_p13 = scmp.lt.u32.totalorder %s2143_s24, %s2445_s2 }
  0x40   : > { %p2151_p11 = por %p2150_p8, %p2149_p7 }
  0x41   : > { %p2147_p6 = pneg %p2146_p5 }
  0x42   : > { %p2153_p1 = por %p2152_p13, %p2151_p11 }
  0x44   : > { %p2154_p2 = pnand %p2153_p1, %p2147_p6 }
  0x46   : > { %2157 = shalt.err (!%p2154_p2)
}
  0x47   : > { %s2158_s29 = scalar_lea.vmem %s2447_s8, 64  ;;  %s2276_s11 = smov [#allocation3]  }
  0x48   : > { %p2159_p9 = scmp.ne.s32.totalorder %s2447_s8, %s2158_s29  ;;  %s2163_s13 = sshll.u32 %s2276_s11, 4  ;;  %s2164_s13 = int_to_ptr.vmem [resolvable:$false] %s2163_s13 }
  0x49   : > { %s2165_s21 = scalar_lea.vmem %s2164_s13, 128  ;;  %p2166_p5 = scmp.lt.s32.totalorder %s2447_s8, %s2164_s13 }
  0x4a   : > { %p2161_p0 = pnand %p2159_p9, %p2403_p12  ;;  %p2167_p3 = scmp.lt.s32.totalorder %s2165_s21, %s2158_s29 }
  0x4c   : > { %p2162_p4 = pneg %p2161_p0  ;;  %p2168_p7 = por %p2167_p3, %p2166_p5 }
  0x4e   : > { %p2169_p8 = pnand %p2168_p7, %p2162_p4 }
  0x50   : > { %2172 = shalt.err (!%p2169_p8)
}
  0x51   : > { %2014 = dma.hbm_to_vmem [thread:$0]  (!%p2380_p10), %s2445_s2, 64, %s2447_s8, %s191_s25  }
  0x52   : > { %s2173_s24 = scalar_lea.hbm %s2432_s12, 128  ;;  %s2178_s23 = scalar_lea.hbm %s3061_s3, 512 }
  0x53   : > { %p2174_p6 = scmp.ne.s32.totalorder %s2432_s12, %s2173_s24  ;;  %p2179_p13 = scmp.lt.u32.totalorder %s2432_s12, %s3061_s3 }
  0x54   : > { %p2180_p1 = scmp.lt.u32.totalorder %s2178_s23, %s2173_s24  ;;  %p2182_p9 = scmp.lt.u32.totalorder %s2173_s24, %s2432_s12 }
  0x55   : > { %p2176_p11 = pnand %p2174_p6, %p2403_p12 }
  0x56   : > { %p2181_p2 = por %p2180_p1, %p2179_p13 }
  0x57   : > { %p2177_p3 = pneg %p2176_p11 }
  0x58   : > { %p2183_p0 = por %p2182_p9, %p2181_p2 }
  0x5a   : > { %p2184_p4 = pnand %p2183_p0, %p2177_p3 }
  0x5c   : > { %2187 = shalt.err (!%p2184_p4)
}
  0x5d   : > { %s2188_s2 = scalar_lea.vmem %s238_s10, 128  ;;  %s2277_s25 = smov [#allocation7]  }
  0x5e   : > { %p2189_p5 = scmp.ne.s32.totalorder %s238_s10, %s2188_s2  ;;  %s2193_s8 = sshll.u32 %s2277_s25, 4  ;;  %s2194_s8 = int_to_ptr.vmem [resolvable:$false] %s2193_s8 }
  0x5f   : > { %s2195_s15 = scalar_lea.vmem %s2194_s8, 256  ;;  %p2196_p6 = scmp.lt.s32.totalorder %s238_s10, %s2194_s8 }
  0x60   : > { %p2191_p7 = pnand %p2189_p5, %p2403_p12  ;;  %p2197_p11 = scmp.lt.s32.totalorder %s2195_s15, %s2188_s2 }
  0x62   : > { %p2192_p8 = pneg %p2191_p7  ;;  %p2198_p10 = por %p2197_p11, %p2196_p6 }
  0x64   : > { %p2199_p1 = pnand %p2198_p10, %p2192_p8 }
  0x66   : > { %2202 = shalt.err (!%p2199_p1)
}
  0x67   : > { %p3079_p13 = scmp.ne.s32.totalorder %s3074_s6, 0  ;;  %p3080_p3 = scmp.ne.s32.totalorder %s3077_s5, 0 }
  0x68   : > { %s248_s26 = sand.u32 (!%p3080_p3), 1, %s2249_s16   ;;  %p3081_p12 = scmp.ne.s32.totalorder (!%p3080_p3), %s3073_s30, 0 }
  0x69   : > { %2020 = dma.hbm_to_vmem [thread:$0]  (!%p3079_p13), %s2432_s12, 128, %s238_s10, %s2397_s14  }
  0x6a   : > { %246 = sbr.rel (%p3080_p3) target bundleno = 758 (0x2f6), region = 36  ;;  %s1879_s11 = sshll.u32 (!%p3080_p3), %s248_s26, 2 }
  0x6b   : > { %s249_s13 = scalar_lea.sflag (!%p3080_p3), [#allocation4], %s248_s26  ;;  %s2499_s21 = scalar_lea.vmem (!%p3080_p3), [#allocation3], %s1879_s11 }
  0x71   : > { %2236 = dma.done.wait (%p3081_p12), %s249_s13, 64  }
  0x72   : > { %2238 = vsyncadd (%p3081_p12), %s249_s13, 4294967232  ;;  %s3082_s6 = sadd.s32 4294967295, %s2273_s22   ;;  %s1880_s14 = sshll.u32 %s248_s26, 3 }
  0x73   : > { %s257_s24 = sand.u32 1, %s3082_s6   ;;  %s2507_s5 = scalar_lea.vmem [#allocation5], %s1880_s14 }
  0x74   : > { %s258_s12 = scalar_lea.sflag [#allocation6], %s257_s24 }
  0x75   : > { %2240 = dma.done.wait (%p3081_p12), %s258_s12, 256  }
  0x76   : > { %2242 = vsyncadd (%p3081_p12), %s258_s12, 4294967040  ;;  %p314_p10 = scmp.lt.s32.totalorder %s2261_s19, 1  ;;  %p321_p2 = scmp.lt.s32.totalorder %s2257_s18, 3 }
  0x77   : > { %s2527_s26 = scalar_lea.vmem [#allocation7], %s1880_s14  ;;  %p1887_p9 = scmp.ne.s32.totalorder %s2257_s18, 0 }
  0x78   : > { %s3105_s19 = smov (!%p314_p10, %s2261_s19), 1  ;;  %v367_v0 = vlaneseq (!%p1887_p9)  ;;  %v2278_v27 = vmov (!%p1887_p9), 0   ;;  %s2281_s11 = smov (!%p1887_p9), 97  }
  0x79   : > { %s322_s10 = scalar_select %p321_p2, %s2257_s18, 3 }
  0x7a   : > { %s1979_s7 = sshll.u32 %s3105_s19, 5  ;;  %334 = sbr.rel (%p1887_p9) target bundleno = 492 (0x1ec), region = 52  ;;  %v368_v3 = vand.u32 (!%p1887_p9), 127, %v367_v0  ;;  %v505_v4 = vshrl.u32 (!%p1887_p9), %v367_v0, 7 }
  0x7b   : > { %s2520_s27 = scalar_lea.vmem %s3058_s0, %s1979_s7  ;;  %s1884_s29 = sshll.u32 %s322_s10, 3 }
  0x7c   : > { %s325_s2 = sadd.s32 %s1979_s7, %s1884_s29  ;;  %v2531_v1 = vld [vmem:[%s2520_s27] sm:$0xff] (!%p1887_p9)  ;;  %v2535_v2 = vld [vmem:[%s2520_s27 + $0x18] sm:$0xff] (!%p1887_p9)  ;;  %v2539_v5 = vld [vmem:[%s2520_s27 + $0x8] sm:$0xff] (!%p1887_p9)  ;;  %v370_v6 = vadd.s32 (!%p1887_p9), 256, %v368_v3  ;;  %v371_v7 = vadd.s32 (!%p1887_p9), 384, %v368_v3  ;;  %v369_v8 = vadd.s32 (!%p1887_p9), 128, %v368_v3 }
  0x7d   : > { %s1886_s25 = sshll.u32 %s325_s2, 2  ;;  %926 = vst [vmem:[#allocation2 + $0x80] sm:$0xff] (!%p1887_p9), %v2531_v1  ;;  %929 = vst [vmem:[#allocation2 + $0x98] sm:$0xff] (!%p1887_p9), %v2535_v2  ;;  %v2542_v9 = vsub.s32 (!%p1887_p9), 0, %v505_v4  ;;  %v380_v10 = vand.u32 (!%p1887_p9), 31, %v368_v3  ;;  %v2544_v11 = vadd.s32 (!%p1887_p9), 512, %v368_v3  ;;  %v1901_v40 = vcombine.low (!%p1887_p9), %v2278_v27, %v2531_v1 }
  0x7e   : > { %s2525_s15 = scalar_lea.vmem %s3062_s4, %s1886_s25  ;;  %927 = vst [vmem:[#allocation2 + $0x88] sm:$0xff] (!%p1887_p9), %v2539_v5  ;;  %v2546_v12 = vadd.s32 (!%p1887_p9), 640, %v368_v3  ;;  %v394_v13 = vand.u32 (!%p1887_p9), 31, %v370_v6  ;;  %v401_v14 = vand.u32 (!%p1887_p9), 31, %v371_v7  ;;  %v387_v15 = vand.u32 (!%p1887_p9), 31, %v369_v8  ;;  %v2560_v22 = vld [vmem:[%s2520_s27 + $0x10] sm:$0xff] (!%p1887_p9) }
  0x7f   : > { %v2548_v16 = vadd.s32 (!%p1887_p9), 768, %v368_v3  ;;  %vm2550_vm0 = vcmp.ge.s32.totalorder (!%p1887_p9), %v380_v10, 1  ;;  %v408_v18 = vand.u32 (!%p1887_p9), 31, %v2544_v11  ;;  %v2556_v20 = vadd.s32 (!%p1887_p9), 896, %v368_v3  ;;  %928 = vst [vmem:[#allocation2 + $0x90] sm:$0xff] (!%p1887_p9), %v2560_v22  ;;  %s2279_s18 = smov (!%p1887_p9), 95  }
  0x80   : > { %v415_v19 = vand.u32 (!%p1887_p9), 31, %v2546_v12  ;;  %vm474_vm1 = vcmp.ge.s32.totalorder (!%p1887_p9), %v394_v13, 1  ;;  %vm475_vm2 = vcmp.ge.s32.totalorder (!%p1887_p9), %v401_v14, 1  ;;  %vm473_vm3 = vcmp.ge.s32.totalorder (!%p1887_p9), %v387_v15, 1  ;;  %v2001_v41 = vld [vmem:[%s2520_s27 + $0x4] sm:$0xff] (!%p1887_p9)  ;;  %s2280_s19 = smov (!%p1887_p9), 32  }
  0x81   : > { %v422_v21 = vand.u32 31, %v2548_v16  ;;  %vm497_vm4 = vmpackc.low %vm475_vm2, %vm474_vm1  ;;  %v2562_v23 = vsub.s32 4, %v505_v4  ;;  %vm2564_vm5 = vcmp.ge.s32.totalorder %v408_v18, 1  ;;  %v429_v26 = vand.u32 31, %v2556_v20  ;;  %v2003_v42 = vld [vmem:[%s2520_s27 + $0xc] sm:$0xff]  ;;  %v2004_v43 = vld [vmem:[%s2520_s27 + $0x14] sm:$0xff] }
  0x82   : > { %vm2568_vm6 = vcmp.ge.s32.totalorder %v415_v19, 1  ;;  %v501_v28 = vsel %vm497_vm4, 65537, %v2278_v27  ;;  %vm496_vm7 = vmpackc.low %vm473_vm3, %vm2550_vm0  ;;  %vm668_vm12 = vcmp.le.s32.totalorder %v380_v10, 30  ;;  %vm669_vm13 = vcmp.le.s32.totalorder %v387_v15, 30  ;;  %s2282_s13 = smov 127   ;;  %s2283_s6 = smov 1  }
  0x83   : > { %v2578_v29 = vrot.slane %v501_v28, %v2542_v9  ;;  %v500_v30 = vsel %vm496_vm7, 65537, %v2278_v27  ;;  %vm498_vm8 = vmpackc.low %vm2568_vm6, %vm2564_vm5  ;;  %vm478_vm9 = vcmp.ge.s32.totalorder %v422_v21, 1  ;;  %vm479_vm10 = vcmp.ge.s32.totalorder %v429_v26, 1  ;;  %s2284_s24 = smov 31   ;;  %s2285_s14 = smov 33  }
  0x84   : > { %v2586_v31 = vrot.slane %v500_v30, %v2542_v9  ;;  %v2591_v32 = vrot.slane %v501_v28, %v2562_v23  ;;  %v2596_v33 = vrot.slane %v500_v30, %v2562_v23  ;;  %v502_v34 = vsel %vm498_vm8, 65537, %v2278_v27  ;;  %vm499_vm11 = vmpackc.low %vm479_vm10, %vm478_vm9  ;;  %s2286_s12 = smov 96  }
  0x85   : > { %540 = vrot.lane.b32.xlu1 %v2578_v29, %s2279_s18  ;;  %v2602_v35 = vrot.slane %v502_v34, %v2562_v23  ;;  %v2607_v36 = vrot.slane %v502_v34, %v2542_v9  ;;  %v503_v37 = vsel %vm499_vm11, 65537, %v2278_v27  ;;  %vm692_vm14 = vmpackc.low %vm669_vm13, %vm668_vm12  ;;  %vm670_vm15 = vcmp.le.s32.totalorder %v394_v13, 30 }
  0x86   : > { %536 = vrot.lane.b32.xlu0 %v2586_v31, %s2279_s18  ;;  %v2613_v38 = vrot.slane %v503_v37, %v2562_v23  ;;  %v2618_v39 = vrot.slane %v503_v37, %v2542_v9  ;;  %vm671_vm0 = vcmp.le.s32.totalorder %v401_v14, 30  ;;  %v696_v44 = vsel %vm692_vm14, 65537, %v2278_v27 }
  0x87   : > { %vm693_vm1 = vmpackc.low %vm671_vm0, %vm670_vm15  ;;  %v2632_v45 = vcombine.high %v2535_v2, %v2535_v2  ;;  %vm672_vm2 = vcmp.le.s32.totalorder %v408_v18, 30  ;;  %vm673_vm3 = vcmp.le.s32.totalorder %v415_v19, 30  ;;  %v703_v46 = vrot.slane %v696_v44, %v2542_v9 }
  0x88   : > { %v697_v47 = vsel %vm693_vm1, 65537, %v2278_v27  ;;  %vm694_vm4 = vmpackc.low %vm673_vm3, %vm672_vm2  ;;  %v707_v48 = vrot.slane %v696_v44, %v2562_v23  ;;  %vm674_vm5 = vcmp.le.s32.totalorder %v422_v21, 30  ;;  %vm675_vm6 = vcmp.le.s32.totalorder %v429_v26, 30 }
  0x89   : > { %542 = vrot.lane.b32.xlu1 %v2591_v32, %s2279_s18  ;;  %v711_v49 = vrot.slane %v697_v47, %v2542_v9  ;;  %v698_v50 = vsel %vm694_vm4, 65537, %v2278_v27  ;;  %vm695_vm7 = vmpackc.low %vm675_vm6, %vm674_vm5  ;;  %v715_v51 = vrot.slane %v697_v47, %v2562_v23  ;;  %vm614_vm9 = vcmask 1043456  }
  0x8a   : > { %538 = vrot.lane.b32.xlu0 %v2596_v33, %s2279_s18  ;;  %v719_v52 = vrot.slane %v698_v50, %v2542_v9  ;;  %v699_v53 = vsel %vm695_vm7, 65537, %v2278_v27  ;;  %v723_v54 = vrot.slane %v698_v50, %v2562_v23  ;;  %vm652_vm10 = vcmask 261120  }
  0x8b   : > { %v727_v55 = vrot.slane %v699_v53, %v2542_v9  ;;  %v731_v56 = vrot.slane %v699_v53, %v2562_v23  ;;  %vm552_vm11 = vcmask 777216   ;;  %v2739_v34 = vcombine.low %v2531_v1, %v2531_v1 }
  0x8c   : > { %vm748_vm14 = vcmask 793600   ;;  %vm841_vm3 = vcmask 1039360   ;;  %vm902_vm7 = vcmask 7168  }
  0x8d   : > { %546 = vrot.lane.b32.xlu1 %v2602_v35, %s2279_s18 }
  0x8e   : > { %544 = vrot.lane.b32.xlu0 %v2607_v36, %s2279_s18 }
  0x91   : > { %550 = vrot.lane.b32.xlu1 %v2613_v38, %s2279_s18 }
  0x92   : > { %548 = vrot.lane.b32.xlu0 %v2618_v39, %s2279_s18 }
  0x95   : > { %636 = vrot.lane.b32.xlu1 %v1901_v40, %s2280_s19 }
  0x96   : > { %638 = vrot.lane.b32.xlu0 %v2001_v41, %s2280_s19 }
  0x99   : > { %640 = vrot.lane.b32.xlu1 %v2003_v42, %s2280_s19  ;;  %v2754_v42 = vcombine.high %v2539_v5, %v2539_v5 }
  0x9a   : > { %642 = vrot.lane.b32.xlu0 %v2004_v43, %s2280_s19  ;;  %v2758_v43 = vcombine.low %v2560_v22, %v2560_v22 }
  0x9d   : > { %644 = vrot.lane.b32.xlu1 %v2632_v45, %s2280_s19 }
  0x9e   : > { %732 = vrot.lane.b32.xlu0 %v703_v46, %s2281_s11 }
  0xa1   : > { %734 = vrot.lane.b32.xlu1 %v707_v48, %s2281_s11 }
  0xa2   : > { %736 = vrot.lane.b32.xlu0 %v711_v49, %s2281_s11 }
  0xa5   : > { %738 = vrot.lane.b32.xlu1 %v715_v51, %s2281_s11 }
  0xa6   : > { %740 = vrot.lane.b32.xlu0 %v719_v52, %s2281_s11 }
  0xa9   : > { %742 = vrot.lane.b32.xlu1 %v723_v54, %s2281_s11 }
  0xaa   : > { %744 = vrot.lane.b32.xlu0 %v727_v55, %s2281_s11 }
  0xad   : > { %746 = vrot.lane.b32.xlu1 %v731_v56, %s2281_s11 }
  0xae   : > { %825 = vrot.lane.b32.xlu0 %v2586_v31, %s2282_s13 }
  0xb1   : > { %827 = vrot.lane.b32.xlu1 %v2596_v33, %s2282_s13 }
  0xb2   : > { %829 = vrot.lane.b32.xlu0 %v2578_v29, %s2282_s13 }
  0xb5   : > { %831 = vrot.lane.b32.xlu1 %v2591_v32, %s2282_s13 }
  0xb6   : > { %833 = vrot.lane.b32.xlu0 %v2607_v36, %s2282_s13 }
  0xb9   : > { %835 = vrot.lane.b32.xlu1 %v2602_v35, %s2282_s13 }
  0xba   : > { %837 = vrot.lane.b32.xlu0 %v2618_v39, %s2282_s13 }
  0xbd   : > { %839 = vrot.lane.b32.xlu1 %v2613_v38, %s2282_s13 }
  0xbe   : > { %930 = vrot.lane.b32.xlu0 %v703_v46, %s2283_s6 }
  0xc1   : > { %932 = vrot.lane.b32.xlu1 %v707_v48, %s2283_s6 }
  0xc2   : > { %934 = vrot.lane.b32.xlu0 %v711_v49, %s2283_s6 }
  0xc5   : > { %936 = vrot.lane.b32.xlu1 %v715_v51, %s2283_s6 }
  0xc6   : > { %938 = vrot.lane.b32.xlu0 %v719_v52, %s2283_s6 }
  0xc9   : > { %940 = vrot.lane.b32.xlu1 %v723_v54, %s2283_s6 }
  0xca   : > { %942 = vrot.lane.b32.xlu0 %v727_v55, %s2283_s6 }
  0xcd   : > { %944 = vrot.lane.b32.xlu1 %v731_v56, %s2283_s6 }
  0xce   : > { %1021 = vrot.lane.b32.xlu0 %v2586_v31, %s2284_s24 }
  0xd1   : > { %1023 = vrot.lane.b32.xlu1 %v2596_v33, %s2284_s24 }
  0xd2   : > { %1025 = vrot.lane.b32.xlu0 %v2578_v29, %s2284_s24 }
  0xd5   : > { %1027 = vrot.lane.b32.xlu1 %v2591_v32, %s2284_s24 }
  0xd6   : > { %1029 = vrot.lane.b32.xlu0 %v2607_v36, %s2284_s24 }
  0xd9   : > { %1031 = vrot.lane.b32.xlu1 %v2602_v35, %s2284_s24 }
  0xda   : > { %1033 = vrot.lane.b32.xlu0 %v2618_v39, %s2284_s24 }
  0xdd   : > { %1035 = vrot.lane.b32.xlu1 %v2613_v38, %s2284_s24 }
  0xde   : > { %1143 = vrot.lane.b32.xlu0 %v703_v46, %s2285_s14 }
  0xe1   : > { %1145 = vrot.lane.b32.xlu1 %v707_v48, %s2285_s14 }
  0xe2   : > { %1147 = vrot.lane.b32.xlu0 %v711_v49, %s2285_s14 }
  0xe5   : > { %1149 = vrot.lane.b32.xlu1 %v715_v51, %s2285_s14 }
  0xe6   : > { %1151 = vrot.lane.b32.xlu0 %v719_v52, %s2285_s14 }
  0xe9   : > { %1153 = vrot.lane.b32.xlu1 %v723_v54, %s2285_s14 }
  0xea   : > { %1155 = vrot.lane.b32.xlu0 %v727_v55, %s2285_s14 }
  0xed   : > { %1157 = vrot.lane.b32.xlu1 %v731_v56, %s2285_s14 }
  0xf7   : > { %v2702_v57 = vpop.permute.xlu1 %540 }
  0xf8   : > { %v537_v58 = vpop.permute.xlu0 %536 }
  0xfb   : > { %v2704_v59 = vpop.permute.xlu1 %542 }
  0xfc   : > { %v2706_v60 = vpop.permute.xlu0 %538  ;;  %v555_v54 = vsel %vm552_vm11, %v2702_v57, %v2704_v59 }
  0xfd   : > { %v553_v33 = vsel %vm552_vm11, %v537_v58, %v2706_v60  ;;  %vm562_vm4 = vcmp.ne.s16.totalorder %v555_v54, 0 }
  0xfe   : > { %vm560_vm12 = vcmp.ne.s16.totalorder %v553_v33, 0 }
  0xff   : > { %v2708_v61 = vpop.permute.xlu1 %546  ;;  %v568_v41 = vsel %vm560_vm12, %v2739_v34, 0 }
 0x100   : > { %v545_v62 = vpop.permute.xlu0 %544  ;;  %v1896_v48 = vcombine.low %v2278_v27, %v568_v41 }
 0x101   : > { %v556_v37 = vsel %vm552_vm11, %v2704_v59, %v545_v62  ;;  %v557_v38 = vsel %vm552_vm11, %v545_v62, %v2708_v61 }
 0x102   : > { %vm563_vm15 = vcmp.ne.s16.totalorder %v556_v37, 0  ;;  %vm564_vm0 = vcmp.ne.s16.totalorder %v557_v38, 0 }
 0x103   : > { %v2710_v63 = vpop.permute.xlu1 %550  ;;  %v571_v49 = vsel %vm563_vm15, %v2754_v42, 0  ;;  %v572_v50 = vsel %vm564_vm0, %v2758_v43, 0 }
 0x104   : > { %vm567_vm8 = vcmp.ne.s16.totalorder %v2710_v63, 0  ;;  %v2713_v0 = vpop.permute.xlu0 %548  ;;  %v1898_v55 = vcombine.low %v571_v49, %v572_v50 }
 0x105   : > { %v575_v3 = vsel %vm567_vm8, %v2632_v45, 0 }
 0x106   : > { %v1900_v4 = vcombine.low %v575_v3, %v575_v3  ;;  %v2785_v3 = vcombine.low %v2539_v5, %v2539_v5 }
 0x107   : > { %v637_v6 = vpop.permute.xlu1 %636 }
 0x108   : > { %v639_v7 = vpop.permute.xlu0 %638  ;;  %v646_v8 = vrot.slane %v637_v6, 4  ;;  %607 = vrot.lane.b32.xlu0 %v1900_v4, %s2285_s14  ;;  %v554_v4 = vsel %vm552_vm11, %v2706_v60, %v2702_v57 }
 0x109   : > { %v647_v9 = vrot.slane %v639_v7, 4  ;;  %vm561_vm6 = vcmp.ne.s16.totalorder %v554_v4, 0 }
 0x10b   : > { %v651_v10 = vsel %vm614_vm9, %v646_v8, %v647_v9  ;;  %v641_v11 = vpop.permute.xlu1 %640 }
 0x10c   : > { %v653_v12 = vsel %vm652_vm10, %v637_v6, %v651_v10  ;;  %v643_v13 = vpop.permute.xlu0 %642  ;;  %v648_v14 = vrot.slane %v641_v11, 4  ;;  %v570_v10 = vsel %vm562_vm4, %v2785_v3, 0 }
 0x10d   : > { %664 = vst [vmem:[#allocation2 + $0x20] sm:$0xff] %v653_v12  ;;  %v649_v15 = vrot.slane %v643_v13, 4 }
 0x10e   : > { %v654_v16 = vsel %vm614_vm9, %v647_v9, %v648_v14 }
 0x10f   : > { %v655_v17 = vsel %vm652_vm10, %v639_v7, %v654_v16  ;;  %v656_v18 = vsel %vm614_vm9, %v648_v14, %v649_v15  ;;  %v645_v19 = vpop.permute.xlu1 %644  ;;  %v2795_v7 = vcombine.high %v2531_v1, %v2531_v1 }
 0x110   : > { %v657_v20 = vsel %vm652_vm10, %v641_v11, %v656_v18  ;;  %665 = vst [vmem:[#allocation2 + $0x28] sm:$0xff] %v655_v17  ;;  %v733_v21 = vpop.permute.xlu0 %732  ;;  %v650_v23 = vrot.slane %v645_v19, 4  ;;  %v558_v11 = vsel %vm552_vm11, %v2708_v61, %v2713_v0  ;;  %v2815_v19 = vcombine.high %v2560_v22, %v2560_v22 }
 0x111   : > { %666 = vst [vmem:[#allocation2 + $0x30] sm:$0xff] %v657_v20  ;;  %v569_v17 = vsel %vm561_vm6, %v2795_v7, 0  ;;  %v2819_v20 = vcombine.low %v2535_v2, %v2535_v2 }
 0x112   : > { %v658_v24 = vsel %vm614_vm9, %v649_v15, %v650_v23  ;;  %v1897_v33 = vcombine.low %v569_v17, %v570_v10 }
 0x113   : > { %v659_v25 = vsel %vm652_vm10, %v643_v13, %v658_v24  ;;  %v2725_v26 = vpop.permute.xlu1 %734  ;;  %v559_v13 = vsel %vm552_vm11, %v2713_v0, %v2710_v63 }
 0x114   : > { %667 = vst [vmem:[#allocation2 + $0x38] sm:$0xff] %v659_v25  ;;  %v2727_v28 = vpop.permute.xlu0 %736  ;;  %v749_v47 = vsel %vm748_vm14, %v733_v21, %v2725_v26  ;;  %vm566_vm15 = vcmp.ne.s16.totalorder %v559_v13, 0 }
 0x115   : > { %vm756_vm1 = vcmp.ne.s16.totalorder %v749_v47, 0 }
 0x116   : > { %v764_v56 = vsel %vm756_vm1, %v2739_v34, 0 }
 0x117   : > { %v2729_v29 = vpop.permute.xlu1 %738  ;;  %v1902_v8 = vcombine.low %v2278_v27, %v764_v56 }
 0x118   : > { %v741_v30 = vpop.permute.xlu0 %740  ;;  %v751_v25 = vsel %vm748_vm14, %v2727_v28, %v2729_v29 }
 0x119   : > { %v752_v58 = vsel %vm748_vm14, %v2729_v29, %v741_v30 }
 0x11a   : > { %vm759_vm5 = vcmp.ne.s16.totalorder %v752_v58, 0 }
 0x11b   : > { %v2731_v31 = vpop.permute.xlu1 %742  ;;  %v767_v14 = vsel %vm759_vm5, %v2754_v42, 0  ;;  %vm758_vm5 = vcmp.ne.s16.totalorder %v751_v25, 0 }
 0x11c   : > { %v2733_v32 = vpop.permute.xlu0 %744  ;;  %v753_v53 = vsel %vm748_vm14, %v741_v30, %v2731_v31  ;;  %v766_v54 = vsel %vm758_vm5, %v2785_v3, 0 }
 0x11d   : > { %vm760_vm2 = vcmp.ne.s16.totalorder %v753_v53, 0 }
 0x11e   : > { %v768_v9 = vsel %vm760_vm2, %v2758_v43, 0 }
 0x11f   : > { %v2741_v35 = vpop.permute.xlu1 %746  ;;  %v1904_v61 = vcombine.low %v767_v14, %v768_v9 }
 0x120   : > { %v2743_v36 = vpop.permute.xlu0 %825  ;;  %vm763_vm13 = vcmp.ne.s16.totalorder %v2741_v35, 0  ;;  %v755_v29 = vsel %vm748_vm14, %v2733_v32, %v2741_v35  ;;  %v754_v35 = vsel %vm748_vm14, %v2731_v31, %v2733_v32 }
 0x121   : > { %v771_v39 = vsel %vm763_vm13, %v2632_v45, 0  ;;  %vm565_vm13 = vcmp.ne.s16.totalorder %v558_v11, 0 }
 0x122   : > { %v1906_v40 = vcombine.low %v771_v39, %v771_v39  ;;  %v573_v38 = vsel %vm565_vm13, %v2815_v19, 0  ;;  %v574_v39 = vsel %vm566_vm15, %v2819_v20, 0  ;;  %vm761_vm13 = vcmp.ne.s16.totalorder %v754_v35, 0 }
 0x123   : > { %v2760_v44 = vpop.permute.xlu1 %827 }
 0x124   : > { %v830_v46 = vpop.permute.xlu0 %829  ;;  %801 = vrot.lane.b32.xlu0 %v1906_v40, %s2284_s24  ;;  %v750_v40 = vsel %vm748_vm14, %v2725_v26, %v2727_v28  ;;  %v1899_v28 = vcombine.low %v573_v38, %v574_v39 }
 0x125   : > { %v843_v57 = vsel %vm841_vm3, %v2760_v44, %v830_v46  ;;  %vm757_vm6 = vcmp.ne.s16.totalorder %v750_v40, 0 }
 0x126   : > { %vm850_vm12 = vcmp.ne.s16.totalorder %v843_v57, 0 }
 0x127   : > { %v2768_v51 = vpop.permute.xlu1 %831  ;;  %v858_v30 = vsel %vm850_vm12, %v2795_v7, 0 }
 0x128   : > { %v2770_v52 = vpop.permute.xlu0 %833  ;;  %599 = vrot.lane.b32.xlu0 %v1896_v48, %s2285_s14  ;;  %v844_v59 = vsel %vm841_vm3, %v830_v46, %v2768_v51 }
 0x129   : > { %vm851_vm8 = vcmp.ne.s16.totalorder %v844_v59, 0  ;;  %v842_v59 = vsel %vm841_vm3, %v2743_v36, %v2760_v44  ;;  %v769_v36 = vsel %vm761_vm13, %v2815_v19, 0  ;;  %v845_v13 = vsel %vm841_vm3, %v2768_v51, %v2770_v52 }
 0x12a   : > { %v859_v63 = vsel %vm851_vm8, %v2785_v3, 0  ;;  %vm849_vm15 = vcmp.ne.s16.totalorder %v842_v59, 0 }
 0x12b   : > { %v2781_v62 = vpop.permute.xlu1 %835  ;;  %v1908_v37 = vcombine.low %v858_v30, %v859_v63 }
 0x12c   : > { %v838_v6 = vpop.permute.xlu0 %837  ;;  %603 = vrot.lane.b32.xlu0 %v1898_v55, %s2285_s14  ;;  %v846_v44 = vsel %vm841_vm3, %v2770_v52, %v2781_v62 }
 0x12d   : > { %v847_v0 = vsel %vm841_vm3, %v2781_v62, %v838_v6 }
 0x12e   : > { %vm854_vm1 = vcmp.ne.s16.totalorder %v847_v0, 0 }
 0x12f   : > { %v840_v60 = vpop.permute.xlu1 %839  ;;  %v862_v48 = vsel %vm854_vm1, %v2815_v19, 0  ;;  %vm853_vm1 = vcmp.ne.s16.totalorder %v846_v44, 0 }
 0x130   : > { %vm856_vm10 = vcmp.ne.s16.totalorder %v840_v60, 0  ;;  %793 = vrot.lane.b32.xlu0 %v1902_v8, %s2284_s24  ;;  %v931_v12 = vpop.permute.xlu0 %930  ;;  %v848_v15 = vsel %vm841_vm3, %v838_v6, %v840_v60  ;;  %v765_v6 = vsel %vm757_vm6, %v2795_v7, 0 }
 0x131   : > { %v864_v16 = vsel %vm856_vm10, %v2632_v45, 0  ;;  %vm855_vm0 = vcmp.ne.s16.totalorder %v848_v15, 0  ;;  %vm953_vm2 = vcmp.ne.s16.totalorder %v931_v12, 0  ;;  %vm762_vm10 = vcmp.ne.s16.totalorder %v755_v29, 0 }
 0x132   : > { %v1911_v18 = vcombine.low %v864_v16, %v864_v16  ;;  %v863_v41 = vsel %vm855_vm0, %v2819_v20, 0  ;;  %v961_v49 = vsel %vm953_vm2, %v2739_v34, 0  ;;  %v1903_v32 = vcombine.low %v765_v6, %v766_v54 }
 0x133   : > { %v2824_v21 = vpop.permute.xlu1 %932  ;;  %v1910_v53 = vcombine.low %v862_v48, %v863_v41  ;;  %v770_v9 = vsel %vm762_vm10, %v2819_v20, 0  ;;  %vm809_vm0 = vcmask 252928   ;;  %v2882_v16 = vcombine.low %v2278_v27, %v2278_v27 }
 0x134   : > { %894 = vrot.lane.b32.xlu1 %v1911_v18, %s2283_s6  ;;  %797 = vrot.lane.b32.xlu0 %v1904_v61, %s2284_s24  ;;  %v946_v23 = vsel %vm902_vm7, %v931_v12, %v2824_v21  ;;  %v2830_v24 = vpop.permute.xlu0 %934  ;;  %v1905_v11 = vcombine.low %v769_v36, %v770_v9  ;;  %v857_v12 = vsel %vm849_vm15, %v2739_v34, 0  ;;  %vm852_vm2 = vcmp.ne.s16.totalorder %v845_v13, 0 }
 0x135   : > { %vm954_vm4 = vcmp.ne.s16.totalorder %v946_v23, 0  ;;  %v947_v62 = vsel %vm902_vm7, %v2824_v21, %v2830_v24  ;;  %v1907_v52 = vcombine.low %v2278_v27, %v857_v12  ;;  %v861_v18 = vsel %vm853_vm1, %v2758_v43, 0 }
 0x136   : > { %v962_v50 = vsel %vm954_vm4, %v2795_v7, 0  ;;  %vm955_vm5 = vcmp.ne.s16.totalorder %v947_v62, 0  ;;  %v860_v23 = vsel %vm852_vm2, %v2754_v42, 0 }
 0x137   : > { %v937_v46 = vpop.permute.xlu1 %936  ;;  %v1912_v4 = vcombine.low %v961_v49, %v962_v50  ;;  %v1909_v30 = vcombine.low %v860_v23, %v861_v18 }
 0x138   : > { %601 = vrot.lane.b32.xlu1 %v1897_v33, %s2285_s14  ;;  %888 = vrot.lane.b32.xlu0 %v1908_v37, %s2283_s6  ;;  %v939_v47 = vpop.permute.xlu0 %938  ;;  %v948_v17 = vsel %vm902_vm7, %v2830_v24, %v937_v46  ;;  %v963_v33 = vsel %vm955_vm5, %v2785_v3, 0 }
 0x139   : > { %v949_v26 = vsel %vm902_vm7, %v937_v46, %v939_v47  ;;  %vm956_vm6 = vcmp.ne.s16.totalorder %v948_v17, 0 }
 0x13a   : > { %vm957_vm8 = vcmp.ne.s16.totalorder %v949_v26, 0  ;;  %v964_v37 = vsel %vm956_vm6, %v2754_v42, 0  ;;  %vm616_vm6 = vcmask 269312  }
 0x13b   : > { %v941_v55 = vpop.permute.xlu1 %940  ;;  %v965_v8 = vsel %vm957_vm8, %v2758_v43, 0  ;;  %v1913_v29 = vcombine.low %v963_v33, %v964_v37 }
 0x13c   : > { %605 = vrot.lane.b32.xlu1 %v1899_v28, %s2285_s14  ;;  %892 = vrot.lane.b32.xlu0 %v1910_v53, %s2283_s6  ;;  %v950_v56 = vsel %vm902_vm7, %v939_v47, %v941_v55  ;;  %v943_v58 = vpop.permute.xlu0 %942 }
 0x13d   : > { %vm958_vm12 = vcmp.ne.s16.totalorder %v950_v56, 0  ;;  %v951_v27 = vsel %vm902_vm7, %v941_v55, %v943_v58 }
 0x13e   : > { %v966_v31 = vsel %vm958_vm12, %v2815_v19, 0  ;;  %vm959_vm10 = vcmp.ne.s16.totalorder %v951_v27, 0 }
 0x13f   : > { %v945_v57 = vpop.permute.xlu1 %944  ;;  %v1914_v10 = vcombine.low %v965_v8, %v966_v31  ;;  %v967_v47 = vsel %vm959_vm10, %v2819_v20, 0 }
 0x140   : > { %795 = vrot.lane.b32.xlu1 %v1903_v32, %s2284_s24  ;;  %990 = vrot.lane.b32.xlu0 %v1912_v4, %s2282_s13  ;;  %v2868_v60 = vpop.permute.xlu0 %1021  ;;  %v952_v24 = vsel %vm902_vm7, %v943_v58, %v945_v57 }
 0x141   : > { %vm960_vm12 = vcmp.ne.s16.totalorder %v952_v24, 0  ;;  %vm1044_vm15 = vcmp.ne.s16.totalorder %v2868_v60, 0 }
 0x142   : > { %v968_v48 = vsel %vm960_vm12, %v2632_v45, 0  ;;  %v1052_v56 = vsel %vm1044_vm15, %v2739_v34, 0 }
 0x143   : > { %v1024_v14 = vpop.permute.xlu1 %1023  ;;  %v1915_v55 = vcombine.low %v967_v47, %v968_v48 }
 0x144   : > { %799 = vrot.lane.b32.xlu1 %v1905_v11, %s2284_s24  ;;  %994 = vrot.lane.b32.xlu0 %v1914_v10, %s2282_s13  ;;  %v1026_v15 = vpop.permute.xlu0 %1025  ;;  %v1037_v41 = vsel %vm809_vm0, %v2868_v60, %v1024_v14 }
 0x145   : > { %v1038_v51 = vsel %vm809_vm0, %v1024_v14, %v1026_v15  ;;  %vm1045_vm1 = vcmp.ne.s16.totalorder %v1037_v41, 0 }
 0x146   : > { %vm1046_vm4 = vcmp.ne.s16.totalorder %v1038_v51, 0  ;;  %v1053_v58 = vsel %vm1045_vm1, %v2795_v7, 0 }
 0x147   : > { %v1028_v61 = vpop.permute.xlu1 %1027  ;;  %v1054_v63 = vsel %vm1046_vm4, %v2785_v3, 0  ;;  %v1917_v8 = vcombine.low %v1052_v56, %v1053_v58 }
 0x148   : > { %886 = vrot.lane.b32.xlu1 %v1907_v52, %s2283_s6  ;;  %v1039_v0 = vsel %vm809_vm0, %v1026_v15, %v1028_v61  ;;  %v1030_v21 = vpop.permute.xlu0 %1029  ;;  %998 = vrot.lane.b32.xlu0 %v2882_v16, %s2282_s13 }
 0x149   : > { %vm1047_vm8 = vcmp.ne.s16.totalorder %v1039_v0, 0  ;;  %v1040_v53 = vsel %vm809_vm0, %v1028_v61, %v1030_v21 }
 0x14a   : > { %v1055_v25 = vsel %vm1047_vm8, %v2754_v42, 0  ;;  %vm1048_vm4 = vcmp.ne.s16.totalorder %v1040_v53, 0 }
 0x14b   : > { %v1032_v38 = vpop.permute.xlu1 %1031  ;;  %v1918_v39 = vcombine.low %v1054_v63, %v1055_v25  ;;  %v1056_v31 = vsel %vm1048_vm4, %v2758_v43, 0 }
 0x14c   : > { %890 = vrot.lane.b32.xlu1 %v1909_v30, %s2283_s6  ;;  %v1034_v40 = vpop.permute.xlu0 %1033  ;;  %v1041_v54 = vsel %vm809_vm0, %v1030_v21, %v1032_v38 }
 0x14d   : > { %v1042_v46 = vsel %vm809_vm0, %v1032_v38, %v1034_v40  ;;  %1082 = vrot.lane.b32.xlu0 %v1918_v39, %s2281_s11  ;;  %vm1049_vm5 = vcmp.ne.s16.totalorder %v1041_v54, 0 }
 0x14e   : > { %vm1050_vm13 = vcmp.ne.s16.totalorder %v1042_v46, 0  ;;  %v1057_v32 = vsel %vm1049_vm5, %v2815_v19, 0 }
 0x14f   : > { %v1036_v49 = vpop.permute.xlu1 %1035  ;;  %v1058_v50 = vsel %vm1050_vm13, %v2819_v20, 0  ;;  %v1919_v36 = vcombine.low %v1056_v31, %v1057_v32 }
 0x150   : > { %992 = vrot.lane.b32.xlu1 %v1913_v29, %s2282_s13  ;;  %v1043_v26 = vsel %vm809_vm0, %v1034_v40, %v1036_v49  ;;  %v1144_v28 = vpop.permute.xlu0 %1143 }
 0x151   : > { %vm1051_vm2 = vcmp.ne.s16.totalorder %v1043_v26, 0  ;;  %vm1166_vm15 = vcmp.ne.s16.totalorder %v1144_v28, 0 }
 0x152   : > { %v1059_v35 = vsel %vm1051_vm2, %v2632_v45, 0  ;;  %v1174_v18 = vsel %vm1166_vm15, %v2739_v34, 0 }
 0x153   : > { %v1920_v4 = vcombine.low %v1058_v50, %v1059_v35  ;;  %v1146_v6 = vpop.permute.xlu1 %1145 }
 0x154   : > { %996 = vrot.lane.b32.xlu1 %v1915_v55, %s2282_s13  ;;  %v1148_v59 = vpop.permute.xlu0 %1147  ;;  %v1159_v62 = vsel %vm616_vm6, %v1144_v28, %v1146_v6 }
 0x155   : > { %1086 = vrot.lane.b32.xlu0 %v1920_v4, %s2281_s11  ;;  %v1160_v57 = vsel %vm616_vm6, %v1146_v6, %v1148_v59  ;;  %vm1167_vm1 = vcmp.ne.s16.totalorder %v1159_v62, 0 }
 0x156   : > { %vm1168_vm8 = vcmp.ne.s16.totalorder %v1160_v57, 0  ;;  %v1175_v61 = vsel %vm1167_vm1, %v2795_v7, 0 }
 0x157   : > { %v1150_v9 = vpop.permute.xlu1 %1149  ;;  %v1176_v13 = vsel %vm1168_vm8, %v2785_v3, 0 }
 0x158   : > { %1080 = vrot.lane.b32.xlu1 %v1917_v8, %s2281_s11  ;;  %v1161_v60 = vsel %vm616_vm6, %v1148_v59, %v1150_v9  ;;  %v1152_v10 = vpop.permute.xlu0 %1151 }
 0x159   : > { %1111 = vrot.lane.b32.xlu0 %v2531_v1, %s2286_s12  ;;  %vm1169_vm10 = vcmp.ne.s16.totalorder %v1161_v60, 0 }
 0x15a   : > { %v1177_v14 = vsel %vm1169_vm10, %v2754_v42, 0  ;;  %v1162_v42 = vsel %vm616_vm6, %v1150_v9, %v1152_v10 }
 0x15b   : > { %v1154_v44 = vpop.permute.xlu1 %1153  ;;  %v1922_v17 = vcombine.low %v1176_v13, %v1177_v14  ;;  %vm1170_vm2 = vcmp.ne.s16.totalorder %v1162_v42, 0 }
 0x15c   : > { %1084 = vrot.lane.b32.xlu1 %v1919_v36, %s2281_s11  ;;  %v1156_v11 = vpop.permute.xlu0 %1155  ;;  %v1163_v51 = vsel %vm616_vm6, %v1152_v10, %v1154_v44 }
 0x15d   : > { %1115 = vrot.lane.b32.xlu0 %v2560_v22, %s2286_s12  ;;  %v1164_v12 = vsel %vm616_vm6, %v1154_v44, %v1156_v11  ;;  %vm1171_vm4 = vcmp.ne.s16.totalorder %v1163_v51, 0 }
 0x15e   : > { %vm1172_vm12 = vcmp.ne.s16.totalorder %v1164_v12, 0 }
 0x15f   : > { %v1158_v15 = vpop.permute.xlu1 %1157  ;;  %v1180_v22 = vsel %vm1172_vm12, %v2819_v20, 0  ;;  %v1179_v20 = vsel %vm1171_vm4, %v2815_v19, 0 }
 0x160   : > { %1088 = vrot.lane.b32.xlu1 %v2882_v16, %s2281_s11  ;;  %v1165_v1 = vsel %vm616_vm6, %v1156_v11, %v1158_v15 }
 0x161   : > { %1119 = vrot.lane.b32.xlu0 %v2882_v16, %s2286_s12  ;;  %vm1173_vm13 = vcmp.ne.s16.totalorder %v1165_v1, 0 }
 0x162   : > { %v1181_v3 = vsel %vm1173_vm13, %v2632_v45, 0  ;;  %v1921_v45 = vcombine.low %v1174_v18, %v1175_v61 }
 0x163   : > { %v1924_v52 = vcombine.low %v1180_v22, %v1181_v3 }
 0x164   : > { %1113 = vrot.lane.b32.xlu1 %v2539_v5, %s2286_s12  ;;  %v1178_v5 = vsel %vm1170_vm2, %v2758_v43, 0 }
 0x165   : > { %1204 = vrot.lane.b32.xlu0 %v1922_v17, %s2279_s18  ;;  %v1923_v63 = vcombine.low %v1178_v5, %v1179_v20 }
 0x168   : > { %1117 = vrot.lane.b32.xlu1 %v2535_v2, %s2286_s12 }
 0x169   : > { %1208 = vrot.lane.b32.xlu0 %v1924_v52, %s2279_s18 }
 0x16c   : > { %1202 = vrot.lane.b32.xlu1 %v1921_v45, %s2279_s18 }
 0x170   : > { %1206 = vrot.lane.b32.xlu1 %v1923_v63, %s2279_s18 }
 0x174   : > { %1210 = vrot.lane.b32.xlu1 %v2882_v16, %s2279_s18 }
 0x17a   : > { %v608_v34 = vpop.permute.xlu0 %607 }
 0x17b   : > { %v613_v41 = vrot.slane %v608_v34, 4 }
 0x196   : > { %v802_v7 = vpop.permute.xlu0 %801 }
 0x197   : > { %v807_v32 = vrot.slane %v802_v7, 4 }
 0x19a   : > { %v600_v0 = vpop.permute.xlu0 %599 }
 0x19b   : > { %v609_v43 = vrot.slane %v600_v0, 4 }
 0x19e   : > { %v604_v21 = vpop.permute.xlu0 %603 }
 0x19f   : > { %v611_v30 = vrot.slane %v604_v21, 4 }
 0x1a2   : > { %v794_v2 = vpop.permute.xlu0 %793 }
 0x1a3   : > { %v803_v55 = vrot.slane %v794_v2, 4 }
 0x1a6   : > { %v895_v23 = vpop.permute.xlu1 %894  ;;  %v798_v27 = vpop.permute.xlu0 %797 }
 0x1a7   : > { %v900_v46 = vrot.slane %v895_v23, 4  ;;  %v805_v56 = vrot.slane %v798_v27, 4 }
 0x1aa   : > { %v602_v24 = vpop.permute.xlu1 %601  ;;  %v889_v25 = vpop.permute.xlu0 %888 }
 0x1ab   : > { %v610_v19 = vrot.slane %v602_v24, 4  ;;  %v897_v12 = vrot.slane %v889_v25, 4 }
 0x1ad   : > { %v615_v33 = vsel %vm614_vm9, %v609_v43, %v610_v19  ;;  %v618_v37 = vsel %vm614_vm9, %v610_v19, %v611_v30 }
 0x1ae   : > { %v617_v38 = vsel %vm616_vm6, %v600_v0, %v615_v33  ;;  %v619_v16 = vsel %vm616_vm6, %v602_v24, %v618_v37  ;;  %v606_v39 = vpop.permute.xlu1 %605  ;;  %v893_v40 = vpop.permute.xlu0 %892 }
 0x1af   : > { %628 = vst [vmem:[#allocation2] sm:$0xff] %v617_v38  ;;  %629 = vst [vmem:[#allocation2 + $0x8] sm:$0xff] %v619_v16  ;;  %v612_v29 = vrot.slane %v606_v39, 4  ;;  %v899_v47 = vrot.slane %v893_v40, 4 }
 0x1b1   : > { %v620_v48 = vsel %vm614_vm9, %v611_v30, %v612_v29  ;;  %v622_v49 = vsel %vm614_vm9, %v612_v29, %v613_v41  ;;  %v908_v50 = vsel %vm614_vm9, %v899_v47, %v900_v46 }
 0x1b2   : > { %v621_v26 = vsel %vm616_vm6, %v604_v21, %v620_v48  ;;  %v623_v28 = vsel %vm616_vm6, %v606_v39, %v622_v49  ;;  %v909_v53 = vsel %vm902_vm7, %v893_v40, %v908_v50  ;;  %v796_v54 = vpop.permute.xlu1 %795  ;;  %v991_v35 = vpop.permute.xlu0 %990 }
 0x1b3   : > { %630 = vst [vmem:[#allocation2 + $0x10] sm:$0xff] %v621_v26  ;;  %631 = vst [vmem:[#allocation2 + $0x18] sm:$0xff] %v623_v28  ;;  %v804_v58 = vrot.slane %v796_v54, 4  ;;  %v1000_v61 = vrot.slane %v991_v35, 4 }
 0x1b4   : > { %917 = vst [vmem:[#allocation2 + $0x78] sm:$0xff] %v909_v53 }
 0x1b5   : > { %v808_v4 = vsel %vm614_vm9, %v803_v55, %v804_v58  ;;  %v811_v6 = vsel %vm614_vm9, %v804_v58, %v805_v56 }
 0x1b6   : > { %v810_v59 = vsel %vm809_vm0, %v794_v2, %v808_v4  ;;  %v812_v8 = vsel %vm809_vm0, %v796_v54, %v811_v6  ;;  %v800_v31 = vpop.permute.xlu1 %799  ;;  %v995_v57 = vpop.permute.xlu0 %994 }
 0x1b7   : > { %821 = vst [vmem:[#allocation2 + $0x40] sm:$0xff] %v810_v59  ;;  %822 = vst [vmem:[#allocation2 + $0x48] sm:$0xff] %v812_v8  ;;  %v806_v9 = vrot.slane %v800_v31, 4  ;;  %v1002_v45 = vrot.slane %v995_v57, 4 }
 0x1b9   : > { %v813_v60 = vsel %vm614_vm9, %v805_v56, %v806_v9  ;;  %v815_v10 = vsel %vm614_vm9, %v806_v9, %v807_v32 }
 0x1ba   : > { %v814_v36 = vsel %vm809_vm0, %v798_v27, %v813_v60  ;;  %v816_v44 = vsel %vm809_vm0, %v800_v31, %v815_v10  ;;  %v887_v11 = vpop.permute.xlu1 %886  ;;  %v999_v14 = vpop.permute.xlu0 %998 }
 0x1bb   : > { %823 = vst [vmem:[#allocation2 + $0x50] sm:$0xff] %v814_v36  ;;  %824 = vst [vmem:[#allocation2 + $0x58] sm:$0xff] %v816_v44  ;;  %v896_v13 = vrot.slane %v887_v11, 4  ;;  %v1004_v34 = vrot.slane %v999_v14, 4 }
 0x1bd   : > { %v901_v15 = vsel %vm614_vm9, %v896_v13, %v897_v12 }
 0x1be   : > { %v903_v1 = vsel %vm902_vm7, %v887_v11, %v901_v15  ;;  %v891_v62 = vpop.permute.xlu1 %890 }
 0x1bf   : > { %914 = vst [vmem:[#allocation2 + $0x60] sm:$0xff] %v903_v1  ;;  %v898_v17 = vrot.slane %v891_v62, 4  ;;  %v1083_v42 = vpop.permute.xlu0 %1082 }
 0x1c0   : > { %v1091_v19 = vrot.slane %v1083_v42, 4 }
 0x1c1   : > { %v904_v22 = vsel %vm614_vm9, %v897_v12, %v898_v17  ;;  %v906_v3 = vsel %vm614_vm9, %v898_v17, %v899_v47 }
 0x1c2   : > { %v905_v51 = vsel %vm902_vm7, %v889_v25, %v904_v22  ;;  %v907_v52 = vsel %vm902_vm7, %v891_v62, %v906_v3  ;;  %v993_v18 = vpop.permute.xlu1 %992 }
 0x1c3   : > { %915 = vst [vmem:[#allocation2 + $0x68] sm:$0xff] %v905_v51  ;;  %916 = vst [vmem:[#allocation2 + $0x70] sm:$0xff] %v907_v52  ;;  %v1001_v5 = vrot.slane %v993_v18, 4 }
 0x1c5   : > { %v1005_v20 = vsel %vm614_vm9, %v1000_v61, %v1001_v5  ;;  %v1007_v63 = vsel %vm614_vm9, %v1001_v5, %v1002_v45 }
 0x1c6   : > { %v1006_v7 = vsel %vm841_vm3, %v991_v35, %v1005_v20  ;;  %v1008_v0 = vsel %vm841_vm3, %v993_v18, %v1007_v63  ;;  %v997_v21 = vpop.permute.xlu1 %996 }
 0x1c7   : > { %1017 = vst [vmem:[#allocation2 + $0xa0] sm:$0xff] %v1006_v7  ;;  %1018 = vst [vmem:[#allocation2 + $0xa8] sm:$0xff] %v1008_v0  ;;  %v1003_v2 = vrot.slane %v997_v21, 4  ;;  %v1087_v23 = vpop.permute.xlu0 %1086 }
 0x1c8   : > { %v1093_v16 = vrot.slane %v1087_v23, 4 }
 0x1c9   : > { %v1009_v27 = vsel %vm614_vm9, %v1002_v45, %v1003_v2  ;;  %v1011_v24 = vsel %vm614_vm9, %v1003_v2, %v1004_v34 }
 0x1ca   : > { %v1010_v25 = vsel %vm841_vm3, %v995_v57, %v1009_v27  ;;  %v1012_v43 = vsel %vm841_vm3, %v997_v21, %v1011_v24  ;;  %v1081_v30 = vpop.permute.xlu1 %1080  ;;  %vm1127_vm3 = vcmask 785408  }
 0x1cb   : > { %1019 = vst [vmem:[#allocation2 + $0xb0] sm:$0xff] %v1010_v25  ;;  %1020 = vst [vmem:[#allocation2 + $0xb8] sm:$0xff] %v1012_v43  ;;  %v1090_v33 = vrot.slane %v1081_v30, 4  ;;  %v1112_v37 = vpop.permute.xlu0 %1111 }
 0x1cc   : > { %v1121_v53 = vrot.slane %v1112_v37, 4 }
 0x1cd   : > { %v1095_v38 = vsel %vm614_vm9, %v1090_v33, %v1091_v19 }
 0x1ce   : > { %v1096_v39 = vsel %vm748_vm14, %v1081_v30, %v1095_v38  ;;  %v1085_v40 = vpop.permute.xlu1 %1084 }
 0x1cf   : > { %1107 = vst [vmem:[#allocation2 + $0xc0] sm:$0xff] %v1096_v39  ;;  %v1092_v41 = vrot.slane %v1085_v40, 4  ;;  %v1116_v46 = vpop.permute.xlu0 %1115 }
 0x1d0   : > { %v1123_v35 = vrot.slane %v1116_v46, 4 }
 0x1d1   : > { %v1097_v29 = vsel %vm614_vm9, %v1091_v19, %v1092_v41  ;;  %v1099_v47 = vsel %vm614_vm9, %v1092_v41, %v1093_v16 }
 0x1d2   : > { %v1098_v48 = vsel %vm748_vm14, %v1083_v42, %v1097_v29  ;;  %v1100_v49 = vsel %vm748_vm14, %v1085_v40, %v1099_v47  ;;  %v1089_v50 = vpop.permute.xlu1 %1088 }
 0x1d3   : > { %1108 = vst [vmem:[#allocation2 + $0xc8] sm:$0xff] %v1098_v48  ;;  %1109 = vst [vmem:[#allocation2 + $0xd0] sm:$0xff] %v1100_v49  ;;  %v1094_v26 = vrot.slane %v1089_v50, 4  ;;  %v1120_v28 = vpop.permute.xlu0 %1119 }
 0x1d4   : > { %v1125_v59 = vrot.slane %v1120_v28, 4 }
 0x1d5   : > { %v1101_v54 = vsel %vm614_vm9, %v1093_v16, %v1094_v26 }
 0x1d6   : > { %v1102_v55 = vsel %vm748_vm14, %v1087_v23, %v1101_v54  ;;  %v1114_v56 = vpop.permute.xlu1 %1113 }
 0x1d7   : > { %1110 = vst [vmem:[#allocation2 + $0xd8] sm:$0xff] %v1102_v55  ;;  %v1122_v58 = vrot.slane %v1114_v56, 4  ;;  %v1205_v9 = vpop.permute.xlu0 %1204 }
 0x1d8   : > { %v1213_v13 = vrot.slane %v1205_v9, 4 }
 0x1d9   : > { %v1126_v4 = vsel %vm614_vm9, %v1121_v53, %v1122_v58  ;;  %v1129_v6 = vsel %vm614_vm9, %v1122_v58, %v1123_v35 }
 0x1da   : > { %v1128_v8 = vsel %vm1127_vm3, %v1112_v37, %v1126_v4  ;;  %v1130_v31 = vsel %vm1127_vm3, %v1114_v56, %v1129_v6  ;;  %v1118_v32 = vpop.permute.xlu1 %1117 }
 0x1db   : > { %1139 = vst [vmem:[#allocation2 + $0xe0] sm:$0xff] %v1128_v8  ;;  %1140 = vst [vmem:[#allocation2 + $0xe8] sm:$0xff] %v1130_v31  ;;  %v1124_v57 = vrot.slane %v1118_v32, 4  ;;  %v1209_v12 = vpop.permute.xlu0 %1208 }
 0x1dc   : > { %v1215_v1 = vrot.slane %v1209_v12, 4 }
 0x1dd   : > { %v1131_v60 = vsel %vm614_vm9, %v1123_v35, %v1124_v57  ;;  %v1133_v10 = vsel %vm614_vm9, %v1124_v57, %v1125_v59 }
 0x1de   : > { %v1132_v36 = vsel %vm1127_vm3, %v1116_v46, %v1131_v60  ;;  %v1134_v44 = vsel %vm1127_vm3, %v1118_v32, %v1133_v10  ;;  %v1203_v11 = vpop.permute.xlu1 %1202 }
 0x1df   : > { %1141 = vst [vmem:[#allocation2 + $0xf0] sm:$0xff] %v1132_v36  ;;  %1142 = vst [vmem:[#allocation2 + $0xf8] sm:$0xff] %v1134_v44  ;;  %v1212_v14 = vrot.slane %v1203_v11, 4 }
 0x1e1   : > { %v1217_v15 = vsel %vm614_vm9, %v1212_v14, %v1213_v13 }
 0x1e2   : > { %v1218_v62 = vsel %vm552_vm11, %v1203_v11, %v1217_v15  ;;  %v1207_v17 = vpop.permute.xlu1 %1206 }
 0x1e3   : > { %1229 = vst [vmem:[#allocation2 + $0x100] sm:$0xff] %v1218_v62  ;;  %v1214_v22 = vrot.slane %v1207_v17, 4 }
 0x1e5   : > { %v1219_v3 = vsel %vm614_vm9, %v1213_v13, %v1214_v22  ;;  %v1221_v42 = vsel %vm614_vm9, %v1214_v22, %v1215_v1 }
 0x1e6   : > { %v1220_v51 = vsel %vm552_vm11, %v1205_v9, %v1219_v3  ;;  %v1222_v52 = vsel %vm552_vm11, %v1207_v17, %v1221_v42  ;;  %v1211_v18 = vpop.permute.xlu1 %1210 }
 0x1e7   : > { %1230 = vst [vmem:[#allocation2 + $0x108] sm:$0xff] %v1220_v51  ;;  %1231 = vst [vmem:[#allocation2 + $0x110] sm:$0xff] %v1222_v52  ;;  %v1216_v61 = vrot.slane %v1211_v18, 4 }
 0x1e9   : > { %v1223_v45 = vsel %vm614_vm9, %v1215_v1, %v1216_v61 }
 0x1ea   : > { %v1224_v5 = vsel %vm552_vm11, %v1209_v12, %v1223_v45 }
 0x1eb   : > { %1232 = vst [vmem:[#allocation2 + $0x118] sm:$0xff] %v1224_v5 }
 0x1ec PF: > { %v1234_v20 = vld [vmem:[#allocation2] sm:$0xff]  ;;  %v1235_v34 = vld [vmem:[#allocation2 + $0x8] sm:$0xff]  ;;  %v2287_v27 = vmov 0   ;;  %vm1454_vm9 = vcmask 1043456   ;;  %v1236_v32 = vld [vmem:[#allocation2 + $0x10] sm:$0xff]  ;;  %vm1450_vm11 = vcmask 588800  }
 0x1ed   : > { %v1238_v63 = vld [vmem:[#allocation2 + $0x20] sm:$0xff]  ;;  %v1239_v0 = vld [vmem:[#allocation2 + $0x28] sm:$0xff]  ;;  %1511 = vmatprep.mubr.bf16.mxu0 %v2287_v27  ;;  %1552 = vmatprep.mubr.bf16.mxu1 %v2287_v27  ;;  %v1240_v9 = vld [vmem:[#allocation2 + $0x30] sm:$0xff] }
 0x1ee   : > { %v1926_v7 = vcombine.high %v1234_v20, %v1238_v63  ;;  %v1925_v21 = vcombine.low %v1234_v20, %v1238_v63  ;;  %v1242_v2 = vld [vmem:[#allocation2 + $0x40] sm:$0xff]  ;;  %v1928_v24 = vcombine.high %v1235_v34, %v1239_v0  ;;  %v1927_v25 = vcombine.low %v1235_v34, %v1239_v0  ;;  %v1243_v30 = vld [vmem:[#allocation2 + $0x48] sm:$0xff]  ;;  %2104 = vset.pattern.permute.xlu0 %v2287_v27  ;;  %v1237_v57 = vld [vmem:[#allocation2 + $0x18] sm:$0xff] }
 0x1ef   : > { %v1246_v23 = vld [vmem:[#allocation2 + $0x60] sm:$0xff]  ;;  %v1247_v19 = vld [vmem:[#allocation2 + $0x68] sm:$0xff]  ;;  %v1241_v60 = vld [vmem:[#allocation2 + $0x38] sm:$0xff]  ;;  %v1930_v44 = vcombine.high %v1236_v32, %v1240_v9  ;;  %v1929_v17 = vcombine.low %v1236_v32, %v1240_v9 }
 0x1f0   : > { %v1934_v43 = vcombine.high %v1242_v2, %v1246_v23  ;;  %v1250_v33 = vld [vmem:[#allocation2 + $0x80] sm:$0xff]  ;;  %1479 = vmatprep.subr.bf16.mxu0 %v1926_v7  ;;  %v1936_v37 = vcombine.high %v1243_v30, %v1247_v19  ;;  %v1251_v16 = vld [vmem:[#allocation2 + $0x88] sm:$0xff]  ;;  %1520 = vmatprep.subr.bf16.mxu1 %v1928_v24  ;;  %v1933_v40 = vcombine.low %v1242_v2, %v1246_v23  ;;  %v1244_v13 = vld [vmem:[#allocation2 + $0x50] sm:$0xff] }
 0x1f1   : > { %v1254_v38 = vld [vmem:[#allocation2 + $0xa0] sm:$0xff]  ;;  %v1255_v39 = vld [vmem:[#allocation2 + $0xa8] sm:$0xff]  ;;  %1480 = vmatpush1.bf16.msra.mxu0 %v1925_v21  ;;  %1521 = vmatpush1.bf16.msra.mxu1 %v1927_v25  ;;  %v1935_v41 = vcombine.low %v1243_v30, %v1247_v19  ;;  %v1932_v12 = vcombine.high %v1237_v57, %v1241_v60  ;;  %v1248_v14 = vld [vmem:[#allocation2 + $0x70] sm:$0xff]  ;;  %v1931_v22 = vcombine.low %v1237_v57, %v1241_v60 }
 0x1f2   : > { %1481 = vmatprep.subr.bf16.mxu0 %v1934_v43  ;;  %v1942_v46 = vcombine.high %v1250_v33, %v1254_v38  ;;  %1522 = vmatprep.subr.bf16.mxu1 %v1936_v37  ;;  %v1944_v29 = vcombine.high %v1251_v16, %v1255_v39  ;;  %v1258_v47 = vld [vmem:[#allocation2 + $0xc0] sm:$0xff]  ;;  %v1259_v49 = vld [vmem:[#allocation2 + $0xc8] sm:$0xff]  ;;  %v1941_v26 = vcombine.low %v1250_v33, %v1254_v38  ;;  %v1245_v15 = vld [vmem:[#allocation2 + $0x58] sm:$0xff] }
 0x1f3   : > { %v1262_v48 = vld [vmem:[#allocation2 + $0xe0] sm:$0xff]  ;;  %v1263_v50 = vld [vmem:[#allocation2 + $0xe8] sm:$0xff]  ;;  %v1943_v28 = vcombine.low %v1251_v16, %v1255_v39  ;;  %v1249_v1 = vld [vmem:[#allocation2 + $0x78] sm:$0xff]  ;;  %v1938_v3 = vcombine.high %v1244_v13, %v1248_v14  ;;  %v1937_v45 = vcombine.low %v1244_v13, %v1248_v14 }
 0x1f4   : > { %v1950_v53 = vcombine.high %v1258_v47, %v1262_v48  ;;  %v1952_v54 = vcombine.high %v1259_v49, %v1263_v50  ;;  %v1266_v35 = vld [vmem:[#allocation2 + $0x100] sm:$0xff]  ;;  %v1267_v55 = vld [vmem:[#allocation2 + $0x108] sm:$0xff]  ;;  %v1949_v56 = vcombine.low %v1258_v47, %v1262_v48  ;;  %v1951_v4 = vcombine.low %v1259_v49, %v1263_v50  ;;  %v1252_v51 = vld [vmem:[#allocation2 + $0x90] sm:$0xff] }
 0x1f5   : > { %1482 = vmatpush1.bf16.msra.mxu0 %v1933_v40  ;;  %1523 = vmatpush1.bf16.msra.mxu1 %v1935_v41  ;;  %v1643_v58 = vld [vmem:[%s2507_s5] sm:$0xff]  ;;  %v1958_v6 = vcombine.high %v1266_v35, %v1266_v35  ;;  %v1957_v59 = vcombine.low %v1266_v35, %v1266_v35  ;;  %v1960_v8 = vcombine.high %v1267_v55, %v1267_v55  ;;  %v1657_v10 = vld [vmem:[%s2527_s26] sm:$0xff] }
 0x1f6   : > { %1483 = vmatprep.subr.bf16.mxu0 %v1942_v46  ;;  %1524 = vmatprep.subr.bf16.mxu1 %v1944_v29  ;;  %v1959_v31 = vcombine.low %v1267_v55, %v1267_v55  ;;  %v1233_v62 = vld [vmem:[%s2499_s21] sm:$0xf]  ;;  %v1940_v42 = vcombine.high %v1245_v15, %v1249_v1  ;;  %v1256_v52 = vld [vmem:[#allocation2 + $0xb0] sm:$0xff]  ;;  %v1253_v18 = vld [vmem:[#allocation2 + $0x98] sm:$0xff]  ;;  %v1939_v5 = vcombine.low %v1245_v15, %v1249_v1 }
 0x1f7   : > { %1646 = vperm.xlu0 %2104, %v1643_v58   ;;  %v1456_v36 = vsel %vm1454_vm9, %v1957_v59, 0  ;;  %v1257_v61 = vld [vmem:[#allocation2 + $0xb8] sm:$0xff]  ;;  %v1946_v20 = vcombine.high %v1252_v51, %v1256_v52  ;;  %v1260_v34 = vld [vmem:[#allocation2 + $0xd0] sm:$0xff]  ;;  %v1945_v2 = vcombine.low %v1252_v51, %v1256_v52 }
 0x1f8   : > { %v1462_v11 = vsel %vm1454_vm9, %v1959_v31, 0  ;;  %v1948_v63 = vcombine.high %v1253_v18, %v1257_v61  ;;  %v1264_v7 = vld [vmem:[#allocation2 + $0xf0] sm:$0xff]  ;;  %v1261_v0 = vld [vmem:[#allocation2 + $0xd8] sm:$0xff]  ;;  %v1947_v23 = vcombine.low %v1253_v18, %v1257_v61 }
 0x1f9   : > { %1484 = vmatpush1.bf16.msra.mxu0 %v1941_v26  ;;  %1525 = vmatpush1.bf16.msra.mxu1 %v1943_v28  ;;  %v1265_v21 = vld [vmem:[#allocation2 + $0xf8] sm:$0xff]  ;;  %v1954_v24 = vcombine.high %v1260_v34, %v1264_v7  ;;  %v1268_v43 = vld [vmem:[#allocation2 + $0x110] sm:$0xff]  ;;  %v1953_v19 = vcombine.low %v1260_v34, %v1264_v7 }
 0x1fa   : > { %1485 = vmatprep.subr.bf16.mxu0 %v1950_v53  ;;  %1526 = vmatprep.subr.bf16.mxu1 %v1952_v54  ;;  %v1956_v25 = vcombine.high %v1261_v0, %v1265_v21  ;;  %v1269_v30 = vld [vmem:[#allocation2 + $0x118] sm:$0xff]  ;;  %v1955_v33 = vcombine.low %v1261_v0, %v1265_v21  ;;  %v1962_v37 = vcombine.high %v1268_v43, %v1268_v43 }
 0x1fb   : > { %1660 = vperm.xlu0 %2104, %v1657_v10   ;;  %v1961_v38 = vcombine.low %v1268_v43, %v1268_v43  ;;  %v1964_v16 = vcombine.high %v1269_v30, %v1269_v30 }
 0x1fd   : > { %1486 = vmatpush1.bf16.msra.mxu0 %v1949_v56  ;;  %1527 = vmatpush1.bf16.msra.mxu1 %v1951_v4  ;;  %v1468_v39 = vsel %vm1454_vm9, %v1961_v38, 0 }
 0x1fe   : > { %1965 = vmatprep.subr.msk.bf16.mxu0 %vm1454_vm9, %v1958_v6  ;;  %1967 = vmatprep.subr.msk.bf16.mxu1 %vm1454_vm9, %v1960_v8 }
 0x201   : > { %1488 = vmatpush1.bf16.msra.mxu0 %v1456_v36  ;;  %1529 = vmatpush1.bf16.msra.mxu1 %v1462_v11 }
 0x202   : > { %1561 = vmatprep.subr.bf16.mxu0 %v1930_v44  ;;  %1602 = vmatprep.subr.bf16.mxu1 %v1932_v12 }
 0x204   : > { %1966 = vmatmul.mubr.msk.bf16.vlgmr.msra.gmra.mrb[0].mxu0 %vm1450_vm11, %v1233_v62  ;;  %1968 = vmatmul.mubr.msk.bf16.vlgmr.msra.gmra.mrb[0].mxu1 %vm1450_vm11, %v1233_v62 }
 0x205   : > { %1562 = vmatpush1.bf16.msra.mxu0 %v1929_v17  ;;  %1603 = vmatpush1.bf16.msra.mxu1 %v1931_v22 }
 0x206   : > { %1563 = vmatprep.subr.bf16.mxu0 %v1938_v3  ;;  %1604 = vmatprep.subr.bf16.mxu1 %v1940_v42 }
 0x207   : > { %1593 = vmatprep.mubr.bf16.mxu0 %v2287_v27  ;;  %1634 = vmatprep.mubr.bf16.mxu1 %v2287_v27  ;;  %v1963_v27 = vcombine.low %v1269_v30, %v1269_v30 }
 0x209   : > { %1564 = vmatpush1.bf16.msra.mxu0 %v1937_v45  ;;  %1605 = vmatpush1.bf16.msra.mxu1 %v1939_v5  ;;  %v1474_v40 = vsel %vm1454_vm9, %v1963_v27, 0 }
 0x20a   : > { %1565 = vmatprep.subr.bf16.mxu0 %v1946_v20  ;;  %1606 = vmatprep.subr.bf16.mxu1 %v1948_v63 }
 0x20d   : > { %1566 = vmatpush1.bf16.msra.mxu0 %v1945_v2  ;;  %1607 = vmatpush1.bf16.msra.mxu1 %v1947_v23 }
 0x20e   : > { %1567 = vmatprep.subr.bf16.mxu0 %v1954_v24  ;;  %1608 = vmatprep.subr.bf16.mxu1 %v1956_v25 }
 0x211   : > { %1568 = vmatpush1.bf16.msra.mxu0 %v1953_v19  ;;  %1609 = vmatpush1.bf16.msra.mxu1 %v1955_v33 }
 0x212   : > { %1969 = vmatprep.subr.msk.bf16.mxu0 %vm1454_vm9, %v1962_v37  ;;  %1971 = vmatprep.subr.msk.bf16.mxu1 %vm1454_vm9, %v1964_v16 }
 0x215   : > { %1570 = vmatpush1.bf16.msra.mxu0 %v1468_v39  ;;  %1611 = vmatpush1.bf16.msra.mxu1 %v1474_v40 }
 0x218   : > { %1970 = vmatmul.mubr.msk.bf16.vlgmr.msra.gmra.mrb[4].mxu0 %vm1450_vm11, %v1233_v62  ;;  %1972 = vmatmul.mubr.msk.bf16.vlgmr.msra.gmra.mrb[4].mxu1 %vm1450_vm11, %v1233_v62 }
 0x276   : > { %v1647_v41 = vpop.permute.xlu0 %1646 }
 0x27a   : > { %v1661_v29 = vpop.permute.xlu0 %1660 }
 0x2d7   : > { %v1513_v46 = vpop.f32.mrb[0].mxu0  ;;  %v1554_v48 = vpop.f32.mrb[0].mxu1 }
 0x2d8   : > { %v1649_v47 = vmul.f32 %v1647_v41, %v1513_v46  ;;  %v1515_v49 = vpop.f32.mrb[1].mxu0  ;;  %v1651_v50 = vmul.f32 %v1647_v41, %v1554_v48  ;;  %v1556_v28 = vpop.f32.mrb[1].mxu1 }
 0x2d9   : > { %v1650_v26 = vmul.f32 %v1647_v41, %v1515_v49  ;;  %v1517_v53 = vpop.f32.mrb[2].mxu0  ;;  %v1652_v54 = vmul.f32 %v1647_v41, %v1556_v28  ;;  %v1558_v35 = vpop.f32.mrb[2].mxu1 }
 0x2da   : > { %v1663_v55 = vadd.f32 %v1661_v29, %v1649_v47  ;;  %v1518_v56 = vpop.f32.mrb[3].mxu0  ;;  %v1665_v4 = vadd.f32 %v1661_v29, %v1651_v50  ;;  %v1559_v6 = vpop.f32.mrb[3].mxu1 }
 0x2db   : > { %v1664_v58 = vadd.f32 %v1661_v29, %v1650_v26  ;;  %v1666_v59 = vadd.f32 %v1661_v29, %v1652_v54 }
 0x2dc   : > { %v1671_v8 = vmax.f32 %v1663_v55, 0.0  ;;  %v1673_v32 = vmax.f32 %v1665_v4, 0.0 }
 0x2dd   : > { %v1672_v31 = vmax.f32 %v1664_v58, 0.0  ;;  %v1674_v9 = vmax.f32 %v1666_v59, 0.0 }
 0x2df   : > { %v1995_v57 = vpack.c.bf16 %v1672_v31, %v1671_v8  ;;  %v1996_v60 = vpack.c.bf16 %v1674_v9, %v1673_v32 }
 0x2e1   : > { %1711 = vst [vmem:[%s2525_s15] sm:$0xff] %v1995_v57  ;;  %1712 = vst [vmem:[%s2525_s15 + $0x8] sm:$0xff] %v1996_v60 }
 0x2eb   : > { %v1595_v10 = vpop.f32.mrb[4].mxu0  ;;  %v1636_v44 = vpop.f32.mrb[4].mxu1 }
 0x2ec   : > { %v1653_v36 = vmul.f32 %v1647_v41, %v1595_v10  ;;  %v1597_v11 = vpop.f32.mrb[5].mxu0  ;;  %v1655_v12 = vmul.f32 %v1647_v41, %v1636_v44  ;;  %v1638_v14 = vpop.f32.mrb[5].mxu1 }
 0x2ed   : > { %v1654_v13 = vmul.f32 %v1647_v41, %v1597_v11  ;;  %v1599_v15 = vpop.f32.mrb[6].mxu0  ;;  %v1656_v62 = vmul.f32 %v1647_v41, %v1638_v14  ;;  %v1640_v17 = vpop.f32.mrb[6].mxu1 }
 0x2ee   : > { %v1667_v1 = vadd.f32 %v1661_v29, %v1653_v36  ;;  %v1600_v22 = vpop.f32.mrb[7].mxu0  ;;  %v1669_v3 = vadd.f32 %v1661_v29, %v1655_v12  ;;  %v1641_v51 = vpop.f32.mrb[7].mxu1 }
 0x2ef   : > { %v1668_v42 = vadd.f32 %v1661_v29, %v1654_v13  ;;  %v1670_v18 = vadd.f32 %v1661_v29, %v1656_v62 }
 0x2f0   : > { %v1675_v52 = vmax.f32 %v1667_v1, 0.0  ;;  %v1677_v61 = vmax.f32 %v1669_v3, 0.0 }
 0x2f1   : > { %v1676_v45 = vmax.f32 %v1668_v42, 0.0  ;;  %v1678_v5 = vmax.f32 %v1670_v18, 0.0 }
 0x2f3   : > { %v1997_v20 = vpack.c.bf16 %v1676_v45, %v1675_v52  ;;  %v1998_v63 = vpack.c.bf16 %v1678_v5, %v1677_v61 }
 0x2f5   : > { %1713 = vst [vmem:[%s2525_s15 + $0x10] sm:$0xff] %v1997_v20  ;;  %1714 = vst [vmem:[%s2525_s15 + $0x18] sm:$0xff] %v1998_v63 }
 0x2f6 PF: > { %s20_s22 = sadd.s32 1, %s2273_s22   ;;  %s3089_s19 = sld [smem:[#allocation10_spill]] }
 0x2f7   : > { %p17_p0 = scmp.ge.s32.totalorder %s20_s22, 10   ;;  %s3090_s21 = sld [smem:[#allocation11_spill]] }
 0x2f8   : > { %s3091_s5 = sld [smem:[#allocation12_spill]]  ;;  %s3092_s15 = smov %s2249_s16 }
 0x2f9   : > { %s3093_s16 = smov %s2253_s17  ;;  %s3094_s17 = smov %s2367_s28 }
 0x2fa   : > { %s3095_s18 = smov %s2265_s20  ;;  %19 = sbr.rel (!%p17_p0) target bundleno = 9 (0x9), region = 107 }
 0x2fd   : > { %s3096_s20 = smov %s3090_s21 }
 0x2fe   : > { %s3097_s21 = smov %s3091_s5 }
 0x301   :  { %1744 = vsyncpa [#allocation4], 1 }
 0x302   :  { %1746 = vsyncpa [#allocation4 + $0x1], 1 }
 0x303   :  { %1747 = vsyncpa [#allocation6], 1 }
 0x304   :  { %1749 = vsyncpa [#allocation6 + $0x1], 1 }

// kernel: _lambda_.5
= control target key start
LH: loop header
LB: loop body
LE: loop exit
PB: predicated region body
PF: predicated region fallthrough
CT: control target
= control target key end

     0   :  { %s6034_s15 = smov 0   ;;  %s6036_s16 = smov 0   ;;  %s9421_s0 = inlined_call_operand.vmem [shape: bf16[2,8,4096], index: 0, kind: input, shape index: {}]   ;;  %s9422_s1 = inlined_call_operand.vmem [shape: bf16[4,72], index: 1, kind: input, shape index: {}]   ;;  %s9423_s2 = inlined_call_operand.vmem [shape: f32[4,1], index: 2, kind: input, shape index: {}]   ;;  %s9424_s3 = inlined_call_operand.vmem [shape: f32[4,1], index: 3, kind: input, shape index: {}]   ;;  %s9425_s4 = inlined_call_operand.vmem [shape: f32[2,4,4096], index: 4, kind: output, shape index: {}]  }
   0x1   :  { %s6038_s17 = smov 0  }
   0x2 LB: > { %s26_s18 = sadd.s32 1, %s5997_s16  ;;  %p5459_p0 = scmp.ge.s32.totalorder %s6001_s17, 1  ;;  %s6001_s17 = sphi %s6038_s17, %s14_s17   ;;  %s5997_s16 = sphi %s6036_s16, %s9725_s16   ;;  %s5993_s15 = sphi %s6034_s15, %s9724_s15  }
   0x3   : > { %p28_p1 = scmp.ge.s32.totalorder %s26_s18, 2  ;;  %p203_p2 = scmp.lt.s32.totalorder %s6001_s17, 3 }
   0x5   : > { %s9727_s18 = smov (%p28_p1, %s26_s18), 0  ;;  %p204_p3 = pnand %p5459_p0, %p203_p2 }
   0x7   : > { %207 = sbr.rel (%p204_p3) target bundleno = 936 (0x3a8), region = 36 }
   0xe   : > { %v406_v0 = vlaneseq  ;;  %v9426_v1 = vmov 0   ;;  %s6004_s19 = smov 63   ;;  %s6005_s20 = smov 65  }
   0xf   : > { %4511 = vmatprep.mubr.bf16.mxu0 %v9426_v1  ;;  %4552 = vmatprep.mubr.bf16.mxu1 %v9426_v1  ;;  %s6006_s21 = smov 127   ;;  %s6007_s22 = smov 1  }
  0x10   : > { %v6056_v2 = vand.u32 127, %v406_v0  ;;  %v952_v3 = vshrl.u32 %v406_v0, 7  ;;  %5928 = vset.pattern.permute.xlu0 %v9426_v1  ;;  %5929 = vset.pattern.permute.xlu1 %v9426_v1  ;;  %p245_p4 = scmp.lt.s32.totalorder %s5993_s15, 1  ;;  %s6008_s27 = smov 64  }
  0x12   : > { %9473 = vst [vmem:[#allocation3_spill] sm:$0xff] %v6056_v2  ;;  %v6061_v4 = vadd.s32 256, %v6056_v2  ;;  %v6064_v5 = vadd.s32 384, %v6056_v2  ;;  %v6066_v6 = vsub.s32 0, %v952_v3  ;;  %v6068_v7 = vsub.s32 4, %v952_v3  ;;  %s9729_s15 = smov (!%p245_p4, %s5993_s15), 1 }
  0x13   : > { %v6071_v8 = vadd.s32 128, %v6056_v2  ;;  %v443_v9 = vand.u32 63, %v6056_v2  ;;  %v6075_v10 = vadd.s32 512, %v6056_v2  ;;  %v6078_v11 = vadd.s32 640, %v6056_v2  ;;  %s5791_s23 = sshll.u32 %s9729_s15, 7 }
  0x14   : > { %v457_v12 = vand.u32 63, %v6061_v4  ;;  %v464_v13 = vand.u32 63, %v6064_v5  ;;  %v6083_v14 = vadd.s32 768, %v6056_v2  ;;  %v6086_v15 = vadd.s32 896, %v6056_v2  ;;  %s6460_s26 = scalar_lea.vmem %s9421_s0, %s5791_s23  ;;  %s9342_s14 = scalar_lea.vmem %s9425_s4, %s5791_s23 }
  0x15   : > { %v450_v16 = vand.u32 63, %v6071_v8  ;;  %vm6091_vm0 = vcmp.ge.s32.totalorder %v443_v9, 1  ;;  %v471_v18 = vand.u32 63, %v6075_v10  ;;  %v478_v19 = vand.u32 63, %v6078_v11  ;;  %v6488_v57 = vld [vmem:[%s6460_s26 + $0x8] sm:$0xff] }
  0x16   : > { %vm825_vm1 = vcmp.ge.s32.totalorder %v457_v12, 1  ;;  %vm826_vm2 = vcmp.ge.s32.totalorder %v464_v13, 1  ;;  %v485_v20 = vand.u32 63, %v6083_v14  ;;  %v492_v21 = vand.u32 63, %v6086_v15  ;;  %v5872_v62 = vld [vmem:[%s6460_s26 + $0xc] sm:$0xff] }
  0x17   : > { %vm920_vm3 = vmpackc.low %vm826_vm2, %vm825_vm1  ;;  %vm824_vm4 = vcmp.ge.s32.totalorder %v450_v16, 1  ;;  %vm6107_vm5 = vcmp.ge.s32.totalorder %v471_v18, 1  ;;  %vm6113_vm6 = vcmp.ge.s32.totalorder %v478_v19, 1  ;;  %v6118_v24 = vadd.s32 1024, %v6056_v2 }
  0x18   : > { %v936_v25 = vsel %vm920_vm3, 65537, %v9426_v1  ;;  %vm919_vm7 = vmpackc.low %vm824_vm4, %vm6091_vm0  ;;  %v6124_v26 = vadd.s32 1152, %v6056_v2  ;;  %vm6140_vm9 = vcmp.ge.s32.totalorder %v485_v20, 1  ;;  %vm6146_vm10 = vcmp.ge.s32.totalorder %v492_v21, 1 }
  0x19   : > { %v6127_v27 = vrot.slane %v936_v25, %v6066_v6  ;;  %v935_v28 = vsel %vm919_vm7, 65537, %v9426_v1  ;;  %vm921_vm8 = vmpackc.low %vm6113_vm6, %vm6107_vm5  ;;  %v499_v29 = vand.u32 63, %v6118_v24  ;;  %v6152_v34 = vrot.slane %v936_v25, %v6068_v7 }
  0x1a   : > { %v6136_v30 = vrot.slane %v935_v28, %v6066_v6  ;;  %v506_v33 = vand.u32 63, %v6124_v26  ;;  %v6157_v35 = vrot.slane %v935_v28, %v6068_v7  ;;  %v937_v36 = vsel %vm921_vm8, 65537, %v9426_v1  ;;  %vm922_vm11 = vmpackc.low %vm6146_vm10, %vm6140_vm9 }
  0x1b   : > { %1083 = vrot.lane.b32.xlu1 %v6127_v27, %s6004_s19  ;;  %v417_v37 = vadd.s32 1280, %v6056_v2  ;;  %vm6169_vm12 = vcmp.ge.s32.totalorder %v499_v29, 1  ;;  %v418_v39 = vadd.s32 1408, %v6056_v2  ;;  %v419_v42 = vadd.s32 1536, %v6056_v2 }
  0x1c   : > { %1079 = vrot.lane.b32.xlu0 %v6136_v30, %s6004_s19  ;;  %vm6176_vm13 = vcmp.ge.s32.totalorder %v506_v33, 1  ;;  %v420_v43 = vadd.s32 1664, %v6056_v2  ;;  %v6185_v44 = vrot.slane %v937_v36, %v6068_v7  ;;  %v6190_v46 = vrot.slane %v937_v36, %v6066_v6 }
  0x1d   : > { %v513_v41 = vand.u32 63, %v417_v37  ;;  %v520_v45 = vand.u32 63, %v418_v39  ;;  %v938_v47 = vsel %vm922_vm11, 65537, %v9426_v1  ;;  %vm923_vm14 = vmpackc.low %vm6176_vm13, %vm6169_vm12  ;;  %v421_v48 = vadd.s32 1792, %v6056_v2 }
  0x1e   : > { %v422_v49 = vadd.s32 1920, %v6056_v2  ;;  %v527_v52 = vand.u32 63, %v419_v42  ;;  %v534_v53 = vand.u32 63, %v420_v43  ;;  %v6210_v54 = vrot.slane %v938_v47, %v6068_v7 }
  0x1f   : > { %1085 = vrot.lane.b32.xlu1 %v6152_v34, %s6004_s19  ;;  %vm6199_vm15 = vcmp.ge.s32.totalorder %v513_v41, 1  ;;  %vm6203_vm0 = vcmp.ge.s32.totalorder %v520_v45, 1  ;;  %v6215_v55 = vrot.slane %v938_v47, %v6066_v6  ;;  %v939_v56 = vsel %vm923_vm14, 65537, %v9426_v1 }
  0x20   : > { %1081 = vrot.lane.b32.xlu0 %v6157_v35, %s6004_s19  ;;  %vm924_vm1 = vmpackc.low %vm6203_vm0, %vm6199_vm15  ;;  %vm6222_vm2 = vcmp.ge.s32.totalorder %v527_v52, 1  ;;  %vm6226_vm3 = vcmp.ge.s32.totalorder %v534_v53, 1  ;;  %v541_v59 = vand.u32 63, %v421_v48  ;;  %v548_v60 = vand.u32 63, %v422_v49 }
  0x21   : > { %v6233_v61 = vrot.slane %v939_v56, %v6068_v7  ;;  %vm6235_vm4 = vcmp.le.s32.totalorder %v513_v41, 62  ;;  %v6242_v63 = vrot.slane %v939_v56, %v6066_v6  ;;  %v940_v0 = vsel %vm924_vm1, 65537, %v9426_v1  ;;  %vm925_vm6 = vmpackc.low %vm6226_vm3, %vm6222_vm2 }
  0x22   : > { %vm6245_vm5 = vcmp.le.s32.totalorder %v520_v45, 62  ;;  %vm6253_vm7 = vcmp.le.s32.totalorder %v527_v52, 62  ;;  %vm6257_vm8 = vcmp.ge.s32.totalorder %v541_v59, 1  ;;  %vm6261_vm9 = vcmp.ge.s32.totalorder %v548_v60, 1  ;;  %v6472_v52 = vld [vmem:[%s6460_s26] sm:$0xff] }
  0x23   : > { %1089 = vrot.lane.b32.xlu1 %v6185_v44, %s6004_s19  ;;  %vm1672_vm10 = vmpackc.low %vm6245_vm5, %vm6235_vm4  ;;  %vm6269_vm11 = vcmp.le.s32.totalorder %v534_v53, 62  ;;  %v6276_v28 = vrot.slane %v940_v0, %v6068_v7  ;;  %v6285_v31 = vrot.slane %v940_v0, %v6066_v6  ;;  %v941_v32 = vsel %vm925_vm6, 65537, %v9426_v1 }
  0x24   : > { %1087 = vrot.lane.b32.xlu0 %v6190_v46, %s6004_s19  ;;  %vm1673_vm12 = vmpackc.low %vm6269_vm11, %vm6253_vm7  ;;  %vm6294_vm14 = vcmp.le.s32.totalorder %v443_v9, 62  ;;  %vm6300_vm15 = vcmp.le.s32.totalorder %v450_v16, 62  ;;  %v6307_v38 = vrot.slane %v941_v32, %v6068_v7  ;;  %vm6309_vm0 = vcmp.le.s32.totalorder %v541_v59, 62  ;;  %v6491_v59 = vld [vmem:[%s6460_s26 + $0x10] sm:$0xff] }
  0x25   : > { %vm926_vm13 = vmpackc.low %vm6261_vm9, %vm6257_vm8  ;;  %v6316_v9 = vrot.slane %v941_v32, %v6066_v6  ;;  %vm6323_vm2 = vcmp.le.s32.totalorder %v548_v60, 62  ;;  %vm1573_vm6 = vcmp.le.s32.totalorder %v457_v12, 62  ;;  %vm1574_vm8 = vcmp.le.s32.totalorder %v464_v13, 62 }
  0x26   : > { %v942_v8 = vsel %vm926_vm13, 65537, %v9426_v1  ;;  %vm1667_vm1 = vmpackc.low %vm6300_vm15, %vm6294_vm14  ;;  %vm1575_vm13 = vcmp.le.s32.totalorder %v471_v18, 62  ;;  %vm1576_vm14 = vcmp.le.s32.totalorder %v478_v19, 62  ;;  %v423_v43 = vadd.s32 2048, %v6056_v2 }
  0x27   : > { %1093 = vrot.lane.b32.xlu1 %v6210_v54, %s6004_s19  ;;  %vm1674_vm3 = vmpackc.low %vm6323_vm2, %vm6309_vm0  ;;  %v6338_v40 = vrot.slane %v942_v8, %v6068_v7  ;;  %v6343_v41 = vrot.slane %v942_v8, %v6066_v6  ;;  %v1683_v42 = vsel %vm1667_vm1, 65537, %v9426_v1  ;;  %vm1577_vm1 = vcmp.le.s32.totalorder %v485_v20, 62 }
  0x28   : > { %1091 = vrot.lane.b32.xlu0 %v6215_v55, %s6004_s19  ;;  %vm1668_vm9 = vmpackc.low %vm1574_vm8, %vm1573_vm6  ;;  %v1706_v4 = vrot.slane %v1683_v42, %v6068_v7  ;;  %v1702_v5 = vrot.slane %v1683_v42, %v6066_v6  ;;  %vm1578_vm6 = vcmp.le.s32.totalorder %v492_v21, 62  ;;  %v555_v45 = vand.u32 63, %v423_v43 }
  0x29   : > { %v1684_v12 = vsel %vm1668_vm9, 65537, %v9426_v1  ;;  %vm1669_vm15 = vmpackc.low %vm1576_vm14, %vm1575_vm13  ;;  %vm1579_vm9 = vcmp.le.s32.totalorder %v499_v29, 62  ;;  %vm1580_vm13 = vcmp.le.s32.totalorder %v506_v33, 62  ;;  %v1689_v33 = vsel %vm1673_vm12, 65537, %v9426_v1 }
  0x2a   : > { %v1714_v10 = vrot.slane %v1684_v12, %v6068_v7  ;;  %v1710_v11 = vrot.slane %v1684_v12, %v6066_v6  ;;  %v1685_v13 = vsel %vm1669_vm15, 65537, %v9426_v1  ;;  %vm1670_vm8 = vmpackc.low %vm1578_vm6, %vm1577_vm1  ;;  %vm839_vm4 = vcmp.ge.s32.totalorder %v555_v45, 1 }
  0x2b   : > { %1097 = vrot.lane.b32.xlu1 %v6233_v61, %s6004_s19  ;;  %v1722_v18 = vrot.slane %v1685_v13, %v6068_v7  ;;  %v1718_v19 = vrot.slane %v1685_v13, %v6066_v6  ;;  %v1686_v14 = vsel %vm1670_vm8, 65537, %v9426_v1  ;;  %vm1671_vm14 = vmpackc.low %vm1580_vm13, %vm1579_vm9  ;;  %v5513_v53 = vcombine.low %v9426_v1, %v6472_v52 }
  0x2c   : > { %1095 = vrot.lane.b32.xlu0 %v6242_v63, %s6004_s19  ;;  %v1730_v15 = vrot.slane %v1686_v14, %v6068_v7  ;;  %v1726_v20 = vrot.slane %v1686_v14, %v6066_v6  ;;  %v1687_v21 = vsel %vm1671_vm14, 65537, %v9426_v1  ;;  %v1690_v56 = vsel %vm1674_vm3, 65537, %v9426_v1 }
  0x2d   : > { %v1738_v24 = vrot.slane %v1687_v21, %v6068_v7  ;;  %v1734_v26 = vrot.slane %v1687_v21, %v6066_v6  ;;  %v6508_v0 = vrot.slane %v1690_v56, %v6066_v6  ;;  %v6512_v3 = vcombine.low %v6472_v52, %v6472_v52 }
  0x2e   : > { %v6516_v17 = vcombine.low %v6488_v57, %v6488_v57  ;;  %v6520_v22 = vcombine.high %v6472_v52, %v6472_v52  ;;  %v6526_v25 = vcombine.low %v6491_v59, %v6491_v59  ;;  %vm6532_vm0 = vcmp.le.s32.totalorder %v555_v45, 62 }
  0x2f   : > { %1101 = vrot.lane.b32.xlu1 %v6276_v28, %s6004_s19  ;;  %vm9466_vm8 = vcmask 531456  }
  0x30   : > { %1099 = vrot.lane.b32.xlu0 %v6285_v31, %s6004_s19 }
  0x33   : > { %1105 = vrot.lane.b32.xlu1 %v6307_v38, %s6004_s19 }
  0x34   : > { %1103 = vrot.lane.b32.xlu0 %v6316_v9, %s6004_s19 }
  0x37   : > { %1109 = vrot.lane.b32.xlu1 %v6338_v40, %s6004_s19 }
  0x38   : > { %1107 = vrot.lane.b32.xlu0 %v6343_v41, %s6004_s19 }
  0x3b   : > { %1829 = vrot.lane.b32.xlu1 %v1706_v4, %s6005_s20 }
  0x3c   : > { %1827 = vrot.lane.b32.xlu0 %v1702_v5, %s6005_s20 }
  0x3f   : > { %1833 = vrot.lane.b32.xlu1 %v1714_v10, %s6005_s20 }
  0x40   : > { %1831 = vrot.lane.b32.xlu0 %v1710_v11, %s6005_s20 }
  0x43   : > { %1837 = vrot.lane.b32.xlu1 %v1722_v18, %s6005_s20 }
  0x44   : > { %1835 = vrot.lane.b32.xlu0 %v1718_v19, %s6005_s20 }
  0x47   : > { %2184 = vrot.lane.b32.xlu1 %v6157_v35, %s6006_s21  ;;  %v1750_v35 = vrot.slane %v1689_v33, %v6066_v6 }
  0x48   : > { %2182 = vrot.lane.b32.xlu0 %v6136_v30, %s6006_s21 }
  0x4b   : > { %2188 = vrot.lane.b32.xlu1 %v6152_v34, %s6006_s21  ;;  %v1754_v34 = vrot.slane %v1689_v33, %v6068_v7 }
  0x4c   : > { %2186 = vrot.lane.b32.xlu0 %v6127_v27, %s6006_s21  ;;  %v1688_v27 = vsel %vm1672_vm10, 65537, %v9426_v1  ;;  %vm1143_vm10 = vcmask 515072  }
  0x4d   : > { %v1746_v29 = vrot.slane %v1688_v27, %v6068_v7  ;;  %v1742_v30 = vrot.slane %v1688_v27, %v6066_v6 }
  0x4f   : > { %2192 = vrot.lane.b32.xlu1 %v6185_v44, %s6006_s21  ;;  %v424_v44 = vadd.s32 2176, %v6056_v2 }
  0x50   : > { %2190 = vrot.lane.b32.xlu0 %v6190_v46, %s6006_s21 }
  0x51   : > { %v562_v46 = vand.u32 63, %v424_v44 }
  0x53   : > { %2589 = vrot.lane.b32.xlu1 %v1706_v4, %s6007_s22  ;;  %vm840_vm5 = vcmp.ge.s32.totalorder %v562_v46, 1  ;;  %vm6536_vm2 = vcmp.le.s32.totalorder %v562_v46, 62 }
  0x54   : > { %2587 = vrot.lane.b32.xlu0 %v1702_v5, %s6007_s22  ;;  %vm927_vm7 = vmpackc.low %vm840_vm5, %vm839_vm4 }
  0x55   : > { %v943_v47 = vsel %vm927_vm7, 65537, %v9426_v1  ;;  %vm1675_vm6 = vmpackc.low %vm6536_vm2, %vm6532_vm0  ;;  %vm9471_vm0 = vcmask 1039360  }
  0x56   : > { %v6463_v48 = vrot.slane %v943_v47, %v6068_v7  ;;  %v6467_v49 = vrot.slane %v943_v47, %v6066_v6 }
  0x57   : > { %2593 = vrot.lane.b32.xlu1 %v1714_v10, %s6007_s22 }
  0x58   : > { %2591 = vrot.lane.b32.xlu0 %v1710_v11, %s6007_s22  ;;  %v1691_v11 = vsel %vm1675_vm6, 65537, %v9426_v1 }
  0x5b   : > { %2597 = vrot.lane.b32.xlu1 %v1722_v18, %s6007_s22 }
  0x5c   : > { %2595 = vrot.lane.b32.xlu0 %v1718_v19, %s6007_s22 }
  0x5f   : > { %1841 = vrot.lane.b32.xlu1 %v1730_v15, %s6005_s20 }
  0x60   : > { %1839 = vrot.lane.b32.xlu0 %v1726_v20, %s6005_s20 }
  0x63   : > { %1845 = vrot.lane.b32.xlu1 %v1738_v24, %s6005_s20 }
  0x64   : > { %1843 = vrot.lane.b32.xlu0 %v1734_v26, %s6005_s20 }
  0x67   : > { %2196 = vrot.lane.b32.xlu1 %v6210_v54, %s6006_s21  ;;  %v5870_v54 = vld [vmem:[%s6460_s26 + $0x4] sm:$0xff] }
  0x68   : > { %2194 = vrot.lane.b32.xlu0 %v6215_v55, %s6006_s21 }
  0x6b   : > { %2200 = vrot.lane.b32.xlu1 %v6233_v61, %s6006_s21 }
  0x6c   : > { %2198 = vrot.lane.b32.xlu0 %v6242_v63, %s6006_s21 }
  0x6f   : > { %2601 = vrot.lane.b32.xlu1 %v1730_v15, %s6007_s22  ;;  %v6591_v15 = vrot.slane %v1691_v11, %v6068_v7 }
  0x70   : > { %2599 = vrot.lane.b32.xlu0 %v1726_v20, %s6007_s22  ;;  %v6595_v20 = vrot.slane %v1691_v11, %v6066_v6 }
  0x73   : > { %2605 = vrot.lane.b32.xlu1 %v1738_v24, %s6007_s22 }
  0x74   : > { %2603 = vrot.lane.b32.xlu0 %v1734_v26, %s6007_s22 }
  0x77   : > { %1849 = vrot.lane.b32.xlu1 %v1746_v29, %s6005_s20 }
  0x78   : > { %1847 = vrot.lane.b32.xlu0 %v1742_v30, %s6005_s20 }
  0x7b   : > { %1853 = vrot.lane.b32.xlu1 %v1754_v34, %s6005_s20 }
  0x7c   : > { %1851 = vrot.lane.b32.xlu0 %v1750_v35, %s6005_s20 }
  0x7f   : > { %2204 = vrot.lane.b32.xlu1 %v6276_v28, %s6006_s21 }
  0x80   : > { %2202 = vrot.lane.b32.xlu0 %v6285_v31, %s6006_s21  ;;  %v6530_v31 = vrot.slane %v1690_v56, %v6068_v7 }
  0x83   : > { %2208 = vrot.lane.b32.xlu1 %v6307_v38, %s6006_s21 }
  0x84   : > { %2206 = vrot.lane.b32.xlu0 %v6316_v9, %s6006_s21  ;;  %v6558_v9 = vcombine.high %v6488_v57, %v6488_v57 }
  0x87   : > { %2609 = vrot.lane.b32.xlu1 %v1746_v29, %s6007_s22 }
  0x88   : > { %2607 = vrot.lane.b32.xlu0 %v1742_v30, %s6007_s22 }
  0x8b   : > { %2613 = vrot.lane.b32.xlu1 %v1754_v34, %s6007_s22 }
  0x8c   : > { %2611 = vrot.lane.b32.xlu0 %v1750_v35, %s6007_s22 }
  0x8d   : > { %v1084_v50 = vpop.permute.xlu1 %1083 }
  0x8e   : > { %v6469_v51 = vpop.permute.xlu0 %1079 }
  0x8f   : > { %1113 = vrot.lane.b32.xlu1 %v6463_v48, %s6004_s19 }
  0x90   : > { %1111 = vrot.lane.b32.xlu0 %v6467_v49, %s6004_s19 }
  0x91   : > { %v1086_v55 = vpop.permute.xlu1 %1085 }
  0x92   : > { %v1082_v58 = vpop.permute.xlu0 %1081  ;;  %v6494_v60 = vsel %vm1143_vm10, %v1084_v50, %v1086_v55 }
  0x93   : > { %v6498_v61 = vsel %vm1143_vm10, %v6469_v51, %v1082_v58  ;;  %1455 = vrot.lane.b32.xlu1 %v5513_v53, %s6008_s27  ;;  %v6503_v63 = vsel %vm1143_vm10, %v1082_v58, %v1084_v50  ;;  %vm1177_vm12 = vcmp.ne.s16.totalorder %v6494_v60, 0 }
  0x94   : > { %vm1175_vm11 = vcmp.ne.s16.totalorder %v6498_v61, 0  ;;  %1457 = vrot.lane.b32.xlu0 %v5870_v54, %s6008_s27  ;;  %vm1176_vm3 = vcmp.ne.s16.totalorder %v6503_v63, 0  ;;  %v1209_v16 = vsel %vm1177_vm12, %v6516_v17, 0 }
  0x95   : > { %v6522_v23 = vpop.permute.xlu1 %1089  ;;  %v1207_v37 = vsel %vm1175_vm11, %v6512_v3, 0  ;;  %v1208_v42 = vsel %vm1176_vm3, %v6520_v22, 0 }
  0x96   : > { %v1088_v28 = vpop.permute.xlu0 %1087  ;;  %v5496_v5 = vcombine.low %v9426_v1, %v1207_v37  ;;  %v5497_v18 = vcombine.low %v1208_v42, %v1209_v16 }
  0x97   : > { %v6545_v38 = vsel %vm1143_vm10, %v1086_v55, %v1088_v28  ;;  %v6549_v39 = vsel %vm1143_vm10, %v1088_v28, %v6522_v23  ;;  %1459 = vrot.lane.b32.xlu1 %v5872_v62, %s6008_s27 }
  0x98   : > { %vm1178_vm15 = vcmp.ne.s16.totalorder %v6545_v38, 0  ;;  %vm1179_vm1 = vcmp.ne.s16.totalorder %v6549_v39, 0  ;;  %1855 = vrot.lane.b32.xlu0 %v6508_v0, %s6005_s20 }
  0x99   : > { %v6560_v8 = vpop.permute.xlu1 %1093  ;;  %v1210_v12 = vsel %vm1178_vm15, %v6558_v9, 0  ;;  %v1211_v10 = vsel %vm1179_vm1, %v6526_v25, 0  ;;  %v2947_v63 = vsel %vm1178_vm15, %v6526_v25, 0 }
  0x9a   : > { %v6572_v4 = vpop.permute.xlu0 %1091  ;;  %v5498_v14 = vcombine.low %v1210_v12, %v1211_v10 }
  0x9b   : > { %1857 = vrot.lane.b32.xlu1 %v6530_v31, %s6005_s20 }
  0x9c   : > { %1322 = vrot.lane.b32.xlu0 %v5496_v5, %s6005_s20 }
  0x9d   : > { %v6585_v13 = vpop.permute.xlu1 %1097 }
  0x9e   : > { %v6587_v19 = vpop.permute.xlu0 %1095 }
  0x9f   : > { %1324 = vrot.lane.b32.xlu1 %v5497_v18, %s6005_s20 }
  0xa0   : > { %1326 = vrot.lane.b32.xlu0 %v5498_v14, %s6005_s20 }
  0xa1   : > { %v6597_v21 = vpop.permute.xlu1 %1101 }
  0xa2   : > { %v6599_v24 = vpop.permute.xlu0 %1099 }
  0xa3   : > { %1861 = vrot.lane.b32.xlu1 %v6591_v15, %s6005_s20 }
  0xa4   : > { %1859 = vrot.lane.b32.xlu0 %v6595_v20, %s6005_s20 }
  0xa5   : > { %v6605_v26 = vpop.permute.xlu1 %1105 }
  0xa6   : > { %v6607_v27 = vpop.permute.xlu0 %1103 }
  0xa7   : > { %2212 = vrot.lane.b32.xlu1 %v6338_v40, %s6006_s21 }
  0xa8   : > { %2210 = vrot.lane.b32.xlu0 %v6343_v41, %s6006_s21 }
  0xa9   : > { %v6613_v29 = vpop.permute.xlu1 %1109 }
  0xaa   : > { %v6615_v30 = vpop.permute.xlu0 %1107 }
  0xab   : > { %2216 = vrot.lane.b32.xlu1 %v6463_v48, %s6006_s21 }
  0xac   : > { %2214 = vrot.lane.b32.xlu0 %v6467_v49, %s6006_s21 }
  0xad   : > { %v1830_v33 = vpop.permute.xlu1 %1829 }
  0xae   : > { %v1828_v34 = vpop.permute.xlu0 %1827 }
  0xaf   : > { %v1891_v35 = vsel %vm9466_vm8, %v1828_v34, %v1830_v33  ;;  %vm3285_vm9 = vcmp.ne.s16.totalorder %v1828_v34, 0 }
  0xb0   : > { %vm1922_vm13 = vcmp.ne.s16.totalorder %v1891_v35, 0  ;;  %v6623_v40 = vsel %vm3285_vm9, %v6512_v3, 0 }
  0xb1   : > { %v1954_v41 = vsel %vm1922_vm13, %v6512_v3, 0  ;;  %v6627_v43 = vsel %vm1922_vm13, %v6520_v22, 0  ;;  %v1834_v44 = vpop.permute.xlu1 %1833 }
  0xb2   : > { %v1832_v45 = vpop.permute.xlu0 %1831  ;;  %v5514_v46 = vcombine.low %v9426_v1, %v1954_v41  ;;  %v5581_v47 = vcombine.low %v6623_v40, %v6627_v43 }
  0xb3   : > { %v1892_v48 = vsel %vm9466_vm8, %v1830_v33, %v1832_v45  ;;  %v1893_v49 = vsel %vm9466_vm8, %v1832_v45, %v1834_v44 }
  0xb4   : > { %vm1923_vm14 = vcmp.ne.s16.totalorder %v1892_v48, 0  ;;  %vm1924_vm4 = vcmp.ne.s16.totalorder %v1893_v49, 0  ;;  %2067 = vrot.lane.b32.xlu0 %v5514_v46, %s6004_s19 }
  0xb5   : > { %v1955_v50 = vsel %vm1923_vm14, %v6520_v22, 0  ;;  %v1956_v53 = vsel %vm1924_vm4, %v6516_v17, 0  ;;  %v6638_v54 = vsel %vm1923_vm14, %v6516_v17, 0  ;;  %v6641_v55 = vsel %vm1924_vm4, %v6558_v9, 0  ;;  %v6643_v56 = vpop.permute.xlu1 %1837 }
  0xb6   : > { %v1836_v58 = vpop.permute.xlu0 %1835  ;;  %v5515_v62 = vcombine.low %v1955_v50, %v1956_v53  ;;  %v5582_v28 = vcombine.low %v6638_v54, %v6641_v55  ;;  %vm2475_vm4 = vcmask 7168  }
  0xb7   : > { %v6648_v32 = vsel %vm9466_vm8, %v1834_v44, %v1836_v58  ;;  %v6652_v36 = vsel %vm9466_vm8, %v1836_v58, %v6643_v56 }
  0xb8   : > { %vm1925_vm5 = vcmp.ne.s16.totalorder %v6648_v32, 0  ;;  %vm1926_vm7 = vcmp.ne.s16.totalorder %v6652_v36, 0  ;;  %2069 = vrot.lane.b32.xlu1 %v5515_v62, %s6004_s19  ;;  %v6813_v32 = vsel %vm1143_vm10, %v6572_v4, %v6560_v8  ;;  %v6841_v36 = vsel %vm1143_vm10, %v6560_v8, %v6587_v19 }
  0xb9   : > { %v1957_v37 = vsel %vm1925_vm5, %v6558_v9, 0  ;;  %v1958_v16 = vsel %vm1926_vm7, %v6526_v25, 0  ;;  %v2185_v42 = vpop.permute.xlu1 %2184 }
  0xba   : > { %v2183_v5 = vpop.permute.xlu0 %2182  ;;  %v5516_v12 = vcombine.low %v1957_v37, %v1958_v16 }
  0xbb   : > { %v2247_v10 = vsel %vm9471_vm0, %v2183_v5, %v2185_v42 }
  0xbc   : > { %vm2278_vm2 = vcmp.ne.s16.totalorder %v2247_v10, 0  ;;  %2071 = vrot.lane.b32.xlu0 %v5516_v12, %s6004_s19 }
  0xbd   : > { %v2310_v11 = vsel %vm2278_vm2, %v6512_v3, 0  ;;  %v2189_v18 = vpop.permute.xlu1 %2188 }
  0xbe   : > { %v2187_v14 = vpop.permute.xlu0 %2186  ;;  %v5531_v33 = vcombine.low %v9426_v1, %v2310_v11 }
  0xbf   : > { %v2248_v34 = vsel %vm9471_vm0, %v2185_v42, %v2187_v14  ;;  %v2249_v35 = vsel %vm9471_vm0, %v2187_v14, %v2189_v18 }
  0xc0   : > { %vm2279_vm6 = vcmp.ne.s16.totalorder %v2248_v34, 0  ;;  %vm2280_vm9 = vcmp.ne.s16.totalorder %v2249_v35, 0  ;;  %2423 = vrot.lane.b32.xlu1 %v5531_v33, %s6007_s22  ;;  %v6696_v34 = vcombine.high %v6491_v59, %v6491_v59 }
  0xc1   : > { %v2311_v41 = vsel %vm2279_vm6, %v6520_v22, 0  ;;  %v2312_v44 = vsel %vm2280_vm9, %v6516_v17, 0  ;;  %v6672_v45 = vpop.permute.xlu1 %2192 }
  0xc2   : > { %v2191_v46 = vpop.permute.xlu0 %2190  ;;  %v5532_v48 = vcombine.low %v2311_v41, %v2312_v44 }
  0xc3   : > { %v2250_v49 = vsel %vm9471_vm0, %v2189_v18, %v2191_v46  ;;  %v2251_v50 = vsel %vm9471_vm0, %v2191_v46, %v6672_v45 }
  0xc4   : > { %vm2281_vm13 = vcmp.ne.s16.totalorder %v2250_v49, 0  ;;  %vm2282_vm14 = vcmp.ne.s16.totalorder %v2251_v50, 0  ;;  %2425 = vrot.lane.b32.xlu0 %v5532_v48, %s6007_s22  ;;  %v6711_v50 = vadd.s32 2304, %v6056_v2 }
  0xc5   : > { %v2313_v53 = vsel %vm2281_vm13, %v6558_v9, 0  ;;  %v2314_v58 = vsel %vm2282_vm14, %v6526_v25, 0  ;;  %v2590_v62 = vpop.permute.xlu1 %2589 }
  0xc6   : > { %v2588_v37 = vpop.permute.xlu0 %2587  ;;  %v5533_v16 = vcombine.low %v2313_v53, %v2314_v58 }
  0xc7   : > { %v2651_v42 = vsel %vm2475_vm4, %v2588_v37, %v2590_v62  ;;  %vm2682_vm2 = vcmp.ne.s16.totalorder %v2588_v37, 0  ;;  %v6717_v37 = vadd.s32 2432, %v6056_v2 }
  0xc8   : > { %vm2683_vm6 = vcmp.ne.s16.totalorder %v2651_v42, 0  ;;  %2427 = vrot.lane.b32.xlu1 %v5533_v16, %s6007_s22  ;;  %2615 = vrot.lane.b32.xlu0 %v6508_v0, %s6007_s22  ;;  %v2714_v5 = vsel %vm2682_vm2, %v6512_v3, 0  ;;  %v2944_v16 = vsel %vm1175_vm11, %v6520_v22, 0  ;;  %v2945_v42 = vsel %vm1176_vm3, %v6516_v17, 0 }
  0xc9   : > { %v2715_v12 = vsel %vm2683_vm6, %v6520_v22, 0  ;;  %v2594_v10 = vpop.permute.xlu1 %2593  ;;  %vm2942_vm6 = vcmp.ne.s16.totalorder %v6469_v51, 0  ;;  %v576_v61 = vand.u32 63, %v6717_v37  ;;  %v6747_v22 = vadd.s32 2688, %v6056_v2 }
  0xca   : > { %v2592_v11 = vpop.permute.xlu0 %2591  ;;  %v5548_v33 = vcombine.low %v2714_v5, %v2715_v12  ;;  %v2943_v51 = vsel %vm2942_vm6, %v6512_v3, 0  ;;  %v6744_v3 = vadd.s32 2560, %v6056_v2 }
  0xcb   : > { %v2652_v18 = vsel %vm2475_vm4, %v2590_v62, %v2592_v11  ;;  %v2653_v14 = vsel %vm2475_vm4, %v2592_v11, %v2594_v10  ;;  %v5565_v60 = vcombine.low %v2943_v51, %v2944_v16 }
  0xcc   : > { %vm2684_vm9 = vcmp.ne.s16.totalorder %v2652_v18, 0  ;;  %vm2685_vm13 = vcmp.ne.s16.totalorder %v2653_v14, 0  ;;  %2617 = vrot.lane.b32.xlu1 %v6530_v31, %s6007_s22  ;;  %2619 = vrot.lane.b32.xlu0 %v6595_v20, %s6007_s22  ;;  %v583_v39 = vand.u32 63, %v6744_v3  ;;  %v590_v14 = vand.u32 63, %v6747_v22  ;;  %v5874_v3 = vld [vmem:[%s6460_s26 + $0x14] sm:$0xff] }
  0xcd   : > { %v6692_v0 = vpop.permute.xlu1 %2597  ;;  %v2716_v41 = vsel %vm2684_vm9, %v6516_v17, 0  ;;  %v2717_v44 = vsel %vm2685_vm13, %v6558_v9, 0  ;;  %v2948_v17 = vsel %vm1179_vm1, %v6696_v34, 0 }
  0xce   : > { %v2596_v35 = vpop.permute.xlu0 %2595  ;;  %v5549_v58 = vcombine.low %v2716_v41, %v2717_v44  ;;  %v5567_v38 = vcombine.low %v2947_v63, %v2948_v17  ;;  %vm6764_vm15 = vcmp.ge.s32.totalorder %v583_v39, 1  ;;  %vm6768_vm1 = vcmp.ge.s32.totalorder %v590_v14, 1 }
  0xcf   : > { %v2654_v46 = vsel %vm2475_vm4, %v2594_v10, %v2596_v35  ;;  %v2655_v31 = vsel %vm2475_vm4, %v2596_v35, %v6692_v0  ;;  %v569_v10 = vand.u32 63, %v6711_v50  ;;  %vm929_vm9 = vmpackc.low %vm6768_vm1, %vm6764_vm15  ;;  %v6846_v50 = vsel %vm1143_vm10, %v6587_v19, %v6585_v13 }
  0xd0   : > { %vm2686_vm14 = vcmp.ne.s16.totalorder %v2654_v46, 0  ;;  %vm2687_vm2 = vcmp.ne.s16.totalorder %v2655_v31, 0  ;;  %2621 = vrot.lane.b32.xlu1 %v6591_v15, %s6007_s22  ;;  %2827 = vrot.lane.b32.xlu0 %v5548_v33, %s6006_s21  ;;  %v2946_v15 = vsel %vm1177_vm12, %v6558_v9, 0  ;;  %vm842_vm12 = vcmp.ge.s32.totalorder %v576_v61, 1 }
  0xd1   : > { %v2718_v20 = vsel %vm2686_vm14, %v6526_v25, 0  ;;  %v2719_v48 = vsel %vm2687_vm2, %v6696_v34, 0  ;;  %v6708_v49 = vpop.permute.xlu1 %1841  ;;  %v5566_v9 = vcombine.low %v2945_v42, %v2946_v15  ;;  %vm841_vm11 = vcmp.ge.s32.totalorder %v569_v10, 1 }
  0xd2   : > { %v6714_v53 = vpop.permute.xlu0 %1839  ;;  %v5550_v62 = vcombine.low %v2718_v20, %v2719_v48  ;;  %vm928_vm3 = vmpackc.low %vm842_vm12, %vm841_vm11  ;;  %v3290_v20 = vsel %vm1925_vm5, %v6526_v25, 0  ;;  %v6808_v25 = vsel %vm1143_vm10, %v6522_v23, %v6572_v4  ;;  %v945_v43 = vsel %vm929_vm9, 65537, %v9426_v1 }
  0xd3   : > { %v944_v46 = vsel %vm928_vm3, 65537, %v9426_v1  ;;  %vm1180_vm5 = vcmp.ne.s16.totalorder %v6808_v25, 0  ;;  %v6836_v4 = vrot.slane %v945_v43, %v6066_v6  ;;  %vm6862_vm13 = vcmp.le.s32.totalorder %v569_v10, 62 }
  0xd4   : > { %2829 = vrot.lane.b32.xlu1 %v5549_v58, %s6006_s21  ;;  %2831 = vrot.lane.b32.xlu0 %v5550_v62, %s6006_s21  ;;  %v6803_v48 = vrot.slane %v944_v46, %v6066_v6  ;;  %v6833_v23 = vrot.slane %v944_v46, %v6068_v7  ;;  %v1212_v15 = vsel %vm1180_vm5, %v6696_v34, 0  ;;  %vm6866_vm14 = vcmp.le.s32.totalorder %v576_v61, 62 }
  0xd5   : > { %v6731_v5 = vpop.permute.xlu1 %1845  ;;  %vm1182_vm2 = vcmp.ne.s16.totalorder %v6841_v36, 0  ;;  %vm1183_vm6 = vcmp.ne.s16.totalorder %v6846_v50, 0  ;;  %v6877_v42 = vrot.slane %v945_v43, %v6068_v7  ;;  %vm1676_vm11 = vmpackc.low %vm6866_vm14, %vm6862_vm13  ;;  %vm6897_vm12 = vcmp.le.s32.totalorder %v583_v39, 62  ;;  %v5876_v39 = vld [vmem:[%s6460_s26 + $0x1c] sm:$0xff] }
  0xd6   : > { %v6733_v12 = vpop.permute.xlu0 %1843  ;;  %vm1592_vm3 = vcmp.le.s32.totalorder %v590_v14, 62  ;;  %v6946_v19 = vsel %vm9466_vm8, %v6643_v56, %v6714_v53 }
  0xd7   : > { %vm1677_vm15 = vmpackc.low %vm1592_vm3, %vm6897_vm12  ;;  %vm1927_vm1 = vcmp.ne.s16.totalorder %v6946_v19, 0  ;;  %v6966_v56 = vsel %vm9466_vm8, %v6708_v49, %v6733_v12 }
  0xd8   : > { %3055 = vrot.lane.b32.xlu1 %v5565_v60, %s6005_s20  ;;  %3057 = vrot.lane.b32.xlu0 %v5566_v9, %s6005_s20  ;;  %vm1929_vm13 = vcmp.ne.s16.totalorder %v6966_v56, 0  ;;  %v7165_v56 = vsel %vm1143_vm10, %v6599_v24, %v6597_v21 }
  0xd9   : > { %v6751_v11 = vpop.permute.xlu1 %2196 }
  0xda   : > { %v6753_v18 = vpop.permute.xlu0 %2194 }
  0xdb   : > { %v2252_v17 = vsel %vm9471_vm0, %v6672_v45, %v6753_v18 }
  0xdc   : > { %3059 = vrot.lane.b32.xlu1 %v5567_v38, %s6005_s20  ;;  %3170 = vrot.lane.b32.xlu0 %v6472_v52, %s6008_s27  ;;  %v1692_v38 = vsel %vm1676_vm11, 65537, %v9426_v1  ;;  %vm2283_vm11 = vcmp.ne.s16.totalorder %v2252_v17, 0 }
  0xdd   : > { %v6760_v33 = vpop.permute.xlu1 %2200  ;;  %v6916_v14 = vrot.slane %v1692_v38, %v6066_v6  ;;  %v6927_v43 = vrot.slane %v1692_v38, %v6068_v7 }
  0xde   : > { %v6762_v35 = vpop.permute.xlu0 %2198 }
  0xdf   : > { %v2254_v45 = vsel %vm9471_vm0, %v6751_v11, %v6762_v35 }
  0xe0   : > { %3172 = vrot.lane.b32.xlu1 %v6488_v57, %s6008_s27  ;;  %3174 = vrot.lane.b32.xlu0 %v6491_v59, %s6008_s27  ;;  %v3291_v57 = vsel %vm1926_vm7, %v6696_v34, 0  ;;  %v6792_v59 = vld [vmem:[%s6460_s26 + $0x18] sm:$0xff]  ;;  %vm1181_vm7 = vcmp.ne.s16.totalorder %v6813_v32, 0  ;;  %vm2285_vm3 = vcmp.ne.s16.totalorder %v2254_v45, 0 }
  0xe1   : > { %v6776_v52 = vpop.permute.xlu1 %2601  ;;  %v5583_v54 = vcombine.low %v3290_v20, %v3291_v57  ;;  %v6822_v55 = vcombine.low %v6792_v59, %v6792_v59  ;;  %v6881_v51 = vcombine.high %v6792_v59, %v6792_v59  ;;  %v1693_v20 = vsel %vm1677_vm15, 65537, %v9426_v1 }
  0xe2   : > { %v6779_v31 = vpop.permute.xlu0 %2599  ;;  %v6941_v16 = vrot.slane %v1693_v20, %v6068_v7 }
  0xe3   : > { %v1213_v8 = vsel %vm1181_vm7, %v6822_v55, 0  ;;  %v1214_v61 = vsel %vm1182_vm2, %v6881_v51, 0  ;;  %v1961_v17 = vsel %vm1929_vm13, %v6881_v51, 0  ;;  %v2317_v1 = vsel %vm2285_vm3, %v6881_v51, 0 }
  0xe4   : > { %3398 = vrot.lane.b32.xlu1 %v5581_v47, %s6004_s19  ;;  %3400 = vrot.lane.b32.xlu0 %v5582_v28, %s6004_s19  ;;  %v6825_v28 = vld [vmem:[%s6460_s26 + $0x20] sm:$0xff]  ;;  %v5499_v9 = vcombine.low %v1212_v15, %v1213_v8  ;;  %v2657_v45 = vsel %vm2475_vm4, %v6779_v31, %v6776_v52 }
  0xe5   : > { %v6815_v40 = vpop.permute.xlu1 %2605  ;;  %v6852_v62 = vcombine.low %v6825_v28, %v6825_v28 }
  0xe6   : > { %v6818_v47 = vpop.permute.xlu0 %2603 }
  0xe7   : > { %v1215_v63 = vsel %vm1183_vm6, %v6852_v62, 0  ;;  %v2659_v25 = vsel %vm2475_vm4, %v6818_v47, %v6815_v40 }
  0xe8   : > { %3402 = vrot.lane.b32.xlu1 %v5583_v54, %s6004_s19  ;;  %1115 = vrot.lane.b32.xlu0 %v6803_v48, %s6004_s19  ;;  %v5500_v41 = vcombine.low %v1214_v61, %v1215_v63  ;;  %v6930_v54 = vrot.slane %v1693_v20, %v6066_v6 }
  0xe9   : > { %v6848_v58 = vpop.permute.xlu1 %1849 }
  0xea   : > { %v6854_v37 = vpop.permute.xlu0 %1847 }
  0xec   : > { %1117 = vrot.lane.b32.xlu1 %v6833_v23, %s6004_s19  ;;  %1119 = vrot.lane.b32.xlu0 %v6836_v4, %s6004_s19 }
  0xed   : > { %v6883_v60 = vpop.permute.xlu1 %1853 }
  0xee   : > { %v6885_v10 = vpop.permute.xlu0 %1851 }
  0xf0   : > { %1121 = vrot.lane.b32.xlu1 %v6877_v42, %s6004_s19  ;;  %1328 = vrot.lane.b32.xlu0 %v5499_v9, %s6005_s20  ;;  %v6951_v9 = vsel %vm9466_vm8, %v6714_v53, %v6708_v49  ;;  %v6971_v53 = vsel %vm9466_vm8, %v6733_v12, %v6731_v5  ;;  %v1959_v49 = vsel %vm1927_vm1, %v6696_v34, 0 }
  0xf1   : > { %v6905_v22 = vpop.permute.xlu1 %2204  ;;  %vm1928_vm9 = vcmp.ne.s16.totalorder %v6951_v9, 0  ;;  %vm1930_vm14 = vcmp.ne.s16.totalorder %v6971_v53, 0 }
  0xf2   : > { %v6908_v44 = vpop.permute.xlu0 %2202  ;;  %v1960_v12 = vsel %vm1928_vm9, %v6822_v55, 0 }
  0xf4   : > { %1330 = vrot.lane.b32.xlu1 %v5500_v41, %s6005_s20  ;;  %1461 = vrot.lane.b32.xlu0 %v5874_v3, %s6008_s27  ;;  %v2253_v3 = vsel %vm9471_vm0, %v6753_v18, %v6751_v11  ;;  %v2255_v18 = vsel %vm9471_vm0, %v6762_v35, %v6760_v33 }
  0xf5   : > { %v6918_v46 = vpop.permute.xlu1 %2208  ;;  %vm2284_vm12 = vcmp.ne.s16.totalorder %v2253_v3, 0  ;;  %vm2286_vm15 = vcmp.ne.s16.totalorder %v2255_v18, 0 }
  0xf6   : > { %v6921_v57 = vpop.permute.xlu0 %2206  ;;  %v2316_v3 = vsel %vm2284_vm12, %v6822_v55, 0  ;;  %vm9465_vm12 = vcmask 523264  }
  0xf8   : > { %1463 = vrot.lane.b32.xlu1 %v5876_v39, %s6008_s27  ;;  %1863 = vrot.lane.b32.xlu0 %v6916_v14, %s6005_s20  ;;  %v5517_v39 = vcombine.low %v1959_v49, %v1960_v12 }
  0xf9   : > { %v6932_v15 = vpop.permute.xlu1 %2609 }
  0xfa   : > { %v6934_v8 = vpop.permute.xlu0 %2607 }
  0xfc   : > { %1865 = vrot.lane.b32.xlu1 %v6927_v43, %s6005_s20  ;;  %1867 = vrot.lane.b32.xlu0 %v6930_v54, %s6005_s20 }
  0xfd   : > { %v6953_v61 = vpop.permute.xlu1 %2613 }
  0xfe   : > { %v6955_v63 = vpop.permute.xlu0 %2611 }
 0x100   : > { %1869 = vrot.lane.b32.xlu1 %v6941_v16, %s6005_s20  ;;  %2218 = vrot.lane.b32.xlu0 %v6803_v48, %s6006_s21 }
 0x101   : > { %v6979_v38 = vpop.permute.xlu1 %1113 }
 0x102   : > { %9530 = vst [vmem:[#allocation4_spill] sm:$0xff] %v6979_v38  ;;  %v6981_v48 = vpop.permute.xlu0 %1111  ;;  %v2318_v38 = vsel %vm2286_vm15, %v6852_v62, 0  ;;  %vm2689_vm15 = vcmp.ne.s16.totalorder %v2657_v45, 0 }
 0x103   : > { %9531 = vst [vmem:[#allocation5_spill] sm:$0xff] %v6981_v48 }
 0x104   : > { %2220 = vrot.lane.b32.xlu1 %v6833_v23, %s6006_s21  ;;  %2222 = vrot.lane.b32.xlu0 %v6836_v4, %s6006_s21  ;;  %v1962_v23 = vsel %vm1930_vm14, %v6852_v62, 0  ;;  %v2315_v4 = vsel %vm2283_vm11, %v6696_v34, 0  ;;  %vm1373_vm11 = vcmask 1043456  }
 0x105   : > { %v1456_v41 = vpop.permute.xlu1 %1455  ;;  %v5518_v35 = vcombine.low %v1961_v17, %v1962_v23  ;;  %v5534_v49 = vcombine.low %v2315_v4, %v2316_v3  ;;  %v5535_v17 = vcombine.low %v2317_v1, %v2318_v38  ;;  %v7030_v4 = vadd.s32 2816, %v6056_v2 }
 0x106   : > { %v1458_v20 = vpop.permute.xlu0 %1457  ;;  %v1489_v48 = vrot.slane %v1456_v41, 4  ;;  %v7033_v3 = vadd.s32 2944, %v6056_v2  ;;  %v2950_v38 = vsel %vm1181_vm7, %v6881_v51, 0  ;;  %vm2691_vm7 = vcmp.ne.s16.totalorder %v2659_v25, 0 }
 0x107   : > { %v1490_v34 = vrot.slane %v1458_v20, 4 }
 0x108   : > { %2224 = vrot.lane.b32.xlu1 %v6877_v42, %s6006_s21  ;;  %2073 = vrot.lane.b32.xlu0 %v5517_v39, %s6004_s19  ;;  %v2656_v42 = vsel %vm2475_vm4, %v6692_v0, %v6779_v31  ;;  %v7037_v0 = vcombine.high %v6825_v28, %v6825_v28  ;;  %v2949_v31 = vsel %vm1180_vm5, %v6822_v55, 0 }
 0x109   : > { %v7012_v11 = vpop.permute.xlu1 %1459  ;;  %vm2688_vm3 = vcmp.ne.s16.totalorder %v2656_v42, 0  ;;  %v1506_v1 = vsel %vm1373_vm11, %v1489_v48, %v1490_v34 }
 0x10a   : > { %v7014_v12 = vpop.permute.xlu0 %1855  ;;  %v9432_v18 = vrot.slane %v7012_v11, 4 }
 0x10b   : > { %9532 = vst [vmem:[#allocation6_spill] sm:$0xff] %v7014_v12  ;;  %v2720_v12 = vsel %vm2688_vm3, %v6822_v55, 0 }
 0x10c   : > { %2075 = vrot.lane.b32.xlu1 %v5518_v35, %s6004_s19  ;;  %2429 = vrot.lane.b32.xlu0 %v5534_v49, %s6007_s22  ;;  %v2658_v35 = vsel %vm2475_vm4, %v6776_v52, %v6818_v47  ;;  %v1509_v42 = vsel %vm1373_vm11, %v1490_v34, %v9432_v18  ;;  %v2721_v52 = vsel %vm2689_vm15, %v6881_v51, 0  ;;  %v1508_v47 = vsel %vm9465_vm12, %v1456_v41, %v1506_v1 }
 0x10d   : > { %v7027_v39 = vpop.permute.xlu1 %1857  ;;  %vm2690_vm5 = vcmp.ne.s16.totalorder %v2658_v35, 0  ;;  %v1510_v18 = vsel %vm9465_vm12, %v1458_v20, %v1509_v42  ;;  %v7077_v41 = vadd.s32 3072, %v6056_v2  ;;  %v7080_v1 = vadd.s32 3200, %v6056_v2 }
 0x10e   : > { %9533 = vst [vmem:[#allocation7_spill] sm:$0xff] %v7027_v39  ;;  %v1323_v23 = vpop.permute.xlu0 %1322  ;;  %v2723_v20 = vsel %vm2691_vm7, %v7037_v0, 0 }
 0x10f   : > { %v611_v36 = vand.u32 63, %v7077_v41  ;;  %v618_v50 = vand.u32 63, %v7080_v1 }
 0x110   : > { %2431 = vrot.lane.b32.xlu1 %v5535_v17, %s6007_s22  ;;  %2623 = vrot.lane.b32.xlu0 %v6916_v14, %s6007_s22  ;;  %v1356_v14 = vrot.slane %v1323_v23, 4 }
 0x111   : > { %v1325_v49 = vpop.permute.xlu1 %1324 }
 0x112   : > { %v1357_v45 = vrot.slane %v1325_v49, 4  ;;  %v7058_v48 = vpop.permute.xlu0 %1326 }
 0x113   : > { %v9433_v39 = vrot.slane %v7058_v48, 4 }
 0x114   : > { %2625 = vrot.lane.b32.xlu1 %v6927_v43, %s6007_s22  ;;  %2627 = vrot.lane.b32.xlu0 %v6930_v54, %s6007_s22  ;;  %v1374_v34 = vsel %vm1373_vm11, %v1356_v14, %v1357_v45  ;;  %v5551_v43 = vcombine.low %v2720_v12, %v2721_v52  ;;  %v2722_v14 = vsel %vm2690_vm5, %v6852_v62, 0  ;;  %v2951_v12 = vsel %vm1182_vm2, %v6852_v62, 0 }
 0x115   : > { %v1376_v17 = vsel %vm9466_vm8, %v1323_v23, %v1374_v34  ;;  %v1377_v32 = vsel %vm1373_vm11, %v1357_v45, %v9433_v39  ;;  %v5568_v45 = vcombine.low %v2949_v31, %v2950_v38  ;;  %v3293_v34 = vsel %vm1928_vm9, %v6881_v51, 0 }
 0x116   : > { %v5598_v35 = vcombine.high %v1376_v17, %v1508_v47  ;;  %v1378_v54 = vsel %vm9466_vm8, %v1325_v49, %v1377_v32  ;;  %v5597_v25 = vcombine.low %v1376_v17, %v1508_v47  ;;  %v2952_v49 = vsel %vm1183_vm6, %v7037_v0, 0  ;;  %v7110_v52 = vpop.permute.xlu0 %1859 }
 0x117   : > { %v5600_v23 = vcombine.high %v1378_v54, %v1510_v18  ;;  %v5599_v42 = vcombine.low %v1378_v54, %v1510_v18  ;;  %v5552_v32 = vcombine.low %v2722_v14, %v2723_v20  ;;  %v9534_v18 = vand.u32 63, %v7030_v4  ;;  %v7147_v54 = vld [vmem:[%s6460_s26 + $0x28] sm:$0xff] }
 0x118   : > { %2629 = vrot.lane.b32.xlu1 %v6941_v16, %s6007_s22  ;;  %2833 = vrot.lane.b32.xlu0 %v5551_v43, %s6006_s21  ;;  %v9537_v17 = vand.u32 63, %v7033_v3  ;;  %v5569_v38 = vcombine.low %v2951_v12, %v2952_v49  ;;  %v3292_v47 = vsel %vm1927_vm1, %v6822_v55, 0  ;;  %vm7122_vm6 = vcmp.ge.s32.totalorder %v611_v36, 1  ;;  %v7130_v43 = vpop.permute.xlu1 %1861 }
 0x119   : > { %4479 = vmatprep.subr.bf16.mxu0 %v5598_v35  ;;  %4520 = vmatprep.subr.bf16.mxu1 %v5600_v23  ;;  %vm7096_vm3 = vcmp.ge.s32.totalorder %v9534_v18, 1  ;;  %vm7126_vm5 = vcmp.ge.s32.totalorder %v618_v50, 1  ;;  %9544 = vst [vmem:[#allocation8_spill] sm:$0xff] %v7130_v43  ;;  %v9545_v55 = vmov 0   ;;  %v5584_v9 = vcombine.low %v3292_v47, %v3293_v34  ;;  %v7175_v23 = vld [vmem:[%s6460_s26 + $0x30] sm:$0xff] }
 0x11a   : > { %4480 = vmatpush1.bf16.msra.mxu0 %v5597_v25  ;;  %4521 = vmatpush1.bf16.msra.mxu1 %v5599_v42  ;;  %vm7102_vm15 = vcmp.ge.s32.totalorder %v9537_v17, 1  ;;  %vm931_vm1 = vmpackc.low %vm7126_vm5, %vm7122_vm6  ;;  %v3294_v51 = vsel %vm1929_vm13, %v6852_v62, 0  ;;  %v3295_v35 = vsel %vm1930_vm14, %v7037_v0, 0  ;;  %v7160_v62 = vsel %vm1143_vm10, %v6585_v13, %v6599_v24 }
 0x11b   : > { %vm930_vm2 = vmpackc.low %vm7102_vm15, %vm7096_vm3  ;;  %v947_v53 = vsel %vm931_vm1, 65537, %v9545_v55  ;;  %v5585_v14 = vcombine.low %v3294_v51, %v3295_v35  ;;  %vm1184_vm9 = vcmp.ne.s16.totalorder %v7160_v62, 0  ;;  %vm1185_vm13 = vcmp.ne.s16.totalorder %v7165_v56, 0  ;;  %v5878_v51 = vld [vmem:[%s6460_s26 + $0x24] sm:$0xff] }
 0x11c   : > { %2835 = vrot.lane.b32.xlu1 %v5552_v32, %s6006_s21  ;;  %3061 = vrot.lane.b32.xlu0 %v5568_v45, %s6005_s20  ;;  %v946_v19 = vsel %vm930_vm2, 65537, %v9545_v55  ;;  %v7168_v20 = vpop.permute.xlu1 %2212  ;;  %v7188_v42 = vrot.slane %v947_v53, %v6066_v6  ;;  %v7193_v45 = vsel %vm1143_vm10, %v6597_v21, %v6607_v27  ;;  %v7198_v12 = vsel %vm1143_vm10, %v6607_v27, %v6605_v26 }
 0x11d   : > { %v7155_v25 = vrot.slane %v946_v19, %v6066_v6  ;;  %9546 = vst [vmem:[#allocation9_spill] sm:$0xff] %v7168_v20  ;;  %v7185_v24 = vrot.slane %v946_v19, %v6068_v7  ;;  %v7202_v49 = vcombine.low %v7175_v23, %v7175_v23  ;;  %v1216_v18 = vsel %vm1184_vm9, %v7037_v0, 0 }
 0x11e   : > { %v9549_v16 = vand.u32 63, %v7030_v4  ;;  %v9552_v27 = vand.u32 63, %v7033_v3  ;;  %vm1186_vm3 = vcmp.ne.s16.totalorder %v7193_v45, 0  ;;  %vm1187_vm15 = vcmp.ne.s16.totalorder %v7198_v12, 0 }
 0x11f   : > { %v7231_v4 = vrot.slane %v947_v53, %v6068_v7  ;;  %v7235_v3 = vcombine.high %v7147_v54, %v7147_v54  ;;  %v1219_v41 = vsel %vm1187_vm15, %v7202_v49, 0  ;;  %vm7247_vm6 = vcmp.le.s32.totalorder %v611_v36, 62 }
 0x120   : > { %3063 = vrot.lane.b32.xlu1 %v5569_v38, %s6005_s20  ;;  %3176 = vrot.lane.b32.xlu0 %v6792_v59, %s6008_s27  ;;  %v7149_v59 = vpop.permute.xlu0 %2210  ;;  %v7204_v32 = vpop.permute.xlu1 %2216  ;;  %vm7214_vm14 = vcmp.le.s32.totalorder %v9549_v16, 62  ;;  %vm7220_vm7 = vcmp.le.s32.totalorder %v9552_v27, 62  ;;  %vm7251_vm5 = vcmp.le.s32.totalorder %v618_v50, 62 }
 0x121   : > { %9548 = vst [vmem:[#allocation11_spill] sm:$0xff] %v7204_v32  ;;  %vm1678_vm2 = vmpackc.low %vm7220_vm7, %vm7214_vm14  ;;  %v1218_v34 = vsel %vm1186_vm3, %v7235_v3, 0 }
 0x122   : > { %v1694_v35 = vsel %vm1678_vm2, 65537, %v9545_v55  ;;  %v5502_v53 = vcombine.low %v1218_v34, %v1219_v41  ;;  %vm1679_vm1 = vmpackc.low %vm7251_vm5, %vm7247_vm6 }
 0x123   : > { %v1695_v17 = vsel %vm1679_vm1, 65537, %v9545_v55  ;;  %v7279_v1 = vrot.slane %v1694_v35, %v6068_v7 }
 0x124   : > { %3178 = vrot.lane.b32.xlu1 %v6825_v28, %s6008_s27  ;;  %3404 = vrot.lane.b32.xlu0 %v5584_v9, %s6004_s19  ;;  %v7172_v28 = vcombine.low %v7147_v54, %v7147_v54  ;;  %v7179_v13 = vpop.permute.xlu0 %2214  ;;  %v7282_v19 = vrot.slane %v1695_v17, %v6066_v6 }
 0x125   : > { %9547 = vst [vmem:[#allocation10_spill] sm:$0xff] %v7179_v13 }
 0x126   : > { %v1217_v21 = vsel %vm1185_vm13, %v7172_v28, 0 }
 0x127   : > { %v5501_v38 = vcombine.low %v1216_v18, %v1217_v21  ;;  %v5880_v18 = vld [vmem:[%s6460_s26 + $0x2c] sm:$0xff]  ;;  %v7270_v21 = vrot.slane %v1694_v35, %v6066_v6 }
 0x128   : > { %3406 = vrot.lane.b32.xlu1 %v5585_v14, %s6004_s19  ;;  %1123 = vrot.lane.b32.xlu0 %v7155_v25, %s6004_s19  ;;  %v2068_v47 = vpop.permute.xlu0 %2067 }
 0x129   : > { %v2101_v16 = vrot.slane %v2068_v47, 4 }
 0x12a   : > { %v2070_v9 = vpop.permute.xlu1 %2069 }
 0x12b   : > { %v2102_v36 = vrot.slane %v2070_v9, 4 }
 0x12c   : > { %1125 = vrot.lane.b32.xlu1 %v7185_v24, %s6004_s19  ;;  %1127 = vrot.lane.b32.xlu0 %v7188_v42, %s6004_s19 }
 0x12d   : > { %v2118_v41 = vsel %vm1373_vm11, %v2101_v16, %v2102_v36 }
 0x12e   : > { %v7260_v14 = vpop.permute.xlu0 %2071 }
 0x12f   : > { %v9559_v20 = vrot.slane %v7260_v14, 4 }
 0x130   : > { %1129 = vrot.lane.b32.xlu1 %v7231_v4, %s6004_s19  ;;  %1332 = vrot.lane.b32.xlu0 %v5501_v38, %s6005_s20 }
 0x132   : > { %v2424_v50 = vpop.permute.xlu1 %2423 }
 0x133   : > { %v2457_v38 = vrot.slane %v2424_v50, 4 }
 0x134   : > { %1334 = vrot.lane.b32.xlu1 %v5502_v53, %s6005_s20  ;;  %1465 = vrot.lane.b32.xlu0 %v5878_v51, %s6008_s27  ;;  %v7288_v53 = vsel %vm9466_vm8, %v6731_v5, %v6854_v37  ;;  %v7303_v5 = vsel %vm9466_vm8, %v6854_v37, %v6848_v58 }
 0x135   : > { %vm9438_vm14 = vcmp.ne.s16.totalorder %v7288_v53, 0  ;;  %vm9437_vm7 = vcmp.ne.s16.totalorder %v7303_v5, 0 }
 0x136   : > { %v2426_v27 = vpop.permute.xlu0 %2425 }
 0x137   : > { %v2458_v34 = vrot.slane %v2426_v27, 4 }
 0x138   : > { %1467 = vrot.lane.b32.xlu1 %v5880_v18, %s6008_s27  ;;  %1871 = vrot.lane.b32.xlu0 %v7270_v21, %s6005_s20  ;;  %v2119_v18 = vsel %vm1143_vm10, %v2068_v47, %v2118_v41  ;;  %v7310_v47 = vrot.slane %v1695_v17, %v6068_v7  ;;  %v7331_v41 = vsel %vm9466_vm8, %v6885_v10, %v6883_v60 }
 0x139   : > { %v2474_v51 = vsel %vm1373_vm11, %v2457_v38, %v2458_v34  ;;  %v2120_v38 = vsel %vm1373_vm11, %v2102_v36, %v9559_v20  ;;  %vm1934_vm6 = vcmp.ne.s16.totalorder %v7331_v41, 0 }
 0x13a   : > { %v7290_v39 = vpop.permute.xlu1 %2427  ;;  %v7292_v16 = vpop.permute.xlu0 %2615  ;;  %v2476_v31 = vsel %vm2475_vm4, %v2424_v50, %v2474_v51  ;;  %v2121_v36 = vsel %vm1143_vm10, %v2070_v9, %v2120_v38  ;;  %v2257_v9 = vsel %vm9471_vm0, %v6908_v44, %v6905_v22  ;;  %v1966_v38 = vsel %vm1934_vm6, %v7202_v49, 0 }
 0x13b   : > { %v9441_v35 = vrot.slane %v7290_v39, 4  ;;  %v5630_v32 = vcombine.high %v2119_v18, %v2476_v31  ;;  %v5629_v13 = vcombine.low %v2119_v18, %v2476_v31  ;;  %vm2288_vm1 = vcmp.ne.s16.totalorder %v2257_v9, 0 }
 0x13c   : > { %1873 = vrot.lane.b32.xlu1 %v7279_v1, %s6005_s20  ;;  %1875 = vrot.lane.b32.xlu0 %v7282_v19, %s6005_s20 }
 0x13d   : > { %4481 = vmatprep.subr.bf16.mxu0 %v5630_v32  ;;  %v2477_v50 = vsel %vm1373_vm11, %v2458_v34, %v9441_v35  ;;  %v7326_v32 = vsel %vm9466_vm8, %v6848_v58, %v6885_v10  ;;  %v1963_v58 = vsel %vm9438_vm14, %v7037_v0, 0  ;;  %v1964_v10 = vsel %vm9437_vm7, %v7172_v28, 0 }
 0x13e   : > { %v7316_v20 = vpop.permute.xlu1 %2617  ;;  %4482 = vmatpush1.bf16.msra.mxu0 %v5629_v13  ;;  %v7318_v37 = vpop.permute.xlu0 %2619  ;;  %v2478_v31 = vsel %vm2475_vm4, %v2426_v27, %v2477_v50  ;;  %v2256_v13 = vsel %vm9471_vm0, %v6760_v33, %v6908_v44  ;;  %vm1933_vm2 = vcmp.ne.s16.totalorder %v7326_v32, 0  ;;  %v2259_v27 = vsel %vm9471_vm0, %v6921_v57, %v6918_v46 }
 0x13f   : > { %9560 = vst [vmem:[#allocation12_spill] sm:$0xff] %v7318_v37  ;;  %v5632_v17 = vcombine.high %v2121_v36, %v2478_v31  ;;  %v5631_v34 = vcombine.low %v2121_v36, %v2478_v31  ;;  %vm2287_vm5 = vcmp.ne.s16.totalorder %v2256_v13, 0  ;;  %v5519_v51 = vcombine.low %v1963_v58, %v1964_v10 }
 0x140   : > { %1877 = vrot.lane.b32.xlu1 %v7310_v47, %s6005_s20  ;;  %2226 = vrot.lane.b32.xlu0 %v7155_v25, %s6006_s21  ;;  %v2258_v25 = vsel %vm9471_vm0, %v6905_v22, %v6921_v57  ;;  %v1965_v18 = vsel %vm1933_vm2, %v7235_v3, 0  ;;  %v2319_v22 = vsel %vm2287_vm5, %v7037_v0, 0  ;;  %v2320_v50 = vsel %vm2288_vm1, %v7172_v28, 0 }
 0x141   : > { %4522 = vmatprep.subr.bf16.mxu1 %v5632_v17  ;;  %vm2289_vm7 = vcmp.ne.s16.totalorder %v2258_v25, 0  ;;  %vm2290_vm14 = vcmp.ne.s16.totalorder %v2259_v27, 0  ;;  %v5520_v17 = vcombine.low %v1965_v18, %v1966_v38  ;;  %v5536_v0 = vcombine.low %v2319_v22, %v2320_v50  ;;  %v5962_v38 = vld [vmem:[%s6460_s26] sm:$0xff]  ;;  %v5963_v50 = vld [vmem:[%s6460_s26 + $0x8] sm:$0xff] }
 0x142   : > { %v7350_v33 = vpop.permute.xlu1 %2621  ;;  %4523 = vmatpush1.bf16.msra.mxu1 %v5631_v34  ;;  %v2828_v44 = vpop.permute.xlu0 %2827  ;;  %v2321_v9 = vsel %vm2289_vm7, %v7235_v3, 0  ;;  %v2322_v58 = vsel %vm2290_vm14, %v7202_v49, 0  ;;  %v2661_v18 = vsel %vm2475_vm4, %v6934_v8, %v6932_v15 }
 0x143   : > { %9561 = vst [vmem:[#allocation13_spill] sm:$0xff] %v7350_v33  ;;  %vm2693_vm7 = vcmp.ne.s16.totalorder %v2661_v18, 0 }
 0x144   : > { %2228 = vrot.lane.b32.xlu1 %v7185_v24, %s6006_s21  ;;  %2230 = vrot.lane.b32.xlu0 %v7188_v42, %s6006_s21  ;;  %v2861_v24 = vrot.slane %v2828_v44, 4 }
 0x146   : > { %v2830_v57 = vpop.permute.xlu1 %2829  ;;  %v7371_v36 = vpop.permute.xlu0 %2831 }
 0x147   : > { %v2862_v42 = vrot.slane %v2830_v57, 4  ;;  %v9439_v31 = vrot.slane %v7371_v36, 4 }
 0x148   : > { %2232 = vrot.lane.b32.xlu1 %v7231_v4, %s6006_s21  ;;  %2077 = vrot.lane.b32.xlu0 %v5519_v51, %s6004_s19  ;;  %v2660_v51 = vsel %vm2475_vm4, %v6815_v40, %v6934_v8  ;;  %v5537_v40 = vcombine.low %v2321_v9, %v2322_v58  ;;  %v2662_v8 = vsel %vm2475_vm4, %v6932_v15, %v6955_v63  ;;  %v7415_v15 = vadd.s32 3456, %v6056_v2 }
 0x149   : > { %v2878_v34 = vsel %vm1373_vm11, %v2861_v24, %v2862_v42  ;;  %v2880_v13 = vsel %vm1373_vm11, %v2862_v42, %v9439_v31  ;;  %vm2692_vm14 = vcmp.ne.s16.totalorder %v2660_v51, 0  ;;  %v7409_v9 = vcombine.high %v7175_v23, %v7175_v23 }
 0x14a   : > { %v3056_v10 = vpop.permute.xlu1 %3055  ;;  %v3058_v25 = vpop.permute.xlu0 %3057  ;;  %v2879_v27 = vsel %vm9471_vm0, %v2828_v44, %v2878_v34  ;;  %v2881_v4 = vsel %vm9471_vm0, %v2830_v57, %v2880_v13  ;;  %v7396_v57 = vadd.s32 3328, %v6056_v2  ;;  %v2724_v58 = vsel %vm2692_vm14, %v7172_v28, 0 }
 0x14b   : > { %v5662_v22 = vcombine.high %v5962_v38, %v2879_v27  ;;  %v5664_v24 = vcombine.high %v5963_v50, %v2881_v4  ;;  %v5661_v42 = vcombine.low %v5962_v38, %v2879_v27  ;;  %v5663_v44 = vcombine.low %v5963_v50, %v2881_v4 }
 0x14c   : > { %2079 = vrot.lane.b32.xlu1 %v5520_v17, %s6004_s19  ;;  %2433 = vrot.lane.b32.xlu0 %v5536_v0, %s6007_s22  ;;  %v2663_v0 = vsel %vm2475_vm4, %v6955_v63, %v6953_v61  ;;  %v3089_v13 = vrot.slane %v3056_v10, 4  ;;  %v3090_v27 = vrot.slane %v3058_v25, 4  ;;  %v2953_v63 = vsel %vm1184_vm9, %v7172_v28, 0 }
 0x14d   : > { %4483 = vmatprep.subr.bf16.mxu0 %v5662_v22  ;;  %4524 = vmatprep.subr.bf16.mxu1 %v5664_v24  ;;  %v2725_v38 = vsel %vm2693_vm7, %v7235_v3, 0  ;;  %v2954_v50 = vsel %vm1185_vm13, %v7235_v3, 0  ;;  %vm2694_vm5 = vcmp.ne.s16.totalorder %v2662_v8, 0  ;;  %vm2695_vm1 = vcmp.ne.s16.totalorder %v2663_v0, 0 }
 0x14e   : > { %v7401_v34 = vpop.permute.xlu1 %3059  ;;  %4484 = vmatpush1.bf16.msra.mxu0 %v5661_v42  ;;  %4525 = vmatpush1.bf16.msra.mxu1 %v5663_v44  ;;  %v3171_v17 = vpop.permute.xlu0 %3170  ;;  %v3106_v51 = vsel %vm1373_vm11, %v3089_v13, %v3090_v27  ;;  %v7441_v8 = vadd.s32 3584, %v6056_v2  ;;  %v7444_v0 = vadd.s32 3712, %v6056_v2  ;;  %v2726_v13 = vsel %vm2694_vm5, %v7202_v49, 0 }
 0x14f   : > { %9562 = vst [vmem:[#allocation14_spill] sm:$0xff] %v7401_v34  ;;  %v9440_v4 = vrot.slane %v7401_v34, 4  ;;  %v3204_v22 = vrot.slane %v3171_v17, 4  ;;  %v2727_v31 = vsel %vm2695_vm1, %v7409_v9, 0  ;;  %v5570_v33 = vcombine.low %v2953_v63, %v2954_v50 }
 0x150   : > { %2435 = vrot.lane.b32.xlu1 %v5537_v40, %s6007_s22  ;;  %2631 = vrot.lane.b32.xlu0 %v7270_v21, %s6007_s22  ;;  %v5553_v40 = vcombine.low %v2724_v58, %v2725_v38  ;;  %v3107_v38 = vsel %vm9466_vm8, %v3056_v10, %v3106_v51  ;;  %v2955_v10 = vsel %vm1186_vm3, %v7202_v49, 0  ;;  %v9563_v63 = vand.u32 63, %v7396_v57 }
 0x151   : > { %v3108_v18 = vsel %vm1373_vm11, %v3090_v27, %v9440_v4  ;;  %v639_v50 = vand.u32 63, %v7441_v8  ;;  %v9566_v51 = vand.u32 63, %v7415_v15  ;;  %vm9452_vm7 = vcmask 588800  }
 0x152   : > { %v3173_v21 = vpop.permute.xlu1 %3172  ;;  %v7427_v24 = vpop.permute.xlu0 %3174  ;;  %v3109_v35 = vsel %vm9466_vm8, %v3058_v25, %v3108_v18  ;;  %v2956_v25 = vsel %vm1187_vm15, %v7409_v9, 0  ;;  %vm7468_vm9 = vcmp.ge.s32.totalorder %v9563_v63, 1  ;;  %vm9573_vm5 = vcmp.ne.s16.totalorder %v7288_v53, 0  ;;  %v7533_v53 = vld [vmem:[%s6460_s26 + $0x38] sm:$0xff] }
 0x153   : > { %v3205_v62 = vrot.slane %v3173_v21, 4  ;;  %v9449_v44 = vrot.slane %v7427_v24, 4  ;;  %vm7482_vm13 = vcmp.ge.s32.totalorder %v9566_v51, 1  ;;  %v5571_v18 = vcombine.low %v2955_v10, %v2956_v25 }
 0x154   : > { %2633 = vrot.lane.b32.xlu1 %v7279_v1, %s6007_s22  ;;  %2635 = vrot.lane.b32.xlu0 %v7282_v19, %s6007_s22  ;;  %vm932_vm3 = vmpackc.low %vm7482_vm13, %vm7468_vm9  ;;  %vm7504_vm15 = vcmp.ge.s32.totalorder %v639_v50, 1  ;;  %vm9574_vm1 = vcmp.ne.s16.totalorder %v7303_v5, 0  ;;  %v3299_v63 = vsel %vm1934_vm6, %v7409_v9, 0  ;;  %v9575_v51 = vrot.slane %v7058_v48, 4 }
 0x155   : > { %v3221_v27 = vsel %vm1373_vm11, %v3204_v22, %v3205_v62  ;;  %v3223_v1 = vsel %vm1373_vm11, %v3205_v62, %v9449_v44  ;;  %v948_v10 = vsel %vm932_vm3, 65537, %v9545_v55 }
 0x156   : > { %v3399_v58 = vpop.permute.xlu1 %3398  ;;  %v3401_v19 = vpop.permute.xlu0 %3400  ;;  %v3222_v4 = vsel %vm9465_vm12, %v3171_v17, %v3221_v27  ;;  %v3224_v56 = vsel %vm9465_vm12, %v3173_v21, %v3223_v1 }
 0x157   : > { %v3432_v42 = vrot.slane %v3399_v58, 4  ;;  %v3433_v34 = vrot.slane %v3401_v19, 4  ;;  %v5694_v2 = vcombine.high %v3107_v38, %v3222_v4  ;;  %v5696_v37 = vcombine.high %v3109_v35, %v3224_v56 }
 0x158   : > { %2637 = vrot.lane.b32.xlu1 %v7310_v47, %s6007_s22  ;;  %2837 = vrot.lane.b32.xlu0 %v5553_v40, %s6006_s21  ;;  %v5693_v22 = vcombine.low %v3107_v38, %v3222_v4  ;;  %v5695_v62 = vcombine.low %v3109_v35, %v3224_v56  ;;  %v5554_v4 = vcombine.low %v2726_v13, %v2727_v31  ;;  %v3297_v38 = vsel %vm9574_vm1, %v7235_v3, 0 }
 0x159   : > { %v3449_v17 = vsel %vm1373_vm11, %v3432_v42, %v3433_v34  ;;  %4485 = vmatprep.subr.bf16.mxu0 %v5694_v2  ;;  %4526 = vmatprep.subr.bf16.mxu1 %v5696_v37  ;;  %v646_v2 = vand.u32 63, %v7444_v0  ;;  %vm7668_vm1 = vcmp.le.s32.totalorder %v639_v50, 62  ;;  %v5882_v0 = vld [vmem:[%s6460_s26 + $0x34] sm:$0xff] }
 0x15a   : > { %v7472_v35 = vpop.permute.xlu1 %3402  ;;  %4486 = vmatpush1.bf16.msra.mxu0 %v5693_v22  ;;  %4527 = vmatpush1.bf16.msra.mxu1 %v5695_v62  ;;  %v7474_v45 = vpop.permute.xlu0 %1115  ;;  %v3450_v12 = vsel %vm1143_vm10, %v3399_v58, %v3449_v17  ;;  %v7517_v58 = vld [vmem:[%s9422_s1] sm:$0x3]  ;;  %v7551_v17 = vsel %vm1143_vm10, %v6615_v30, %v6613_v29 }
 0x15b   : > { %v9448_v37 = vrot.slane %v7472_v35, 4  ;;  %v5726_v21 = vcombine.high %v3450_v12, %v3450_v12  ;;  %v5725_v42 = vcombine.low %v3450_v12, %v3450_v12  ;;  %vm7510_vm14 = vcmp.ge.s32.totalorder %v646_v2, 1 }
 0x15c   : > { %2839 = vrot.lane.b32.xlu1 %v5554_v4, %s6006_s21  ;;  %3065 = vrot.lane.b32.xlu0 %v5570_v33, %s6005_s20  ;;  %vm933_vm9 = vmpackc.low %vm7510_vm14, %vm7504_vm15  ;;  %v7563_v4 = vrot.slane %v948_v10, %v6066_v6  ;;  %vm1189_vm6 = vcmp.ne.s16.totalorder %v7551_v17, 0 }
 0x15d   : > { %v3451_v40 = vsel %vm1373_vm11, %v3433_v34, %v9448_v37  ;;  %5757 = vmatprep.subr.msk.bf16.mxu0 %vm1373_vm11, %v5726_v21  ;;  %v4384_v56 = vsel %vm1373_vm11, %v5725_v42, 0  ;;  %v949_v32 = vsel %vm933_vm9, 65537, %v9545_v55  ;;  %v9576_v34 = vld [vmem:[#allocation5_spill] sm:$0xff]  ;;  %vm7674_vm9 = vcmp.le.s32.totalorder %v646_v2, 62 }
 0x15e   : > { %v7493_v13 = vpop.permute.xlu1 %1117  ;;  %4488 = vmatpush1.bf16.msra.mxu0 %v4384_v56  ;;  %v7495_v27 = vpop.permute.xlu0 %1119  ;;  %v3452_v1 = vsel %vm1143_vm10, %v3401_v19, %v3451_v40  ;;  %v3296_v19 = vsel %vm9573_vm5, %v7172_v28, 0  ;;  %v7538_v28 = vsel %vm1143_vm10, %v6605_v26, %v6615_v30  ;;  %v3298_v26 = vsel %vm1933_vm2, %v7202_v49, 0  ;;  %v7571_v49 = vld [vmem:[%s6460_s26 + $0x40] sm:$0xff] }
 0x15f   : > { %v5728_v22 = vcombine.high %v3452_v1, %v3452_v1  ;;  %v5727_v62 = vcombine.low %v3452_v1, %v3452_v1  ;;  %v5586_v3 = vcombine.low %v3296_v19, %v3297_v38  ;;  %v7567_v30 = vcombine.low %v7533_v53, %v7533_v53  ;;  %v9577_v38 = vld [vmem:[#allocation4_spill] sm:$0xff] }
 0x160   : > { %3067 = vrot.lane.b32.xlu1 %v5571_v18, %s6005_s20  ;;  %3180 = vrot.lane.b32.xlu0 %v7147_v54, %s6008_s27  ;;  %vm1188_vm2 = vcmp.ne.s16.totalorder %v7538_v28, 0  ;;  %v5587_v41 = vcombine.low %v3298_v26, %v3299_v63  ;;  %v7589_v40 = vcombine.low %v7571_v49, %v7571_v49  ;;  %v7595_v56 = vrot.slane %v948_v10, %v6068_v7 }
 0x161   : > { %5759 = vmatprep.subr.msk.bf16.mxu1 %vm1373_vm11, %v5728_v22  ;;  %5758 = vmatmul.mubr.msk.bf16.vlgmr.msra.gmra.mrb[0].mxu0 %vm9452_vm7, %v7517_v58  ;;  %v4390_v54 = vsel %vm1373_vm11, %v5727_v62, 0  ;;  %v1220_v18 = vsel %vm1188_vm2, %v7409_v9, 0  ;;  %v7598_v1 = vrot.slane %v949_v32, %v6066_v6  ;;  %v1221_v33 = vsel %vm1189_vm6, %v7567_v30, 0 }
 0x162   : > { %v7540_v5 = vpop.permute.xlu1 %1121  ;;  %v1329_v25 = vpop.permute.xlu0 %1328  ;;  %4593 = vmatprep.mubr.bf16.mxu0 %v9545_v55  ;;  %4529 = vmatpush1.bf16.msra.mxu1 %v4390_v54  ;;  %v7606_v19 = vsel %vm1143_vm10, %v6613_v29, %v9576_v34  ;;  %v7611_v22 = vsel %vm1143_vm10, %v9576_v34, %v9577_v38  ;;  %v9578_v62 = vrot.slane %v7012_v11, 4  ;;  %v9579_v63 = vand.u32 63, %v7396_v57 }
 0x163   : > { %v1359_v47 = vrot.slane %v1329_v25, 4  ;;  %vm1190_vm15 = vcmp.ne.s16.totalorder %v7606_v19, 0  ;;  %vm1191_vm14 = vcmp.ne.s16.totalorder %v7611_v22, 0  ;;  %v7651_v57 = vcombine.high %v7533_v53, %v7533_v53 }
 0x164   : > { %3182 = vrot.lane.b32.xlu1 %v7175_v23, %s6008_s27  ;;  %3408 = vrot.lane.b32.xlu0 %v5586_v3, %s6004_s19  ;;  %vm7626_vm13 = vcmp.le.s32.totalorder %v9579_v63, 62  ;;  %v9610_v28 = vrot.slane %v7427_v24, 4 }
 0x165   : > { %5760 = vmatmul.mubr.msk.bf16.vlgmr.msra.gmra.mrb[0].mxu1 %vm9452_vm7, %v7517_v58  ;;  %v1379_v31 = vsel %vm1373_vm11, %v9575_v51, %v1359_v47  ;;  %v9582_v51 = vand.u32 63, %v7415_v15  ;;  %v5503_v15 = vcombine.low %v1220_v18, %v1221_v33 }
 0x166   : > { %v7575_v12 = vpop.permute.xlu1 %1330  ;;  %v1462_v23 = vpop.permute.xlu0 %1461  ;;  %4634 = vmatprep.mubr.bf16.mxu1 %v9545_v55  ;;  %v1380_v26 = vsel %vm9466_vm8, %v7058_v48, %v1379_v31  ;;  %v7647_v48 = vrot.slane %v949_v32, %v6068_v7 }
 0x167   : > { %v9451_v21 = vrot.slane %v7575_v12, 4  ;;  %v1492_v42 = vrot.slane %v1462_v23, 4  ;;  %vm7632_vm3 = vcmp.le.s32.totalorder %v9582_v51, 62 }
 0x168   : > { %3410 = vrot.lane.b32.xlu1 %v5587_v41, %s6004_s19  ;;  %1131 = vrot.lane.b32.xlu0 %v7563_v4, %s6004_s19  ;;  %vm1680_vm5 = vmpackc.low %vm7632_vm3, %vm7626_vm13 }
 0x169   : > { %v1511_v10 = vsel %vm1373_vm11, %v9578_v62, %v1492_v42  ;;  %v1696_v2 = vsel %vm1680_vm5, 65537, %v9545_v55  ;;  %vm1681_vm13 = vmpackc.low %vm7674_vm9, %vm7668_vm1 }
 0x16a   : > { %v7616_v3 = vpop.permute.xlu1 %1463  ;;  %v7618_v54 = vpop.permute.xlu0 %1863  ;;  %v1512_v29 = vsel %vm9465_vm12, %v7012_v11, %v1511_v10  ;;  %v1381_v11 = vsel %vm1373_vm11, %v1359_v47, %v9451_v21  ;;  %v7701_v63 = vrot.slane %v1696_v2, %v6066_v6  ;;  %v1697_v41 = vsel %vm1681_vm13, 65537, %v9545_v55 }
 0x16b   : > { %v9450_v62 = vrot.slane %v7616_v3, 4  ;;  %v5601_v37 = vcombine.low %v1380_v26, %v1512_v29  ;;  %v5602_v44 = vcombine.high %v1380_v26, %v1512_v29  ;;  %v1382_v26 = vsel %vm9466_vm8, %v1329_v25, %v1381_v11  ;;  %v5884_v29 = vld [vmem:[%s6460_s26 + $0x3c] sm:$0xff] }
 0x16c   : > { %1133 = vrot.lane.b32.xlu1 %v7595_v56, %s6004_s19  ;;  %1135 = vrot.lane.b32.xlu0 %v7598_v1, %s6004_s19  ;;  %v1222_v25 = vsel %vm1190_vm15, %v7651_v57, 0  ;;  %v7712_v11 = vrot.slane %v1696_v2, %v6068_v7  ;;  %v2260_v2 = vsel %vm9471_vm0, %v6918_v46, %v7149_v59 }
 0x16d   : > { %4561 = vmatprep.subr.bf16.mxu0 %v5602_v44  ;;  %v1513_v47 = vsel %vm1373_vm11, %v1492_v42, %v9450_v62  ;;  %v9596_v44 = vld [vmem:[#allocation6_spill] sm:$0xff]  ;;  %v9598_v62 = vrot.slane %v7260_v14, 4  ;;  %vm2291_vm13 = vcmp.ne.s16.totalorder %v2260_v2, 0 }
 0x16e   : > { %v7656_v31 = vpop.permute.xlu1 %1865  ;;  %4562 = vmatpush1.bf16.msra.mxu0 %v5601_v37  ;;  %v7658_v10 = vpop.permute.xlu0 %1867  ;;  %v1514_v32 = vsel %vm9465_vm12, %v1462_v23, %v1513_v47  ;;  %v1223_v23 = vsel %vm1191_vm14, %v7589_v40, 0 }
 0x16f   : > { %9585 = vst [vmem:[#allocation5_spill] sm:$0xff] %v7658_v10  ;;  %v5603_v8 = vcombine.low %v1382_v26, %v1514_v32  ;;  %v5604_v50 = vcombine.high %v1382_v26, %v1514_v32  ;;  %v5504_v42 = vcombine.low %v1222_v25, %v1223_v23  ;;  %v9595_v32 = vld [vmem:[#allocation7_spill] sm:$0xff]  ;;  %v7729_v23 = vrot.slane %v1697_v41, %v6068_v7 }
 0x170   : > { %1137 = vrot.lane.b32.xlu1 %v7647_v48, %s6004_s19  ;;  %1336 = vrot.lane.b32.xlu0 %v5503_v15, %s6005_s20  ;;  %v7715_v15 = vrot.slane %v1697_v41, %v6066_v6  ;;  %v7722_v37 = vsel %vm9466_vm8, %v9596_v44, %v9595_v32 }
 0x171   : > { %4602 = vmatprep.subr.bf16.mxu1 %v5604_v50  ;;  %vm1936_vm3 = vcmp.ne.s16.totalorder %v7722_v37, 0  ;;  %v7740_v50 = vsel %vm9466_vm8, %v9595_v32, %v7110_v52  ;;  %v7974_v37 = vld [vmem:[%s6460_s26 + $0x48] sm:$0xff] }
 0x172   : > { %v7689_v18 = vpop.permute.xlu1 %1869  ;;  %4603 = vmatpush1.bf16.msra.mxu1 %v5603_v8  ;;  %v7691_v33 = vpop.permute.xlu0 %2218  ;;  %v7734_v8 = vsel %vm9466_vm8, %v6883_v60, %v9596_v44  ;;  %v1968_v46 = vsel %vm1936_vm3, %v7567_v30, 0  ;;  %vm9462_vm1 = vcmp.ne.s16.totalorder %v7740_v50, 0 }
 0x173   : > { %9590 = vst [vmem:[#allocation4_spill] sm:$0xff] %v7689_v18  ;;  %9591 = vst [vmem:[#allocation15_spill] sm:$0xff] %v7691_v33  ;;  %vm1935_vm5 = vcmp.ne.s16.totalorder %v7734_v8, 0 }
 0x174   : > { %1338 = vrot.lane.b32.xlu1 %v5504_v42, %s6005_s20  ;;  %1469 = vrot.lane.b32.xlu0 %v5882_v0, %s6008_s27  ;;  %v7745_v0 = vsel %vm9466_vm8, %v7110_v52, %v7130_v43  ;;  %v9599_v52 = vrot.slane %v7290_v39, 4  ;;  %v1967_v18 = vsel %vm1935_vm5, %v7409_v9, 0  ;;  %v9602_v43 = vld [vmem:[#allocation10_spill] sm:$0xff] }
 0x175   : > { %vm9461_vm9 = vcmp.ne.s16.totalorder %v7745_v0, 0 }
 0x176   : > { %v7704_v51 = vpop.permute.xlu1 %2220  ;;  %v7706_v34 = vpop.permute.xlu0 %2222 }
 0x177   : > { %9592 = vst [vmem:[#allocation16_spill] sm:$0xff] %v7704_v51  ;;  %9593 = vst [vmem:[#allocation17_spill] sm:$0xff] %v7706_v34 }
 0x178   : > { %1471 = vrot.lane.b32.xlu1 %v5884_v29, %s6008_s27  ;;  %1879 = vrot.lane.b32.xlu0 %v7701_v63, %s6005_s20  ;;  %v9597_v29 = vld [vmem:[#allocation9_spill] sm:$0xff] }
 0x179   : > { %v2261_v41 = vsel %vm9471_vm0, %v7149_v59, %v9597_v29 }
 0x17a   : > { %v7717_v47 = vpop.permute.xlu1 %2224  ;;  %v2074_v26 = vpop.permute.xlu0 %2073  ;;  %vm2292_vm7 = vcmp.ne.s16.totalorder %v2261_v41, 0 }
 0x17b   : > { %9594 = vst [vmem:[#allocation18_spill] sm:$0xff] %v7717_v47  ;;  %v2104_v25 = vrot.slane %v2074_v26, 4 }
 0x17c   : > { %1881 = vrot.lane.b32.xlu1 %v7712_v11, %s6005_s20  ;;  %1883 = vrot.lane.b32.xlu0 %v7715_v15, %s6005_s20 }
 0x17d   : > { %v2122_v21 = vsel %vm1373_vm11, %v9598_v62, %v2104_v25 }
 0x17e   : > { %v7750_v42 = vpop.permute.xlu1 %2075  ;;  %v2430_v60 = vpop.permute.xlu0 %2429 }
 0x17f   : > { %v2460_v32 = vrot.slane %v2430_v60, 4  ;;  %v9601_v10 = vrot.slane %v7750_v42, 4 }
 0x180   : > { %1885 = vrot.lane.b32.xlu1 %v7729_v23, %s6005_s20  ;;  %2234 = vrot.lane.b32.xlu0 %v7563_v4, %s6006_s21  ;;  %v2123_v4 = vsel %vm1143_vm10, %v7260_v14, %v2122_v21  ;;  %v9603_v14 = vld [vmem:[#allocation11_spill] sm:$0xff]  ;;  %v5521_v21 = vcombine.low %v1967_v18, %v1968_v46 }
 0x181   : > { %v2479_v59 = vsel %vm1373_vm11, %v9599_v52, %v2460_v32  ;;  %v2124_v52 = vsel %vm1373_vm11, %v2104_v25, %v9601_v10  ;;  %v1969_v10 = vsel %vm9462_vm1, %v7651_v57, 0 }
 0x182   : > { %v7772_v62 = vpop.permute.xlu1 %2431  ;;  %v7774_v44 = vpop.permute.xlu0 %2623  ;;  %v2480_v34 = vsel %vm2475_vm4, %v7290_v39, %v2479_v59  ;;  %v2263_v39 = vsel %vm9471_vm0, %v9602_v43, %v9603_v14 }
 0x183   : > { %9600 = vst [vmem:[#allocation7_spill] sm:$0xff] %v7774_v44  ;;  %v9464_v47 = vrot.slane %v7772_v62, 4  ;;  %v5633_v33 = vcombine.low %v2123_v4, %v2480_v34  ;;  %v5634_v51 = vcombine.high %v2123_v4, %v2480_v34  ;;  %v2262_v44 = vsel %vm9471_vm0, %v9597_v29, %v9602_v43 }
 0x184   : > { %2236 = vrot.lane.b32.xlu1 %v7595_v56, %s6006_s21  ;;  %2238 = vrot.lane.b32.xlu0 %v7598_v1, %s6006_s21  ;;  %v1970_v34 = vsel %vm9461_vm9, %v7589_v40, 0  ;;  %v2323_v56 = vsel %vm2291_vm13, %v7409_v9, 0  ;;  %v2324_v1 = vsel %vm2292_vm7, %v7567_v30, 0  ;;  %v2125_v29 = vsel %vm1143_vm10, %v2074_v26, %v2124_v52 }
 0x185   : > { %4563 = vmatprep.subr.bf16.mxu0 %v5634_v51  ;;  %v2481_v43 = vsel %vm1373_vm11, %v2460_v32, %v9464_v47  ;;  %vm2293_vm9 = vcmp.ne.s16.totalorder %v2262_v44, 0  ;;  %vm2294_vm1 = vcmp.ne.s16.totalorder %v2263_v39, 0  ;;  %v5522_v9 = vcombine.low %v1969_v10, %v1970_v34  ;;  %v9606_v10 = vld [vmem:[#allocation12_spill] sm:$0xff] }
 0x186   : > { %v7810_v18 = vpop.permute.xlu1 %2625  ;;  %4564 = vmatpush1.bf16.msra.mxu0 %v5633_v33  ;;  %v7812_v25 = vpop.permute.xlu0 %2627  ;;  %v2482_v46 = vsel %vm2475_vm4, %v2430_v60, %v2481_v43  ;;  %v5538_v2 = vcombine.low %v2323_v56, %v2324_v1  ;;  %v2325_v33 = vsel %vm2293_vm9, %v7651_v57, 0  ;;  %v2326_v41 = vsel %vm2294_vm1, %v7589_v40, 0 }
 0x187   : > { %v5635_v51 = vcombine.low %v2125_v29, %v2482_v46  ;;  %v5636_v59 = vcombine.high %v2125_v29, %v2482_v46  ;;  %v2665_v60 = vsel %vm2475_vm4, %v7292_v16, %v7316_v20  ;;  %v9604_v4 = vrot.slane %v7371_v36, 4 }
 0x188   : > { %2240 = vrot.lane.b32.xlu1 %v7647_v48, %s6006_s21  ;;  %2081 = vrot.lane.b32.xlu0 %v5521_v21, %s6004_s19  ;;  %v5539_v48 = vcombine.low %v2325_v33, %v2326_v41  ;;  %v2664_v39 = vsel %vm2475_vm4, %v6953_v61, %v7292_v16  ;;  %vm2697_vm7 = vcmp.ne.s16.totalorder %v2665_v60, 0  ;;  %v9605_v21 = vld [vmem:[#allocation13_spill] sm:$0xff]  ;;  %v7848_v61 = vcombine.high %v7571_v49, %v7571_v49  ;;  %v9607_v16 = vld [vmem:[#allocation3_spill] sm:$0xff] }
 0x189   : > { %4604 = vmatprep.subr.bf16.mxu1 %v5636_v59  ;;  %v2667_v34 = vsel %vm2475_vm4, %v9606_v10, %v9605_v21  ;;  %vm2696_vm1 = vcmp.ne.s16.totalorder %v2664_v39, 0  ;;  %v7863_v41 = vadd.s32 3968, %v9607_v16  ;;  %v2957_v60 = vsel %vm1188_vm2, %v7567_v30, 0 }
 0x18a   : > { %v7821_v32 = vpop.permute.xlu1 %2629  ;;  %4605 = vmatpush1.bf16.msra.mxu1 %v5635_v51  ;;  %v2834_v26 = vpop.permute.xlu0 %2833  ;;  %v5964_v51 = vld [vmem:[%s6460_s26 + $0x10] sm:$0xff]  ;;  %vm2699_vm9 = vcmp.ne.s16.totalorder %v2667_v34, 0 }
 0x18b   : > { %v2864_v44 = vrot.slane %v2834_v26, 4  ;;  %v2731_v39 = vsel %vm2699_vm9, %v7848_v61, 0 }
 0x18c   : > { %2083 = vrot.lane.b32.xlu1 %v5522_v9, %s6004_s19  ;;  %2437 = vrot.lane.b32.xlu0 %v5538_v2, %s6007_s22  ;;  %v7854_v2 = vadd.s32 3840, %v9607_v16 }
 0x18d   : > { %v2882_v52 = vsel %vm1373_vm11, %v9604_v4, %v2864_v44 }
 0x18e   : > { %v7837_v43 = vpop.permute.xlu1 %2835  ;;  %v7839_v56 = vpop.permute.xlu0 %3061  ;;  %v2883_v1 = vsel %vm9471_vm0, %v7371_v36, %v2882_v52  ;;  %v2666_v36 = vsel %vm2475_vm4, %v7316_v20, %v9606_v10 }
 0x18f   : > { %v9463_v29 = vrot.slane %v7837_v43, 4  ;;  %v3092_v46 = vrot.slane %v7839_v56, 4  ;;  %v5665_v59 = vcombine.low %v5964_v51, %v2883_v1  ;;  %v5666_v9 = vcombine.high %v5964_v51, %v2883_v1  ;;  %v9608_v1 = vld [vmem:[#allocation14_spill] sm:$0xff] }
 0x190   : > { %2439 = vrot.lane.b32.xlu1 %v5539_v48, %s6007_s22  ;;  %2639 = vrot.lane.b32.xlu0 %v7701_v63, %s6007_s22  ;;  %v2729_v63 = vsel %vm2697_vm7, %v7651_v57, 0  ;;  %v9609_v20 = vrot.slane %v9608_v1, 4  ;;  %vm2698_vm13 = vcmp.ne.s16.totalorder %v2666_v36, 0 }
 0x191   : > { %4565 = vmatprep.subr.bf16.mxu0 %v5666_v9  ;;  %v2884_v33 = vsel %vm1373_vm11, %v2864_v44, %v9463_v29  ;;  %v5965_v9 = vld [vmem:[%s6460_s26 + $0x18] sm:$0xff] }
 0x192   : > { %v7867_v48 = vpop.permute.xlu1 %3063  ;;  %4566 = vmatpush1.bf16.msra.mxu0 %v5665_v59  ;;  %v3177_v4 = vpop.permute.xlu0 %3176  ;;  %v2885_v52 = vsel %vm9471_vm0, %v2834_v26, %v2884_v33  ;;  %v3110_v10 = vsel %vm1373_vm11, %v9609_v20, %v3092_v46  ;;  %v2958_v59 = vsel %vm1189_vm6, %v7651_v57, 0  ;;  %v2728_v26 = vsel %vm2696_vm1, %v7567_v30, 0 }
 0x193   : > { %v3093_v51 = vrot.slane %v7867_v48, 4  ;;  %v3207_v44 = vrot.slane %v3177_v4, 4  ;;  %v5667_v16 = vcombine.low %v5965_v9, %v2885_v52  ;;  %v5668_v29 = vcombine.high %v5965_v9, %v2885_v52 }
 0x194   : > { %2641 = vrot.lane.b32.xlu1 %v7712_v11, %s6007_s22  ;;  %2643 = vrot.lane.b32.xlu0 %v7715_v15, %s6007_s22  ;;  %v653_v33 = vand.u32 63, %v7854_v2  ;;  %v5555_v52 = vcombine.low %v2728_v26, %v2729_v63  ;;  %v3111_v15 = vsel %vm9466_vm8, %v9608_v1, %v3110_v10  ;;  %v5572_v17 = vcombine.low %v2957_v60, %v2958_v59 }
 0x195   : > { %4606 = vmatprep.subr.bf16.mxu1 %v5668_v29  ;;  %v3225_v20 = vsel %vm1373_vm11, %v9610_v28, %v3207_v44  ;;  %v3112_v29 = vsel %vm1373_vm11, %v3092_v46, %v3093_v51  ;;  %v2960_v1 = vsel %vm1191_vm14, %v7848_v61, 0  ;;  %v9611_v46 = vrot.slane %v7472_v35, 4 }
 0x196   : > { %v7894_v9 = vpop.permute.xlu1 %3178  ;;  %4607 = vmatpush1.bf16.msra.mxu1 %v5667_v16  ;;  %v3405_v11 = vpop.permute.xlu0 %3404  ;;  %v3226_v63 = vsel %vm9465_vm12, %v7427_v24, %v3225_v20  ;;  %v2959_v16 = vsel %vm1190_vm15, %v7589_v40, 0  ;;  %v2730_v24 = vsel %vm2698_vm13, %v7589_v40, 0  ;;  %vm7923_vm2 = vcmp.ge.s32.totalorder %v653_v33, 1 }
 0x197   : > { %v9470_v26 = vrot.slane %v7894_v9, 4  ;;  %v3435_v28 = vrot.slane %v3405_v11, 4  ;;  %v5697_v47 = vcombine.low %v3111_v15, %v3226_v63  ;;  %v5698_v34 = vcombine.high %v3111_v15, %v3226_v63 }
 0x198   : > { %2645 = vrot.lane.b32.xlu1 %v7729_v23, %s6007_s22  ;;  %2841 = vrot.lane.b32.xlu0 %v5555_v52, %s6006_s21  ;;  %v5556_v23 = vcombine.low %v2730_v24, %v2731_v39  ;;  %v3113_v52 = vsel %vm9466_vm8, %v7839_v56, %v3112_v29  ;;  %vm9617_vm14 = vcmp.ne.s16.totalorder %v7740_v50, 0  ;;  %v7998_v50 = vcombine.low %v7974_v37, %v7974_v37 }
 0x199   : > { %v3453_v10 = vsel %vm1373_vm11, %v9611_v46, %v3435_v28  ;;  %4567 = vmatprep.subr.bf16.mxu0 %v5698_v34  ;;  %v3227_v19 = vsel %vm1373_vm11, %v3207_v44, %v9470_v26  ;;  %v9614_v34 = vand.u32 63, %v7863_v41  ;;  %v3302_v22 = vsel %vm9617_vm14, %v7589_v40, 0 }
 0x19a   : > { %v7927_v60 = vpop.permute.xlu1 %3406  ;;  %4568 = vmatpush1.bf16.msra.mxu0 %v5697_v47  ;;  %v7929_v36 = vpop.permute.xlu0 %1123  ;;  %v3454_v59 = vsel %vm1143_vm10, %v7472_v35, %v3453_v10  ;;  %v3228_v44 = vsel %vm9465_vm12, %v3177_v4, %v3227_v19  ;;  %v5573_v4 = vcombine.low %v2959_v16, %v2960_v1  ;;  %v7965_v16 = vsel %vm1143_vm10, %v7474_v45, %v7493_v13 }
 0x19b   : > { %v9469_v20 = vrot.slane %v7927_v60, 4  ;;  %v5730_v15 = vcombine.high %v3454_v59, %v3454_v59  ;;  %v5699_v63 = vcombine.low %v3113_v52, %v3228_v44  ;;  %vm7939_vm6 = vcmp.ge.s32.totalorder %v9614_v34, 1 }
 0x19c   : > { %2843 = vrot.lane.b32.xlu1 %v5556_v23, %s6006_s21  ;;  %3069 = vrot.lane.b32.xlu0 %v5572_v17, %s6005_s20  ;;  %v5700_v35 = vcombine.high %v3113_v52, %v3228_v44  ;;  %v5729_v47 = vcombine.low %v3454_v59, %v3454_v59  ;;  %vm934_vm15 = vmpackc.low %vm7939_vm6, %vm7923_vm2  ;;  %v3301_v17 = vsel %vm1936_vm3, %v7651_v57, 0  ;;  %v3300_v1 = vsel %vm1935_vm5, %v7567_v30, 0  ;;  %v8012_v52 = vld [vmem:[%s6460_s26 + $0x50] sm:$0xff] }
 0x19d   : > { %v3455_v56 = vsel %vm1373_vm11, %v3435_v28, %v9469_v20  ;;  %5761 = vmatprep.subr.msk.bf16.mxu0 %vm1373_vm11, %v5730_v15  ;;  %v950_v57 = vsel %vm934_vm15, 65537, %v9545_v55  ;;  %v5588_v19 = vcombine.low %v3300_v1, %v3301_v17  ;;  %vm9618_vm3 = vcmp.ne.s16.totalorder %v7745_v0, 0 }
 0x19e   : > { %4608 = vmatprep.subr.bf16.mxu1 %v5700_v35  ;;  %v7949_v29 = vpop.permute.xlu1 %1125  ;;  %v4396_v24 = vsel %vm1373_vm11, %v5729_v47, 0  ;;  %v7952_v46 = vpop.permute.xlu0 %1127  ;;  %v3456_v10 = vsel %vm1143_vm10, %v3405_v11, %v3455_v56  ;;  %vm9619_vm5 = vcmask 588800   ;;  %v7992_v59 = vsel %vm1143_vm10, %v9577_v38, %v7474_v45 }
 0x19f   : > { %4570 = vmatpush1.bf16.msra.mxu0 %v4396_v24  ;;  %4609 = vmatpush1.bf16.msra.mxu1 %v5699_v63  ;;  %v5732_v28 = vcombine.high %v3456_v10, %v3456_v10  ;;  %v5731_v11 = vcombine.low %v3456_v10, %v3456_v10  ;;  %vm1193_vm7 = vcmp.ne.s16.totalorder %v7965_v16, 0  ;;  %v8003_v0 = vsel %vm1143_vm10, %v7495_v27, %v7540_v5  ;;  %vm9622_vm13 = vmmov %vm9619_vm5 }
 0x1a0   : > { %3071 = vrot.lane.b32.xlu1 %v5573_v4, %s6005_s20  ;;  %3184 = vrot.lane.b32.xlu0 %v7533_v53, %s6008_s27  ;;  %v3303_v53 = vsel %vm9618_vm3, %v7848_v61, 0  ;;  %v8009_v45 = vrot.slane %v950_v57, %v6066_v6  ;;  %vm8016_vm1 = vcmp.le.s32.totalorder %v653_v33, 62  ;;  %vm1192_vm9 = vcmp.ne.s16.totalorder %v7992_v59, 0 }
 0x1a1   : > { %5763 = vmatprep.subr.msk.bf16.mxu1 %vm1373_vm11, %v5732_v28  ;;  %v4402_v30 = vsel %vm1373_vm11, %v5731_v11, 0  ;;  %v5589_v38 = vcombine.low %v3302_v22, %v3303_v53  ;;  %v8027_v15 = vsel %vm1143_vm10, %v7493_v13, %v7495_v27  ;;  %v9623_v2 = vand.u32 63, %v7863_v41 }
 0x1a2   : > { %v7984_v23 = vpop.permute.xlu1 %1129  ;;  %v1333_v8 = vpop.permute.xlu0 %1332  ;;  %5762 = vmatmul.mubr.msk.bf16.vlgmr.msra.gmra.mrb[4].mxu0 %vm9619_vm5, %v7517_v58  ;;  %vm1195_vm6 = vcmp.ne.s16.totalorder %v8003_v0, 0  ;;  %v9626_v13 = vrot.slane %v7575_v12, 4  ;;  %v8053_v41 = vrot.slane %v950_v57, %v6068_v7  ;;  %v1224_v47 = vsel %vm1192_vm9, %v7848_v61, 0 }
 0x1a3   : > { %4611 = vmatpush1.bf16.msra.mxu1 %v4402_v30  ;;  %v1361_v40 = vrot.slane %v1333_v8, 4  ;;  %4675 = vmatprep.mubr.bf16.mxu0 %v9545_v55  ;;  %vm8035_vm2 = vcmp.le.s32.totalorder %v9623_v2, 62  ;;  %v8060_v56 = vcombine.high %v7974_v37, %v7974_v37  ;;  %vm1194_vm15 = vcmp.ne.s16.totalorder %v8027_v15, 0 }
 0x1a4   : > { %3186 = vrot.lane.b32.xlu1 %v7571_v49, %s6008_s27  ;;  %3412 = vrot.lane.b32.xlu0 %v5588_v19, %s6004_s19  ;;  %v1225_v49 = vsel %vm1193_vm7, %v7998_v50, 0  ;;  %v9627_v4 = vrot.slane %v7616_v3, 4  ;;  %vm1682_vm14 = vmpackc.low %vm8035_vm2, %vm8016_vm1  ;;  %v9636_v20 = vrot.slane %v7750_v42, 4  ;;  %v8269_v0 = vsel %vm1143_vm10, %v7929_v36, %v7949_v29 }
 0x1a5   : > { %v1383_v27 = vsel %vm1373_vm11, %v9626_v13, %v1361_v40  ;;  %v5505_v10 = vcombine.low %v1224_v47, %v1225_v49  ;;  %v1698_v44 = vsel %vm1682_vm14, 65537, %v9545_v55 }
 0x1a6   : > { %v8029_v63 = vpop.permute.xlu1 %1334  ;;  %v1466_v34 = vpop.permute.xlu0 %1465  ;;  %5764 = vmatmul.mubr.msk.bf16.vlgmr.msra.gmra.mrb[4].mxu1 %vm9622_vm13, %v7517_v58  ;;  %v8047_v58 = vcombine.low %v8012_v52, %v8012_v52  ;;  %v1384_v1 = vsel %vm9466_vm8, %v7575_v12, %v1383_v27  ;;  %v5886_v12 = vld [vmem:[%s6460_s26 + $0x44] sm:$0xff] }
 0x1a7   : > { %v9468_v39 = vrot.slane %v8029_v63, 4  ;;  %v1494_v35 = vrot.slane %v1466_v34, 4  ;;  %4716 = vmatprep.mubr.bf16.mxu1 %v9545_v55 }
 0x1a8   : > { %3414 = vrot.lane.b32.xlu1 %v5589_v38, %s6004_s19  ;;  %1139 = vrot.lane.b32.xlu0 %v8009_v45, %s6004_s19  ;;  %v1227_v17 = vsel %vm1195_vm6, %v8047_v58, 0  ;;  %v2963_v59 = vsel %vm1194_vm15, %v8047_v58, 0 }
 0x1a9   : > { %v1515_v24 = vsel %vm1373_vm11, %v9627_v4, %v1494_v35  ;;  %v1385_v30 = vsel %vm1373_vm11, %v1361_v40, %v9468_v39  ;;  %v5888_v4 = vld [vmem:[%s6460_s26 + $0x4c] sm:$0xff] }
 0x1aa   : > { %v8069_v28 = vpop.permute.xlu1 %1467  ;;  %v8071_v11 = vpop.permute.xlu0 %1871  ;;  %v1516_v57 = vsel %vm9465_vm12, %v7616_v3, %v1515_v24  ;;  %v1226_v3 = vsel %vm1194_vm15, %v8060_v56, 0  ;;  %v1386_v33 = vsel %vm9466_vm8, %v1333_v8, %v1385_v30  ;;  %v8111_v24 = vsel %vm9466_vm8, %v7618_v54, %v7656_v31  ;;  %v9632_v30 = vld [vmem:[#allocation15_spill] sm:$0xff] }
 0x1ab   : > { %v9467_v19 = vrot.slane %v8069_v28, 4  ;;  %v5605_v22 = vcombine.low %v1384_v1, %v1516_v57  ;;  %v5606_v53 = vcombine.high %v1384_v1, %v1516_v57  ;;  %v5506_v49 = vcombine.low %v1226_v3, %v1227_v17  ;;  %v9629_v1 = vld [vmem:[#allocation4_spill] sm:$0xff]  ;;  %v9630_v57 = vld [vmem:[#allocation5_spill] sm:$0xff] }
 0x1ac   : > { %1141 = vrot.lane.b32.xlu1 %v8053_v41, %s6004_s19  ;;  %1340 = vrot.lane.b32.xlu0 %v5505_v10, %s6005_s20  ;;  %vm1940_vm3 = vcmp.ne.s16.totalorder %v8111_v24, 0 }
 0x1ad   : > { %4643 = vmatprep.subr.bf16.mxu0 %v5606_v53  ;;  %v1517_v38 = vsel %vm1373_vm11, %v1494_v35, %v9467_v19  ;;  %v8106_v35 = vrot.slane %v1698_v44, %v6066_v6  ;;  %v8127_v6 = vrot.slane %v1698_v44, %v6068_v7  ;;  %v9631_v53 = vld [vmem:[#allocation16_spill] sm:$0xff]  ;;  %v1972_v7 = vsel %vm1940_vm3, %v7998_v50, 0 }
 0x1ae   : > { %v8096_v40 = vpop.permute.xlu1 %1873  ;;  %4644 = vmatpush1.bf16.msra.mxu0 %v5605_v22  ;;  %v8098_v2 = vpop.permute.xlu0 %1875  ;;  %v1518_v13 = vsel %vm9465_vm12, %v1466_v34, %v1517_v38  ;;  %v9628_v34 = vld [vmem:[#allocation8_spill] sm:$0xff]  ;;  %v8132_v22 = vsel %vm9466_vm8, %v9630_v57, %v9629_v1  ;;  %v8148_v38 = vsel %vm9466_vm8, %v7656_v31, %v9630_v57  ;;  %v2264_v44 = vsel %vm9471_vm0, %v9603_v14, %v9632_v30 }
 0x1af   : > { %v5607_v27 = vcombine.low %v1386_v33, %v1518_v13  ;;  %v5608_v47 = vcombine.high %v1386_v33, %v1518_v13  ;;  %v8120_v17 = vsel %vm9466_vm8, %v9628_v34, %v7618_v54  ;;  %v2265_v54 = vsel %vm9471_vm0, %v9632_v30, %v9631_v53  ;;  %v9634_v33 = vld [vmem:[#allocation17_spill] sm:$0xff]  ;;  %v9635_v30 = vld [vmem:[#allocation7_spill] sm:$0xff] }
 0x1b0   : > { %1342 = vrot.lane.b32.xlu1 %v5506_v49, %s6005_s20  ;;  %1473 = vrot.lane.b32.xlu0 %v5886_v12, %s6008_s27  ;;  %vm1939_vm5 = vcmp.ne.s16.totalorder %v8120_v17, 0  ;;  %vm1942_vm1 = vcmp.ne.s16.totalorder %v8132_v22, 0  ;;  %vm2296_vm13 = vcmp.ne.s16.totalorder %v2265_v54, 0  ;;  %v9633_v49 = vld [vmem:[#allocation18_spill] sm:$0xff]  ;;  %vm1941_vm2 = vcmp.ne.s16.totalorder %v8148_v38, 0 }
 0x1b1   : > { %4684 = vmatprep.subr.bf16.mxu1 %v5608_v47  ;;  %v2267_v13 = vsel %vm9471_vm0, %v9634_v33, %v9633_v49  ;;  %v1971_v31 = vsel %vm1939_vm5, %v7848_v61, 0  ;;  %vm2295_vm14 = vcmp.ne.s16.totalorder %v2264_v44, 0  ;;  %v2266_v14 = vsel %vm9471_vm0, %v9631_v53, %v9634_v33 }
 0x1b2   : > { %v8113_v10 = vpop.permute.xlu1 %1877  ;;  %4685 = vmatpush1.bf16.msra.mxu1 %v5607_v27  ;;  %v8115_v8 = vpop.permute.xlu0 %2226  ;;  %v5523_v27 = vcombine.low %v1971_v31, %v1972_v7  ;;  %v1974_v34 = vsel %vm1942_vm1, %v8047_v58, 0  ;;  %vm2298_vm12 = vcmp.ne.s16.totalorder %v2267_v13, 0  ;;  %v2669_v54 = vsel %vm2475_vm4, %v9635_v30, %v7810_v18 }
 0x1b3   : > { %v1973_v53 = vsel %vm1941_vm2, %v8060_v56, 0  ;;  %v2327_v7 = vsel %vm2295_vm14, %v7848_v61, 0  ;;  %vm2297_vm8 = vcmp.ne.s16.totalorder %v2266_v14, 0  ;;  %v2330_v13 = vsel %vm2298_vm12, %v8047_v58, 0 }
 0x1b4   : > { %1475 = vrot.lane.b32.xlu1 %v5888_v4, %s6008_s27  ;;  %1887 = vrot.lane.b32.xlu0 %v8106_v35, %s6005_s20  ;;  %v5524_v44 = vcombine.low %v1973_v53, %v1974_v34  ;;  %v2668_v31 = vsel %vm2475_vm4, %v9605_v21, %v9635_v30  ;;  %v2329_v14 = vsel %vm2297_vm8, %v8060_v56, 0  ;;  %v2671_v21 = vsel %vm2475_vm4, %v7812_v25, %v7821_v32 }
 0x1b5   : > { %v5541_v34 = vcombine.low %v2329_v14, %v2330_v13  ;;  %vm2700_vm12 = vcmp.ne.s16.totalorder %v2668_v31, 0  ;;  %vm2703_vm8 = vcmp.ne.s16.totalorder %v2671_v21, 0  ;;  %v2962_v31 = vsel %vm1193_vm7, %v8060_v56, 0 }
 0x1b6   : > { %v8138_v12 = vpop.permute.xlu1 %2228  ;;  %v8140_v3 = vpop.permute.xlu0 %2230  ;;  %vm1197_vm7 = vcmp.ne.s16.totalorder %v8269_v0, 0  ;;  %v8299_v17 = vsel %vm1143_vm10, %v7949_v29, %v7952_v46 }
 0x1b8   : > { %1889 = vrot.lane.b32.xlu1 %v8127_v6, %s6005_s20  ;;  %2242 = vrot.lane.b32.xlu0 %v8009_v45, %s6006_s21  ;;  %v2328_v45 = vsel %vm2296_vm13, %v7998_v50, 0  ;;  %vm2701_vm13 = vcmp.ne.s16.totalorder %v2669_v54, 0 }
 0x1b9   : > { %v5540_v33 = vcombine.low %v2327_v7, %v2328_v45  ;;  %v9637_v45 = vrot.slane %v7772_v62, 4  ;;  %v2733_v54 = vsel %vm2701_vm13, %v8060_v56, 0 }
 0x1ba   : > { %v8168_v47 = vpop.permute.xlu1 %2232  ;;  %v2078_v4 = vpop.permute.xlu0 %2077 }
 0x1bb   : > { %v2106_v57 = vrot.slane %v2078_v4, 4 }
 0x1bc   : > { %2244 = vrot.lane.b32.xlu1 %v8053_v41, %s6006_s21  ;;  %2085 = vrot.lane.b32.xlu0 %v5523_v27, %s6004_s19 }
 0x1bd   : > { %v2126_v61 = vsel %vm1373_vm11, %v9636_v20, %v2106_v57  ;;  %v2670_v20 = vsel %vm2475_vm4, %v7810_v18, %v7812_v25 }
 0x1be   : > { %v8188_v19 = vpop.permute.xlu1 %2079  ;;  %v2434_v41 = vpop.permute.xlu0 %2433  ;;  %vm2702_vm14 = vcmp.ne.s16.totalorder %v2670_v20, 0 }
 0x1bf   : > { %v2107_v27 = vrot.slane %v8188_v19, 4  ;;  %v2462_v39 = vrot.slane %v2434_v41, 4 }
 0x1c0   : > { %2087 = vrot.lane.b32.xlu1 %v5524_v44, %s6004_s19  ;;  %2441 = vrot.lane.b32.xlu0 %v5540_v33, %s6007_s22  ;;  %v2127_v44 = vsel %vm1143_vm10, %v7750_v42, %v2126_v61  ;;  %v8224_v42 = vcombine.high %v8012_v52, %v8012_v52 }
 0x1c1   : > { %v2483_v30 = vsel %vm1373_vm11, %v9637_v45, %v2462_v39  ;;  %v2128_v26 = vsel %vm1373_vm11, %v2106_v57, %v2107_v27 }
 0x1c2   : > { %v8207_v53 = vpop.permute.xlu1 %2435  ;;  %v8209_v7 = vpop.permute.xlu0 %2631  ;;  %v2484_v33 = vsel %vm2475_vm4, %v7772_v62, %v2483_v30  ;;  %v2732_v62 = vsel %vm2700_vm12, %v7998_v50, 0  ;;  %v2129_v61 = vsel %vm1143_vm10, %v2078_v4, %v2128_v26  ;;  %v2735_v21 = vsel %vm2703_vm8, %v8224_v42, 0 }
 0x1c3   : > { %v2463_v13 = vrot.slane %v8207_v53, 4  ;;  %v5637_v14 = vcombine.low %v2127_v44, %v2484_v33  ;;  %v5638_v45 = vcombine.high %v2127_v44, %v2484_v33  ;;  %v5557_v25 = vcombine.low %v2732_v62, %v2733_v54  ;;  %v8242_v54 = vld [vmem:[%s6460_s26 + $0x58] sm:$0xff] }
 0x1c4   : > { %2647 = vrot.lane.b32.xlu0 %v8106_v35, %s6007_s22  ;;  %2443 = vrot.lane.b32.xlu1 %v5541_v34, %s6007_s22  ;;  %v2961_v26 = vsel %vm1192_vm9, %v7998_v50, 0  ;;  %v2964_v16 = vsel %vm1195_vm6, %v8224_v42, 0  ;;  %v2734_v4 = vsel %vm2702_vm14, %v8047_v58, 0  ;;  %vm1198_vm6 = vcmp.ne.s16.totalorder %v8299_v17, 0 }
 0x1c5   : > { %4645 = vmatprep.subr.bf16.mxu0 %v5638_v45  ;;  %v2485_v18 = vsel %vm1373_vm11, %v2462_v39, %v2463_v13  ;;  %v5574_v20 = vcombine.low %v2961_v26, %v2962_v31  ;;  %v5558_v44 = vcombine.low %v2734_v4, %v2735_v21  ;;  %v5575_v62 = vcombine.low %v2963_v59, %v2964_v16 }
 0x1c6   : > { %v8231_v57 = vpop.permute.xlu1 %2633  ;;  %4646 = vmatpush1.bf16.msra.mxu0 %v5637_v14  ;;  %v8233_v35 = vpop.permute.xlu0 %2635  ;;  %v2486_v34 = vsel %vm2475_vm4, %v2434_v41, %v2485_v18  ;;  %v8255_v41 = vld [vmem:[%s6460_s26 + $0x60] sm:$0xff]  ;;  %v8264_v14 = vcombine.low %v8242_v54, %v8242_v54  ;;  %v8273_v18 = vcombine.high %v8242_v54, %v8242_v54  ;;  %v9638_v31 = vrot.slane %v7837_v43, 4 }
 0x1c7   : > { %v5639_v30 = vcombine.low %v2129_v61, %v2486_v34  ;;  %v5640_v39 = vcombine.high %v2129_v61, %v2486_v34  ;;  %v8277_v15 = vcombine.low %v8255_v41, %v8255_v41  ;;  %v3305_v61 = vsel %vm1940_vm3, %v8060_v56, 0 }
 0x1c8   : > { %2649 = vrot.lane.b32.xlu1 %v8127_v6, %s6007_s22  ;;  %2845 = vrot.lane.b32.xlu0 %v5557_v25, %s6006_s21  ;;  %v3304_v25 = vsel %vm1939_vm5, %v7998_v50, 0  ;;  %v8290_v34 = vsel %vm1143_vm10, %v7540_v5, %v7929_v36  ;;  %v8304_v50 = vsel %vm1143_vm10, %v7952_v46, %v7984_v23  ;;  %v3306_v46 = vsel %vm1941_vm2, %v8047_v58, 0 }
 0x1c9   : > { %4686 = vmatprep.subr.bf16.mxu1 %v5640_v39  ;;  %v5966_v39 = vld [vmem:[%s6460_s26 + $0x20] sm:$0xff]  ;;  %v5590_v16 = vcombine.low %v3304_v25, %v3305_v61  ;;  %v3307_v4 = vsel %vm1942_vm1, %v8224_v42, 0  ;;  %vm1196_vm9 = vcmp.ne.s16.totalorder %v8290_v34, 0  ;;  %vm1199_vm15 = vcmp.ne.s16.totalorder %v8304_v50, 0 }
 0x1ca   : > { %v8257_v33 = vpop.permute.xlu1 %2637  ;;  %4687 = vmatpush1.bf16.msra.mxu1 %v5639_v30  ;;  %v2838_v6 = vpop.permute.xlu0 %2837  ;;  %vm9639_vm3 = vcmask 531456   ;;  %vm9643_vm12 = vcmask 523264   ;;  %v2965_v0 = vsel %vm1196_vm9, %v8264_v14, 0 }
 0x1cb   : > { %v2866_v45 = vrot.slane %v2838_v6, 4  ;;  %vm9640_vm5 = vmmov %vm9639_vm3 }
 0x1cc   : > { %3073 = vrot.lane.b32.xlu0 %v5574_v20, %s6005_s20  ;;  %2847 = vrot.lane.b32.xlu1 %v5558_v44, %s6006_s21  ;;  %v8341_v22 = vsel %vm9640_vm5, %v8071_v11, %v8096_v40  ;;  %vm9642_vm13 = vmmov %vm9639_vm3 }
 0x1cd   : > { %v2886_v21 = vsel %vm1373_vm11, %v9638_v31, %v2866_v45  ;;  %v5591_v31 = vcombine.low %v3306_v46, %v3307_v4  ;;  %vm1944_vm2 = vcmp.ne.s16.totalorder %v8341_v22, 0  ;;  %vm9644_vm8 = vmmov %vm9639_vm3 }
 0x1ce   : > { %v8306_v56 = vpop.permute.xlu1 %2839  ;;  %v8308_v5 = vpop.permute.xlu0 %3065  ;;  %v2887_v36 = vsel %vm9471_vm0, %v7837_v43, %v2886_v21  ;;  %v1229_v43 = vsel %vm1197_vm7, %v8264_v14, 0  ;;  %v1230_v21 = vsel %vm1198_vm6, %v8273_v18, 0  ;;  %vm9645_vm14 = vmmov %vm9639_vm3 }
 0x1cf   : > { %v2867_v24 = vrot.slane %v8306_v56, 4  ;;  %v3094_v30 = vrot.slane %v8308_v5, 4  ;;  %v5669_v26 = vcombine.low %v5966_v39, %v2887_v36  ;;  %v5670_v29 = vcombine.high %v5966_v39, %v2887_v36  ;;  %vm9647_vm5 = vmmov %vm9643_vm12 }
 0x1d0   : > { %3188 = vrot.lane.b32.xlu0 %v7974_v37, %s6008_s27  ;;  %3075 = vrot.lane.b32.xlu1 %v5575_v62, %s6005_s20  ;;  %v8336_v37 = vsel %vm9639_vm3, %v9629_v1, %v8071_v11  ;;  %v5967_v1 = vld [vmem:[%s6460_s26 + $0x28] sm:$0xff]  ;;  %v1228_v11 = vsel %vm1196_vm9, %v8224_v42, 0  ;;  %v9641_v36 = vrot.slane %v7894_v9, 4 }
 0x1d1   : > { %4647 = vmatprep.subr.bf16.mxu0 %v5670_v29  ;;  %v2888_v58 = vsel %vm1373_vm11, %v2866_v45, %v2867_v24  ;;  %v3114_v59 = vsel %vm1373_vm11, %v3093_v51, %v3094_v30  ;;  %v5507_v51 = vcombine.low %v1228_v11, %v1229_v43  ;;  %vm1943_vm1 = vcmp.ne.s16.totalorder %v8336_v37, 0 }
 0x1d2   : > { %v8343_v38 = vpop.permute.xlu1 %3067  ;;  %4648 = vmatpush1.bf16.msra.mxu0 %v5669_v26  ;;  %v3181_v20 = vpop.permute.xlu0 %3180  ;;  %v2889_v44 = vsel %vm9471_vm0, %v2838_v6, %v2888_v58  ;;  %v1231_v6 = vsel %vm1199_vm15, %v8277_v15, 0 }
 0x1d3   : > { %v3095_v45 = vrot.slane %v8343_v38, 4  ;;  %v3209_v62 = vrot.slane %v3181_v20, 4  ;;  %v5671_v25 = vcombine.low %v5967_v1, %v2889_v44  ;;  %v5672_v61 = vcombine.high %v5967_v1, %v2889_v44 }
 0x1d4   : > { %3416 = vrot.lane.b32.xlu0 %v5590_v16, %s6004_s19  ;;  %3190 = vrot.lane.b32.xlu1 %v8012_v52, %s6008_s27  ;;  %v3115_v52 = vsel %vm9642_vm13, %v7867_v48, %v3114_v59  ;;  %v5508_v1 = vcombine.low %v1230_v21, %v1231_v6  ;;  %v8384_v48 = vsel %vm9644_vm8, %v8096_v40, %v8098_v2  ;;  %v1976_v59 = vsel %vm1944_vm2, %v8264_v14, 0 }
 0x1d5   : > { %4688 = vmatprep.subr.bf16.mxu1 %v5672_v61  ;;  %v3229_v39 = vsel %vm1373_vm11, %v9641_v36, %v3209_v62  ;;  %v3116_v46 = vsel %vm1373_vm11, %v3094_v30, %v3095_v45  ;;  %v5890_v30 = vld [vmem:[%s6460_s26 + $0x54] sm:$0xff]  ;;  %v2269_v61 = vsel %vm9471_vm0, %v8115_v8, %v8138_v12  ;;  %v9646_v40 = vrot.slane %v7927_v60, 4 }
 0x1d6   : > { %v8368_v26 = vpop.permute.xlu1 %3182  ;;  %4689 = vmatpush1.bf16.msra.mxu1 %v5671_v25  ;;  %v3409_v29 = vpop.permute.xlu0 %3408  ;;  %v3230_v16 = vsel %vm9643_vm12, %v7894_v9, %v3229_v39  ;;  %v1975_v25 = vsel %vm1943_vm1, %v8224_v42, 0  ;;  %v8389_v9 = vsel %vm9645_vm14, %v8098_v2, %v8113_v10  ;;  %v3117_v36 = vsel %vm9639_vm3, %v8308_v5, %v3116_v46 }
 0x1d7   : > { %v3210_v4 = vrot.slane %v8368_v26, 4  ;;  %v3437_v43 = vrot.slane %v3409_v29, 4  ;;  %v5701_v58 = vcombine.low %v3115_v52, %v3230_v16  ;;  %v5702_v44 = vcombine.high %v3115_v52, %v3230_v16  ;;  %v5892_v16 = vld [vmem:[%s6460_s26 + $0x5c] sm:$0xff] }
 0x1d8   : > { %3418 = vrot.lane.b32.xlu1 %v5591_v31, %s6004_s19  ;;  %1344 = vrot.lane.b32.xlu0 %v5507_v51, %s6005_s20  ;;  %v2268_v31 = vsel %vm9471_vm0, %v9633_v49, %v8115_v8  ;;  %vm1946_vm13 = vcmp.ne.s16.totalorder %v8389_v9, 0  ;;  %vm9472_vm12 = vcmp.ne.s16.totalorder %v8384_v48, 0  ;;  %vm2300_vm8 = vcmp.ne.s16.totalorder %v2269_v61, 0 }
 0x1d9   : > { %v3457_v11 = vsel %vm1373_vm11, %v9646_v40, %v3437_v43  ;;  %4649 = vmatprep.subr.bf16.mxu0 %v5702_v44  ;;  %v3231_v2 = vsel %vm1373_vm11, %v3209_v62, %v3210_v4  ;;  %v2271_v5 = vsel %vm9471_vm0, %v8140_v3, %v8168_v47  ;;  %v1978_v44 = vsel %vm1946_vm13, %v8277_v15, 0 }
 0x1da   : > { %v8409_v21 = vpop.permute.xlu1 %3410  ;;  %4650 = vmatpush1.bf16.msra.mxu0 %v5701_v58  ;;  %v8411_v51 = vpop.permute.xlu0 %1131  ;;  %v3458_v6 = vsel %vm1143_vm10, %v7927_v60, %v3457_v11  ;;  %v3232_v39 = vsel %vm9647_vm5, %v3181_v20, %v3231_v2  ;;  %v5525_v58 = vcombine.low %v1975_v25, %v1976_v59  ;;  %v2673_v20 = vsel %vm2475_vm4, %v8209_v7, %v8231_v57 }
 0x1db   : > { %v3438_v62 = vrot.slane %v8409_v21, 4  ;;  %v5734_v52 = vcombine.high %v3458_v6, %v3458_v6  ;;  %v5703_v8 = vcombine.low %v3117_v36, %v3232_v39  ;;  %v5704_v49 = vcombine.high %v3117_v36, %v3232_v39 }
 0x1dc   : > { %1477 = vrot.lane.b32.xlu0 %v5890_v30, %s6008_s27  ;;  %1346 = vrot.lane.b32.xlu1 %v5508_v1, %s6005_s20  ;;  %v5733_v60 = vcombine.low %v3458_v6, %v3458_v6  ;;  %vm2299_vm14 = vcmp.ne.s16.totalorder %v2268_v31, 0  ;;  %v2332_v40 = vsel %vm2300_vm8, %v8264_v14, 0  ;;  %v2672_v11 = vsel %vm2475_vm4, %v7821_v32, %v8209_v7 }
 0x1dd   : > { %v3459_v46 = vsel %vm1373_vm11, %v3437_v43, %v3438_v62  ;;  %5765 = vmatprep.subr.msk.bf16.mxu0 %vm1373_vm11, %v5734_v52  ;;  %4690 = vmatprep.subr.bf16.mxu1 %v5704_v49  ;;  %v2270_v43 = vsel %vm9471_vm0, %v8138_v12, %v8140_v3  ;;  %v1977_v6 = vsel %vm9472_vm12, %v8273_v18, 0  ;;  %vm2302_vm3 = vcmp.ne.s16.totalorder %v2271_v5, 0  ;;  %v8468_v52 = vld [vmem:[%s9422_s1] sm:$0x3] }
 0x1de   : > { %v8437_v1 = vpop.permute.xlu1 %1133  ;;  %v4408_v25 = vsel %vm1373_vm11, %v5733_v60, 0  ;;  %v8440_v30 = vpop.permute.xlu0 %1135  ;;  %v3460_v59 = vsel %vm1143_vm10, %v3409_v29, %v3459_v46  ;;  %4691 = vmatpush1.bf16.msra.mxu1 %v5703_v8  ;;  %vm2705_vm5 = vcmp.ne.s16.totalorder %v2673_v20, 0  ;;  %v5526_v61 = vcombine.low %v1977_v6, %v1978_v44 }
 0x1df   : > { %4652 = vmatpush1.bf16.msra.mxu0 %v4408_v25  ;;  %v5736_v2 = vcombine.high %v3460_v59, %v3460_v59  ;;  %v5735_v29 = vcombine.low %v3460_v59, %v3460_v59  ;;  %v2331_v12 = vsel %vm2299_vm14, %v8224_v42, 0  ;;  %v2675_v32 = vsel %vm2475_vm4, %v8233_v35, %v8257_v33 }
 0x1e0   : > { %1479 = vrot.lane.b32.xlu1 %v5892_v16, %s6008_s27  ;;  %2089 = vrot.lane.b32.xlu0 %v5525_v58, %s6004_s19  ;;  %v5542_v3 = vcombine.low %v2331_v12, %v2332_v40  ;;  %vm2301_vm8 = vcmp.ne.s16.totalorder %v2270_v43, 0  ;;  %vm2704_vm0 = vcmp.ne.s16.totalorder %v2672_v11, 0  ;;  %vm9648_vm14 = vcmask 588800  }
 0x1e1   : > { %5767 = vmatprep.subr.msk.bf16.mxu1 %vm1373_vm11, %v5736_v2  ;;  %v4414_v36 = vsel %vm1373_vm11, %v5735_v29, 0  ;;  %v2334_v42 = vsel %vm2302_vm3, %v8277_v15, 0  ;;  %v2737_v31 = vsel %vm2705_vm5, %v8273_v18, 0  ;;  %v2674_v8 = vsel %vm2475_vm4, %v8231_v57, %v8233_v35  ;;  %vm9649_vm5 = vmmov %vm9648_vm14 }
 0x1e2   : > { %v8462_v7 = vpop.permute.xlu1 %1137  ;;  %v1337_v39 = vpop.permute.xlu0 %1336  ;;  %5766 = vmatmul.mubr.msk.bf16.vlgmr.msra.gmra.mrb[8].mxu0 %vm9648_vm14, %v8468_v52  ;;  %4693 = vmatpush1.bf16.msra.mxu1 %v4414_v36  ;;  %vm2707_vm12 = vcmp.ne.s16.totalorder %v2675_v32, 0  ;;  %v8484_v60 = vcombine.high %v8255_v41, %v8255_v41  ;;  %v2333_v16 = vsel %vm2301_vm8, %v8273_v18, 0  ;;  %v2736_v58 = vsel %vm2704_vm0, %v8264_v14, 0 }
 0x1e3   : > { %v1363_v49 = vrot.slane %v1337_v39, 4  ;;  %4757 = vmatprep.mubr.bf16.mxu0 %v9545_v55  ;;  %v2966_v57 = vsel %vm1197_vm7, %v8273_v18, 0  ;;  %v5543_v35 = vcombine.low %v2333_v16, %v2334_v42  ;;  %v5559_v5 = vcombine.low %v2736_v58, %v2737_v31 }
 0x1e4   : > { %2091 = vrot.lane.b32.xlu1 %v5526_v61, %s6004_s19  ;;  %2445 = vrot.lane.b32.xlu0 %v5542_v3, %s6007_s22  ;;  %vm2706_vm3 = vcmp.ne.s16.totalorder %v2674_v8, 0  ;;  %v2739_v44 = vsel %vm2707_vm12, %v8484_v60, 0  ;;  %v9650_v40 = vrot.slane %v8029_v63, 4  ;;  %v5576_v11 = vcombine.low %v2965_v0, %v2966_v57 }
 0x1e5   : > { %5768 = vmatmul.mubr.msk.bf16.vlgmr.msra.gmra.mrb[8].mxu1 %vm9649_vm5, %v8468_v52  ;;  %v2738_v2 = vsel %vm2706_vm3, %v8277_v15, 0  ;;  %v9651_v6 = vrot.slane %v8069_v28, 4  ;;  %v2968_v61 = vsel %vm1199_vm15, %v8484_v60, 0  ;;  %vm9652_vm0 = vcmask 531456  }
 0x1e6   : > { %v8493_v20 = vpop.permute.xlu1 %1338  ;;  %v1470_v46 = vpop.permute.xlu0 %1469  ;;  %v1387_v43 = vsel %vm1373_vm11, %v9650_v40, %v1363_v49  ;;  %4798 = vmatprep.mubr.bf16.mxu1 %v9545_v55  ;;  %v5560_v12 = vcombine.low %v2738_v2, %v2739_v44  ;;  %vm9653_vm7 = vcmask 523264   ;;  %v2967_v16 = vsel %vm1198_vm6, %v8277_v15, 0  ;;  %vm9654_vm9 = vmmov %vm9652_vm0 }
 0x1e7   : > { %v1364_v25 = vrot.slane %v8493_v20, 4  ;;  %v1496_v59 = vrot.slane %v1470_v46, 4  ;;  %v1388_v3 = vsel %vm9652_vm0, %v8029_v63, %v1387_v43  ;;  %v8533_v63 = vsel %vm1143_vm10, %v8411_v51, %v8437_v1  ;;  %vm9655_vm6 = vmmov %vm9653_vm7 }
 0x1e8   : > { %2447 = vrot.lane.b32.xlu1 %v5543_v35, %s6007_s22  ;;  %2849 = vrot.lane.b32.xlu0 %v5559_v5, %s6006_s21  ;;  %v5577_v58 = vcombine.low %v2967_v16, %v2968_v61  ;;  %v3309_v44 = vsel %vm1944_vm2, %v8273_v18, 0  ;;  %v8549_v40 = vsel %vm1143_vm10, %v7984_v23, %v8411_v51  ;;  %vm1201_vm15 = vcmp.ne.s16.totalorder %v8533_v63, 0  ;;  %vm9657_vm12 = vmmov %vm9652_vm0 }
 0x1e9   : > { %v1519_v29 = vsel %vm1373_vm11, %v9651_v6, %v1496_v59  ;;  %v1389_v50 = vsel %vm1373_vm11, %v1363_v49, %v1364_v25  ;;  %v8539_v49 = vld [vmem:[%s6460_s26 + $0x68] sm:$0xff]  ;;  %v8565_v23 = vsel %vm1143_vm10, %v8440_v30, %v8462_v7  ;;  %vm1200_vm2 = vcmp.ne.s16.totalorder %v8549_v40, 0  ;;  %vm9658_vm14 = vmmov %vm9652_vm0 }
 0x1ea   : > { %v8515_v32 = vpop.permute.xlu1 %1471  ;;  %v1880_v34 = vpop.permute.xlu0 %1879  ;;  %v1520_v36 = vsel %vm9653_vm7, %v8069_v28, %v1519_v29  ;;  %v1390_v17 = vsel %vm9654_vm9, %v1337_v39, %v1389_v50  ;;  %v3308_v39 = vsel %vm1943_vm1, %v8264_v14, 0  ;;  %v8560_v18 = vcombine.low %v8539_v49, %v8539_v49  ;;  %vm9659_vm5 = vmmov %vm9652_vm0 }
 0x1eb   : > { %v1497_v42 = vrot.slane %v8515_v32, 4  ;;  %v5609_v31 = vcombine.low %v1388_v3, %v1520_v36  ;;  %v5610_v8 = vcombine.high %v1388_v3, %v1520_v36  ;;  %v5592_v22 = vcombine.low %v3308_v39, %v3309_v44  ;;  %v5894_v36 = vld [vmem:[%s6460_s26 + $0x64] sm:$0xff]  ;;  %vm9661_vm9 = vmmov %vm9659_vm5 }
 0x1ec   : > { %3077 = vrot.lane.b32.xlu0 %v5576_v11, %s6005_s20  ;;  %2851 = vrot.lane.b32.xlu1 %v5560_v12, %s6006_s21  ;;  %v3311_v14 = vsel %vm1946_vm13, %v8484_v60, 0  ;;  %v8582_v0 = vsel %vm1143_vm10, %v8437_v1, %v8440_v30  ;;  %v8586_v11 = vcombine.high %v8539_v49, %v8539_v49  ;;  %vm1203_vm1 = vcmp.ne.s16.totalorder %v8565_v23, 0 }
 0x1ed   : > { %4725 = vmatprep.subr.bf16.mxu0 %v5610_v8  ;;  %v1521_v28 = vsel %vm1373_vm11, %v1496_v59, %v1497_v42  ;;  %vm9656_vm13 = vcmp.ne.s16.totalorder %v8384_v48, 0  ;;  %v1232_v1 = vsel %vm1200_vm2, %v8484_v60, 0  ;;  %vm1202_vm8 = vcmp.ne.s16.totalorder %v8582_v0, 0 }
 0x1ee   : > { %v1882_v57 = vpop.permute.xlu1 %1881  ;;  %4726 = vmatpush1.bf16.msra.mxu0 %v5609_v31  ;;  %v1884_v35 = vpop.permute.xlu0 %1883  ;;  %v1522_v5 = vsel %vm9655_vm6, %v1470_v46, %v1521_v28  ;;  %v1233_v46 = vsel %vm1201_vm15, %v8560_v18, 0  ;;  %v3310_v9 = vsel %vm9656_vm13, %v8277_v15, 0  ;;  %v8611_v48 = vsel %vm9658_vm14, %v8113_v10, %v1880_v34 }
 0x1ef   : > { %v5611_v59 = vcombine.low %v1390_v17, %v1522_v5  ;;  %v5612_v43 = vcombine.high %v1390_v17, %v1522_v5  ;;  %v8603_v2 = vsel %vm9657_vm12, %v1880_v34, %v1882_v57  ;;  %v5593_v6 = vcombine.low %v3310_v9, %v3311_v14 }
 0x1f0   : > { %3192 = vrot.lane.b32.xlu0 %v8242_v54, %s6008_s27  ;;  %3079 = vrot.lane.b32.xlu1 %v5577_v58, %s6005_s20  ;;  %v8569_v54 = vld [vmem:[%s6460_s26 + $0x70] sm:$0xff]  ;;  %v5509_v29 = vcombine.low %v1232_v1, %v1233_v46  ;;  %vm1948_vm3 = vcmp.ne.s16.totalorder %v8603_v2, 0  ;;  %vm9660_vm0 = vcmask 1039360   ;;  %v1234_v31 = vsel %vm1202_vm8, %v8586_v11, 0 }
 0x1f1   : > { %4766 = vmatprep.subr.bf16.mxu1 %v5612_v43  ;;  %v8600_v30 = vcombine.low %v8569_v54, %v8569_v54  ;;  %vm1947_vm7 = vcmp.ne.s16.totalorder %v8611_v48, 0  ;;  %v8627_v34 = vsel %vm9661_vm9, %v1882_v57, %v1884_v35  ;;  %vm9662_vm6 = vmmov %vm9660_vm0  ;;  %v1980_v28 = vsel %vm1948_vm3, %v8560_v18, 0  ;;  %v5896_v57 = vld [vmem:[%s6460_s26 + $0x6c] sm:$0xff] }
 0x1f2   : > { %v8571_v51 = vpop.permute.xlu1 %1885  ;;  %4767 = vmatpush1.bf16.msra.mxu1 %v5611_v59  ;;  %v2235_v37 = vpop.permute.xlu0 %2234  ;;  %vm9663_vm14 = vmmov %vm9660_vm0 }
 0x1f3   : > { %v1235_v15 = vsel %vm1203_vm1, %v8600_v30, 0  ;;  %v8616_v12 = vsel %vm9659_vm5, %v1884_v35, %v8571_v51  ;;  %v2272_v8 = vsel %vm9662_vm6, %v8168_v47, %v2235_v37  ;;  %v1979_v47 = vsel %vm1947_vm7, %v8484_v60, 0  ;;  %vm9664_vm9 = vmmov %vm9662_vm6 }
 0x1f4   : > { %3420 = vrot.lane.b32.xlu0 %v5592_v22, %s6004_s19  ;;  %3194 = vrot.lane.b32.xlu1 %v8255_v41, %s6008_s27  ;;  %v5510_v10 = vcombine.low %v1234_v31, %v1235_v15  ;;  %vm1950_vm13 = vcmp.ne.s16.totalorder %v8616_v12, 0  ;;  %vm1949_vm5 = vcmp.ne.s16.totalorder %v8627_v34, 0  ;;  %v5527_v35 = vcombine.low %v1979_v47, %v1980_v28 }
 0x1f5   : > { %v1982_v5 = vsel %vm1950_vm13, %v8600_v30, 0  ;;  %v1981_v46 = vsel %vm1949_vm5, %v8586_v11, 0 }
 0x1f6   : > { %v2237_v41 = vpop.permute.xlu1 %2236  ;;  %v2239_v61 = vpop.permute.xlu0 %2238  ;;  %v5528_v1 = vcombine.low %v1981_v46, %v1982_v5  ;;  %v2970_v46 = vsel %vm1201_vm15, %v8586_v11, 0  ;;  %vm9665_vm15 = vcmask 1039360  }
 0x1f7   : > { %v2273_v3 = vsel %vm9660_vm0, %v2235_v37, %v2237_v41  ;;  %vm2303_vm0 = vcmp.ne.s16.totalorder %v2272_v8, 0  ;;  %v2274_v59 = vsel %vm9664_vm9, %v2237_v41, %v2239_v61 }
 0x1f8   : > { %3422 = vrot.lane.b32.xlu1 %v5593_v6, %s6004_s19  ;;  %1348 = vrot.lane.b32.xlu0 %v5509_v29, %s6005_s20  ;;  %vm2304_vm12 = vcmp.ne.s16.totalorder %v2273_v3, 0  ;;  %v2335_v9 = vsel %vm2303_vm0, %v8484_v60, 0 }
 0x1f9   : > { %v2336_v44 = vsel %vm2304_vm12, %v8560_v18, 0  ;;  %vm2305_vm12 = vcmp.ne.s16.totalorder %v2274_v59, 0 }
 0x1fa   : > { %v8631_v50 = vpop.permute.xlu1 %2240  ;;  %v2082_v16 = vpop.permute.xlu0 %2081  ;;  %v5544_v6 = vcombine.low %v2335_v9, %v2336_v44  ;;  %v2337_v8 = vsel %vm2305_vm12, %v8586_v11, 0 }
 0x1fb   : > { %v2108_v58 = vrot.slane %v2082_v16, 4  ;;  %v2275_v17 = vsel %vm9663_vm14, %v2239_v61, %v8631_v50 }
 0x1fc   : > { %1481 = vrot.lane.b32.xlu0 %v5894_v36, %s6008_s27  ;;  %1350 = vrot.lane.b32.xlu1 %v5510_v10, %s6005_s20  ;;  %vm2306_vm6 = vcmp.ne.s16.totalorder %v2275_v17, 0 }
 0x1fd   : > { %v2130_v22 = vsel %vm1373_vm11, %v2107_v27, %v2108_v58  ;;  %v2338_v29 = vsel %vm2306_vm6, %v8600_v30, 0 }
 0x1fe   : > { %v8651_v43 = vpop.permute.xlu1 %2083  ;;  %v2438_v39 = vpop.permute.xlu0 %2437  ;;  %v2131_v15 = vsel %vm1143_vm10, %v8188_v19, %v2130_v22  ;;  %v5545_v28 = vcombine.low %v2337_v8, %v2338_v29  ;;  %v8694_v22 = vcombine.high %v8569_v54, %v8569_v54  ;;  %v5969_v8 = vld [vmem:[%s6460_s26 + $0x30] sm:$0xff] }
 0x1ff   : > { %v2109_v37 = vrot.slane %v8651_v43, 4  ;;  %v2464_v14 = vrot.slane %v2438_v39, 4 }
 0x200   : > { %1483 = vrot.lane.b32.xlu1 %v5896_v57, %s6008_s27  ;;  %2093 = vrot.lane.b32.xlu0 %v5527_v35, %s6004_s19 }
 0x201   : > { %v2487_v27 = vsel %vm1373_vm11, %v2463_v13, %v2464_v14  ;;  %v2132_v41 = vsel %vm1373_vm11, %v2108_v58, %v2109_v37 }
 0x202   : > { %v8670_v61 = vpop.permute.xlu1 %2439  ;;  %v2640_v60 = vpop.permute.xlu0 %2639  ;;  %v2488_v3 = vsel %vm2475_vm4, %v8207_v53, %v2487_v27 }
 0x203   : > { %v2465_v36 = vrot.slane %v8670_v61, 4  ;;  %v2676_v13 = vsel %vm2475_vm4, %v8257_v33, %v2640_v60  ;;  %v5641_v31 = vcombine.low %v2131_v15, %v2488_v3  ;;  %v5642_v10 = vcombine.high %v2131_v15, %v2488_v3 }
 0x204   : > { %2095 = vrot.lane.b32.xlu1 %v5528_v1, %s6004_s19  ;;  %2449 = vrot.lane.b32.xlu0 %v5544_v6, %s6007_s22  ;;  %vm2708_vm14 = vcmp.ne.s16.totalorder %v2676_v13, 0  ;;  %v2133_v33 = vsel %vm1143_vm10, %v2082_v16, %v2132_v41  ;;  %v2969_v6 = vsel %vm1200_vm2, %v8560_v18, 0  ;;  %vm9666_vm2 = vmmov %vm9665_vm15 }
 0x205   : > { %v2489_v19 = vsel %vm1373_vm11, %v2464_v14, %v2465_v36  ;;  %4727 = vmatprep.subr.bf16.mxu0 %v5642_v10  ;;  %v2740_v44 = vsel %vm2708_vm14, %v8560_v18, 0  ;;  %v5578_v41 = vcombine.low %v2969_v6, %v2970_v46  ;;  %vm9671_vm14 = vcmask 588800  }
 0x206   : > { %v2642_v53 = vpop.permute.xlu1 %2641  ;;  %4728 = vmatpush1.bf16.msra.mxu0 %v5641_v31  ;;  %v2644_v58 = vpop.permute.xlu0 %2643  ;;  %v2490_v17 = vsel %vm2475_vm4, %v2438_v39, %v2489_v19 }
 0x207   : > { %v2677_v57 = vsel %vm2475_vm4, %v2640_v60, %v2642_v53  ;;  %v2678_v47 = vsel %vm2475_vm4, %v2642_v53, %v2644_v58  ;;  %v5643_v35 = vcombine.low %v2133_v33, %v2490_v17  ;;  %v5644_v5 = vcombine.high %v2133_v33, %v2490_v17 }
 0x208   : > { %vm2709_vm0 = vcmp.ne.s16.totalorder %v2677_v57, 0  ;;  %2451 = vrot.lane.b32.xlu1 %v5545_v28, %s6007_s22  ;;  %vm2710_vm9 = vcmp.ne.s16.totalorder %v2678_v47, 0  ;;  %v2972_v60 = vsel %vm1203_vm1, %v8694_v22, 0  ;;  %v3313_v53 = vsel %vm1948_vm3, %v8586_v11, 0 }
 0x209   : > { %v2741_v59 = vsel %vm2709_vm0, %v8586_v11, 0  ;;  %4768 = vmatprep.subr.bf16.mxu1 %v5644_v5  ;;  %v2742_v27 = vsel %vm2710_vm9, %v8600_v30, 0  ;;  %v3312_v11 = vsel %vm1947_vm7, %v8560_v18, 0  ;;  %vm9667_vm1 = vcmask 531456  }
 0x20a   : > { %v5561_v16 = vcombine.low %v2740_v44, %v2741_v59  ;;  %v8696_v39 = vpop.permute.xlu1 %2645  ;;  %4769 = vmatpush1.bf16.msra.mxu1 %v5643_v35  ;;  %v2842_v14 = vpop.permute.xlu0 %2841  ;;  %v5970_v35 = vld [vmem:[%s6460_s26 + $0x38] sm:$0xff]  ;;  %v3315_v59 = vsel %vm1950_vm13, %v8694_v22, 0  ;;  %vm9669_vm3 = vmmov %vm9667_vm1 }
 0x20b   : > { %v2679_v9 = vsel %vm2475_vm4, %v2644_v58, %v8696_v39  ;;  %v2868_v1 = vrot.slane %v2842_v14, 4  ;;  %vm9672_vm0 = vmmov %vm9667_vm1 }
 0x20c   : > { %vm2711_vm6 = vcmp.ne.s16.totalorder %v2679_v9, 0  ;;  %2853 = vrot.lane.b32.xlu0 %v5561_v16, %s6006_s21 }
 0x20d   : > { %v2743_v29 = vsel %vm2711_vm6, %v8694_v22, 0  ;;  %v2890_v63 = vsel %vm1373_vm11, %v2867_v24, %v2868_v1  ;;  %v2971_v24 = vsel %vm1202_vm8, %v8600_v30, 0  ;;  %vm9668_vm8 = vcmask 523264   ;;  %vm9674_vm6 = vmmov %vm9671_vm14 }
 0x20e   : > { %v5562_v15 = vcombine.low %v2742_v27, %v2743_v29  ;;  %v8715_v3 = vpop.permute.xlu1 %2843  ;;  %v3070_v13 = vpop.permute.xlu0 %3069  ;;  %v2891_v40 = vsel %vm9665_vm15, %v8306_v56, %v2890_v63  ;;  %v5579_v56 = vcombine.low %v2971_v24, %v2972_v60  ;;  %vm9670_vm7 = vmmov %vm9668_vm8 }
 0x20f   : > { %v2869_v31 = vrot.slane %v8715_v3, 4  ;;  %v3096_v10 = vrot.slane %v3070_v13, 4  ;;  %v5673_v19 = vcombine.low %v5969_v8, %v2891_v40  ;;  %v5674_v28 = vcombine.high %v5969_v8, %v2891_v40  ;;  %vm9673_vm9 = vmmov %vm9670_vm7 }
 0x210   : > { %3081 = vrot.lane.b32.xlu0 %v5578_v41, %s6005_s20  ;;  %2855 = vrot.lane.b32.xlu1 %v5562_v15, %s6006_s21  ;;  %v8782_v41 = vld [vmem:[%s6460_s26 + $0x78] sm:$0xff]  ;;  %vm9675_vm15 = vmmov %vm9672_vm0 }
 0x211   : > { %v2892_v23 = vsel %vm1373_vm11, %v2868_v1, %v2869_v31  ;;  %4729 = vmatprep.subr.bf16.mxu0 %v5674_v28  ;;  %v3118_v58 = vsel %vm1373_vm11, %v3095_v45, %v3096_v10  ;;  %v5594_v45 = vcombine.low %v3312_v11, %v3313_v53  ;;  %v3314_v1 = vsel %vm1949_vm5, %v8600_v30, 0 }
 0x212   : > { %v8735_v33 = vpop.permute.xlu1 %3071  ;;  %4730 = vmatpush1.bf16.msra.mxu0 %v5673_v19  ;;  %v3185_v17 = vpop.permute.xlu0 %3184  ;;  %v2893_v0 = vsel %vm9666_vm2, %v2842_v14, %v2892_v23  ;;  %v3119_v16 = vsel %vm9667_vm1, %v8343_v38, %v3118_v58  ;;  %v5595_v6 = vcombine.low %v3314_v1, %v3315_v59  ;;  %vm9676_vm1 = vmmov %vm9672_vm0 }
 0x213   : > { %v3097_v57 = vrot.slane %v8735_v33, 4  ;;  %v3211_v47 = vrot.slane %v3185_v17, 4  ;;  %v5675_v5 = vcombine.low %v5970_v35, %v2893_v0  ;;  %v5676_v44 = vcombine.high %v5970_v35, %v2893_v0 }
 0x214   : > { %3196 = vrot.lane.b32.xlu0 %v8539_v49, %s6008_s27  ;;  %3083 = vrot.lane.b32.xlu1 %v5579_v56, %s6005_s20 }
 0x215   : > { %v3233_v2 = vsel %vm1373_vm11, %v3210_v4, %v3211_v47  ;;  %4770 = vmatprep.subr.bf16.mxu1 %v5676_v44  ;;  %v3120_v48 = vsel %vm1373_vm11, %v3096_v10, %v3097_v57 }
 0x216   : > { %v8755_v18 = vpop.permute.xlu1 %3186  ;;  %4771 = vmatpush1.bf16.msra.mxu1 %v5675_v5  ;;  %v3413_v49 = vpop.permute.xlu0 %3412  ;;  %v3234_v14 = vsel %vm9668_vm8, %v8368_v26, %v3233_v2  ;;  %v3121_v34 = vsel %vm9669_vm3, %v3070_v13, %v3120_v48  ;;  %vm9677_vm8 = vmmov %vm9670_vm7 }
 0x217   : > { %v3212_v4 = vrot.slane %v8755_v18, 4  ;;  %v3439_v46 = vrot.slane %v3413_v49, 4  ;;  %v5705_v9 = vcombine.low %v3119_v16, %v3234_v14  ;;  %v5706_v12 = vcombine.high %v3119_v16, %v3234_v14  ;;  %vm9678_vm3 = vmmov %vm9672_vm0 }
 0x218   : > { %3424 = vrot.lane.b32.xlu0 %v5594_v45, %s6004_s19  ;;  %3198 = vrot.lane.b32.xlu1 %v8569_v54, %s6008_s27 }
 0x219   : > { %v3235_v38 = vsel %vm1373_vm11, %v3211_v47, %v3212_v4  ;;  %v3461_v26 = vsel %vm1373_vm11, %v3438_v62, %v3439_v46  ;;  %4731 = vmatprep.subr.bf16.mxu0 %v5706_v12 }
 0x21a   : > { %v8774_v27 = vpop.permute.xlu1 %3414  ;;  %4732 = vmatpush1.bf16.msra.mxu0 %v5705_v9  ;;  %v1140_v29 = vpop.permute.xlu0 %1139  ;;  %v3462_v54 = vsel %vm1143_vm10, %v8409_v21, %v3461_v26  ;;  %v3236_v30 = vsel %vm9670_vm7, %v3185_v17, %v3235_v38  ;;  %v8791_v21 = vcombine.high %v8782_v41, %v8782_v41 }
 0x21b   : > { %v3440_v63 = vrot.slane %v8774_v27, 4  ;;  %v8786_v62 = vsel %vm1143_vm10, %v8462_v7, %v1140_v29  ;;  %v5738_v60 = vcombine.high %v3462_v54, %v3462_v54  ;;  %v5707_v15 = vcombine.low %v3121_v34, %v3236_v30 }
 0x21c   : > { %3426 = vrot.lane.b32.xlu1 %v5595_v6, %s6004_s19  ;;  %v5708_v40 = vcombine.high %v3121_v34, %v3236_v30  ;;  %v5737_v13 = vcombine.low %v3462_v54, %v3462_v54  ;;  %v8799_v7 = vcombine.low %v8782_v41, %v8782_v41  ;;  %vm1204_vm13 = vcmp.ne.s16.totalorder %v8786_v62, 0 }
 0x21d   : > { %v3463_v10 = vsel %vm1373_vm11, %v3439_v46, %v3440_v63  ;;  %5769 = vmatprep.subr.msk.bf16.mxu0 %vm1373_vm11, %v5738_v60  ;;  %v1236_v0 = vsel %vm1204_vm13, %v8694_v22, 0 }
 0x21e   : > { %4772 = vmatprep.subr.bf16.mxu1 %v5708_v40  ;;  %v1142_v8 = vpop.permute.xlu1 %1141  ;;  %v4420_v19 = vsel %vm1373_vm11, %v5737_v13, 0  ;;  %v1341_v28 = vpop.permute.xlu0 %1340  ;;  %v3464_v24 = vsel %vm1143_vm10, %v3413_v49, %v3463_v10  ;;  %v5897_v49 = vld [vmem:[%s6460_s26 + $0x74] sm:$0xff] }
 0x21f   : > { %v8805_v23 = vsel %vm1143_vm10, %v1140_v29, %v1142_v8  ;;  %vm1206_vm5 = vcmp.ne.s16.totalorder %v1142_v8, 0  ;;  %4734 = vmatpush1.bf16.msra.mxu0 %v4420_v19  ;;  %4773 = vmatpush1.bf16.msra.mxu1 %v5707_v15  ;;  %v1365_v56 = vrot.slane %v1341_v28, 4  ;;  %v5740_v53 = vcombine.high %v3464_v24, %v3464_v24 }
 0x220   : > { %vm1205_vm12 = vcmp.ne.s16.totalorder %v8805_v23, 0  ;;  %v1238_v58 = vsel %vm1206_vm5, %v8791_v21, 0  ;;  %v5739_v17 = vcombine.low %v3464_v24, %v3464_v24  ;;  %vm9679_vm5 = vcmask 1039360  }
 0x221   : > { %v1237_v47 = vsel %vm1205_vm12, %v8799_v7, 0  ;;  %v5512_v35 = vcombine.low %v1238_v58, %v1238_v58  ;;  %5771 = vmatprep.subr.msk.bf16.mxu1 %vm1373_vm11, %v5740_v53  ;;  %v1391_v2 = vsel %vm1373_vm11, %v1364_v25, %v1365_v56  ;;  %v2973_v23 = vsel %vm1204_vm13, %v8799_v7, 0 }
 0x222   : > { %v5511_v5 = vcombine.low %v1236_v0, %v1237_v47  ;;  %v8816_v44 = vpop.permute.xlu1 %1342  ;;  %v4426_v11 = vsel %vm1373_vm11, %v5739_v17, 0  ;;  %v1474_v45 = vpop.permute.xlu0 %1473  ;;  %5770 = vmatmul.mubr.msk.bf16.vlgmr.msra.gmra.mrb[12].mxu0 %vm9671_vm14, %v8468_v52  ;;  %v1392_v9 = vsel %vm9672_vm0, %v8493_v20, %v1391_v2  ;;  %v5564_v2 = vcombine.low %v9545_v55, %v9545_v55 }
 0x223   : > { %v1366_v59 = vrot.slane %v8816_v44, 4  ;;  %4775 = vmatpush1.bf16.msra.mxu1 %v4426_v11  ;;  %v1498_v48 = vrot.slane %v1474_v45, 4  ;;  %1354 = vrot.lane.b32.xlu1 %v5512_v35, %s6005_s20  ;;  %vm9683_vm13 = vcmask 531456  }
 0x224   : > { %1352 = vrot.lane.b32.xlu0 %v5511_v5, %s6005_s20  ;;  %4839 = vmatprep.mubr.bf16.mxu0 %v9545_v55 }
 0x225   : > { %v1523_v16 = vsel %vm1373_vm11, %v1497_v42, %v1498_v48  ;;  %v1393_v14 = vsel %vm1373_vm11, %v1365_v56, %v1366_v59 }
 0x226   : > { %v8835_v25 = vpop.permute.xlu1 %1475  ;;  %v1888_v46 = vpop.permute.xlu0 %1887  ;;  %v1524_v12 = vsel %vm9673_vm9, %v8515_v32, %v1523_v16  ;;  %5772 = vmatmul.mubr.msk.bf16.vlgmr.msra.gmra.mrb[12].mxu1 %vm9674_vm6, %v8468_v52  ;;  %v1394_v6 = vsel %vm9676_vm1, %v1341_v28, %v1393_v14  ;;  %vm9680_vm9 = vmmov %vm9679_vm5 }
 0x227   : > { %v1499_v1 = vrot.slane %v8835_v25, 4  ;;  %v8846_v42 = vsel %vm9675_vm15, %v8571_v51, %v1888_v46  ;;  %1487 = vrot.lane.b32.xlu1 %v8791_v21, %s6008_s27  ;;  %v5613_v38 = vcombine.low %v1392_v9, %v1524_v12  ;;  %v5614_v26 = vcombine.high %v1392_v9, %v1524_v12  ;;  %4880 = vmatprep.mubr.bf16.mxu1 %v9545_v55 }
 0x228   : > { %1485 = vrot.lane.b32.xlu0 %v5897_v49, %s6008_s27  ;;  %vm1951_vm2 = vcmp.ne.s16.totalorder %v8846_v42, 0 }
 0x229   : > { %v1525_v20 = vsel %vm1373_vm11, %v1498_v48, %v1499_v1  ;;  %4807 = vmatprep.subr.bf16.mxu0 %v5614_v26  ;;  %v1983_v40 = vsel %vm1951_vm2, %v8694_v22, 0 }
 0x22a   : > { %v1890_v32 = vpop.permute.xlu1 %1889  ;;  %4808 = vmatpush1.bf16.msra.mxu0 %v5613_v38  ;;  %v2243_v51 = vpop.permute.xlu0 %2242  ;;  %v1526_v29 = vsel %vm9677_vm8, %v1474_v45, %v1525_v20 }
 0x22b   : > { %v8859_v54 = vsel %vm9678_vm3, %v1888_v46, %v1890_v32  ;;  %vm1953_vm7 = vcmp.ne.s16.totalorder %v1890_v32, 0  ;;  %v2276_v34 = vsel %vm9679_vm5, %v8631_v50, %v2243_v51  ;;  %v5615_v30 = vcombine.low %v1394_v6, %v1526_v29  ;;  %vm9681_vm3 = vmmov %vm9679_vm5 }
 0x22c   : > { %vm1952_vm14 = vcmp.ne.s16.totalorder %v8859_v54, 0  ;;  %v1985_v60 = vsel %vm1953_vm7, %v8791_v21, 0  ;;  %v5616_v15 = vcombine.high %v1394_v6, %v1526_v29  ;;  %vm2307_vm0 = vcmp.ne.s16.totalorder %v2276_v34, 0  ;;  %vm9685_vm5 = vmmov %vm9683_vm13 }
 0x22d   : > { %v1984_v13 = vsel %vm1952_vm14, %v8799_v7, 0  ;;  %v5530_v10 = vcombine.low %v1985_v60, %v1985_v60  ;;  %v2339_v53 = vsel %vm2307_vm0, %v8694_v22, 0  ;;  %v2974_v60 = vsel %vm1205_vm12, %v8791_v21, 0  ;;  %vm9682_vm12 = vmmov %vm9681_vm3 }
 0x22e   : > { %v5529_v8 = vcombine.low %v1983_v40, %v1984_v13  ;;  %4848 = vmatprep.subr.bf16.mxu1 %v5616_v15  ;;  %v2245_v19 = vpop.permute.xlu1 %2244  ;;  %v2086_v50 = vpop.permute.xlu0 %2085  ;;  %vm9684_vm7 = vcmask 523264  }
 0x22f   : > { %v2277_v28 = vsel %vm9680_vm9, %v2243_v51, %v2245_v19  ;;  %vm2309_vm6 = vcmp.ne.s16.totalorder %v2245_v19, 0  ;;  %4849 = vmatpush1.bf16.msra.mxu1 %v5615_v30  ;;  %v2110_v24 = vrot.slane %v2086_v50, 4  ;;  %2099 = vrot.lane.b32.xlu1 %v5530_v10, %s6004_s19  ;;  %vm9689_vm9 = vcmask 588800  }
 0x230   : > { %vm2308_vm15 = vcmp.ne.s16.totalorder %v2277_v28, 0  ;;  %v2341_v56 = vsel %vm2309_vm6, %v8791_v21, 0  ;;  %2097 = vrot.lane.b32.xlu0 %v5529_v8, %s6004_s19  ;;  %vm9690_vm6 = vmmov %vm9685_vm5 }
 0x231   : > { %v2340_v58 = vsel %vm2308_vm15, %v8799_v7, 0  ;;  %v5547_v17 = vcombine.low %v2341_v56, %v2341_v56  ;;  %v2134_v5 = vsel %vm1373_vm11, %v2109_v37, %v2110_v24 }
 0x232   : > { %v5546_v0 = vcombine.low %v2339_v53, %v2340_v58  ;;  %v8877_v47 = vpop.permute.xlu1 %2087  ;;  %v2442_v35 = vpop.permute.xlu0 %2441  ;;  %v2135_v16 = vsel %vm1143_vm10, %v8651_v43, %v2134_v5 }
 0x233   : > { %v2111_v11 = vrot.slane %v8877_v47, 4  ;;  %v2466_v45 = vrot.slane %v2442_v35, 4  ;;  %2455 = vrot.lane.b32.xlu1 %v5547_v17, %s6007_s22 }
 0x234   : > { %2453 = vrot.lane.b32.xlu0 %v5546_v0, %s6007_s22 }
 0x235   : > { %v2491_v22 = vsel %vm1373_vm11, %v2465_v36, %v2466_v45  ;;  %v2136_v48 = vsel %vm1373_vm11, %v2110_v24, %v2111_v11 }
 0x236   : > { %v8893_v49 = vpop.permute.xlu1 %2443  ;;  %v2648_v37 = vpop.permute.xlu0 %2647  ;;  %v2492_v14 = vsel %vm2475_vm4, %v8670_v61, %v2491_v22  ;;  %v2137_v61 = vsel %vm1143_vm10, %v2086_v50, %v2136_v48  ;;  %v5971_v50 = vld [vmem:[%s6460_s26 + $0x40] sm:$0xff]  ;;  %v3317_v48 = vsel %vm1952_vm14, %v8791_v21, 0  ;;  %vm9687_vm14 = vmmov %vm9685_vm5 }
 0x237   : > { %v2467_v46 = vrot.slane %v8893_v49, 4  ;;  %v2680_v9 = vsel %vm2475_vm4, %v8696_v39, %v2648_v37  ;;  %v5645_v12 = vcombine.low %v2135_v16, %v2492_v14  ;;  %v5646_v36 = vcombine.high %v2135_v16, %v2492_v14  ;;  %2859 = vrot.lane.b32.xlu1 %v5564_v2, %s6006_s21 }
 0x238   : > { %vm2712_vm1 = vcmp.ne.s16.totalorder %v2680_v9, 0 }
 0x239   : > { %v2493_v38 = vsel %vm1373_vm11, %v2466_v45, %v2467_v46  ;;  %4809 = vmatprep.subr.bf16.mxu0 %v5646_v36  ;;  %v2744_v29 = vsel %vm2712_vm1, %v8799_v7, 0  ;;  %vm9692_vm1 = vmmov %vm9689_vm9 }
 0x23a   : > { %v2650_v26 = vpop.permute.xlu1 %2649  ;;  %4810 = vmatpush1.bf16.msra.mxu0 %v5645_v12  ;;  %v2846_v43 = vpop.permute.xlu0 %2845  ;;  %v2494_v20 = vsel %vm2475_vm4, %v2442_v35, %v2493_v38  ;;  %v5972_v35 = vld [vmem:[%s6460_s26 + $0x48] sm:$0xff] }
 0x23b   : > { %v2681_v32 = vsel %vm2475_vm4, %v2648_v37, %v2650_v26  ;;  %v2870_v39 = vrot.slane %v2846_v43, 4  ;;  %v5647_v51 = vcombine.low %v2137_v61, %v2494_v20  ;;  %v5648_v6 = vcombine.high %v2137_v61, %v2494_v20  ;;  %3087 = vrot.lane.b32.xlu1 %v5564_v2, %s6005_s20 }
 0x23c   : > { %vm2713_vm8 = vcmp.ne.s16.totalorder %v2681_v32, 0 }
 0x23d   : > { %v2745_v34 = vsel %vm2713_vm8, %v8791_v21, 0  ;;  %v2894_v30 = vsel %vm1373_vm11, %v2869_v31, %v2870_v39  ;;  %4850 = vmatprep.subr.bf16.mxu1 %v5648_v6  ;;  %v3316_v21 = vsel %vm1951_vm2, %v8799_v7, 0  ;;  %vm9686_vm2 = vmmov %vm9684_vm7  ;;  %v8979_v6 = vpop.f32.mrb[0].mxu0 }
 0x23e   : > { %v5563_v15 = vcombine.low %v2744_v29, %v2745_v34  ;;  %v8918_v40 = vpop.permute.xlu1 %2847  ;;  %4851 = vmatpush1.bf16.msra.mxu1 %v5647_v51  ;;  %v3074_v13 = vpop.permute.xlu0 %3073  ;;  %v2895_v10 = vsel %vm9681_vm3, %v8715_v3, %v2894_v30  ;;  %v5580_v3 = vcombine.low %v2973_v23, %v2974_v60  ;;  %v5596_v38 = vcombine.low %v3316_v21, %v3317_v48  ;;  %vm9688_vm0 = vmmov %vm9686_vm2 }
 0x23f   : > { %v2871_v8 = vrot.slane %v8918_v40, 4  ;;  %v3098_v19 = vrot.slane %v3074_v13, 4  ;;  %v5677_v28 = vcombine.low %v5971_v50, %v2895_v10  ;;  %v5678_v31 = vcombine.high %v5971_v50, %v2895_v10  ;;  %3202 = vrot.lane.b32.xlu1 %v5564_v2, %s6008_s27  ;;  %v8984_v30 = vpop.f32.mrb[1].mxu0  ;;  %vm9691_vm15 = vmmov %vm9688_vm0 }
 0x240   : > { %2857 = vrot.lane.b32.xlu0 %v5563_v15, %s6006_s21  ;;  %v5135_v15 = vld [vmem:[%s9423_s2] sm:$0xf]  ;;  %vm9693_vm8 = vmmov %vm9681_vm3 }
 0x241   : > { %v2896_v24 = vsel %vm1373_vm11, %v2870_v39, %v2871_v8  ;;  %4811 = vmatprep.subr.bf16.mxu0 %v5678_v31  ;;  %v3122_v56 = vsel %vm1373_vm11, %v3097_v57, %v3098_v19  ;;  %v5173_v57 = vld [vmem:[%s9424_s3] sm:$0xf] }
 0x242   : > { %v8935_v53 = vpop.permute.xlu1 %3075  ;;  %4812 = vmatpush1.bf16.msra.mxu0 %v5677_v28  ;;  %v3189_v58 = vpop.permute.xlu0 %3188  ;;  %v2897_v17 = vsel %vm9682_vm12, %v2846_v43, %v2896_v24  ;;  %v3123_v14 = vsel %vm9683_vm13, %v8735_v33, %v3122_v56  ;;  %vm9694_vm12 = vmmov %vm9685_vm5 }
 0x243   : > { %v3099_v0 = vrot.slane %v8935_v53, 4  ;;  %v3213_v62 = vrot.slane %v3189_v58, 4  ;;  %v5679_v5 = vcombine.low %v5972_v35, %v2897_v17  ;;  %v5680_v45 = vcombine.high %v5972_v35, %v2897_v17  ;;  %3430 = vrot.lane.b32.xlu1 %v5564_v2, %s6004_s19  ;;  %vm9695_vm13 = vmmov %vm9688_vm0 }
 0x244   : > { %3085 = vrot.lane.b32.xlu0 %v5580_v3, %s6005_s20 }
 0x245   : > { %v3237_v22 = vsel %vm1373_vm11, %v3212_v4, %v3213_v62  ;;  %4852 = vmatprep.subr.bf16.mxu1 %v5680_v45  ;;  %v3124_v37 = vsel %vm1373_vm11, %v3098_v19, %v3099_v0 }
 0x246   : > { %v8954_v2 = vpop.permute.xlu1 %3190  ;;  %4853 = vmatpush1.bf16.msra.mxu1 %v5679_v5  ;;  %v3417_v16 = vpop.permute.xlu0 %3416  ;;  %v3238_v9 = vsel %vm9684_vm7, %v8755_v18, %v3237_v22  ;;  %v3125_v42 = vsel %vm9685_vm5, %v3074_v13, %v3124_v37  ;;  %vm9696_vm7 = vmmov %vm9685_vm5 }
 0x247   : > { %v3214_v4 = vrot.slane %v8954_v2, 4  ;;  %v3441_v12 = vrot.slane %v3417_v16, 4  ;;  %v5709_v36 = vcombine.low %v3123_v14, %v3238_v9  ;;  %v5710_v54 = vcombine.high %v3123_v14, %v3238_v9  ;;  %5176 = vperm.xlu1 %5929, %v5173_v57   ;;  %v4517_v13 = vpop.f32.mrb[2].mxu0  ;;  %vm9697_vm5 = vmmov %vm9688_vm0 }
 0x248   : > { %3200 = vrot.lane.b32.xlu0 %v8782_v41, %s6008_s27  ;;  %v4518_v17 = vpop.f32.mrb[3].mxu0 }
 0x249   : > { %v3239_v33 = vsel %vm1373_vm11, %v3213_v62, %v3214_v4  ;;  %v3465_v18 = vsel %vm1373_vm11, %v3440_v63, %v3441_v12  ;;  %4813 = vmatprep.subr.bf16.mxu0 %v5710_v54  ;;  %v8981_v63 = vpop.f32.mrb[0].mxu1 }
 0x24a   : > { %v8972_v26 = vpop.permute.xlu1 %3418  ;;  %4814 = vmatpush1.bf16.msra.mxu0 %v5709_v36  ;;  %v1345_v43 = vpop.permute.xlu0 %1344  ;;  %v3466_v61 = vsel %vm1143_vm10, %v8774_v27, %v3465_v18  ;;  %v3240_v7 = vsel %vm9686_vm2, %v3189_v58, %v3239_v33  ;;  %vm9698_vm2 = vmmov %vm9690_vm6 }
 0x24b   : > { %v3442_v20 = vrot.slane %v8972_v26, 4  ;;  %v1367_v32 = vrot.slane %v1345_v43, 4  ;;  %v5742_v39 = vcombine.high %v3466_v61, %v3466_v61  ;;  %v5711_v51 = vcombine.low %v3125_v42, %v3240_v7  ;;  %v8986_v27 = vpop.f32.mrb[1].mxu1 }
 0x24c   : > { %3428 = vrot.lane.b32.xlu0 %v5596_v38, %s6004_s19  ;;  %v5712_v29 = vcombine.high %v3125_v42, %v3240_v7  ;;  %v5741_v34 = vcombine.low %v3466_v61, %v3466_v61  ;;  %v4558_v10 = vpop.f32.mrb[2].mxu1 }
 0x24d   : > { %v3467_v60 = vsel %vm1373_vm11, %v3441_v12, %v3442_v20  ;;  %5773 = vmatprep.subr.msk.bf16.mxu0 %vm1373_vm11, %v5742_v39  ;;  %v1395_v19 = vsel %vm1373_vm11, %v1366_v59, %v1367_v32  ;;  %v4559_v62 = vpop.f32.mrb[3].mxu1 }
 0x24e   : > { %4854 = vmatprep.subr.bf16.mxu1 %v5712_v29  ;;  %v8998_v50 = vpop.permute.xlu1 %1346  ;;  %v4432_v28 = vsel %vm1373_vm11, %v5741_v34, 0  ;;  %v1478_v31 = vpop.permute.xlu0 %1477  ;;  %v3468_v23 = vsel %vm1143_vm10, %v3417_v16, %v3467_v60  ;;  %v1396_v22 = vsel %vm9687_vm14, %v8816_v44, %v1395_v19  ;;  %vm9699_vm14 = vmmov %vm9688_vm0 }
 0x24f   : > { %v1368_v24 = vrot.slane %v8998_v50, 4  ;;  %4816 = vmatpush1.bf16.msra.mxu0 %v4432_v28  ;;  %4855 = vmatpush1.bf16.msra.mxu1 %v5711_v51  ;;  %v1500_v3 = vrot.slane %v1478_v31, 4  ;;  %v5744_v56 = vcombine.high %v3468_v23, %v3468_v23  ;;  %v5743_v58 = vcombine.low %v3468_v23, %v3468_v23  ;;  %v5973_v28 = vld [vmem:[%s6460_s26 + $0x50] sm:$0xff] }
 0x250   : > { %5138 = vperm.xlu0 %5928, %v5135_v15  }
 0x251   : > { %v1527_v59 = vsel %vm1373_vm11, %v1499_v1, %v1500_v3  ;;  %5775 = vmatprep.subr.msk.bf16.mxu1 %vm1373_vm11, %v5744_v56  ;;  %v4438_v35 = vsel %vm1373_vm11, %v5743_v58, 0  ;;  %v1397_v5 = vsel %vm1373_vm11, %v1367_v32, %v1368_v24 }
 0x252   : > { %v9011_v45 = vpop.permute.xlu1 %1479  ;;  %v2090_v57 = vpop.permute.xlu0 %2089  ;;  %v1528_v48 = vsel %vm9688_vm0, %v8835_v25, %v1527_v59  ;;  %5774 = vmatmul.mubr.msk.bf16.vlgmr.msra.gmra.mrb[16].mxu0 %vm9689_vm9, %v8468_v52  ;;  %v1398_v36 = vsel %vm9690_vm6, %v1345_v43, %v1397_v5  ;;  %v5974_v5 = vld [vmem:[%s6460_s26 + $0x58] sm:$0xff]  ;;  %vm9700_vm0 = vmmov %vm9692_vm1 }
 0x253   : > { %v1501_v1 = vrot.slane %v9011_v45, 4  ;;  %4857 = vmatpush1.bf16.msra.mxu1 %v4438_v35  ;;  %v2112_v37 = vrot.slane %v2090_v57, 4  ;;  %v5617_v16 = vcombine.low %v1396_v22, %v1528_v48  ;;  %v5618_v14 = vcombine.high %v1396_v22, %v1528_v48  ;;  %4921 = vmatprep.mubr.bf16.mxu0 %v9545_v55  ;;  %vm9701_vm9 = vmmov %vm9698_vm2 }
 0x254   : > { %vm9702_vm6 = vmmov %vm9697_vm5 }
 0x255   : > { %v1529_v9 = vsel %vm1373_vm11, %v1500_v3, %v1501_v1  ;;  %4889 = vmatprep.subr.bf16.mxu0 %v5618_v14  ;;  %v2138_v44 = vsel %vm1373_vm11, %v2111_v11, %v2112_v37 }
 0x256   : > { %v9027_v25 = vpop.permute.xlu1 %2091  ;;  %4890 = vmatpush1.bf16.msra.mxu0 %v5617_v16  ;;  %v2446_v12 = vpop.permute.xlu0 %2445  ;;  %v1530_v54 = vsel %vm9691_vm15, %v1478_v31, %v1529_v9  ;;  %5776 = vmatmul.mubr.msk.bf16.vlgmr.msra.gmra.mrb[16].mxu1 %vm9692_vm1, %v8468_v52  ;;  %v2139_v42 = vsel %vm1143_vm10, %v8877_v47, %v2138_v44  ;;  %vm9703_vm15 = vmmov %vm9700_vm0 }
 0x257   : > { %v2113_v21 = vrot.slane %v9027_v25, 4  ;;  %v2468_v33 = vrot.slane %v2446_v12, 4  ;;  %v5619_v18 = vcombine.low %v1398_v36, %v1530_v54  ;;  %v5620_v38 = vcombine.high %v1398_v36, %v1530_v54  ;;  %4962 = vmatprep.mubr.bf16.mxu1 %v9545_v55  ;;  %vm9704_vm1 = vmmov %vm9681_vm3 }
 0x259   : > { %v2495_v11 = vsel %vm1373_vm11, %v2467_v46, %v2468_v33  ;;  %4930 = vmatprep.subr.bf16.mxu1 %v5620_v38  ;;  %v2140_v43 = vsel %vm1373_vm11, %v2112_v37, %v2113_v21 }
 0x25a   : > { %v9041_v61 = vpop.permute.xlu1 %2447  ;;  %4931 = vmatpush1.bf16.msra.mxu1 %v5619_v18  ;;  %v2850_v52 = vpop.permute.xlu0 %2849  ;;  %v2496_v7 = vsel %vm2475_vm4, %v8893_v49, %v2495_v11  ;;  %v2141_v15 = vsel %vm1143_vm10, %v2090_v57, %v2140_v43 }
 0x25b   : > { %v2469_v32 = vrot.slane %v9041_v61, 4  ;;  %v2872_v39 = vrot.slane %v2850_v52, 4  ;;  %v5649_v46 = vcombine.low %v2139_v42, %v2496_v7  ;;  %v5650_v51 = vcombine.high %v2139_v42, %v2496_v7 }
 0x25d   : > { %v2497_v29 = vsel %vm1373_vm11, %v2468_v33, %v2469_v32  ;;  %v2898_v34 = vsel %vm1373_vm11, %v2871_v8, %v2872_v39  ;;  %4891 = vmatprep.subr.bf16.mxu0 %v5650_v51 }
 0x25e   : > { %v9054_v60 = vpop.permute.xlu1 %2851  ;;  %4892 = vmatpush1.bf16.msra.mxu0 %v5649_v46  ;;  %v3078_v47 = vpop.permute.xlu0 %3077  ;;  %v2899_v49 = vsel %vm9693_vm8, %v8918_v40, %v2898_v34  ;;  %v2498_v13 = vsel %vm2475_vm4, %v2446_v12, %v2497_v29  ;;  %vm9705_vm8 = vmmov %vm9704_vm1 }
 0x25f   : > { %v2873_v10 = vrot.slane %v9054_v60, 4  ;;  %v3100_v19 = vrot.slane %v3078_v47, 4  ;;  %v5681_v31 = vcombine.low %v5973_v28, %v2899_v49  ;;  %v5682_v23 = vcombine.high %v5973_v28, %v2899_v49 }
 0x260   : > { %v5651_v8 = vcombine.low %v2141_v15, %v2498_v13  ;;  %v5652_v3 = vcombine.high %v2141_v15, %v2498_v13 }
 0x261   : > { %v2900_v56 = vsel %vm1373_vm11, %v2872_v39, %v2873_v10  ;;  %4893 = vmatprep.subr.bf16.mxu0 %v5682_v23  ;;  %v3126_v40 = vsel %vm1373_vm11, %v3099_v0, %v3100_v19 }
 0x262   : > { %4932 = vmatprep.subr.bf16.mxu1 %v5652_v3  ;;  %v9068_v58 = vpop.permute.xlu1 %3079  ;;  %4894 = vmatpush1.bf16.msra.mxu0 %v5681_v31  ;;  %v3193_v17 = vpop.permute.xlu0 %3192  ;;  %v2901_v62 = vsel %vm9681_vm3, %v2850_v52, %v2900_v56  ;;  %v3127_v14 = vsel %vm9694_vm12, %v8935_v53, %v3126_v40  ;;  %vm9706_vm3 = vmmov %vm9698_vm2 }
 0x263   : > { %v3101_v59 = vrot.slane %v9068_v58, 4  ;;  %4933 = vmatpush1.bf16.msra.mxu1 %v5651_v8  ;;  %v3215_v35 = vrot.slane %v3193_v17, 4  ;;  %v5683_v57 = vcombine.low %v5974_v5, %v2901_v62  ;;  %v5684_v22 = vcombine.high %v5974_v5, %v2901_v62  ;;  %vm9707_vm12 = vmmov %vm9697_vm5 }
 0x265   : > { %v3241_v48 = vsel %vm1373_vm11, %v3214_v4, %v3215_v35  ;;  %4934 = vmatprep.subr.bf16.mxu1 %v5684_v22  ;;  %v3128_v0 = vsel %vm1373_vm11, %v3100_v19, %v3101_v59 }
 0x266   : > { %v9079_v37 = vpop.permute.xlu1 %3194  ;;  %v3421_v16 = vpop.permute.xlu0 %3420  ;;  %v3242_v9 = vsel %vm9695_vm13, %v8954_v2, %v3241_v48  ;;  %v3129_v38 = vsel %vm9696_vm7, %v3078_v47, %v3128_v0  ;;  %vm9708_vm13 = vmmov %vm9698_vm2 }
 0x267   : > { %v3216_v44 = vrot.slane %v9079_v37, 4  ;;  %4935 = vmatpush1.bf16.msra.mxu1 %v5683_v57  ;;  %v3443_v12 = vrot.slane %v3421_v16, 4  ;;  %v5713_v36 = vcombine.low %v3127_v14, %v3242_v9  ;;  %v5714_v4 = vcombine.high %v3127_v14, %v3242_v9  ;;  %vm9709_vm7 = vmmov %vm9697_vm5 }
 0x269   : > { %v3243_v54 = vsel %vm1373_vm11, %v3215_v35, %v3216_v44  ;;  %v3469_v33 = vsel %vm1373_vm11, %v3442_v20, %v3443_v12  ;;  %4895 = vmatprep.subr.bf16.mxu0 %v5714_v4 }
 0x26a   : > { %v9092_v18 = vpop.permute.xlu1 %3422  ;;  %4896 = vmatpush1.bf16.msra.mxu0 %v5713_v36  ;;  %v1349_v53 = vpop.permute.xlu0 %1348  ;;  %v3470_v2 = vsel %vm1143_vm10, %v8972_v26, %v3469_v33  ;;  %v3244_v11 = vsel %vm9697_vm5, %v3193_v17, %v3243_v54  ;;  %vm9710_vm5 = vmmov %vm9700_vm0 }
 0x26b   : > { %v3444_v43 = vrot.slane %v9092_v18, 4  ;;  %v1369_v52 = vrot.slane %v1349_v53, 4  ;;  %v5746_v42 = vcombine.high %v3470_v2, %v3470_v2  ;;  %v5715_v7 = vcombine.low %v3129_v38, %v3244_v11 }
 0x26c   : > { %v5716_v39 = vcombine.high %v3129_v38, %v3244_v11  ;;  %v5745_v46 = vcombine.low %v3470_v2, %v3470_v2 }
 0x26d   : > { %v3471_v20 = vsel %vm1373_vm11, %v3443_v12, %v3444_v43  ;;  %5777 = vmatprep.subr.msk.bf16.mxu0 %vm1373_vm11, %v5746_v42  ;;  %v1399_v26 = vsel %vm1373_vm11, %v1368_v24, %v1369_v52 }
 0x26e   : > { %4936 = vmatprep.subr.bf16.mxu1 %v5716_v39  ;;  %v9106_v51 = vpop.permute.xlu1 %1350  ;;  %v4444_v29 = vsel %vm1373_vm11, %v5745_v46, 0  ;;  %v1482_v34 = vpop.permute.xlu0 %1481  ;;  %v3472_v47 = vsel %vm1143_vm10, %v3421_v16, %v3471_v20  ;;  %v1400_v3 = vsel %vm9698_vm2, %v8998_v50, %v1399_v26  ;;  %vm9711_vm2 = vmmov %vm9700_vm0 }
 0x26f   : > { %v1370_v49 = vrot.slane %v9106_v51, 4  ;;  %4898 = vmatpush1.bf16.msra.mxu0 %v4444_v29  ;;  %4937 = vmatpush1.bf16.msra.mxu1 %v5715_v7  ;;  %v1502_v15 = vrot.slane %v1482_v34, 4  ;;  %v5748_v13 = vcombine.high %v3472_v47, %v3472_v47  ;;  %v5747_v19 = vcombine.low %v3472_v47, %v3472_v47 }
 0x271   : > { %v1531_v28 = vsel %vm1373_vm11, %v1501_v1, %v1502_v15  ;;  %5779 = vmatprep.subr.msk.bf16.mxu1 %vm1373_vm11, %v5748_v13  ;;  %v4450_v24 = vsel %vm1373_vm11, %v5747_v19, 0  ;;  %v1401_v31 = vsel %vm1373_vm11, %v1369_v52, %v1370_v49  ;;  %v9128_v1 = vld [vmem:[%s9422_s1] sm:$0x3] }
 0x272   : > { %v9119_v23 = vpop.permute.xlu1 %1483  ;;  %v2094_v8 = vpop.permute.xlu0 %2093  ;;  %v1532_v56 = vsel %vm9699_vm14, %v9011_v45, %v1531_v28  ;;  %5778 = vmatmul.mubr.msk.bf16.vlgmr.msra.gmra.mrb[20].mxu0 %vm9700_vm0, %v9128_v1  ;;  %v1402_v48 = vsel %vm9701_vm9, %v1349_v53, %v1401_v31  ;;  %vm9712_vm14 = vmmov %vm9706_vm3 }
 0x273   : > { %v1503_v40 = vrot.slane %v9119_v23, 4  ;;  %4939 = vmatpush1.bf16.msra.mxu1 %v4450_v24  ;;  %v2114_v17 = vrot.slane %v2094_v8, 4  ;;  %v5621_v62 = vcombine.low %v1400_v3, %v1532_v56  ;;  %v5622_v35 = vcombine.high %v1400_v3, %v1532_v56  ;;  %5003 = vmatprep.mubr.bf16.mxu0 %v9545_v55  ;;  %vm9713_vm0 = vmmov %vm9702_vm6 }
 0x274   : > { %vm9714_vm9 = vmmov %vm9706_vm3 }
 0x275   : > { %v1533_v50 = vsel %vm1373_vm11, %v1502_v15, %v1503_v40  ;;  %4971 = vmatprep.subr.bf16.mxu0 %v5622_v35  ;;  %v9137_v45 = vpop.f32.mrb[4].mxu0  ;;  %v2142_v5 = vsel %vm1373_vm11, %v2113_v21, %v2114_v17 }
 0x276   : > { %v9142_v57 = vpop.permute.xlu1 %2095  ;;  %4972 = vmatpush1.bf16.msra.mxu0 %v5621_v62  ;;  %v2450_v22 = vpop.permute.xlu0 %2449  ;;  %v1534_v0 = vsel %vm9702_vm6, %v1482_v34, %v1533_v50  ;;  %5780 = vmatmul.mubr.msk.bf16.vlgmr.msra.gmra.mrb[20].mxu1 %vm9703_vm15, %v9128_v1  ;;  %v2143_v2 = vsel %vm1143_vm10, %v9027_v25, %v2142_v5  ;;  %vm9715_vm6 = vmmov %vm9713_vm0 }
 0x277   : > { %v2115_v16 = vrot.slane %v9142_v57, 4  ;;  %v2470_v14 = vrot.slane %v2450_v22, 4  ;;  %v5623_v9 = vcombine.low %v1402_v48, %v1534_v0  ;;  %v5624_v12 = vcombine.high %v1402_v48, %v1534_v0  ;;  %5044 = vmatprep.mubr.bf16.mxu1 %v9545_v55  ;;  %v9150_v36 = vpop.f32.mrb[5].mxu0  ;;  %vm9717_vm15 = vmmov %vm9704_vm1 }
 0x278   : > { %v4599_v21 = vpop.f32.mrb[6].mxu0 }
 0x279   : > { %v2499_v4 = vsel %vm1373_vm11, %v2469_v32, %v2470_v14  ;;  %5012 = vmatprep.subr.bf16.mxu1 %v5624_v12  ;;  %v9155_v54 = vpop.f32.mrb[4].mxu1  ;;  %v4600_v33 = vpop.f32.mrb[7].mxu0  ;;  %v2144_v52 = vsel %vm1373_vm11, %v2114_v17, %v2115_v16 }
 0x27a   : > { %v9157_v53 = vpop.permute.xlu1 %2451  ;;  %5013 = vmatpush1.bf16.msra.mxu1 %v5623_v9  ;;  %v2500_v38 = vsel %vm2475_vm4, %v9041_v61, %v2499_v4  ;;  %v9163_v11 = vpop.f32.mrb[5].mxu1  ;;  %v2145_v61 = vsel %vm1143_vm10, %v2094_v8, %v2144_v52  ;;  %v5976_v8 = vld [vmem:[%s6460_s26 + $0x60] sm:$0xff] }
 0x27b   : > { %v2471_v32 = vrot.slane %v9157_v53, 4  ;;  %v5653_v42 = vcombine.low %v2143_v2, %v2500_v38  ;;  %v5654_v7 = vcombine.high %v2143_v2, %v2500_v38  ;;  %v4640_v39 = vpop.f32.mrb[6].mxu1 }
 0x27c   : > { %v4641_v46 = vpop.f32.mrb[7].mxu1 }
 0x27d   : > { %v2501_v20 = vsel %vm1373_vm11, %v2470_v14, %v2471_v32  ;;  %4973 = vmatprep.subr.bf16.mxu0 %v5654_v7 }
 0x27e   : > { %4974 = vmatpush1.bf16.msra.mxu0 %v5653_v42  ;;  %v2854_v25 = vpop.permute.xlu0 %2853  ;;  %v2502_v26 = vsel %vm2475_vm4, %v2450_v22, %v2501_v20  ;;  %v5977_v22 = vld [vmem:[%s6460_s26 + $0x68] sm:$0xff] }
 0x27f   : > { %v2874_v29 = vrot.slane %v2854_v25, 4  ;;  %v5655_v34 = vcombine.low %v2145_v61, %v2502_v26  ;;  %v5656_v47 = vcombine.high %v2145_v61, %v2502_v26 }
 0x281   : > { %v2902_v15 = vsel %vm1373_vm11, %v2873_v10, %v2874_v29  ;;  %5014 = vmatprep.subr.bf16.mxu1 %v5656_v47 }
 0x282   : > { %v9177_v13 = vpop.permute.xlu1 %2855  ;;  %5015 = vmatpush1.bf16.msra.mxu1 %v5655_v34  ;;  %v3082_v19 = vpop.permute.xlu0 %3081  ;;  %v2903_v28 = vsel %vm9704_vm1, %v9054_v60, %v2902_v15 }
 0x283   : > { %v2875_v24 = vrot.slane %v9177_v13, 4  ;;  %v3102_v31 = vrot.slane %v3082_v19, 4  ;;  %v5685_v3 = vcombine.low %v5976_v8, %v2903_v28  ;;  %v5686_v56 = vcombine.high %v5976_v8, %v2903_v28 }
 0x285   : > { %v2904_v17 = vsel %vm1373_vm11, %v2874_v29, %v2875_v24  ;;  %4975 = vmatprep.subr.bf16.mxu0 %v5686_v56  ;;  %v3130_v10 = vsel %vm1373_vm11, %v3101_v59, %v3102_v31 }
 0x286   : > { %v9189_v62 = vpop.permute.xlu1 %3083  ;;  %4976 = vmatpush1.bf16.msra.mxu0 %v5685_v3  ;;  %v3197_v35 = vpop.permute.xlu0 %3196  ;;  %v2905_v60 = vsel %vm9705_vm8, %v2854_v25, %v2904_v17  ;;  %v3131_v21 = vsel %vm9706_vm3, %v9068_v58, %v3130_v10  ;;  %vm9719_vm8 = vmmov %vm9713_vm0 }
 0x287   : > { %v3103_v50 = vrot.slane %v9189_v62, 4  ;;  %v3217_v5 = vrot.slane %v3197_v35, 4  ;;  %v5687_v48 = vcombine.low %v5977_v22, %v2905_v60  ;;  %v5688_v0 = vcombine.high %v5977_v22, %v2905_v60 }
 0x289   : > { %v3245_v14 = vsel %vm1373_vm11, %v3216_v44, %v3217_v5  ;;  %5016 = vmatprep.subr.bf16.mxu1 %v5688_v0  ;;  %v3132_v59 = vsel %vm1373_vm11, %v3102_v31, %v3103_v50 }
 0x28a   : > { %v9200_v9 = vpop.permute.xlu1 %3198  ;;  %5017 = vmatpush1.bf16.msra.mxu1 %v5687_v48  ;;  %v3425_v12 = vpop.permute.xlu0 %3424  ;;  %v3246_v4 = vsel %vm9707_vm12, %v9079_v37, %v3245_v14  ;;  %v3133_v37 = vsel %vm9708_vm13, %v3082_v19, %v3132_v59  ;;  %vm9721_vm12 = vmmov %vm9713_vm0 }
 0x28b   : > { %v3218_v33 = vrot.slane %v9200_v9, 4  ;;  %v3445_v2 = vrot.slane %v3425_v12, 4  ;;  %v5717_v38 = vcombine.low %v3131_v21, %v3246_v4  ;;  %v5718_v44 = vcombine.high %v3131_v21, %v3246_v4  ;;  %vm9722_vm13 = vmmov %vm9711_vm2 }
 0x28d   : > { %v3247_v52 = vsel %vm1373_vm11, %v3217_v5, %v3218_v33  ;;  %v3473_v42 = vsel %vm1373_vm11, %v3444_v43, %v3445_v2  ;;  %4977 = vmatprep.subr.bf16.mxu0 %v5718_v44 }
 0x28e   : > { %v9213_v7 = vpop.permute.xlu1 %3426  ;;  %4978 = vmatpush1.bf16.msra.mxu0 %v5717_v38  ;;  %v3474_v58 = vsel %vm1143_vm10, %v9092_v18, %v3473_v42  ;;  %v3248_v39 = vsel %vm9709_vm7, %v3197_v35, %v3247_v52 }
 0x28f   : > { %v3446_v46 = vrot.slane %v9213_v7, 4  ;;  %v5750_v20 = vcombine.high %v3474_v58, %v3474_v58  ;;  %v5719_v25 = vcombine.low %v3133_v37, %v3248_v39  ;;  %v5720_v61 = vcombine.high %v3133_v37, %v3248_v39 }
 0x290   : > { %v5749_v26 = vcombine.low %v3474_v58, %v3474_v58 }
 0x291   : > { %v3475_v43 = vsel %vm1373_vm11, %v3445_v2, %v3446_v46  ;;  %5781 = vmatprep.subr.msk.bf16.mxu0 %vm1373_vm11, %v5750_v20  ;;  %5018 = vmatprep.subr.bf16.mxu1 %v5720_v61 }
 0x292   : > { %v4456_v29 = vsel %vm1373_vm11, %v5749_v26, 0  ;;  %5019 = vmatpush1.bf16.msra.mxu1 %v5719_v25  ;;  %v3476_v18 = vsel %vm1143_vm10, %v3425_v12, %v3475_v43 }
 0x293   : > { %4980 = vmatpush1.bf16.msra.mxu0 %v4456_v29  ;;  %v5752_v34 = vcombine.high %v3476_v18, %v3476_v18  ;;  %v5751_v47 = vcombine.low %v3476_v18, %v3476_v18 }
 0x295   : > { %v1355_v15 = vpop.permute.xlu1 %1354  ;;  %5783 = vmatprep.subr.msk.bf16.mxu1 %vm1373_vm11, %v5752_v34  ;;  %v4462_v19 = vsel %vm1373_vm11, %v5751_v47, 0 }
 0x296   : > { %5021 = vmatpush1.bf16.msra.mxu1 %v4462_v19  ;;  %v1353_v28 = vpop.permute.xlu0 %1352  ;;  %5782 = vmatmul.mubr.msk.bf16.vlgmr.msra.gmra.mrb[24].mxu0 %vm9710_vm5, %v9128_v1  ;;  %v1372_v31 = vrot.slane %v1355_v15, 4 }
 0x297   : > { %v1371_v8 = vrot.slane %v1353_v28, 4  ;;  %5085 = vmatprep.mubr.bf16.mxu0 %v9545_v55 }
 0x299   : > { %v1488_v3 = vpop.permute.xlu1 %1487  ;;  %5784 = vmatmul.mubr.msk.bf16.vlgmr.msra.gmra.mrb[24].mxu1 %vm9711_vm2, %v9128_v1  ;;  %v1403_v10 = vsel %vm1373_vm11, %v1370_v49, %v1371_v8  ;;  %v1405_v35 = vsel %vm1373_vm11, %v1371_v8, %v1372_v31 }
 0x29a   : > { %v1505_v56 = vrot.slane %v1488_v3, 4  ;;  %v1486_v17 = vpop.permute.xlu0 %1485  ;;  %5126 = vmatprep.mubr.bf16.mxu1 %v9545_v55  ;;  %v1406_v48 = vsel %vm9712_vm14, %v1353_v28, %v1405_v35  ;;  %v1404_v55 = vsel %vm9714_vm9, %v9106_v51, %v1403_v10 }
 0x29b   : > { %v1504_v60 = vrot.slane %v1486_v17, 4 }
 0x29d   : > { %v1535_v5 = vsel %vm1373_vm11, %v1503_v40, %v1504_v60  ;;  %v1537_v22 = vsel %vm1373_vm11, %v1504_v60, %v1505_v56 }
 0x29e   : > { %v1538_v0 = vsel %vm9713_vm0, %v1486_v17, %v1537_v22  ;;  %v1536_v14 = vsel %vm9715_vm6, %v9119_v23, %v1535_v5  ;;  %v5978_v22 = vld [vmem:[%s6460_s26 + $0x70] sm:$0xff] }
 0x29f   : > { %v5627_v49 = vcombine.low %v1406_v48, %v1538_v0  ;;  %v5628_v59 = vcombine.high %v1406_v48, %v1538_v0  ;;  %v5625_v12 = vcombine.low %v1404_v55, %v1536_v14  ;;  %v5626_v21 = vcombine.high %v1404_v55, %v1536_v14 }
 0x2a1   : > { %v2100_v4 = vpop.permute.xlu1 %2099  ;;  %5053 = vmatprep.subr.bf16.mxu0 %v5626_v21  ;;  %5094 = vmatprep.subr.bf16.mxu1 %v5628_v59 }
 0x2a2   : > { %5054 = vmatpush1.bf16.msra.mxu0 %v5625_v12  ;;  %5095 = vmatpush1.bf16.msra.mxu1 %v5627_v49  ;;  %v2098_v40 = vpop.permute.xlu0 %2097  ;;  %v2117_v2 = vrot.slane %v2100_v4, 4 }
 0x2a3   : > { %v2116_v38 = vrot.slane %v2098_v40, 4 }
 0x2a5   : > { %v2456_v44 = vpop.permute.xlu1 %2455  ;;  %v2146_v51 = vsel %vm1373_vm11, %v2115_v16, %v2116_v38  ;;  %v2148_v23 = vsel %vm1373_vm11, %v2116_v38, %v2117_v2 }
 0x2a6   : > { %v2473_v52 = vrot.slane %v2456_v44, 4  ;;  %v2454_v42 = vpop.permute.xlu0 %2453  ;;  %v2149_v25 = vsel %vm1143_vm10, %v2098_v40, %v2148_v23  ;;  %v2147_v26 = vsel %vm1143_vm10, %v9142_v57, %v2146_v51 }
 0x2a7   : > { %v2472_v58 = vrot.slane %v2454_v42, 4 }
 0x2a9   : > { %v2503_v37 = vsel %vm1373_vm11, %v2471_v32, %v2472_v58  ;;  %v2505_v39 = vsel %vm1373_vm11, %v2472_v58, %v2473_v52  ;;  %v2860_v20 = vpop.permute.xlu1 %2859 }
 0x2aa   : > { %v2506_v61 = vsel %vm2475_vm4, %v2454_v42, %v2505_v39  ;;  %v2504_v16 = vsel %vm2475_vm4, %v9157_v53, %v2503_v37  ;;  %v2877_v47 = vrot.slane %v2860_v20, 4  ;;  %vm9716_vm4 = vmmov %vm9704_vm1 }
 0x2ab   : > { %v5659_v43 = vcombine.low %v2149_v25, %v2506_v61  ;;  %v5660_v29 = vcombine.high %v2149_v25, %v2506_v61  ;;  %v5657_v18 = vcombine.low %v2147_v26, %v2504_v16  ;;  %v5658_v34 = vcombine.high %v2147_v26, %v2504_v16  ;;  %vm9718_vm1 = vmmov %vm9706_vm3 }
 0x2ac   : > { %vm9720_vm3 = vmmov %vm9718_vm1 }
 0x2ad   : > { %5055 = vmatprep.subr.bf16.mxu0 %v5658_v34  ;;  %5096 = vmatprep.subr.bf16.mxu1 %v5660_v29  ;;  %v3088_v32 = vpop.permute.xlu1 %3087 }
 0x2ae   : > { %5056 = vmatpush1.bf16.msra.mxu0 %v5657_v18  ;;  %5097 = vmatpush1.bf16.msra.mxu1 %v5659_v43  ;;  %v3105_v3 = vrot.slane %v3088_v32, 4 }
 0x2b1   : > { %v3203_v28 = vpop.permute.xlu1 %3202 }
 0x2b2   : > { %v2858_v15 = vpop.permute.xlu0 %2857  ;;  %v3220_v14 = vrot.slane %v3203_v28, 4 }
 0x2b3   : > { %v2876_v19 = vrot.slane %v2858_v15, 4 }
 0x2b5   : > { %v2906_v57 = vsel %vm1373_vm11, %v2875_v24, %v2876_v19  ;;  %v2908_v53 = vsel %vm1373_vm11, %v2876_v19, %v2877_v47  ;;  %v9266_v31 = vpop.f32.mrb[8].mxu0  ;;  %v3431_v49 = vpop.permute.xlu1 %3430 }
 0x2b6   : > { %v2909_v8 = vsel %vm9716_vm4, %v2858_v15, %v2908_v53  ;;  %v3086_v56 = vpop.permute.xlu0 %3085  ;;  %v2907_v17 = vsel %vm9717_vm15, %v9177_v13, %v2906_v57  ;;  %v9271_v10 = vpop.f32.mrb[9].mxu0  ;;  %v3448_v52 = vrot.slane %v3431_v49, 4 }
 0x2b7   : > { %v5691_v35 = vcombine.low %v8782_v41, %v2909_v8  ;;  %v5692_v60 = vcombine.high %v8782_v41, %v2909_v8  ;;  %v3104_v5 = vrot.slane %v3086_v56, 4  ;;  %v5689_v24 = vcombine.low %v5978_v22, %v2907_v17  ;;  %v4681_v48 = vpop.f32.mrb[10].mxu0 }
 0x2b8   : > { %v5690_v0 = vcombine.high %v5978_v22, %v2907_v17  ;;  %v4682_v55 = vpop.f32.mrb[11].mxu0  ;;  %v9276_v59 = vpop.f32.mrb[8].mxu1 }
 0x2b9   : > { %5098 = vmatprep.subr.bf16.mxu1 %v5692_v60  ;;  %v9278_v12 = vpop.f32.mrb[9].mxu1  ;;  %v3134_v41 = vsel %vm1373_vm11, %v3103_v50, %v3104_v5  ;;  %v3136_v21 = vsel %vm1373_vm11, %v3104_v5, %v3105_v3 }
 0x2ba   : > { %5057 = vmatprep.subr.bf16.mxu0 %v5690_v0  ;;  %5099 = vmatpush1.bf16.msra.mxu1 %v5691_v35  ;;  %v3201_v13 = vpop.permute.xlu0 %3200  ;;  %v4722_v40 = vpop.f32.mrb[10].mxu1  ;;  %v3137_v42 = vsel %vm9718_vm1, %v3086_v56, %v3136_v21  ;;  %v3135_v50 = vsel %vm9720_vm3, %v9189_v62, %v3134_v41 }
 0x2bb   : > { %5058 = vmatpush1.bf16.msra.mxu0 %v5689_v24  ;;  %v3219_v4 = vrot.slane %v3201_v13, 4  ;;  %v4723_v2 = vpop.f32.mrb[11].mxu1 }
 0x2bd   : > { %v3249_v38 = vsel %vm1373_vm11, %v3218_v33, %v3219_v4  ;;  %v3251_v44 = vsel %vm1373_vm11, %v3219_v4, %v3220_v14 }
 0x2be   : > { %v3252_v51 = vsel %vm9719_vm8, %v3201_v13, %v3251_v44  ;;  %v3429_v23 = vpop.permute.xlu0 %3428  ;;  %v3250_v58 = vsel %vm9721_vm12, %v9200_v9, %v3249_v38 }
 0x2bf   : > { %v5723_v37 = vcombine.low %v3137_v42, %v3252_v51  ;;  %v5724_v39 = vcombine.high %v3137_v42, %v3252_v51  ;;  %v3447_v20 = vrot.slane %v3429_v23, 4  ;;  %v5721_v25 = vcombine.low %v3135_v50, %v3250_v58 }
 0x2c0   : > { %v5722_v61 = vcombine.high %v3135_v50, %v3250_v58 }
 0x2c1   : > { %v3477_v33 = vsel %vm1373_vm11, %v3446_v46, %v3447_v20  ;;  %v3479_v26 = vsel %vm1373_vm11, %v3447_v20, %v3448_v52  ;;  %5100 = vmatprep.subr.bf16.mxu1 %v5724_v39 }
 0x2c2   : > { %v3480_v16 = vsel %vm1143_vm10, %v3429_v23, %v3479_v26  ;;  %5059 = vmatprep.subr.bf16.mxu0 %v5722_v61  ;;  %5101 = vmatpush1.bf16.msra.mxu1 %v5723_v37  ;;  %v3478_v62 = vsel %vm1143_vm10, %v9213_v7, %v3477_v33  ;;  %vm9723_vm10 = vmmov %vm9711_vm2 }
 0x2c3   : > { %v5755_v9 = vcombine.low %v3480_v16, %v3480_v16  ;;  %v5756_v43 = vcombine.high %v3480_v16, %v3480_v16  ;;  %5060 = vmatpush1.bf16.msra.mxu0 %v5721_v25  ;;  %v5754_v29 = vcombine.high %v3478_v62, %v3478_v62  ;;  %v5753_v18 = vcombine.low %v3478_v62, %v3478_v62 }
 0x2c5   : > { %5785 = vmatprep.subr.msk.bf16.mxu0 %vm1373_vm11, %v5754_v29  ;;  %5787 = vmatprep.subr.msk.bf16.mxu1 %vm1373_vm11, %v5756_v43  ;;  %v4468_v46 = vsel %vm1373_vm11, %v5753_v18, 0  ;;  %v4474_v34 = vsel %vm1373_vm11, %v5755_v9, 0 }
 0x2c6   : > { %5103 = vmatpush1.bf16.msra.mxu1 %v4474_v34  ;;  %v9311_v32 = vpop.permute.xlu1 %5176 }
 0x2c7   : > { %5062 = vmatpush1.bf16.msra.mxu0 %v4468_v46 }
 0x2c9   : > { %5788 = vmatmul.mubr.msk.bf16.vlgmr.msra.gmra.mrb[28].mxu1 %vm9722_vm13, %v9128_v1 }
 0x2ca   : > { %5786 = vmatmul.mubr.msk.bf16.vlgmr.msra.gmra.mrb[28].mxu0 %vm9723_vm10, %v9128_v1 }
 0x2cf   : > { %v9309_v7 = vpop.permute.xlu0 %5138 }
 0x2d0   : > { %v5145_v47 = vmul.f32 %v9309_v7, %v9137_v45  ;;  %v5147_v15 = vmul.f32 %v9309_v7, %v9155_v54  ;;  %v5141_v19 = vmul.f32 %v9309_v7, %v8979_v6  ;;  %v5142_v28 = vmul.f32 %v9309_v7, %v8984_v30 }
 0x2d1   : > { %v5143_v57 = vmul.f32 %v9309_v7, %v8981_v63  ;;  %v5144_v1 = vmul.f32 %v9309_v7, %v8986_v27  ;;  %v5146_v53 = vmul.f32 %v9309_v7, %v9150_v36  ;;  %v5148_v45 = vmul.f32 %v9309_v7, %v9163_v11 }
 0x2d2   : > { %v5183_v54 = vadd.f32 %v9311_v32, %v5145_v47  ;;  %v5185_v6 = vadd.f32 %v9311_v32, %v5147_v15  ;;  %v5179_v8 = vadd.f32 %v9311_v32, %v5141_v19  ;;  %v5180_v30 = vadd.f32 %v9311_v32, %v5142_v28 }
 0x2d3   : > { %v5181_v63 = vadd.f32 %v9311_v32, %v5143_v57  ;;  %v5182_v3 = vadd.f32 %v9311_v32, %v5144_v1  ;;  %v5184_v27 = vadd.f32 %v9311_v32, %v5146_v53  ;;  %v5186_v56 = vadd.f32 %v9311_v32, %v5148_v45 }
 0x2d4   : > { %v5215_v36 = vmax.f32 %v5183_v54, 0.0  ;;  %v5217_v17 = vmax.f32 %v5185_v6, 0.0  ;;  %v5211_v35 = vmax.f32 %v5179_v8, 0.0  ;;  %v5212_v11 = vmax.f32 %v5180_v30, 0.0 }
 0x2d5   : > { %v5213_v60 = vmax.f32 %v5181_v63, 0.0  ;;  %v5214_v5 = vmax.f32 %v5182_v3, 0.0  ;;  %v5216_v22 = vmax.f32 %v5184_v27, 0.0  ;;  %v5218_v24 = vmax.f32 %v5186_v56, 0.0 }
 0x2d6   : > { %v5275_v48 = vcombine.low %v5211_v35, %v5212_v11  ;;  %v5149_v0 = vmul.f32 %v9309_v7, %v9266_v31  ;;  %v5151_v55 = vmul.f32 %v9309_v7, %v9276_v59  ;;  %v5150_v14 = vmul.f32 %v9309_v7, %v9271_v10 }
 0x2d7   : > { %v5276_v49 = vcombine.low %v5213_v60, %v5214_v5  ;;  %v5277_v13 = vcombine.low %v5215_v36, %v5216_v22  ;;  %v5278_v41 = vcombine.low %v5217_v17, %v5218_v24  ;;  %v5152_v21 = vmul.f32 %v9309_v7, %v9278_v12 }
 0x2d8   : > { %5307 = vst [vmem:[%s9342_s14] sm:$0xff] %v5275_v48  ;;  %v5187_v4 = vadd.f32 %v9311_v32, %v5149_v0  ;;  %v5189_v40 = vadd.f32 %v9311_v32, %v5151_v55  ;;  %v5188_v31 = vadd.f32 %v9311_v32, %v5150_v14 }
 0x2d9   : > { %5308 = vst [vmem:[%s9342_s14 + $0x8] sm:$0xff] %v5276_v49  ;;  %5309 = vst [vmem:[%s9342_s14 + $0x10] sm:$0xff] %v5277_v13  ;;  %v5190_v10 = vadd.f32 %v9311_v32, %v5152_v21 }
 0x2da   : > { %5310 = vst [vmem:[%s9342_s14 + $0x18] sm:$0xff] %v5278_v41  ;;  %v5219_v59 = vmax.f32 %v5187_v4, 0.0  ;;  %v5221_v2 = vmax.f32 %v5189_v40, 0.0  ;;  %v5220_v38 = vmax.f32 %v5188_v31, 0.0 }
 0x2db   : > { %v5222_v44 = vmax.f32 %v5190_v10, 0.0 }
 0x2dc   : > { %v5279_v52 = vcombine.low %v5219_v59, %v5220_v38 }
 0x2dd   : > { %v5280_v42 = vcombine.low %v5221_v2, %v5222_v44 }
 0x2de   : > { %5311 = vst [vmem:[%s9342_s14 + $0x20] sm:$0xff] %v5279_v52 }
 0x2df   : > { %5312 = vst [vmem:[%s9342_s14 + $0x28] sm:$0xff] %v5280_v42 }
 0x2f5   : > { %v4759_v12 = vpop.f32.mrb[12].mxu0 }
 0x2f6   : > { %v5153_v51 = vmul.f32 %v9309_v7, %v4759_v12  ;;  %v4761_v23 = vpop.f32.mrb[13].mxu0 }
 0x2f7   : > { %v5154_v50 = vmul.f32 %v9309_v7, %v4761_v23  ;;  %v4763_v58 = vpop.f32.mrb[14].mxu0 }
 0x2f8   : > { %v5191_v37 = vadd.f32 %v9311_v32, %v5153_v51  ;;  %v4764_v39 = vpop.f32.mrb[15].mxu0 }
 0x2f9   : > { %v4800_v20 = vpop.f32.mrb[12].mxu1  ;;  %v5192_v25 = vadd.f32 %v9311_v32, %v5154_v50 }
 0x2fa   : > { %v5223_v61 = vmax.f32 %v5191_v37, 0.0  ;;  %v5155_v33 = vmul.f32 %v9309_v7, %v4800_v20  ;;  %v4802_v26 = vpop.f32.mrb[13].mxu1 }
 0x2fb   : > { %v5224_v16 = vmax.f32 %v5192_v25, 0.0  ;;  %v5156_v62 = vmul.f32 %v9309_v7, %v4802_v26  ;;  %v4804_v9 = vpop.f32.mrb[14].mxu1 }
 0x2fc   : > { %v5193_v43 = vadd.f32 %v9311_v32, %v5155_v33  ;;  %v4805_v29 = vpop.f32.mrb[15].mxu1 }
 0x2fd   : > { %v5281_v18 = vcombine.low %v5223_v61, %v5224_v16  ;;  %v5194_v46 = vadd.f32 %v9311_v32, %v5156_v62 }
 0x2fe   : > { %v5225_v34 = vmax.f32 %v5193_v43, 0.0 }
 0x2ff   : > { %5313 = vst [vmem:[%s9342_s14 + $0x30] sm:$0xff] %v5281_v18  ;;  %v5226_v47 = vmax.f32 %v5194_v46, 0.0 }
 0x301   : > { %v5282_v15 = vcombine.low %v5225_v34, %v5226_v47 }
 0x303   : > { %5314 = vst [vmem:[%s9342_s14 + $0x38] sm:$0xff] %v5282_v15 }
 0x325   : > { %v4841_v19 = vpop.f32.mrb[16].mxu0 }
 0x326   : > { %v5157_v28 = vmul.f32 %v9309_v7, %v4841_v19  ;;  %v4843_v57 = vpop.f32.mrb[17].mxu0 }
 0x327   : > { %v5158_v1 = vmul.f32 %v9309_v7, %v4843_v57  ;;  %v4845_v53 = vpop.f32.mrb[18].mxu0 }
 0x328   : > { %v5195_v45 = vadd.f32 %v9311_v32, %v5157_v28  ;;  %v4846_v54 = vpop.f32.mrb[19].mxu0 }
 0x329   : > { %v4882_v6 = vpop.f32.mrb[16].mxu1  ;;  %v5196_v8 = vadd.f32 %v9311_v32, %v5158_v1 }
 0x32a   : > { %v5227_v30 = vmax.f32 %v5195_v45, 0.0  ;;  %v5159_v63 = vmul.f32 %v9309_v7, %v4882_v6  ;;  %v4884_v3 = vpop.f32.mrb[17].mxu1 }
 0x32b   : > { %v5228_v27 = vmax.f32 %v5196_v8, 0.0  ;;  %v5160_v56 = vmul.f32 %v9309_v7, %v4884_v3  ;;  %v4886_v36 = vpop.f32.mrb[18].mxu1 }
 0x32c   : > { %v5197_v17 = vadd.f32 %v9311_v32, %v5159_v63  ;;  %v4887_v35 = vpop.f32.mrb[19].mxu1 }
 0x32d   : > { %v5283_v11 = vcombine.low %v5227_v30, %v5228_v27  ;;  %v5198_v60 = vadd.f32 %v9311_v32, %v5160_v56 }
 0x32e   : > { %v5229_v5 = vmax.f32 %v5197_v17, 0.0 }
 0x32f   : > { %5315 = vst [vmem:[%s9342_s14 + $0x40] sm:$0xff] %v5283_v11  ;;  %v5230_v22 = vmax.f32 %v5198_v60, 0.0 }
 0x331   : > { %v5284_v24 = vcombine.low %v5229_v5, %v5230_v22 }
 0x333   : > { %5316 = vst [vmem:[%s9342_s14 + $0x48] sm:$0xff] %v5284_v24 }
 0x345   : > { %v4923_v48 = vpop.f32.mrb[20].mxu0 }
 0x346   : > { %v5161_v0 = vmul.f32 %v9309_v7, %v4923_v48  ;;  %v4925_v55 = vpop.f32.mrb[21].mxu0 }
 0x347   : > { %v5162_v14 = vmul.f32 %v9309_v7, %v4925_v55  ;;  %v4927_v49 = vpop.f32.mrb[22].mxu0 }
 0x348   : > { %v5199_v13 = vadd.f32 %v9311_v32, %v5161_v0  ;;  %v4928_v41 = vpop.f32.mrb[23].mxu0 }
 0x349   : > { %v4964_v21 = vpop.f32.mrb[20].mxu1  ;;  %v5200_v4 = vadd.f32 %v9311_v32, %v5162_v14 }
 0x34a   : > { %v5231_v40 = vmax.f32 %v5199_v13, 0.0  ;;  %v5163_v31 = vmul.f32 %v9309_v7, %v4964_v21  ;;  %v4966_v10 = vpop.f32.mrb[21].mxu1 }
 0x34b   : > { %v5232_v59 = vmax.f32 %v5200_v4, 0.0  ;;  %v5164_v2 = vmul.f32 %v9309_v7, %v4966_v10  ;;  %v4968_v38 = vpop.f32.mrb[22].mxu1 }
 0x34c   : > { %v5201_v44 = vadd.f32 %v9311_v32, %v5163_v31  ;;  %v4969_v52 = vpop.f32.mrb[23].mxu1 }
 0x34d   : > { %v5285_v42 = vcombine.low %v5231_v40, %v5232_v59  ;;  %v5202_v12 = vadd.f32 %v9311_v32, %v5164_v2 }
 0x34e   : > { %v5233_v51 = vmax.f32 %v5201_v44, 0.0 }
 0x34f   : > { %5317 = vst [vmem:[%s9342_s14 + $0x50] sm:$0xff] %v5285_v42  ;;  %v5234_v23 = vmax.f32 %v5202_v12, 0.0 }
 0x351   : > { %v5286_v50 = vcombine.low %v5233_v51, %v5234_v23 }
 0x353   : > { %5318 = vst [vmem:[%s9342_s14 + $0x58] sm:$0xff] %v5286_v50 }
 0x369   : > { %v5005_v58 = vpop.f32.mrb[24].mxu0 }
 0x36a   : > { %v5165_v37 = vmul.f32 %v9309_v7, %v5005_v58  ;;  %v5007_v39 = vpop.f32.mrb[25].mxu0 }
 0x36b   : > { %v5166_v20 = vmul.f32 %v9309_v7, %v5007_v39  ;;  %v5009_v25 = vpop.f32.mrb[26].mxu0 }
 0x36c   : > { %v5203_v61 = vadd.f32 %v9311_v32, %v5165_v37  ;;  %v5046_v33 = vpop.f32.mrb[24].mxu1  ;;  %v5010_v26 = vpop.f32.mrb[27].mxu0 }
 0x36d   : > { %v5167_v16 = vmul.f32 %v9309_v7, %v5046_v33  ;;  %v5204_v62 = vadd.f32 %v9311_v32, %v5166_v20  ;;  %v5048_v9 = vpop.f32.mrb[25].mxu1 }
 0x36e   : > { %v5235_v43 = vmax.f32 %v5203_v61, 0.0  ;;  %v5168_v29 = vmul.f32 %v9309_v7, %v5048_v9  ;;  %v5050_v18 = vpop.f32.mrb[26].mxu1 }
 0x36f   : > { %v5205_v46 = vadd.f32 %v9311_v32, %v5167_v16  ;;  %v5236_v34 = vmax.f32 %v5204_v62, 0.0  ;;  %v5051_v47 = vpop.f32.mrb[27].mxu1 }
 0x370   : > { %v5206_v15 = vadd.f32 %v9311_v32, %v5168_v29 }
 0x371   : > { %v5237_v19 = vmax.f32 %v5205_v46, 0.0  ;;  %v5287_v28 = vcombine.low %v5235_v43, %v5236_v34 }
 0x372   : > { %v5238_v57 = vmax.f32 %v5206_v15, 0.0 }
 0x373   : > { %5319 = vst [vmem:[%s9342_s14 + $0x60] sm:$0xff] %v5287_v28 }
 0x374   : > { %v5288_v1 = vcombine.low %v5237_v19, %v5238_v57 }
 0x376   : > { %5320 = vst [vmem:[%s9342_s14 + $0x68] sm:$0xff] %v5288_v1 }
 0x39c   : > { %v5128_v53 = vpop.f32.mrb[28].mxu1 }
 0x39d   : > { %v5087_v45 = vpop.f32.mrb[28].mxu0  ;;  %v5171_v54 = vmul.f32 %v9309_v7, %v5128_v53  ;;  %v5130_v6 = vpop.f32.mrb[29].mxu1 }
 0x39e   : > { %v5169_v8 = vmul.f32 %v9309_v7, %v5087_v45  ;;  %v5089_v30 = vpop.f32.mrb[29].mxu0  ;;  %v5172_v63 = vmul.f32 %v9309_v7, %v5130_v6  ;;  %v5132_v3 = vpop.f32.mrb[30].mxu1 }
 0x39f   : > { %v5209_v27 = vadd.f32 %v9311_v32, %v5171_v54  ;;  %v5170_v56 = vmul.f32 %v9309_v7, %v5089_v30  ;;  %v5091_v36 = vpop.f32.mrb[30].mxu0  ;;  %v5133_v17 = vpop.f32.mrb[31].mxu1 }
 0x3a0   : > { %v5207_v35 = vadd.f32 %v9311_v32, %v5169_v8  ;;  %v5210_v11 = vadd.f32 %v9311_v32, %v5172_v63  ;;  %v5092_v60 = vpop.f32.mrb[31].mxu0 }
 0x3a1   : > { %v5241_v5 = vmax.f32 %v5209_v27, 0.0  ;;  %v5208_v22 = vadd.f32 %v9311_v32, %v5170_v56 }
 0x3a2   : > { %v5239_v24 = vmax.f32 %v5207_v35, 0.0  ;;  %v5242_v48 = vmax.f32 %v5210_v11, 0.0 }
 0x3a3   : > { %v5240_v0 = vmax.f32 %v5208_v22, 0.0 }
 0x3a4   : > { %v5290_v55 = vcombine.low %v5241_v5, %v5242_v48 }
 0x3a5   : > { %v5289_v14 = vcombine.low %v5239_v24, %v5240_v0 }
 0x3a6   : > { %5322 = vst [vmem:[%s9342_s14 + $0x78] sm:$0xff] %v5290_v55 }
 0x3a7   : > { %5321 = vst [vmem:[%s9342_s14 + $0x70] sm:$0xff] %v5289_v14 }
 0x3a8 PF: > { %s14_s17 = sadd.s32 1, %s6001_s17   ;;  %s9724_s15 = smov %s5997_s16 }
 0x3a9   : > { %p11_p5 = scmp.ge.s32.totalorder %s14_s17, 4   ;;  %s9725_s16 = smov %s9727_s18 }
 0x3ab   :  { %13 = sbr.rel (!%p11_p5) target bundleno = 2 (0x2), region = 79 }

</bundles_post_ra>
